<compile_context>
chip_gen: v5e
topology: v5e:2x2
jax: 0.10.0
libtpu: 0.0.40
codegen_flags: <defaults>
</compile_context>

<pallas_src>
import numpy as np
import jax
import jax.numpy as jnp
from jax.experimental import pallas as pl
from jax.experimental.pallas import tpu as pltpu

NUM_CLASSES = 10


# ---------------------------------------------------------------------------
# Fused kernel: conv1+pool, conv2+pool, fc1, fc2, fc3 for one batch tile.
# ---------------------------------------------------------------------------
def cnn_cifar_kernel(p_ref, w1_ref, b1_ref, w2_ref, b2_ref,
                     wf1_ref, bf1_ref, wf2_ref, bf2_ref, wf3_ref, bf3_ref,
                     o_ref, p1_ref):
    f32, bf16 = jnp.float32, jnp.bfloat16
    bt = o_ref.shape[0]                       # images in this batch tile

    def mm(x, w_ref):                         # 2-D MXU matmul, f32 accumulation
        return jnp.dot(x, w_ref[...], preferred_element_type=f32)

    def relu_pool(y, b_ref):
        # bias + ReLU, then max over the 4 conv positions of each 2x2 pool
        # window.  Each window position occupies its own aligned 128-lane
        # block, so the max is pure full-vreg VPU work (no lane shuffles).
        y = jnp.maximum(y + b_ref[...], 0.0)
        return jnp.maximum(jnp.maximum(y[:, 0:128], y[:, 128:256]),
                           jnp.maximum(y[:, 256:384], y[:, 384:512]))

    # ---- Stage 1: conv1(5x5,3->6)+bias+ReLU+maxpool as ONE matmul
    #      (bt*16, 576) @ (576, 512).  Rows are ordered (pooled row ho, image);
    #      result lanes are wo*6+co (lanes 84..127 of the pooled row are zero).
    p1_ref[...] = relu_pool(mm(p_ref[...], w1_ref), b1_ref)        # (bt*16,128) f32

    # ---- Stage 2: conv2(5x5,6->16)+bias+ReLU+maxpool: one matmul per pooled
    #      output row po.  Its patch is 6 contiguous (bt,128) row blocks of the
    #      stage-1 scratch, lane-concatenated at 128-aligned offsets.
    feats = []
    for po in range(5):
        q = jnp.concatenate(
            [p1_ref[(2 * po + dh) * bt:(2 * po + dh + 1) * bt, :]
             for dh in range(6)], axis=-1).astype(bf16)            # (bt, 768)
        feats.append(relu_pool(mm(q, w2_ref), b2_ref))             # (bt, 128) f32
    feat = jnp.concatenate(feats, axis=-1).astype(bf16)            # (bt, 640)

    # ---- FC stack (NCHW flatten permutation folded into wf1; everything is
    #      padded to 128-lane multiples -> lane-dense, unmasked final store).
    h = jnp.maximum(mm(feat, wf1_ref) + bf1_ref[...], 0.0).astype(bf16)
    h = jnp.maximum(mm(h, wf2_ref) + bf2_ref[...], 0.0).astype(bf16)
    o_ref[...] = (mm(h, wf3_ref) + bf3_ref[...]).astype(o_ref.dtype)


# ---------------------------------------------------------------------------
# Wrapper: patch building + pallas_call
# ---------------------------------------------------------------------------
def _build_stage1_patches(x_nchw, b_pad, bt):
    """(B,3,32,32) f32 -> (b_pad*16, 576) bf16 conv1 row-strip patches.

    Within each batch tile of `bt` images the rows are ordered (ho, image):
    row ho*bt + b holds input rows 2*ho .. 2*ho+5 of image b, flattened as
    (dh, col, channel).  ho = 14, 15 are padding and never consumed."""
    B = x_nchw.shape[0]
    x = jnp.transpose(x_nchw, (0, 2, 3, 1)).astype(jnp.float32)      # NHWC
    x = jnp.pad(x, ((0, b_pad - B), (0, 4), (0, 0), (0, 0)))         # (b_pad,36,32,3)
    strips = [x[:, 2 * ho:2 * ho + 6, :, :].reshape(b_pad, 6 * 32 * 3)
              for ho in range(16)]
    p = jnp.stack(strips, axis=1)                                    # (b_pad,16,576)
    nt = b_pad // bt
    p = p.reshape(nt, bt, 16, 576).transpose(0, 2, 1, 3)             # (nt,16,bt,576)
    return p.reshape(nt * 16 * bt, 576).astype(jnp.bfloat16)


def cnn_cifar_forward(kp, x_nchw, *, batch_tile=32):
    B = x_nchw.shape[0]
    nc = kp['num_classes']
    nc_pad = kp['wf3'].shape[1]
    bt = min(batch_tile, B)
    if bt < B and bt % 8 != 0:
        bt = max(8, (bt // 8) * 8)          # multi-tile => 8-aligned batch tile
    b_pad = -(-B // bt) * bt
    patches = _build_stage1_patches(x_nchw, b_pad, bt)               # (b_pad*16, 576)

    def full(a):
        return pl.BlockSpec(a.shape, lambda i: (0, 0))

    out = pl.pallas_call(
        cnn_cifar_kernel,
        out_shape=jax.ShapeDtypeStruct((b_pad, nc_pad), jnp.float32),
        grid=(b_pad // bt,),
        in_specs=[
            pl.BlockSpec((bt * 16, 576), lambda i: (i, 0)),
            full(kp['w1']), full(kp['b1']),
            full(kp['w2']), full(kp['b2']),
            full(kp['wf1']), full(kp['bf1']),
            full(kp['wf2']), full(kp['bf2']),
            full(kp['wf3']), full(kp['bf3']),
        ],
        out_specs=pl.BlockSpec((bt, nc_pad), lambda i: (i, 0)),
        scratch_shapes=[pltpu.VMEM((bt * 16, 128), jnp.float32)],
        compiler_params=pltpu.CompilerParams(
            dimension_semantics=("parallel",)),
    )(patches, kp['w1'], kp['b1'], kp['w2'], kp['b2'],
      kp['wf1'], kp['bf1'], kp['wf2'], kp['bf2'], kp['wf3'], kp['bf3'])
    return out[:B, :nc]


# ---------------------------------------------------------------------------
# Parameter construction: PyTorch-layout params -> fused-kernel weights
# ---------------------------------------------------------------------------
def init_torch_like_params(key, num_classes):
    ks = jax.random.split(key, 10)

    def u(k, shape, fan_in):
        bound = 1.0 / float(np.sqrt(fan_in))
        return jax.random.uniform(k, shape, jnp.float32, -bound, bound)

    return {
        'conv1_w': u(ks[0], (6, 3, 5, 5), 3 * 25), 'conv1_b': u(ks[1], (6,), 3 * 25),
        'conv2_w': u(ks[2], (16, 6, 5, 5), 6 * 25), 'conv2_b': u(ks[3], (16,), 6 * 25),
        'fc1_w': u(ks[4], (120, 400), 400), 'fc1_b': u(ks[5], (120,), 400),
        'fc2_w': u(ks[6], (84, 120), 120), 'fc2_b': u(ks[7], (84,), 120),
        'fc3_w': u(ks[8], (num_classes, 84), 84), 'fc3_b': u(ks[9], (num_classes,), 84),
    }


def prepare_kernel_params(p):
    wc1 = np.asarray(p['conv1_w'], np.float32); bc1 = np.asarray(p['conv1_b'], np.float32)
    wc2 = np.asarray(p['conv2_w'], np.float32); bc2 = np.asarray(p['conv2_b'], np.float32)
    wf1 = np.asarray(p['fc1_w'], np.float32); bf1 = np.asarray(p['fc1_b'], np.float32)
    wf2 = np.asarray(p['fc2_w'], np.float32); bf2 = np.asarray(p['fc2_b'], np.float32)
    wf3 = np.asarray(p['fc3_w'], np.float32); bf3 = np.asarray(p['fc3_b'], np.float32)
    nc = wf3.shape[0]
    nc_pad = max(128, -(-nc // 128) * 128)

    # Stage 1: conv1 as a (576, 512) block-Toeplitz matmul.  Column layout:
    # win*128 + wo*6 + co (win = 2x2-pool window pos, wo = pooled col, co = out
    # channel); lanes 84..127 of each win block are zero pad (stay 0 thru ReLU).
    W1 = np.zeros((576, 512), np.float32)
    B1 = np.zeros((1, 512), np.float32)
    for win in range(4):
        winh, winw = divmod(win, 2)
        for wo in range(14):
            for co in range(6):
                col = win * 128 + wo * 6 + co
                B1[0, col] = bc1[co]
                for kh in range(5):
                    dh = winh + kh
                    for kw in range(5):
                        w = 2 * wo + winw + kw
                        for ci in range(3):
                            W1[dh * 96 + w * 3 + ci, col] = wc1[co, ci, kh, kw]

    # Stage 2: conv2 as a (768, 512) block-Toeplitz matmul.  Row layout:
    # dh*128 + wo*6 + ci (rows hitting stage-1 pad lanes stay zero).  Column
    # layout: win*128 + qo*16 + co, zero padded past 80 per win block.
    W2 = np.zeros((768, 512), np.float32)
    B2 = np.zeros((1, 512), np.float32)
    for win in range(4):
        winh, winw = divmod(win, 2)
        for qo in range(5):
            for co in range(16):
                col = win * 128 + qo * 16 + co
                B2[0, col] = bc2[co]
                for kh in range(5):
                    dh = winh + kh
                    for kw in range(5):
                        wo = 2 * qo + winw + kw
                        for ci in range(6):
                            W2[dh * 128 + wo * 6 + ci, col] = wc2[co, ci, kh, kw]

    # fc1 with the PyTorch NCHW flatten permutation folded in.  Kernel feature
    # order: po*128 + qo*16 + co (pad rows zero); PyTorch: co*25 + po*5 + qo.
    Wf1 = np.zeros((640, 128), np.float32)
    Bf1 = np.zeros((1, 128), np.float32); Bf1[0, :120] = bf1
    for po in range(5):
        for qo in range(5):
            for co in range(16):
                Wf1[po * 128 + qo * 16 + co, :120] = wf1[:, co * 25 + po * 5 + qo]

    Wf2 = np.zeros((128, 128), np.float32); Wf2[:120, :84] = wf2.T
    Bf2 = np.zeros((1, 128), np.float32); Bf2[0, :84] = bf2
    Wf3 = np.zeros((128, nc_pad), np.float32); Wf3[:84, :nc] = wf3.T
    Bf3 = np.zeros((1, nc_pad), np.float32); Bf3[0, :nc] = bf3

    as_bf16 = lambda a: jnp.asarray(a, jnp.bfloat16)
    as_f32 = lambda a: jnp.asarray(a, jnp.float32)
    return {
        'w1': as_bf16(W1), 'b1': as_f32(B1),
        'w2': as_bf16(W2), 'b2': as_f32(B2),
        'wf1': as_bf16(Wf1), 'bf1': as_f32(Bf1),
        'wf2': as_bf16(Wf2), 'bf2': as_f32(Bf2),
        'wf3': as_bf16(Wf3), 'bf3': as_f32(Bf3),
        'num_classes': nc,
    }


# ---------------------------------------------------------------------------
# Pure-JAX f32 reference (mirrors the PyTorch module exactly)
# ---------------------------------------------------------------------------
def reference_forward(p, x):
    with jax.default_matmul_precision('highest'):
        def conv(x, w, b):
            y = jax.lax.conv_general_dilated(
                x, w, window_strides=(1, 1), padding='VALID',
                dimension_numbers=('NCHW', 'OIHW', 'NCHW'))
            return y + b[None, :, None, None]

        def maxpool2(x):
            return jax.lax.reduce_window(x, -jnp.inf, jax.lax.max,
                                         (1, 1, 2, 2), (1, 1, 2, 2), 'VALID')

        x = maxpool2(jax.nn.relu(conv(x, p['conv1_w'], p['conv1_b'])))
        x = maxpool2(jax.nn.relu(conv(x, p['conv2_w'], p['conv2_b'])))
        x = x.reshape(x.shape[0], -1)
        x = jax.nn.relu(x @ p['fc1_w'].T + p['fc1_b'])
        x = jax.nn.relu(x @ p['fc2_w'].T + p['fc2_b'])
        return x @ p['fc3_w'].T + p['fc3_b']


if __name__ == "__main__":
    key = jax.random.PRNGKey(0)
    p_key, x_key, x2_key = jax.random.split(key, 3)
    torch_params = init_torch_like_params(p_key, NUM_CLASSES)
    kernel_params = prepare_kernel_params(torch_params)

    # Primary check: batch=2 (single tile).
    x = jax.random.normal(x_key, (2, 3, 32, 32), jnp.float32)
    out = jax.block_until_ready(cnn_cifar_forward(kernel_params, x))
    assert out.shape == (2, NUM_CLASSES) and out.dtype == jnp.float32
    ref = jax.block_until_ready(reference_forward(torch_params, x))
    err = float(jnp.max(jnp.abs(out - ref)))
    # bf16 matmul operands with f32 accumulation: ~1e-2 level deviation.
    assert err < 1e-1, f"batch=2 kernel/reference mismatch: max abs err={err}"

    # Multi-tile + batch-padding check: batch=10 with batch_tile=8 -> grid of 2.
    x2 = jax.random.normal(x2_key, (10, 3, 32, 32), jnp.float32)
    out2 = jax.block_until_ready(cnn_cifar_forward(kernel_params, x2, batch_tile=8))
    ref2 = jax.block_until_ready(reference_forward(torch_params, x2))
    err2 = float(jnp.max(jnp.abs(out2 - ref2)))
    assert err2 < 1e-1, f"batch=10 kernel/reference mismatch: max abs err={err2}"

    print("KERNEL_OK")
</pallas_src>

<mosaic_0001>
module attributes {stable_mosaic.version = 11 : i64} {
  func.func @cnn_cifar_kernel(%arg0: i32, %arg1: memref<32x576xbf16, #tpu.memory_space<vmem>>, %arg2: memref<576x512xbf16, #tpu.memory_space<vmem>>, %arg3: memref<1x512xf32, #tpu.memory_space<vmem>>, %arg4: memref<768x512xbf16, #tpu.memory_space<vmem>>, %arg5: memref<1x512xf32, #tpu.memory_space<vmem>>, %arg6: memref<640x128xbf16, #tpu.memory_space<vmem>>, %arg7: memref<1x128xf32, #tpu.memory_space<vmem>>, %arg8: memref<128x128xbf16, #tpu.memory_space<vmem>>, %arg9: memref<1x128xf32, #tpu.memory_space<vmem>>, %arg10: memref<128x128xbf16, #tpu.memory_space<vmem>>, %arg11: memref<1x128xf32, #tpu.memory_space<vmem>>, %arg12: memref<2x128xf32, #tpu.memory_space<vmem>>, %arg13: memref<32x128xf32, #tpu.memory_space<vmem>>) attributes {dimension_semantics = [#tpu.dimension_semantics<parallel>], iteration_bounds = array<i64: 1>, scalar_prefetch = 0 : i64, scratch_operands = 1 : i64, tpu.core_type = #tpu.core_type<tc>, window_params = [{transform_indices = @transform_0, window_bounds = array<i64: 32, 576>}, {pipeline_mode = #tpu.pipeline_mode<synchronous>, transform_indices = @transform_1, window_bounds = array<i64: 576, 512>}, {pipeline_mode = #tpu.pipeline_mode<synchronous>, transform_indices = @transform_2, window_bounds = array<i64: 1, 512>}, {pipeline_mode = #tpu.pipeline_mode<synchronous>, transform_indices = @transform_3, window_bounds = array<i64: 768, 512>}, {pipeline_mode = #tpu.pipeline_mode<synchronous>, transform_indices = @transform_4, window_bounds = array<i64: 1, 512>}, {pipeline_mode = #tpu.pipeline_mode<synchronous>, transform_indices = @transform_5, window_bounds = array<i64: 640, 128>}, {pipeline_mode = #tpu.pipeline_mode<synchronous>, transform_indices = @transform_6, window_bounds = array<i64: 1, 128>}, {pipeline_mode = #tpu.pipeline_mode<synchronous>, transform_indices = @transform_7, window_bounds = array<i64: 128, 128>}, {pipeline_mode = #tpu.pipeline_mode<synchronous>, transform_indices = @transform_8, window_bounds = array<i64: 1, 128>}, {pipeline_mode = #tpu.pipeline_mode<synchronous>, transform_indices = @transform_9, window_bounds = array<i64: 128, 128>}, {pipeline_mode = #tpu.pipeline_mode<synchronous>, transform_indices = @transform_10, window_bounds = array<i64: 1, 128>}, {transform_indices = @transform_11, window_bounds = array<i64: 2, 128>}]} {
    %c0 = arith.constant 0 : index
    %c0_0 = arith.constant 0 : index
    %0 = vector.load %arg1[%c0, %c0_0] : memref<32x576xbf16, #tpu.memory_space<vmem>>, vector<32x576xbf16>
    %c0_1 = arith.constant 0 : index
    %c0_2 = arith.constant 0 : index
    %1 = vector.load %arg2[%c0_1, %c0_2] : memref<576x512xbf16, #tpu.memory_space<vmem>>, vector<576x512xbf16>
    %cst = arith.constant dense<0.000000e+00> : vector<32x512xf32>
    %2 = tpu.matmul %0, %1, %cst {dimension_numbers = #tpu.dot_dimension_numbers<[1], [0], [0], [1], [0, 0, 1, 1], [], []>} : vector<32x576xbf16>, vector<576x512xbf16>, vector<32x512xf32> -> vector<32x512xf32>
    %c0_3 = arith.constant 0 : index
    %c0_4 = arith.constant 0 : index
    %3 = vector.load %arg3[%c0_3, %c0_4] : memref<1x512xf32, #tpu.memory_space<vmem>>, vector<1x512xf32>
    %4 = vector.broadcast %3 : vector<1x512xf32> to vector<32x512xf32>
    %5 = arith.addf %2, %4 : vector<32x512xf32>
    %cst_5 = arith.constant 0.000000e+00 : f32
    %6 = vector.broadcast %cst_5 : f32 to vector<32x512xf32>
    %7 = arith.maximumf %5, %6 : vector<32x512xf32>
    %8 = vector.extract_strided_slice %7 {offsets = [0, 0], sizes = [32, 128], strides = [1, 1]} : vector<32x512xf32> to vector<32x128xf32>
    %9 = vector.extract_strided_slice %7 {offsets = [0, 128], sizes = [32, 128], strides = [1, 1]} : vector<32x512xf32> to vector<32x128xf32>
    %10 = arith.maximumf %8, %9 : vector<32x128xf32>
    %11 = vector.extract_strided_slice %7 {offsets = [0, 256], sizes = [32, 128], strides = [1, 1]} : vector<32x512xf32> to vector<32x128xf32>
    %12 = vector.extract_strided_slice %7 {offsets = [0, 384], sizes = [32, 128], strides = [1, 1]} : vector<32x512xf32> to vector<32x128xf32>
    %13 = arith.maximumf %11, %12 : vector<32x128xf32>
    %14 = arith.maximumf %10, %13 : vector<32x128xf32>
    %c0_6 = arith.constant 0 : index
    %c0_7 = arith.constant 0 : index
    %15 = vector.load %arg13[%c0_6, %c0_7] : memref<32x128xf32, #tpu.memory_space<vmem>>, vector<32x128xf32>
    tpu.vector_store %arg13[%c0_6, %c0_7], %14 {strides = array<i32>} : memref<32x128xf32, #tpu.memory_space<vmem>>, vector<32x128xf32>,
    %c0_8 = arith.constant 0 : index
    %c0_9 = arith.constant 0 : index
    %16 = vector.load %arg13[%c0_8, %c0_9] : memref<32x128xf32, #tpu.memory_space<vmem>>, vector<2x128xf32>
    %c2 = arith.constant 2 : index
    %c0_10 = arith.constant 0 : index
    %17 = vector.load %arg13[%c2, %c0_10] : memref<32x128xf32, #tpu.memory_space<vmem>>, vector<2x128xf32>
    %c4 = arith.constant 4 : index
    %c0_11 = arith.constant 0 : index
    %18 = vector.load %arg13[%c4, %c0_11] : memref<32x128xf32, #tpu.memory_space<vmem>>, vector<2x128xf32>
    %c6 = arith.constant 6 : index
    %c0_12 = arith.constant 0 : index
    %19 = vector.load %arg13[%c6, %c0_12] : memref<32x128xf32, #tpu.memory_space<vmem>>, vector<2x128xf32>
    %c8 = arith.constant 8 : index
    %c0_13 = arith.constant 0 : index
    %20 = vector.load %arg13[%c8, %c0_13] : memref<32x128xf32, #tpu.memory_space<vmem>>, vector<2x128xf32>
    %c10 = arith.constant 10 : index
    %c0_14 = arith.constant 0 : index
    %21 = vector.load %arg13[%c10, %c0_14] : memref<32x128xf32, #tpu.memory_space<vmem>>, vector<2x128xf32>
    %22 = tpu.concatenate %16, %17, %18, %19, %20, %21 in 1 : vector<2x128xf32>, vector<2x128xf32>, vector<2x128xf32>, vector<2x128xf32>, vector<2x128xf32>, vector<2x128xf32> -> vector<2x768xf32>
    %23 = arith.truncf %22 : vector<2x768xf32> to vector<2x768xbf16>
    %c0_15 = arith.constant 0 : index
    %c0_16 = arith.constant 0 : index
    %24 = vector.load %arg4[%c0_15, %c0_16] : memref<768x512xbf16, #tpu.memory_space<vmem>>, vector<768x512xbf16>
    %cst_17 = arith.constant dense<0.000000e+00> : vector<2x512xf32>
    %25 = tpu.matmul %23, %24, %cst_17 {dimension_numbers = #tpu.dot_dimension_numbers<[1], [0], [0], [1], [0, 0, 1, 1], [], []>} : vector<2x768xbf16>, vector<768x512xbf16>, vector<2x512xf32> -> vector<2x512xf32>
    %c0_18 = arith.constant 0 : index
    %c0_19 = arith.constant 0 : index
    %26 = vector.load %arg5[%c0_18, %c0_19] : memref<1x512xf32, #tpu.memory_space<vmem>>, vector<1x512xf32>
    %27 = vector.broadcast %26 : vector<1x512xf32> to vector<2x512xf32>
    %28 = arith.addf %25, %27 : vector<2x512xf32>
    %cst_20 = arith.constant 0.000000e+00 : f32
    %29 = vector.broadcast %cst_20 : f32 to vector<2x512xf32>
    %30 = arith.maximumf %28, %29 : vector<2x512xf32>
    %31 = vector.extract_strided_slice %30 {offsets = [0, 0], sizes = [2, 128], strides = [1, 1]} : vector<2x512xf32> to vector<2x128xf32>
    %32 = vector.extract_strided_slice %30 {offsets = [0, 128], sizes = [2, 128], strides = [1, 1]} : vector<2x512xf32> to vector<2x128xf32>
    %33 = arith.maximumf %31, %32 : vector<2x128xf32>
    %34 = vector.extract_strided_slice %30 {offsets = [0, 256], sizes = [2, 128], strides = [1, 1]} : vector<2x512xf32> to vector<2x128xf32>
    %35 = vector.extract_strided_slice %30 {offsets = [0, 384], sizes = [2, 128], strides = [1, 1]} : vector<2x512xf32> to vector<2x128xf32>
    %36 = arith.maximumf %34, %35 : vector<2x128xf32>
    %37 = arith.maximumf %33, %36 : vector<2x128xf32>
    %c4_21 = arith.constant 4 : index
    %c0_22 = arith.constant 0 : index
    %38 = vector.load %arg13[%c4_21, %c0_22] : memref<32x128xf32, #tpu.memory_space<vmem>>, vector<2x128xf32>
    %c6_23 = arith.constant 6 : index
    %c0_24 = arith.constant 0 : index
    %39 = vector.load %arg13[%c6_23, %c0_24] : memref<32x128xf32, #tpu.memory_space<vmem>>, vector<2x128xf32>
    %c8_25 = arith.constant 8 : index
    %c0_26 = arith.constant 0 : index
    %40 = vector.load %arg13[%c8_25, %c0_26] : memref<32x128xf32, #tpu.memory_space<vmem>>, vector<2x128xf32>
    %c10_27 = arith.constant 10 : index
    %c0_28 = arith.constant 0 : index
    %41 = vector.load %arg13[%c10_27, %c0_28] : memref<32x128xf32, #tpu.memory_space<vmem>>, vector<2x128xf32>
    %c12 = arith.constant 12 : index
    %c0_29 = arith.constant 0 : index
    %42 = vector.load %arg13[%c12, %c0_29] : memref<32x128xf32, #tpu.memory_space<vmem>>, vector<2x128xf32>
    %c14 = arith.constant 14 : index
    %c0_30 = arith.constant 0 : index
    %43 = vector.load %arg13[%c14, %c0_30] : memref<32x128xf32, #tpu.memory_space<vmem>>, vector<2x128xf32>
    %44 = tpu.concatenate %38, %39, %40, %41, %42, %43 in 1 : vector<2x128xf32>, vector<2x128xf32>, vector<2x128xf32>, vector<2x128xf32>, vector<2x128xf32>, vector<2x128xf32> -> vector<2x768xf32>
    %45 = arith.truncf %44 : vector<2x768xf32> to vector<2x768xbf16>
    %c0_31 = arith.constant 0 : index
    %c0_32 = arith.constant 0 : index
    %46 = vector.load %arg4[%c0_31, %c0_32] : memref<768x512xbf16, #tpu.memory_space<vmem>>, vector<768x512xbf16>
    %cst_33 = arith.constant dense<0.000000e+00> : vector<2x512xf32>
    %47 = tpu.matmul %45, %46, %cst_33 {dimension_numbers = #tpu.dot_dimension_numbers<[1], [0], [0], [1], [0, 0, 1, 1], [], []>} : vector<2x768xbf16>, vector<768x512xbf16>, vector<2x512xf32> -> vector<2x512xf32>
    %c0_34 = arith.constant 0 : index
    %c0_35 = arith.constant 0 : index
    %48 = vector.load %arg5[%c0_34, %c0_35] : memref<1x512xf32, #tpu.memory_space<vmem>>, vector<1x512xf32>
    %49 = vector.broadcast %48 : vector<1x512xf32> to vector<2x512xf32>
    %50 = arith.addf %47, %49 : vector<2x512xf32>
    %cst_36 = arith.constant 0.000000e+00 : f32
    %51 = vector.broadcast %cst_36 : f32 to vector<2x512xf32>
    %52 = arith.maximumf %50, %51 : vector<2x512xf32>
    %53 = vector.extract_strided_slice %52 {offsets = [0, 0], sizes = [2, 128], strides = [1, 1]} : vector<2x512xf32> to vector<2x128xf32>
    %54 = vector.extract_strided_slice %52 {offsets = [0, 128], sizes = [2, 128], strides = [1, 1]} : vector<2x512xf32> to vector<2x128xf32>
    %55 = arith.maximumf %53, %54 : vector<2x128xf32>
    %56 = vector.extract_strided_slice %52 {offsets = [0, 256], sizes = [2, 128], strides = [1, 1]} : vector<2x512xf32> to vector<2x128xf32>
    %57 = vector.extract_strided_slice %52 {offsets = [0, 384], sizes = [2, 128], strides = [1, 1]} : vector<2x512xf32> to vector<2x128xf32>
    %58 = arith.maximumf %56, %57 : vector<2x128xf32>
    %59 = arith.maximumf %55, %58 : vector<2x128xf32>
    %c8_37 = arith.constant 8 : index
    %c0_38 = arith.constant 0 : index
    %60 = vector.load %arg13[%c8_37, %c0_38] : memref<32x128xf32, #tpu.memory_space<vmem>>, vector<2x128xf32>
    %c10_39 = arith.constant 10 : index
    %c0_40 = arith.constant 0 : index
    %61 = vector.load %arg13[%c10_39, %c0_40] : memref<32x128xf32, #tpu.memory_space<vmem>>, vector<2x128xf32>
    %c12_41 = arith.constant 12 : index
    %c0_42 = arith.constant 0 : index
    %62 = vector.load %arg13[%c12_41, %c0_42] : memref<32x128xf32, #tpu.memory_space<vmem>>, vector<2x128xf32>
    %c14_43 = arith.constant 14 : index
    %c0_44 = arith.constant 0 : index
    %63 = vector.load %arg13[%c14_43, %c0_44] : memref<32x128xf32, #tpu.memory_space<vmem>>, vector<2x128xf32>
    %c16 = arith.constant 16 : index
    %c0_45 = arith.constant 0 : index
    %64 = vector.load %arg13[%c16, %c0_45] : memref<32x128xf32, #tpu.memory_space<vmem>>, vector<2x128xf32>
    %c18 = arith.constant 18 : index
    %c0_46 = arith.constant 0 : index
    %65 = vector.load %arg13[%c18, %c0_46] : memref<32x128xf32, #tpu.memory_space<vmem>>, vector<2x128xf32>
    %66 = tpu.concatenate %60, %61, %62, %63, %64, %65 in 1 : vector<2x128xf32>, vector<2x128xf32>, vector<2x128xf32>, vector<2x128xf32>, vector<2x128xf32>, vector<2x128xf32> -> vector<2x768xf32>
    %67 = arith.truncf %66 : vector<2x768xf32> to vector<2x768xbf16>
    %c0_47 = arith.constant 0 : index
    %c0_48 = arith.constant 0 : index
    %68 = vector.load %arg4[%c0_47, %c0_48] : memref<768x512xbf16, #tpu.memory_space<vmem>>, vector<768x512xbf16>
    %cst_49 = arith.constant dense<0.000000e+00> : vector<2x512xf32>
    %69 = tpu.matmul %67, %68, %cst_49 {dimension_numbers = #tpu.dot_dimension_numbers<[1], [0], [0], [1], [0, 0, 1, 1], [], []>} : vector<2x768xbf16>, vector<768x512xbf16>, vector<2x512xf32> -> vector<2x512xf32>
    %c0_50 = arith.constant 0 : index
    %c0_51 = arith.constant 0 : index
    %70 = vector.load %arg5[%c0_50, %c0_51] : memref<1x512xf32, #tpu.memory_space<vmem>>, vector<1x512xf32>
    %71 = vector.broadcast %70 : vector<1x512xf32> to vector<2x512xf32>
    %72 = arith.addf %69, %71 : vector<2x512xf32>
    %cst_52 = arith.constant 0.000000e+00 : f32
    %73 = vector.broadcast %cst_52 : f32 to vector<2x512xf32>
    %74 = arith.maximumf %72, %73 : vector<2x512xf32>
    %75 = vector.extract_strided_slice %74 {offsets = [0, 0], sizes = [2, 128], strides = [1, 1]} : vector<2x512xf32> to vector<2x128xf32>
    %76 = vector.extract_strided_slice %74 {offsets = [0, 128], sizes = [2, 128], strides = [1, 1]} : vector<2x512xf32> to vector<2x128xf32>
    %77 = arith.maximumf %75, %76 : vector<2x128xf32>
    %78 = vector.extract_strided_slice %74 {offsets = [0, 256], sizes = [2, 128], strides = [1, 1]} : vector<2x512xf32> to vector<2x128xf32>
    %79 = vector.extract_strided_slice %74 {offsets = [0, 384], sizes = [2, 128], strides = [1, 1]} : vector<2x512xf32> to vector<2x128xf32>
    %80 = arith.maximumf %78, %79 : vector<2x128xf32>
    %81 = arith.maximumf %77, %80 : vector<2x128xf32>
    %c12_53 = arith.constant 12 : index
    %c0_54 = arith.constant 0 : index
    %82 = vector.load %arg13[%c12_53, %c0_54] : memref<32x128xf32, #tpu.memory_space<vmem>>, vector<2x128xf32>
    %c14_55 = arith.constant 14 : index
    %c0_56 = arith.constant 0 : index
    %83 = vector.load %arg13[%c14_55, %c0_56] : memref<32x128xf32, #tpu.memory_space<vmem>>, vector<2x128xf32>
    %c16_57 = arith.constant 16 : index
    %c0_58 = arith.constant 0 : index
    %84 = vector.load %arg13[%c16_57, %c0_58] : memref<32x128xf32, #tpu.memory_space<vmem>>, vector<2x128xf32>
    %c18_59 = arith.constant 18 : index
    %c0_60 = arith.constant 0 : index
    %85 = vector.load %arg13[%c18_59, %c0_60] : memref<32x128xf32, #tpu.memory_space<vmem>>, vector<2x128xf32>
    %c20 = arith.constant 20 : index
    %c0_61 = arith.constant 0 : index
    %86 = vector.load %arg13[%c20, %c0_61] : memref<32x128xf32, #tpu.memory_space<vmem>>, vector<2x128xf32>
    %c22 = arith.constant 22 : index
    %c0_62 = arith.constant 0 : index
    %87 = vector.load %arg13[%c22, %c0_62] : memref<32x128xf32, #tpu.memory_space<vmem>>, vector<2x128xf32>
    %88 = tpu.concatenate %82, %83, %84, %85, %86, %87 in 1 : vector<2x128xf32>, vector<2x128xf32>, vector<2x128xf32>, vector<2x128xf32>, vector<2x128xf32>, vector<2x128xf32> -> vector<2x768xf32>
    %89 = arith.truncf %88 : vector<2x768xf32> to vector<2x768xbf16>
    %c0_63 = arith.constant 0 : index
    %c0_64 = arith.constant 0 : index
    %90 = vector.load %arg4[%c0_63, %c0_64] : memref<768x512xbf16, #tpu.memory_space<vmem>>, vector<768x512xbf16>
    %cst_65 = arith.constant dense<0.000000e+00> : vector<2x512xf32>
    %91 = tpu.matmul %89, %90, %cst_65 {dimension_numbers = #tpu.dot_dimension_numbers<[1], [0], [0], [1], [0, 0, 1, 1], [], []>} : vector<2x768xbf16>, vector<768x512xbf16>, vector<2x512xf32> -> vector<2x512xf32>
    %c0_66 = arith.constant 0 : index
    %c0_67 = arith.constant 0 : index
    %92 = vector.load %arg5[%c0_66, %c0_67] : memref<1x512xf32, #tpu.memory_space<vmem>>, vector<1x512xf32>
    %93 = vector.broadcast %92 : vector<1x512xf32> to vector<2x512xf32>
    %94 = arith.addf %91, %93 : vector<2x512xf32>
    %cst_68 = arith.constant 0.000000e+00 : f32
    %95 = vector.broadcast %cst_68 : f32 to vector<2x512xf32>
    %96 = arith.maximumf %94, %95 : vector<2x512xf32>
    %97 = vector.extract_strided_slice %96 {offsets = [0, 0], sizes = [2, 128], strides = [1, 1]} : vector<2x512xf32> to vector<2x128xf32>
    %98 = vector.extract_strided_slice %96 {offsets = [0, 128], sizes = [2, 128], strides = [1, 1]} : vector<2x512xf32> to vector<2x128xf32>
    %99 = arith.maximumf %97, %98 : vector<2x128xf32>
    %100 = vector.extract_strided_slice %96 {offsets = [0, 256], sizes = [2, 128], strides = [1, 1]} : vector<2x512xf32> to vector<2x128xf32>
    %101 = vector.extract_strided_slice %96 {offsets = [0, 384], sizes = [2, 128], strides = [1, 1]} : vector<2x512xf32> to vector<2x128xf32>
    %102 = arith.maximumf %100, %101 : vector<2x128xf32>
    %103 = arith.maximumf %99, %102 : vector<2x128xf32>
    %c16_69 = arith.constant 16 : index
    %c0_70 = arith.constant 0 : index
    %104 = vector.load %arg13[%c16_69, %c0_70] : memref<32x128xf32, #tpu.memory_space<vmem>>, vector<2x128xf32>
    %c18_71 = arith.constant 18 : index
    %c0_72 = arith.constant 0 : index
    %105 = vector.load %arg13[%c18_71, %c0_72] : memref<32x128xf32, #tpu.memory_space<vmem>>, vector<2x128xf32>
    %c20_73 = arith.constant 20 : index
    %c0_74 = arith.constant 0 : index
    %106 = vector.load %arg13[%c20_73, %c0_74] : memref<32x128xf32, #tpu.memory_space<vmem>>, vector<2x128xf32>
    %c22_75 = arith.constant 22 : index
    %c0_76 = arith.constant 0 : index
    %107 = vector.load %arg13[%c22_75, %c0_76] : memref<32x128xf32, #tpu.memory_space<vmem>>, vector<2x128xf32>
    %c24 = arith.constant 24 : index
    %c0_77 = arith.constant 0 : index
    %108 = vector.load %arg13[%c24, %c0_77] : memref<32x128xf32, #tpu.memory_space<vmem>>, vector<2x128xf32>
    %c26 = arith.constant 26 : index
    %c0_78 = arith.constant 0 : index
    %109 = vector.load %arg13[%c26, %c0_78] : memref<32x128xf32, #tpu.memory_space<vmem>>, vector<2x128xf32>
    %110 = tpu.concatenate %104, %105, %106, %107, %108, %109 in 1 : vector<2x128xf32>, vector<2x128xf32>, vector<2x128xf32>, vector<2x128xf32>, vector<2x128xf32>, vector<2x128xf32> -> vector<2x768xf32>
    %111 = arith.truncf %110 : vector<2x768xf32> to vector<2x768xbf16>
    %c0_79 = arith.constant 0 : index
    %c0_80 = arith.constant 0 : index
    %112 = vector.load %arg4[%c0_79, %c0_80] : memref<768x512xbf16, #tpu.memory_space<vmem>>, vector<768x512xbf16>
    %cst_81 = arith.constant dense<0.000000e+00> : vector<2x512xf32>
    %113 = tpu.matmul %111, %112, %cst_81 {dimension_numbers = #tpu.dot_dimension_numbers<[1], [0], [0], [1], [0, 0, 1, 1], [], []>} : vector<2x768xbf16>, vector<768x512xbf16>, vector<2x512xf32> -> vector<2x512xf32>
    %c0_82 = arith.constant 0 : index
    %c0_83 = arith.constant 0 : index
    %114 = vector.load %arg5[%c0_82, %c0_83] : memref<1x512xf32, #tpu.memory_space<vmem>>, vector<1x512xf32>
    %115 = vector.broadcast %114 : vector<1x512xf32> to vector<2x512xf32>
    %116 = arith.addf %113, %115 : vector<2x512xf32>
    %cst_84 = arith.constant 0.000000e+00 : f32
    %117 = vector.broadcast %cst_84 : f32 to vector<2x512xf32>
    %118 = arith.maximumf %116, %117 : vector<2x512xf32>
    %119 = vector.extract_strided_slice %118 {offsets = [0, 0], sizes = [2, 128], strides = [1, 1]} : vector<2x512xf32> to vector<2x128xf32>
    %120 = vector.extract_strided_slice %118 {offsets = [0, 128], sizes = [2, 128], strides = [1, 1]} : vector<2x512xf32> to vector<2x128xf32>
    %121 = arith.maximumf %119, %120 : vector<2x128xf32>
    %122 = vector.extract_strided_slice %118 {offsets = [0, 256], sizes = [2, 128], strides = [1, 1]} : vector<2x512xf32> to vector<2x128xf32>
    %123 = vector.extract_strided_slice %118 {offsets = [0, 384], sizes = [2, 128], strides = [1, 1]} : vector<2x512xf32> to vector<2x128xf32>
    %124 = arith.maximumf %122, %123 : vector<2x128xf32>
    %125 = arith.maximumf %121, %124 : vector<2x128xf32>
    %126 = tpu.concatenate %37, %59, %81, %103, %125 in 1 : vector<2x128xf32>, vector<2x128xf32>, vector<2x128xf32>, vector<2x128xf32>, vector<2x128xf32> -> vector<2x640xf32>
    %127 = arith.truncf %126 : vector<2x640xf32> to vector<2x640xbf16>
    %c0_85 = arith.constant 0 : index
    %c0_86 = arith.constant 0 : index
    %128 = vector.load %arg6[%c0_85, %c0_86] : memref<640x128xbf16, #tpu.memory_space<vmem>>, vector<640x128xbf16>
    %cst_87 = arith.constant dense<0.000000e+00> : vector<2x128xf32>
    %129 = tpu.matmul %127, %128, %cst_87 {dimension_numbers = #tpu.dot_dimension_numbers<[1], [0], [0], [1], [0, 0, 1, 1], [], []>} : vector<2x640xbf16>, vector<640x128xbf16>, vector<2x128xf32> -> vector<2x128xf32>
    %c0_88 = arith.constant 0 : index
    %c0_89 = arith.constant 0 : index
    %130 = vector.load %arg7[%c0_88, %c0_89] : memref<1x128xf32, #tpu.memory_space<vmem>>, vector<1x128xf32>
    %131 = vector.broadcast %130 : vector<1x128xf32> to vector<2x128xf32>
    %132 = arith.addf %129, %131 : vector<2x128xf32>
    %cst_90 = arith.constant 0.000000e+00 : f32
    %133 = vector.broadcast %cst_90 : f32 to vector<2x128xf32>
    %134 = arith.maximumf %132, %133 : vector<2x128xf32>
    %135 = arith.truncf %134 : vector<2x128xf32> to vector<2x128xbf16>
    %c0_91 = arith.constant 0 : index
    %c0_92 = arith.constant 0 : index
    %136 = vector.load %arg8[%c0_91, %c0_92] : memref<128x128xbf16, #tpu.memory_space<vmem>>, vector<128x128xbf16>
    %cst_93 = arith.constant dense<0.000000e+00> : vector<2x128xf32>
    %137 = tpu.matmul %135, %136, %cst_93 {dimension_numbers = #tpu.dot_dimension_numbers<[1], [0], [0], [1], [0, 0, 1, 1], [], []>} : vector<2x128xbf16>, vector<128x128xbf16>, vector<2x128xf32> -> vector<2x128xf32>
    %c0_94 = arith.constant 0 : index
    %c0_95 = arith.constant 0 : index
    %138 = vector.load %arg9[%c0_94, %c0_95] : memref<1x128xf32, #tpu.memory_space<vmem>>, vector<1x128xf32>
    %139 = vector.broadcast %138 : vector<1x128xf32> to vector<2x128xf32>
    %140 = arith.addf %137, %139 : vector<2x128xf32>
    %cst_96 = arith.constant 0.000000e+00 : f32
    %141 = vector.broadcast %cst_96 : f32 to vector<2x128xf32>
    %142 = arith.maximumf %140, %141 : vector<2x128xf32>
    %143 = arith.truncf %142 : vector<2x128xf32> to vector<2x128xbf16>
    %c0_97 = arith.constant 0 : index
    %c0_98 = arith.constant 0 : index
    %144 = vector.load %arg10[%c0_97, %c0_98] : memref<128x128xbf16, #tpu.memory_space<vmem>>, vector<128x128xbf16>
    %cst_99 = arith.constant dense<0.000000e+00> : vector<2x128xf32>
    %145 = tpu.matmul %143, %144, %cst_99 {dimension_numbers = #tpu.dot_dimension_numbers<[1], [0], [0], [1], [0, 0, 1, 1], [], []>} : vector<2x128xbf16>, vector<128x128xbf16>, vector<2x128xf32> -> vector<2x128xf32>
    %c0_100 = arith.constant 0 : index
    %c0_101 = arith.constant 0 : index
    %146 = vector.load %arg11[%c0_100, %c0_101] : memref<1x128xf32, #tpu.memory_space<vmem>>, vector<1x128xf32>
    %147 = vector.broadcast %146 : vector<1x128xf32> to vector<2x128xf32>
    %148 = arith.addf %145, %147 : vector<2x128xf32>
    %c0_102 = arith.constant 0 : index
    %c0_103 = arith.constant 0 : index
    %149 = vector.load %arg12[%c0_102, %c0_103] : memref<2x128xf32, #tpu.memory_space<vmem>>, vector<2x128xf32>
    tpu.vector_store %arg12[%c0_102, %c0_103], %148 {strides = array<i32>} : memref<2x128xf32, #tpu.memory_space<vmem>>, vector<2x128xf32>,
    return
  }
  func.func @transform_0(%arg0: i32) -> (i32, i32) {
    %c0_i32 = arith.constant 0 : i32
    %c0_i32_0 = arith.constant 0 : i32
    return %arg0, %c0_i32 : i32, i32
  }
  func.func @transform_1(%arg0: i32) -> (i32, i32) {
    %c0_i32 = arith.constant 0 : i32
    %c0_i32_0 = arith.constant 0 : i32
    %c0_i32_1 = arith.constant 0 : i32
    return %c0_i32, %c0_i32_0 : i32, i32
  }
  func.func @transform_2(%arg0: i32) -> (i32, i32) {
    %c0_i32 = arith.constant 0 : i32
    %c0_i32_0 = arith.constant 0 : i32
    %c0_i32_1 = arith.constant 0 : i32
    return %c0_i32, %c0_i32_0 : i32, i32
  }
  func.func @transform_3(%arg0: i32) -> (i32, i32) {
    %c0_i32 = arith.constant 0 : i32
    %c0_i32_0 = arith.constant 0 : i32
    %c0_i32_1 = arith.constant 0 : i32
    return %c0_i32, %c0_i32_0 : i32, i32
  }
  func.func @transform_4(%arg0: i32) -> (i32, i32) {
    %c0_i32 = arith.constant 0 : i32
    %c0_i32_0 = arith.constant 0 : i32
    %c0_i32_1 = arith.constant 0 : i32
    return %c0_i32, %c0_i32_0 : i32, i32
  }
  func.func @transform_5(%arg0: i32) -> (i32, i32) {
    %c0_i32 = arith.constant 0 : i32
    %c0_i32_0 = arith.constant 0 : i32
    %c0_i32_1 = arith.constant 0 : i32
    return %c0_i32, %c0_i32_0 : i32, i32
  }
  func.func @transform_6(%arg0: i32) -> (i32, i32) {
    %c0_i32 = arith.constant 0 : i32
    %c0_i32_0 = arith.constant 0 : i32
    %c0_i32_1 = arith.constant 0 : i32
    return %c0_i32, %c0_i32_0 : i32, i32
  }
  func.func @transform_7(%arg0: i32) -> (i32, i32) {
    %c0_i32 = arith.constant 0 : i32
    %c0_i32_0 = arith.constant 0 : i32
    %c0_i32_1 = arith.constant 0 : i32
    return %c0_i32, %c0_i32_0 : i32, i32
  }
  func.func @transform_8(%arg0: i32) -> (i32, i32) {
    %c0_i32 = arith.constant 0 : i32
    %c0_i32_0 = arith.constant 0 : i32
    %c0_i32_1 = arith.constant 0 : i32
    return %c0_i32, %c0_i32_0 : i32, i32
  }
  func.func @transform_9(%arg0: i32) -> (i32, i32) {
    %c0_i32 = arith.constant 0 : i32
    %c0_i32_0 = arith.constant 0 : i32
    %c0_i32_1 = arith.constant 0 : i32
    return %c0_i32, %c0_i32_0 : i32, i32
  }
  func.func @transform_10(%arg0: i32) -> (i32, i32) {
    %c0_i32 = arith.constant 0 : i32
    %c0_i32_0 = arith.constant 0 : i32
    %c0_i32_1 = arith.constant 0 : i32
    return %c0_i32, %c0_i32_0 : i32, i32
  }
  func.func @transform_11(%arg0: i32) -> (i32, i32) {
    %c0_i32 = arith.constant 0 : i32
    %c0_i32_0 = arith.constant 0 : i32
    return %arg0, %c0_i32 : i32, i32
  }
}

</mosaic_0001>

<bundles_post_ra>
// kernel: tpu_custom_call.1
= control target key start
LH: loop header
LB: loop body
LE: loop exit
PB: predicated region body
PF: predicated region fallthrough
CT: control target
= control target key end

     0   :  { %16 = vsyncpa [#allocation4], 0  ;;  %s9087_s0 = inlined_call_operand.hbm [shape: bf16[32,576], index: 0, kind: input, shape index: {}]   ;;  %s9088_s1 = inlined_call_operand.hbm [shape: bf16[576,512], index: 1, kind: input, shape index: {}]   ;;  %s9089_s2 = inlined_call_operand.hbm [shape: f32[1,512], index: 2, kind: input, shape index: {}]   ;;  %s9090_s3 = inlined_call_operand.hbm [shape: bf16[768,512], index: 3, kind: input, shape index: {}]   ;;  %s9091_s4 = inlined_call_operand.hbm [shape: f32[1,512], index: 4, kind: input, shape index: {}]   ;;  %s9092_s5 = inlined_call_operand.hbm [shape: bf16[640,128], index: 5, kind: input, shape index: {}]   ;;  %s9093_s6 = inlined_call_operand.vmem [shape: f32[1,128], index: 6, kind: input, shape index: {}]   ;;  %s9094_s7 = inlined_call_operand.hbm [shape: bf16[128,128], index: 7, kind: input, shape index: {}]   ;;  %s9095_s8 = inlined_call_operand.vmem [shape: f32[1,128], index: 8, kind: input, shape index: {}]   ;;  %s9096_s9 = inlined_call_operand.hbm [shape: bf16[128,128], index: 9, kind: input, shape index: {}]   ;;  %s9097_s10 = inlined_call_operand.vmem [shape: f32[1,128], index: 10, kind: input, shape index: {}]   ;;  %s9098_s11 = inlined_call_operand.hbm [shape: f32[2,128], index: 11, kind: output, shape index: {}]  }
   0x1   :  { %17 = vsyncpa [#allocation7], 0 }
   0x2   :  { %18 = vsyncpa [#allocation10], 0 }
   0x3   :  { %19 = vsyncpa [#allocation13], 0 }
   0x4   :  { %20 = vsyncpa [#allocation16], 0  ;;  %s39_s19 = sshll.u32 %s9088_s1, 4  ;;  %s40_s19 = int_to_ptr.hbm [resolvable:$true] %s39_s19 }
   0x5   :  { %21 = vsyncpa [#allocation5], 0  ;;  %s7147_s20 = smov [#allocation6]   ;;  %s63_s24 = sshll.u32 %s9090_s3, 4  ;;  %s64_s24 = int_to_ptr.hbm [resolvable:$true] %s63_s24 }
   0x6   :  { %s41_s21 = sshll.u32 %s7147_s20, 4  ;;  %s7148_s25 = smov 256   ;;  %s42_s21 = int_to_ptr.vmem [resolvable:$true] %s41_s21 }
   0x7   :  { %s7149_s26 = smov 16   ;;  %s7150_s27 = smov [#allocation9]  }
   0x8   :  { %47 = dma.hbm_to_vmem [thread:$0]  %s40_s19, 18432, %s42_s21, [#allocation7], %s7148_s25, %s7148_s25, %s7149_s26  }
   0x9   :  { %s65_s28 = sshll.u32 %s7150_s27, 4  ;;  %s87_s12 = sshll.u32 %s9092_s5, 4  ;;  %s66_s28 = int_to_ptr.vmem [resolvable:$true] %s65_s28  ;;  %s88_s12 = int_to_ptr.hbm [resolvable:$true] %s87_s12 }
   0xa   :  { %71 = dma.hbm_to_vmem [thread:$0]  %s64_s24, 24576, %s66_s28, [#allocation10], %s7148_s25, %s7148_s25, %s7149_s26  }
   0xb   :  { %s7151_s1 = smov [#allocation12]   ;;  %s26_s3 = sshll.u32 %s9087_s0, 4  ;;  %s27_s3 = int_to_ptr.hbm [resolvable:$true] %s26_s3 }
   0xc   :  { %s89_s13 = sshll.u32 %s7151_s1, 4  ;;  %s7152_s16 = smov 64   ;;  %s90_s13 = int_to_ptr.vmem [resolvable:$true] %s89_s13 }
   0xd   :  { %s7153_s17 = smov 4   ;;  %s7154_s18 = smov [#allocation3]  }
   0xe   :  { %95 = dma.hbm_to_vmem [thread:$0]  %s88_s12, 5120, %s90_s13, [#allocation13], %s7152_s16, %s7152_s16, %s7153_s17  }
   0xf   :  { %s28_s19 = sshll.u32 %s7154_s18, 4  ;;  %s7155_s5 = smov 320   ;;  %s29_s19 = int_to_ptr.vmem [resolvable:$true] %s28_s19 }
  0x10   :  { %s7156_s20 = smov 20   ;;  %s53_s23 = sshll.u32 %s9089_s2, 4  ;;  %s54_s23 = int_to_ptr.hbm [resolvable:$true] %s53_s23 }
  0x11   :  { %34 = dma.hbm_to_vmem [thread:$0]  %s27_s3, 1280, %s29_s19, [#allocation4], %s7155_s5, %s7155_s5, %s7156_s20  }
  0x12   :  { %s7157_s24 = smov [#allocation8]   ;;  %s77_s27 = sshll.u32 %s9091_s4, 4  ;;  %s78_s27 = int_to_ptr.hbm [resolvable:$true] %s77_s27 }
  0x13   :  { %s55_s0 = sshll.u32 %s7157_s24, 4  ;;  %s7158_s28 = smov [#allocation11]   ;;  %s56_s0 = int_to_ptr.vmem [resolvable:$true] %s55_s0 }
  0x14   :  { %58 = dma.hbm_to_vmem [thread:$0]  %s54_s23, 64, %s56_s0, [#allocation7]  }
  0x15   :  { %s79_s29 = sshll.u32 %s7158_s28, 4  ;;  %s102_s1 = sshll.u32 %s9094_s7, 4  ;;  %s80_s29 = int_to_ptr.vmem [resolvable:$true] %s79_s29  ;;  %s103_s1 = int_to_ptr.hbm [resolvable:$true] %s102_s1 }
  0x16   :  { %82 = dma.hbm_to_vmem [thread:$0]  %s78_s27, 64, %s80_s29, [#allocation10]  }
  0x17   :  { %s117_s14 = sshll.u32 %s9096_s9, 4  ;;  %s7159_s15 = smov [#allocation14]   ;;  %s118_s14 = int_to_ptr.hbm [resolvable:$true] %s117_s14 }
  0x18   :  { %s104_s3 = sshll.u32 %s7159_s15, 4  ;;  %s7160_s4 = smov [#allocation15]   ;;  %s105_s3 = int_to_ptr.vmem [resolvable:$true] %s104_s3 }
  0x19   :  { %110 = dma.hbm_to_vmem [thread:$0]  %s103_s1, 1024, %s105_s3, [#allocation13], %s7152_s16, %s7152_s16, %s7153_s17  }
  0x1a   :  { %s119_s18 = sshll.u32 %s7160_s4, 4  ;;  %s120_s18 = int_to_ptr.vmem [resolvable:$true] %s119_s18 }
  0x1b   :  { %125 = dma.hbm_to_vmem [thread:$0]  %s118_s14, 1024, %s120_s18, [#allocation16], %s7152_s16, %s7152_s16, %s7153_s17  }
  0x1c   :  { %7135 = dma.done.wait [#allocation4], 1280  }
  0x1d   :  { %7136 = vsyncadd [#allocation4], 4294966016 }
  0x1e   :  { %7137 = dma.done.wait [#allocation7], 18496  }
  0x1f   :  { %7138 = vsyncadd [#allocation7], 4294948800 }
  0x20   :  { %7139 = dma.done.wait [#allocation10], 24640  }
  0x21   :  { %7140 = vsyncadd [#allocation10], 4294942656 }
  0x22   :  { %7141 = dma.done.wait [#allocation13], 6144  }
  0x23   :  { %7142 = vsyncadd [#allocation13], 4294961152 }
  0x24   :  { %7143 = dma.done.wait [#allocation16], 1024  }
  0x25   :  { %7144 = vsyncadd [#allocation16], 4294966272  ;;  %v5037_v0 = vld [vmem:[#allocation6 + $0xe0] sm:$0xf]  ;;  %v6539_v1 = vld [vmem:[#allocation6 + $0xec] sm:$0xf0] }
  0x26   :  { %v5165_v2 = vld [vmem:[#allocation6 + $0x1e0] sm:$0xf]  ;;  %v5038_v3 = vor.u32 %v6539_v1, %v5037_v0  ;;  %v6571_v4 = vld [vmem:[#allocation6 + $0x1ec] sm:$0xf0]  ;;  %vm1097_vm0 = vcmask 523264   ;;  %s7161_s5 = smov [#allocation17]  }
  0x27   :  { %v5293_v5 = vld [vmem:[#allocation6 + $0x2e0] sm:$0xf]  ;;  %v6603_v6 = vld [vmem:[#allocation6 + $0x2ec] sm:$0xf0]  ;;  %v5166_v7 = vor.u32 %v6571_v4, %v5165_v2  ;;  %s4867_s20 = sshll.u32 %s7161_s5, 4  ;;  %s4869_s23 = sshll.u32 %s9098_s11, 4  ;;  %s4868_s20 = int_to_ptr.vmem [resolvable:$true] %s4867_s20  ;;  %s4870_s23 = int_to_ptr.hbm [resolvable:$true] %s4869_s23 }
  0x28   :  { %v5294_v8 = vor.u32 %v6603_v6, %v5293_v5  ;;  %v5421_v9 = vld [vmem:[#allocation6 + $0x3e0] sm:$0xf]  ;;  %v6635_v10 = vld [vmem:[#allocation6 + $0x3ec] sm:$0xf0]  ;;  %1104 = vmatpush.bf16.msra.mxu0 %v5038_v3 }
  0x29   :  { %v5021_v11 = vld [vmem:[#allocation6 + $0xc0] sm:$0xf]  ;;  %v5422_v12 = vor.u32 %v6635_v10, %v5421_v9  ;;  %v6535_v13 = vld [vmem:[#allocation6 + $0xcc] sm:$0xf0]  ;;  %1123 = vmatpush.bf16.msra.mxu1 %v5166_v7 }
  0x2a   :  { %v5149_v14 = vld [vmem:[#allocation6 + $0x1c0] sm:$0xf]  ;;  %v6567_v15 = vld [vmem:[#allocation6 + $0x1cc] sm:$0xf0]  ;;  %1142 = vmatpush.bf16.msra.mxu2 %v5294_v8  ;;  %v5022_v16 = vor.u32 %v6535_v13, %v5021_v11 }
  0x2b   :  { %v5150_v17 = vor.u32 %v6567_v15, %v5149_v14  ;;  %v5277_v18 = vld [vmem:[#allocation6 + $0x2c0] sm:$0xf]  ;;  %v6599_v19 = vld [vmem:[#allocation6 + $0x2cc] sm:$0xf0]  ;;  %1161 = vmatpush.bf16.msra.mxu3 %v5422_v12 }
  0x2c   :  { %v5405_v20 = vld [vmem:[#allocation6 + $0x3c0] sm:$0xf]  ;;  %v5278_v21 = vor.u32 %v6599_v19, %v5277_v18  ;;  %v6631_v22 = vld [vmem:[#allocation6 + $0x3cc] sm:$0xf0]  ;;  %1105 = vmatpush.bf16.msra.mxu0 %v5022_v16 }
  0x2d   :  { %v5005_v23 = vld [vmem:[#allocation6 + $0xa0] sm:$0xf]  ;;  %v6531_v24 = vld [vmem:[#allocation6 + $0xac] sm:$0xf0]  ;;  %v5406_v25 = vor.u32 %v6631_v22, %v5405_v20  ;;  %1124 = vmatpush.bf16.msra.mxu1 %v5150_v17 }
  0x2e   :  { %v5133_v26 = vld [vmem:[#allocation6 + $0x1a0] sm:$0xf]  ;;  %v6563_v27 = vld [vmem:[#allocation6 + $0x1ac] sm:$0xf0]  ;;  %v5006_v29 = vor.u32 %v6531_v24, %v5005_v23  ;;  %1143 = vmatpush.bf16.msra.mxu2 %v5278_v21 }
  0x2f   :  { %v5261_v28 = vld [vmem:[#allocation6 + $0x2a0] sm:$0xf]  ;;  %v6595_v30 = vld [vmem:[#allocation6 + $0x2ac] sm:$0xf0]  ;;  %v5134_v33 = vor.u32 %v6563_v27, %v5133_v26  ;;  %1162 = vmatpush.bf16.msra.mxu3 %v5406_v25 }
  0x30   :  { %v5389_v31 = vld [vmem:[#allocation6 + $0x3a0] sm:$0xf]  ;;  %v6627_v32 = vld [vmem:[#allocation6 + $0x3ac] sm:$0xf0]  ;;  %v5262_v34 = vor.u32 %v6595_v30, %v5261_v28  ;;  %1106 = vmatpush.bf16.msra.mxu0 %v5006_v29  ;;  %v6501_v29 = vld [vmem:[#allocation3 + $0x10] sm:$0xf0] }
  0x31   :  { %v4989_v35 = vld [vmem:[#allocation6 + $0x80] sm:$0xf]  ;;  %v6527_v36 = vld [vmem:[#allocation6 + $0x8c] sm:$0xf0]  ;;  %v5390_v38 = vor.u32 %v6627_v32, %v5389_v31  ;;  %1125 = vmatpush.bf16.msra.mxu1 %v5134_v33  ;;  %v6537_v30 = vld [vmem:[#allocation6 + $0xe4] sm:$0xf] }
  0x32   :  { %v5117_v37 = vld [vmem:[#allocation6 + $0x180] sm:$0xf]  ;;  %v6559_v39 = vld [vmem:[#allocation6 + $0x18c] sm:$0xf0]  ;;  %v4990_v44 = vor.u32 %v6527_v36, %v4989_v35  ;;  %1144 = vmatpush.bf16.msra.mxu2 %v5262_v34  ;;  %v5039_v31 = vld [vmem:[#allocation6 + $0xf0] sm:$0xf0] }
  0x33   :  { %v5245_v40 = vld [vmem:[#allocation6 + $0x280] sm:$0xf]  ;;  %v6591_v41 = vld [vmem:[#allocation6 + $0x28c] sm:$0xf0]  ;;  %v5118_v45 = vor.u32 %v6559_v39, %v5117_v37  ;;  %1163 = vmatpush.bf16.msra.mxu3 %v5390_v38  ;;  %v6499_v33 = vld [vmem:[#allocation3 + $0x4] sm:$0xf] }
  0x34   :  { %v5373_v42 = vld [vmem:[#allocation6 + $0x380] sm:$0xf]  ;;  %v6623_v43 = vld [vmem:[#allocation6 + $0x38c] sm:$0xf0]  ;;  %v5246_v46 = vor.u32 %v6591_v41, %v5245_v40  ;;  %1107 = vmatpush.bf16.msra.mxu0 %v4990_v44  ;;  %v6569_v34 = vld [vmem:[#allocation6 + $0x1e4] sm:$0xf]  ;;  %v5042_v44 = vor.u32 %v6537_v30, %v5039_v31 }
  0x35   :  { %v4973_v47 = vld [vmem:[#allocation6 + $0x60] sm:$0xf]  ;;  %v6523_v48 = vld [vmem:[#allocation6 + $0x6c] sm:$0xf0]  ;;  %v5374_v50 = vor.u32 %v6623_v43, %v5373_v42  ;;  %1126 = vmatpush.bf16.msra.mxu1 %v5118_v45  ;;  %v5167_v35 = vld [vmem:[#allocation6 + $0x1f0] sm:$0xf0] }
  0x36   :  { %v5101_v49 = vld [vmem:[#allocation6 + $0x160] sm:$0xf]  ;;  %v6555_v51 = vld [vmem:[#allocation6 + $0x16c] sm:$0xf0]  ;;  %v4974_v56 = vor.u32 %v6523_v48, %v4973_v47  ;;  %1145 = vmatpush.bf16.msra.mxu2 %v5246_v46  ;;  %v4887_v38 = vld [vmem:[#allocation3 + $0x14] sm:$0xf0]  ;;  %v5170_v47 = vor.u32 %v6569_v34, %v5167_v35 }
  0x37   :  { %v5229_v52 = vld [vmem:[#allocation6 + $0x260] sm:$0xf]  ;;  %v6587_v53 = vld [vmem:[#allocation6 + $0x26c] sm:$0xf0]  ;;  %v5102_v57 = vor.u32 %v6555_v51, %v5101_v49  ;;  %1164 = vmatpush.bf16.msra.mxu3 %v5374_v50  ;;  %v4893_v39 = vld [vmem:[#allocation3 + $0x8] sm:$0xf]  ;;  %v7257_v51 = vor.u32 %v6499_v33, %v4887_v38 }
  0x38   :  { %v5357_v54 = vld [vmem:[#allocation6 + $0x360] sm:$0xf]  ;;  %v6619_v55 = vld [vmem:[#allocation6 + $0x36c] sm:$0xf0]  ;;  %v5230_v58 = vor.u32 %v6587_v53, %v5229_v52  ;;  %1108 = vmatpush.bf16.msra.mxu0 %v4974_v56  ;;  %v6502_v40 = vld [vmem:[#allocation3 + $0x18] sm:$0xf0] }
  0x39   :  { %v4957_v59 = vld [vmem:[#allocation6 + $0x40] sm:$0xf]  ;;  %v6519_v60 = vld [vmem:[#allocation6 + $0x4c] sm:$0xf0]  ;;  %v5358_v62 = vor.u32 %v6619_v55, %v5357_v54  ;;  %1127 = vmatpush.bf16.msra.mxu1 %v5102_v57  ;;  %v6500_v42 = vld [vmem:[#allocation3 + $0xc] sm:$0xf]  ;;  %v7259_v52 = vor.u32 %v6502_v40, %v4893_v39 }
  0x3a   :  { %v5085_v61 = vld [vmem:[#allocation6 + $0x140] sm:$0xf]  ;;  %v6551_v63 = vld [vmem:[#allocation6 + $0x14c] sm:$0xf0]  ;;  %v4958_v4 = vor.u32 %v6519_v60, %v4957_v59  ;;  %1146 = vmatpush.bf16.msra.mxu2 %v5230_v58  ;;  %v6601_v45 = vld [vmem:[#allocation6 + $0x2e4] sm:$0xf] }
  0x3b   :  { %v5213_v0 = vld [vmem:[#allocation6 + $0x240] sm:$0xf]  ;;  %v6583_v1 = vld [vmem:[#allocation6 + $0x24c] sm:$0xf0]  ;;  %v5086_v5 = vor.u32 %v6551_v63, %v5085_v61  ;;  %1165 = vmatpush.bf16.msra.mxu3 %v5358_v62  ;;  %v5295_v48 = vld [vmem:[#allocation6 + $0x2f0] sm:$0xf0] }
  0x3c   :  { %v5341_v2 = vld [vmem:[#allocation6 + $0x340] sm:$0xf]  ;;  %v6615_v3 = vld [vmem:[#allocation6 + $0x34c] sm:$0xf0]  ;;  %v5214_v6 = vor.u32 %v6583_v1, %v5213_v0  ;;  %1109 = vmatpush.bf16.msra.mxu0 %v4958_v4  ;;  %v6533_v49 = vld [vmem:[#allocation6 + $0xc4] sm:$0xf]  ;;  %v5298_v56 = vor.u32 %v6601_v45, %v5295_v48 }
  0x3d   :  { %v4941_v7 = vld [vmem:[#allocation6 + $0x20] sm:$0xf]  ;;  %v6515_v8 = vld [vmem:[#allocation6 + $0x2c] sm:$0xf0]  ;;  %v5342_v10 = vor.u32 %v6615_v3, %v5341_v2  ;;  %1128 = vmatpush.bf16.msra.mxu1 %v5086_v5  ;;  %v5023_v50 = vld [vmem:[#allocation6 + $0xd0] sm:$0xf0] }
  0x3e   :  { %v5069_v9 = vld [vmem:[#allocation6 + $0x120] sm:$0xf]  ;;  %v6547_v11 = vld [vmem:[#allocation6 + $0x12c] sm:$0xf0]  ;;  %v4942_v16 = vor.u32 %v6515_v8, %v4941_v7  ;;  %1147 = vmatpush.bf16.msra.mxu2 %v5214_v6  ;;  %v6565_v53 = vld [vmem:[#allocation6 + $0x1c4] sm:$0xf]  ;;  %v5026_v57 = vor.u32 %v6533_v49, %v5023_v50 }
  0x3f   :  { %v5197_v12 = vld [vmem:[#allocation6 + $0x220] sm:$0xf]  ;;  %v6579_v13 = vld [vmem:[#allocation6 + $0x22c] sm:$0xf0]  ;;  %v5070_v20 = vor.u32 %v6547_v11, %v5069_v9  ;;  %1166 = vmatpush.bf16.msra.mxu3 %v5342_v10  ;;  %v5151_v54 = vld [vmem:[#allocation6 + $0x1d0] sm:$0xf0] }
  0x40   :  { %v5325_v14 = vld [vmem:[#allocation6 + $0x320] sm:$0xf]  ;;  %v6611_v15 = vld [vmem:[#allocation6 + $0x32c] sm:$0xf0]  ;;  %v5198_v21 = vor.u32 %v6579_v13, %v5197_v12  ;;  %1110 = vmatpush.bf16.msra.mxu0 %v4942_v16  ;;  %v6597_v58 = vld [vmem:[#allocation6 + $0x2c4] sm:$0xf]  ;;  %v5154_v60 = vor.u32 %v6565_v53, %v5151_v54 }
  0x41   :  { %v4925_v17 = vld [vmem:[#allocation6] sm:$0xf]  ;;  %v6511_v18 = vld [vmem:[#allocation6 + $0xc] sm:$0xf0]  ;;  %v5326_v25 = vor.u32 %v6611_v15, %v5325_v14  ;;  %1129 = vmatpush.bf16.msra.mxu1 %v5070_v20  ;;  %v5279_v59 = vld [vmem:[#allocation6 + $0x2d0] sm:$0xf0] }
  0x42   :  { %v5053_v19 = vld [vmem:[#allocation6 + $0x100] sm:$0xf]  ;;  %v6543_v22 = vld [vmem:[#allocation6 + $0x10c] sm:$0xf0]  ;;  %v4926_v32 = vor.u32 %v6511_v18, %v4925_v17  ;;  %1148 = vmatpush.bf16.msra.mxu2 %v5198_v21  ;;  %v6529_v61 = vld [vmem:[#allocation6 + $0xa4] sm:$0xf]  ;;  %v5282_v4 = vor.u32 %v6597_v58, %v5279_v59 }
  0x43   :  { %v5181_v23 = vld [vmem:[#allocation6 + $0x200] sm:$0xf]  ;;  %v6575_v24 = vld [vmem:[#allocation6 + $0x20c] sm:$0xf0]  ;;  %v5054_v36 = vor.u32 %v6543_v22, %v5053_v19  ;;  %1167 = vmatpush.bf16.msra.mxu3 %v5326_v25  ;;  %v5007_v62 = vld [vmem:[#allocation6 + $0xb0] sm:$0xf0] }
  0x44   :  { %v5309_v26 = vld [vmem:[#allocation6 + $0x300] sm:$0xf]  ;;  %v6607_v27 = vld [vmem:[#allocation6 + $0x30c] sm:$0xf0]  ;;  %v5182_v37 = vor.u32 %v6575_v24, %v5181_v23  ;;  %1111 = vmatpush.bf16.msra.mxu0 %v4926_v32  ;;  %v6561_v0 = vld [vmem:[#allocation6 + $0x1a4] sm:$0xf]  ;;  %v5010_v5 = vor.u32 %v6529_v61, %v5007_v62 }
  0x45   :  { %v4885_v28 = vld [vmem:[#allocation3] sm:$0xf]  ;;  %v5310_v41 = vor.u32 %v6607_v27, %v5309_v26  ;;  %1130 = vmatpush.bf16.msra.mxu1 %v5054_v36  ;;  %v5485_v63 = vld [vmem:[#allocation6 + $0x460] sm:$0xf]  ;;  %v5135_v1 = vld [vmem:[#allocation6 + $0x1b0] sm:$0xf0] }
  0x46   :  { %v4895_v43 = vld [vmem:[#allocation3 + $0x1c] sm:$0xf0]  ;;  %v7255_v46 = vor.u32 %v6501_v29, %v4885_v28  ;;  %1149 = vmatpush.bf16.msra.mxu2 %v5182_v37  ;;  %v6593_v6 = vld [vmem:[#allocation6 + $0x2a4] sm:$0xf]  ;;  %v5469_v7 = vld [vmem:[#allocation6 + $0x440] sm:$0xf]  ;;  %v5138_v9 = vor.u32 %v6561_v0, %v5135_v1 }
  0x47   :  { %v7261_v55 = vor.u32 %v6500_v42, %v4895_v43  ;;  %1168 = vmatpush.bf16.msra.mxu3 %v5310_v41  ;;  %v6651_v2 = vld [vmem:[#allocation6 + $0x46c] sm:$0xf0]  ;;  %v5263_v10 = vld [vmem:[#allocation6 + $0x2b0] sm:$0xf0]  ;;  %v6525_v11 = vld [vmem:[#allocation6 + $0x84] sm:$0xf] }
  0x48   :  { %1112 = vmatmul.bf16.vlgmr.msra.gmra.mxu0 %v7255_v46  ;;  %1131 = vmatmul.bf16.vlgmr.msra.gmra.mxu1 %v7257_v51  ;;  %v5486_v3 = vor.u32 %v6651_v2, %v5485_v63  ;;  %v6647_v8 = vld [vmem:[#allocation6 + $0x44c] sm:$0xf0]  ;;  %v4991_v12 = vld [vmem:[#allocation6 + $0x90] sm:$0xf0]  ;;  %v6557_v14 = vld [vmem:[#allocation6 + $0x184] sm:$0xf]  ;;  %v5266_v19 = vor.u32 %v6593_v6, %v5263_v10 }
  0x49   :  { %1199 = vmatpush.bf16.msrb.mxu1 %v5042_v44  ;;  %1150 = vmatmul.bf16.vlgmr.msra.gmra.mxu2 %v7259_v52  ;;  %v5470_v13 = vor.u32 %v6647_v8, %v5469_v7  ;;  %v5119_v15 = vld [vmem:[#allocation6 + $0x190] sm:$0xf0]  ;;  %v6589_v16 = vld [vmem:[#allocation6 + $0x284] sm:$0xf]  ;;  %v5453_v17 = vld [vmem:[#allocation6 + $0x420] sm:$0xf]  ;;  %v4994_v20 = vor.u32 %v6525_v11, %v4991_v12 }
  0x4a   :  { %1218 = vmatpush.bf16.msrb.mxu2 %v5170_v47  ;;  %1169 = vmatmul.bf16.vlgmr.msra.gmra.mxu3 %v7261_v55  ;;  %v6643_v18 = vld [vmem:[#allocation6 + $0x42c] sm:$0xf0]  ;;  %v5247_v21 = vld [vmem:[#allocation6 + $0x290] sm:$0xf0]  ;;  %v4905_v22 = vld [vmem:[#allocation3 + $0x28] sm:$0xf]  ;;  %v5122_v24 = vor.u32 %v6557_v14, %v5119_v15 }
  0x4b   :  { %1237 = vmatpush.bf16.msrb.mxu3 %v5298_v56  ;;  %1184 = vmatpush.bf16.msrb.mxu0 %v5486_v3  ;;  %v6506_v23 = vld [vmem:[#allocation3 + $0x38] sm:$0xf0]  ;;  %v6504_v25 = vld [vmem:[#allocation3 + $0x2c] sm:$0xf]  ;;  %v4907_v26 = vld [vmem:[#allocation3 + $0x3c] sm:$0xf0]  ;;  %v5454_v30 = vor.u32 %v6643_v18, %v5453_v17  ;;  %v5250_v37 = vor.u32 %v6589_v16, %v5247_v21 }
  0x4c   :  { %v4913_v27 = vld [vmem:[#allocation3 + $0x30] sm:$0xf]  ;;  %v6521_v28 = vld [vmem:[#allocation6 + $0x64] sm:$0xf]  ;;  %v4975_v29 = vld [vmem:[#allocation6 + $0x70] sm:$0xf0]  ;;  %v7267_v42 = vor.u32 %v6506_v23, %v4905_v22  ;;  %v7269_v48 = vor.u32 %v6504_v25, %v4907_v26 }
  0x4d   :  { %1200 = vmatpush.bf16.msrb.mxu1 %v5026_v57  ;;  %v6507_v31 = vld [vmem:[#allocation3 + $0x40] sm:$0xf0]  ;;  %v6553_v32 = vld [vmem:[#allocation6 + $0x164] sm:$0xf]  ;;  %v4915_v35 = vld [vmem:[#allocation3 + $0x44] sm:$0xf0]  ;;  %v4978_v38 = vor.u32 %v6521_v28, %v4975_v29 }
  0x4e   :  { %1219 = vmatpush.bf16.msrb.mxu2 %v5154_v60  ;;  %v5103_v33 = vld [vmem:[#allocation6 + $0x170] sm:$0xf0]  ;;  %v6505_v34 = vld [vmem:[#allocation3 + $0x34] sm:$0xf]  ;;  %v5437_v40 = vld [vmem:[#allocation6 + $0x400] sm:$0xf]  ;;  %v7271_v49 = vor.u32 %v6507_v31, %v4913_v27 }
  0x4f   :  { %1238 = vmatpush.bf16.msrb.mxu3 %v5282_v4  ;;  %1185 = vmatpush.bf16.msrb.mxu0 %v5470_v13  ;;  %v6585_v36 = vld [vmem:[#allocation6 + $0x264] sm:$0xf]  ;;  %v5231_v39 = vld [vmem:[#allocation6 + $0x270] sm:$0xf0]  ;;  %v6639_v41 = vld [vmem:[#allocation6 + $0x40c] sm:$0xf0]  ;;  %v5106_v43 = vor.u32 %v6553_v32, %v5103_v33  ;;  %v7273_v56 = vor.u32 %v6505_v34, %v4915_v35 }
  0x50   :  { %v6517_v44 = vld [vmem:[#allocation6 + $0x44] sm:$0xf]  ;;  %v4959_v45 = vld [vmem:[#allocation6 + $0x50] sm:$0xf0]  ;;  %v5438_v57 = vor.u32 %v6639_v41, %v5437_v40  ;;  %v5234_v58 = vor.u32 %v6585_v36, %v5231_v39  ;;  %v5045_v16 = vld [vmem:[#allocation6 + $0xe8] sm:$0xf] }
  0x51   :  { %1201 = vmatpush.bf16.msrb.mxu1 %v5010_v5  ;;  %v6549_v47 = vld [vmem:[#allocation6 + $0x144] sm:$0xf]  ;;  %v5087_v50 = vld [vmem:[#allocation6 + $0x150] sm:$0xf0]  ;;  %v4962_v59 = vor.u32 %v6517_v44, %v4959_v45  ;;  %v4901_v27 = vld [vmem:[#allocation3 + $0x10] sm:$0xf] }
  0x52   :  { %1220 = vmatpush.bf16.msrb.mxu2 %v5138_v9  ;;  %v6633_v53 = vld [vmem:[#allocation6 + $0x3e4] sm:$0xf]  ;;  %v5423_v54 = vld [vmem:[#allocation6 + $0x3f0] sm:$0xf0]  ;;  %v5090_v62 = vor.u32 %v6549_v47, %v5087_v50  ;;  %v5173_v31 = vld [vmem:[#allocation6 + $0x1e8] sm:$0xf] }
  0x53   :  { %1239 = vmatpush.bf16.msrb.mxu3 %v5266_v19  ;;  %1186 = vmatpush.bf16.msrb.mxu0 %v5454_v30  ;;  %v6581_v60 = vld [vmem:[#allocation6 + $0x244] sm:$0xf]  ;;  %v5215_v61 = vld [vmem:[#allocation6 + $0x250] sm:$0xf0]  ;;  %v5426_v2 = vor.u32 %v6633_v53, %v5423_v54  ;;  %v6540_v19 = vld [vmem:[#allocation6 + $0xf4] sm:$0xf0] }
  0x54   :  { %v6513_v63 = vld [vmem:[#allocation6 + $0x24] sm:$0xf]  ;;  %v4943_v0 = vld [vmem:[#allocation6 + $0x30] sm:$0xf0]  ;;  %v5218_v6 = vor.u32 %v6581_v60, %v5215_v61  ;;  %v5046_v30 = vor.u32 %v6540_v19, %v5045_v16  ;;  %v6572_v32 = vld [vmem:[#allocation6 + $0x1f4] sm:$0xf0] }
  0x55   :  { %1202 = vmatpush.bf16.msrb.mxu1 %v4994_v20  ;;  %v6545_v1 = vld [vmem:[#allocation6 + $0x124] sm:$0xf]  ;;  %v5071_v3 = vld [vmem:[#allocation6 + $0x130] sm:$0xf0]  ;;  %v4946_v7 = vor.u32 %v6513_v63, %v4943_v0  ;;  %v5029_v35 = vld [vmem:[#allocation6 + $0xc8] sm:$0xf]  ;;  %v5174_v39 = vor.u32 %v6572_v32, %v5173_v31 }
  0x56   :  { %1221 = vmatpush.bf16.msrb.mxu2 %v5122_v24  ;;  %v6629_v4 = vld [vmem:[#allocation6 + $0x3c4] sm:$0xf]  ;;  %v5407_v5 = vld [vmem:[#allocation6 + $0x3d0] sm:$0xf0]  ;;  %v5074_v11 = vor.u32 %v6545_v1, %v5071_v3  ;;  %v6536_v36 = vld [vmem:[#allocation6 + $0xd4] sm:$0xf0] }
  0x57   :  { %1240 = vmatpush.bf16.msrb.mxu3 %v5250_v37  ;;  %1187 = vmatpush.bf16.msrb.mxu0 %v5438_v57  ;;  %v6577_v8 = vld [vmem:[#allocation6 + $0x224] sm:$0xf]  ;;  %v5199_v9 = vld [vmem:[#allocation6 + $0x230] sm:$0xf0]  ;;  %v5410_v15 = vor.u32 %v6629_v4, %v5407_v5  ;;  %v5157_v44 = vld [vmem:[#allocation6 + $0x1c8] sm:$0xf]  ;;  %v5030_v47 = vor.u32 %v6536_v36, %v5029_v35 }
  0x58   :  { %1117 = vmatmul.bf16.gmra.mxu0 %v7267_v42  ;;  %1136 = vmatmul.bf16.gmra.mxu1 %v7269_v48  ;;  %v6509_v10 = vld [vmem:[#allocation6 + $0x4] sm:$0xf]  ;;  %v4927_v12 = vld [vmem:[#allocation6 + $0x10] sm:$0xf0]  ;;  %v5202_v22 = vor.u32 %v6577_v8, %v5199_v9  ;;  %v6568_v45 = vld [vmem:[#allocation6 + $0x1d4] sm:$0xf0] }
  0x59   :  { %1203 = vmatpush.bf16.msrb.mxu1 %v4978_v38  ;;  %1155 = vmatmul.bf16.gmra.mxu2 %v7271_v49  ;;  %v6541_v13 = vld [vmem:[#allocation6 + $0x104] sm:$0xf]  ;;  %v5055_v14 = vld [vmem:[#allocation6 + $0x110] sm:$0xf0]  ;;  %v4930_v23 = vor.u32 %v6509_v10, %v4927_v12  ;;  %v5013_v50 = vld [vmem:[#allocation6 + $0xa8] sm:$0xf] }
  0x5a   :  { %1222 = vmatpush.bf16.msrb.mxu2 %v5106_v43  ;;  %1174 = vmatmul.bf16.gmra.mxu3 %v7273_v56  ;;  %v6625_v17 = vld [vmem:[#allocation6 + $0x3a4] sm:$0xf]  ;;  %v5391_v18 = vld [vmem:[#allocation6 + $0x3b0] sm:$0xf0]  ;;  %v5058_v24 = vor.u32 %v6541_v13, %v5055_v14  ;;  %v6532_v53 = vld [vmem:[#allocation6 + $0xb4] sm:$0xf0] }
  0x5b   :  { %1241 = vmatpush.bf16.msrb.mxu3 %v5234_v58  ;;  %1256 = vmatpush.bf16.msra.mxu0 %v5426_v2  ;;  %v6649_v20 = vld [vmem:[#allocation6 + $0x464] sm:$0xf]  ;;  %v5487_v21 = vld [vmem:[#allocation6 + $0x470] sm:$0xf0]  ;;  %v5394_v28 = vor.u32 %v6625_v17, %v5391_v18  ;;  %v5141_v63 = vld [vmem:[#allocation6 + $0x1a8] sm:$0xf]  ;;  %v5014_v1 = vor.u32 %v6532_v53, %v5013_v50 }
  0x5c   :  { %v6573_v25 = vld [vmem:[#allocation6 + $0x204] sm:$0xf]  ;;  %v5183_v26 = vld [vmem:[#allocation6 + $0x210] sm:$0xf0]  ;;  %v5490_v33 = vor.u32 %v6649_v20, %v5487_v21  ;;  %v6564_v0 = vld [vmem:[#allocation6 + $0x1b4] sm:$0xf0] }
  0x5d   :  { %1204 = vmatpush.bf16.msrb.mxu1 %v4962_v59  ;;  %v6503_v29 = vld [vmem:[#allocation3 + $0x20] sm:$0xf0]  ;;  %v5186_v34 = vor.u32 %v6573_v25, %v5183_v26  ;;  %v6621_v37 = vld [vmem:[#allocation6 + $0x384] sm:$0xf]  ;;  %v5158_v59 = vor.u32 %v6568_v45, %v5157_v44  ;;  %v4997_v2 = vld [vmem:[#allocation6 + $0x88] sm:$0xf]  ;;  %v5142_v8 = vor.u32 %v6564_v0, %v5141_v63 }
  0x5e   :  { %1223 = vmatpush.bf16.msrb.mxu2 %v5090_v62  ;;  %v7279_v38 = vor.u32 %v6503_v29, %v4901_v27  ;;  %v5375_v40 = vld [vmem:[#allocation6 + $0x390] sm:$0xf0]  ;;  %v6645_v41 = vld [vmem:[#allocation6 + $0x444] sm:$0xf]  ;;  %v6528_v3 = vld [vmem:[#allocation6 + $0x94] sm:$0xf0] }
  0x5f   :  { %1242 = vmatpush.bf16.msrb.mxu3 %v5218_v6  ;;  %1257 = vmatpush.bf16.msra.mxu0 %v5410_v15  ;;  %v5471_v43 = vld [vmem:[#allocation6 + $0x450] sm:$0xf0]  ;;  %v5378_v54 = vor.u32 %v6621_v37, %v5375_v40  ;;  %v6617_v57 = vld [vmem:[#allocation6 + $0x364] sm:$0xf]  ;;  %v5125_v4 = vld [vmem:[#allocation6 + $0x188] sm:$0xf]  ;;  %v4998_v15 = vor.u32 %v6528_v3, %v4997_v2 }
  0x60   :  { %v5474_v58 = vor.u32 %v6645_v41, %v5471_v43  ;;  %v5359_v60 = vld [vmem:[#allocation6 + $0x370] sm:$0xf0]  ;;  %v6641_v61 = vld [vmem:[#allocation6 + $0x424] sm:$0xf]  ;;  %v6560_v12 = vld [vmem:[#allocation6 + $0x194] sm:$0xf0] }
  0x61   :  { %1205 = vmatpush.bf16.msrb.mxu1 %v4946_v7  ;;  %v5455_v62 = vld [vmem:[#allocation6 + $0x430] sm:$0xf0]  ;;  %v5362_v5 = vor.u32 %v6617_v57, %v5359_v60  ;;  %v6613_v6 = vld [vmem:[#allocation6 + $0x344] sm:$0xf]  ;;  %v5429_v13 = vld [vmem:[#allocation6 + $0x3e8] sm:$0xf]  ;;  %v5126_v20 = vor.u32 %v6560_v12, %v5125_v4 }
  0x62   :  { %1224 = vmatpush.bf16.msrb.mxu2 %v5074_v11  ;;  %v5458_v7 = vor.u32 %v6641_v61, %v5455_v62  ;;  %v5343_v9 = vld [vmem:[#allocation6 + $0x350] sm:$0xf0]  ;;  %v6637_v10 = vld [vmem:[#allocation6 + $0x404] sm:$0xf]  ;;  %v6636_v14 = vld [vmem:[#allocation6 + $0x3f4] sm:$0xf0] }
  0x63   :  { %1243 = vmatpush.bf16.msrb.mxu3 %v5202_v22  ;;  %1258 = vmatpush.bf16.msra.mxu0 %v5394_v28  ;;  %v5439_v11 = vld [vmem:[#allocation6 + $0x410] sm:$0xf0]  ;;  %v4981_v16 = vld [vmem:[#allocation6 + $0x68] sm:$0xf]  ;;  %v6524_v17 = vld [vmem:[#allocation6 + $0x74] sm:$0xf0]  ;;  %v5346_v18 = vor.u32 %v6613_v6, %v5343_v9 }
  0x64   :  { %v5442_v19 = vor.u32 %v6637_v10, %v5439_v11  ;;  %v4921_v21 = vld [vmem:[#allocation3 + $0x38] sm:$0xf]  ;;  %v6609_v22 = vld [vmem:[#allocation6 + $0x324] sm:$0xf]  ;;  %v6508_v25 = vld [vmem:[#allocation3 + $0x48] sm:$0xf0]  ;;  %v4982_v28 = vor.u32 %v6524_v17, %v4981_v16 }
  0x65   :  { %1206 = vmatpush.bf16.msrb.mxu1 %v4930_v23  ;;  %v5327_v23 = vld [vmem:[#allocation6 + $0x330] sm:$0xf0]  ;;  %v5109_v26 = vld [vmem:[#allocation6 + $0x168] sm:$0xf]  ;;  %v6556_v27 = vld [vmem:[#allocation6 + $0x174] sm:$0xf0] }
  0x66   :  { %1225 = vmatpush.bf16.msrb.mxu2 %v5058_v24  ;;  %v5430_v24 = vor.u32 %v6636_v14, %v5429_v13  ;;  %v4965_v29 = vld [vmem:[#allocation6 + $0x48] sm:$0xf]  ;;  %v5330_v32 = vor.u32 %v6609_v22, %v5327_v23  ;;  %v5110_v35 = vor.u32 %v6556_v27, %v5109_v26  ;;  %v5311_v36 = vld [vmem:[#allocation6 + $0x310] sm:$0xf0]  ;;  %v6552_v40 = vld [vmem:[#allocation6 + $0x154] sm:$0xf0] }
  0x67   :  { %1244 = vmatpush.bf16.msrb.mxu3 %v5186_v34  ;;  %1259 = vmatpush.bf16.msra.mxu0 %v5378_v54  ;;  %v5093_v31 = vld [vmem:[#allocation6 + $0x148] sm:$0xf]  ;;  %v7286_v34 = vor.u32 %v6508_v25, %v4921_v21  ;;  %v6604_v43 = vld [vmem:[#allocation6 + $0x2f4] sm:$0xf0]  ;;  %v5047_v16 = vld [vmem:[#allocation6 + $0xf8] sm:$0xf0] }
  0x68   :  { %5499 = vmatmul.msk.bf16.vlgmr.msrb.gmra.mxu0 %vm1097_vm0, %v7279_v38  ;;  %1207 = vmatmul.bf16.vlgmr.msrb.gmra.mxu1 %v7255_v46  ;;  %v5413_v37 = vld [vmem:[#allocation6 + $0x3c8] sm:$0xf]  ;;  %v5094_v54 = vor.u32 %v6552_v40, %v5093_v31  ;;  %v6628_v60 = vld [vmem:[#allocation6 + $0x3b4] sm:$0xf0]  ;;  %v6534_v26 = vld [vmem:[#allocation6 + $0xcc] sm:$0xf] }
  0x69   :  { %1279 = vmatpush.bf16.msra.mxu1 %v5490_v33  ;;  %1226 = vmatmul.bf16.vlgmr.msrb.gmra.mxu2 %v7257_v51  ;;  %v6605_v33 = vld [vmem:[#allocation6 + $0x304] sm:$0xf]  ;;  %v5301_v41 = vld [vmem:[#allocation6 + $0x2e8] sm:$0xf]  ;;  %v6548_v61 = vld [vmem:[#allocation6 + $0x134] sm:$0xf0] }
  0x6a   :  { %1294 = vmatpush.bf16.msra.mxu2 %v5046_v30  ;;  %1245 = vmatmul.bf16.vlgmr.msrb.gmra.mxu3 %v7259_v52  ;;  %v6520_v30 = vld [vmem:[#allocation6 + $0x54] sm:$0xf0]  ;;  %v4949_v45 = vld [vmem:[#allocation6 + $0x28] sm:$0xf]  ;;  %v5314_v50 = vor.u32 %v6605_v33, %v5311_v36  ;;  %v5031_v31 = vld [vmem:[#allocation6 + $0xd8] sm:$0xf0] }
  0x6b   :  { %1313 = vmatpush.bf16.msra.mxu3 %v5174_v39  ;;  %1260 = vmatpush.bf16.msra.mxu0 %v5362_v5  ;;  %v6632_v39 = vld [vmem:[#allocation6 + $0x3d4] sm:$0xf0]  ;;  %v4966_v44 = vor.u32 %v6520_v30, %v4965_v29  ;;  %v5077_v57 = vld [vmem:[#allocation6 + $0x128] sm:$0xf]  ;;  %v6530_v40 = vld [vmem:[#allocation6 + $0xac] sm:$0xf] }
  0x6c   :  { %v5414_v53 = vor.u32 %v6632_v39, %v5413_v37  ;;  %v5285_v62 = vld [vmem:[#allocation6 + $0x2c8] sm:$0xf]  ;;  %v6600_v63 = vld [vmem:[#allocation6 + $0x2d4] sm:$0xf0]  ;;  %v5078_v6 = vor.u32 %v6548_v61, %v5077_v57  ;;  %v5034_v39 = vor.u32 %v6534_v26, %v5031_v31  ;;  %v6594_v31 = vld [vmem:[#allocation6 + $0x2ac] sm:$0xf] }
  0x6d   :  { %1280 = vmatpush.bf16.msra.mxu1 %v5474_v58  ;;  %v5302_v58 = vor.u32 %v6604_v43, %v5301_v41  ;;  %v6512_v2 = vld [vmem:[#allocation6 + $0x14] sm:$0xf0]  ;;  %v5061_v3 = vld [vmem:[#allocation6 + $0x108] sm:$0xf] }
  0x6e   :  { %1295 = vmatpush.bf16.msra.mxu2 %v5030_v47  ;;  %v6516_v47 = vld [vmem:[#allocation6 + $0x34] sm:$0xf0]  ;;  %v5381_v5 = vld [vmem:[#allocation6 + $0x388] sm:$0xf] }
  0x6f   :  { %1314 = vmatpush.bf16.msra.mxu3 %v5158_v59  ;;  %1261 = vmatpush.bf16.msra.mxu0 %v5346_v18  ;;  %v5397_v59 = vld [vmem:[#allocation6 + $0x3a8] sm:$0xf]  ;;  %v4950_v0 = vor.u32 %v6516_v47, %v4949_v45  ;;  %v6652_v10 = vld [vmem:[#allocation6 + $0x474] sm:$0xf0]  ;;  %v5015_v45 = vld [vmem:[#allocation6 + $0xb8] sm:$0xf0] }
  0x70   :  { %v5398_v4 = vor.u32 %v6628_v60, %v5397_v59  ;;  %v5493_v9 = vld [vmem:[#allocation6 + $0x468] sm:$0xf]  ;;  %v6544_v11 = vld [vmem:[#allocation6 + $0x114] sm:$0xf0]  ;;  %v6634_v59 = vld [vmem:[#allocation6 + $0x3ec] sm:$0xf]  ;;  %v5018_v61 = vor.u32 %v6530_v40, %v5015_v45 }
  0x71   :  { %1281 = vmatpush.bf16.msra.mxu1 %v5458_v7  ;;  %v5286_v7 = vor.u32 %v6600_v63, %v5285_v62  ;;  %v5269_v12 = vld [vmem:[#allocation6 + $0x2a8] sm:$0xf]  ;;  %v6596_v13 = vld [vmem:[#allocation6 + $0x2b4] sm:$0xf0]  ;;  %v5431_v60 = vld [vmem:[#allocation6 + $0x3f8] sm:$0xf0] }
  0x72   :  { %1296 = vmatpush.bf16.msra.mxu2 %v5014_v1  ;;  %v4933_v1 = vld [vmem:[#allocation6 + $0x8] sm:$0xf]  ;;  %v5270_v21 = vor.u32 %v6596_v13, %v5269_v12  ;;  %v6620_v22 = vld [vmem:[#allocation6 + $0x374] sm:$0xf0]  ;;  %v6526_v62 = vld [vmem:[#allocation6 + $0x8c] sm:$0xf] }
  0x73   :  { %1315 = vmatpush.bf16.msra.mxu3 %v5142_v8  ;;  %1262 = vmatpush.bf16.msra.mxu0 %v5330_v32  ;;  %v6624_v8 = vld [vmem:[#allocation6 + $0x394] sm:$0xf0]  ;;  %v4934_v14 = vor.u32 %v6512_v2, %v4933_v1  ;;  %v5365_v18 = vld [vmem:[#allocation6 + $0x368] sm:$0xf]  ;;  %v4999_v2 = vld [vmem:[#allocation6 + $0x98] sm:$0xf0] }
  0x74   :  { %v5382_v17 = vor.u32 %v6624_v8, %v5381_v5  ;;  %v5477_v23 = vld [vmem:[#allocation6 + $0x448] sm:$0xf]  ;;  %v5366_v29 = vor.u32 %v6620_v22, %v5365_v18  ;;  %v6616_v33 = vld [vmem:[#allocation6 + $0x354] sm:$0xf0]  ;;  %v5434_v8 = vor.u32 %v6634_v59, %v5431_v60  ;;  %v5002_v12 = vor.u32 %v6526_v62, %v4999_v2  ;;  %v6518_v22 = vld [vmem:[#allocation6 + $0x4c] sm:$0xf] }
  0x75   :  { %1282 = vmatpush.bf16.msra.mxu1 %v5442_v19  ;;  %v5494_v19 = vor.u32 %v6652_v10, %v5493_v9  ;;  %v5253_v27 = vld [vmem:[#allocation6 + $0x288] sm:$0xf]  ;;  %v6644_v36 = vld [vmem:[#allocation6 + $0x434] sm:$0xf0]  ;;  %v6630_v10 = vld [vmem:[#allocation6 + $0x3cc] sm:$0xf] }
  0x76   :  { %1297 = vmatpush.bf16.msra.mxu2 %v4998_v15  ;;  %v6538_v15 = vld [vmem:[#allocation6 + $0xec] sm:$0xf]  ;;  %v5349_v32 = vld [vmem:[#allocation6 + $0x348] sm:$0xf]  ;;  %v6588_v43 = vld [vmem:[#allocation6 + $0x274] sm:$0xf0] }
  0x77   :  { %1316 = vmatpush.bf16.msra.mxu3 %v5126_v20  ;;  %1263 = vmatpush.bf16.msra.mxu0 %v5314_v50  ;;  %v5062_v20 = vor.u32 %v6544_v11, %v5061_v3  ;;  %v5050_v25 = vor.u32 %v6538_v15, %v5047_v16  ;;  %v5237_v41 = vld [vmem:[#allocation6 + $0x268] sm:$0xf]  ;;  %v6612_v50 = vld [vmem:[#allocation6 + $0x334] sm:$0xf0]  ;;  %v5415_v11 = vld [vmem:[#allocation6 + $0x3d8] sm:$0xf0] }
  0x78   :  { %5500 = vmatmul.msk.bf16.gmra.mxu0 %vm1097_vm0, %v7286_v34  ;;  %1212 = vmatmul.bf16.gmra.mxu1 %v7267_v42  ;;  %v5333_v47 = vld [vmem:[#allocation6 + $0x328] sm:$0xf]  ;;  %v6640_v57 = vld [vmem:[#allocation6 + $0x414] sm:$0xf0]  ;;  %v6522_v16 = vld [vmem:[#allocation6 + $0x6c] sm:$0xf] }
  0x79   :  { %1351 = vmatpush.bf16.msrb.mxu1 %v5430_v24  ;;  %1231 = vmatmul.bf16.gmra.mxu2 %v7269_v48  ;;  %v6648_v24 = vld [vmem:[#allocation6 + $0x454] sm:$0xf0]  ;;  %v5221_v63 = vld [vmem:[#allocation6 + $0x248] sm:$0xf]  ;;  %v5334_v1 = vor.u32 %v6612_v50, %v5333_v47  ;;  %v4951_v40 = vld [vmem:[#allocation6 + $0x38] sm:$0xf0] }
  0x7a   :  { %1298 = vmatpush.bf16.msra.mxu2 %v4982_v28  ;;  %1250 = vmatmul.bf16.gmra.mxu3 %v7271_v49  ;;  %v6592_v28 = vld [vmem:[#allocation6 + $0x294] sm:$0xf0]  ;;  %v5478_v30 = vor.u32 %v6648_v24, %v5477_v23  ;;  %v5317_v3 = vld [vmem:[#allocation6 + $0x308] sm:$0xf]  ;;  %v6590_v50 = vld [vmem:[#allocation6 + $0x28c] sm:$0xf] }
  0x7b   :  { %1317 = vmatpush.bf16.msra.mxu3 %v5110_v35  ;;  %1332 = vmatpush.bf16.msrb.mxu0 %v5302_v58  ;;  %v5461_v35 = vld [vmem:[#allocation6 + $0x428] sm:$0xf]  ;;  %v5254_v37 = vor.u32 %v6592_v28, %v5253_v27  ;;  %v5238_v58 = vor.u32 %v6588_v43, %v5237_v41  ;;  %v6576_v27 = vld [vmem:[#allocation6 + $0x214] sm:$0xf0]  ;;  %v6570_v28 = vld [vmem:[#allocation6 + $0x1ec] sm:$0xf] }
  0x7c   :  { %v5205_v13 = vld [vmem:[#allocation6 + $0x228] sm:$0xf]  ;;  %v6566_v43 = vld [vmem:[#allocation6 + $0x1cc] sm:$0xf]  ;;  %v4935_v60 = vld [vmem:[#allocation6 + $0x18] sm:$0xf0] }
  0x7d   :  { %1352 = vmatpush.bf16.msrb.mxu1 %v5414_v53  ;;  %v5462_v53 = vor.u32 %v6644_v36, %v5461_v35  ;;  %v5189_v26 = vld [vmem:[#allocation6 + $0x208] sm:$0xf]  ;;  %v5399_v35 = vld [vmem:[#allocation6 + $0x3b8] sm:$0xf0]  ;;  %v6510_v59 = vld [vmem:[#allocation6 + $0xc] sm:$0xf] }
  0x7e   :  { %1299 = vmatpush.bf16.msra.mxu2 %v4966_v44  ;;  %v5350_v44 = vor.u32 %v6616_v33, %v5349_v32  ;;  %v5271_v32 = vld [vmem:[#allocation6 + $0x2b8] sm:$0xf0]  ;;  %v6626_v33 = vld [vmem:[#allocation6 + $0x3ac] sm:$0xf]  ;;  %v5190_v36 = vor.u32 %v6576_v27, %v5189_v26 }
  0x7f   :  { %1318 = vmatpush.bf16.msra.mxu3 %v5094_v54  ;;  %1333 = vmatpush.bf16.msrb.mxu0 %v5286_v7  ;;  %v5445_v54 = vld [vmem:[#allocation6 + $0x408] sm:$0xf]  ;;  %v5303_v7 = vld [vmem:[#allocation6 + $0x2f8] sm:$0xf0]  ;;  %v5274_v45 = vor.u32 %v6594_v31, %v5271_v32  ;;  %v5402_v47 = vor.u32 %v6626_v33, %v5399_v35  ;;  %v6562_v62 = vld [vmem:[#allocation6 + $0x1ac] sm:$0xf] }
  0x80   :  { %v5446_v5 = vor.u32 %v6640_v57, %v5445_v54  ;;  %v6622_v54 = vld [vmem:[#allocation6 + $0x38c] sm:$0xf]  ;;  %v5383_v57 = vld [vmem:[#allocation6 + $0x398] sm:$0xf0] }
  0x81   :  { %1353 = vmatpush.bf16.msrb.mxu1 %v5398_v4  ;;  %v6608_v4 = vld [vmem:[#allocation6 + $0x314] sm:$0xf0]  ;;  %v6586_v2 = vld [vmem:[#allocation6 + $0x26c] sm:$0xf]  ;;  %v5207_v26 = vld [vmem:[#allocation6 + $0x238] sm:$0xf0] }
  0x82   :  { %1300 = vmatpush.bf16.msra.mxu2 %v4950_v0  ;;  %v6584_v0 = vld [vmem:[#allocation6 + $0x254] sm:$0xf0]  ;;  %v5318_v15 = vor.u32 %v6608_v4, %v5317_v3  ;;  %v5239_v3 = vld [vmem:[#allocation6 + $0x278] sm:$0xf0]  ;;  %v6618_v4 = vld [vmem:[#allocation6 + $0x36c] sm:$0xf] }
  0x83   :  { %1319 = vmatpush.bf16.msra.mxu3 %v5078_v6  ;;  %1334 = vmatpush.bf16.msrb.mxu0 %v5270_v21  ;;  %v6602_v6 = vld [vmem:[#allocation6 + $0x2ec] sm:$0xf]  ;;  %v5222_v9 = vor.u32 %v6584_v0, %v5221_v63  ;;  %v5418_v21 = vor.u32 %v6630_v10, %v5415_v11  ;;  %v5143_v63 = vld [vmem:[#allocation6 + $0x1b8] sm:$0xf0] }
  0x84   :  { %v5306_v18 = vor.u32 %v6602_v6, %v5303_v7  ;;  %v6650_v6 = vld [vmem:[#allocation6 + $0x46c] sm:$0xf]  ;;  %v5495_v7 = vld [vmem:[#allocation6 + $0x478] sm:$0xf0] }
  0x85   :  { %1354 = vmatpush.bf16.msrb.mxu1 %v5382_v17  ;;  %v4983_v17 = vld [vmem:[#allocation6 + $0x78] sm:$0xf0]  ;;  %v6558_v10 = vld [vmem:[#allocation6 + $0x18c] sm:$0xf] }
  0x86   :  { %1301 = vmatpush.bf16.msra.mxu2 %v4934_v14  ;;  %v6580_v14 = vld [vmem:[#allocation6 + $0x234] sm:$0xf0]  ;;  %v4986_v24 = vor.u32 %v6522_v16, %v4983_v17  ;;  %v5127_v11 = vld [vmem:[#allocation6 + $0x198] sm:$0xf0]  ;;  %v6610_v31 = vld [vmem:[#allocation6 + $0x32c] sm:$0xf] }
  0x87   :  { %1320 = vmatpush.bf16.msra.mxu3 %v5062_v20  ;;  %1335 = vmatpush.bf16.msrb.mxu0 %v5254_v37  ;;  %v5287_v20 = vld [vmem:[#allocation6 + $0x2d8] sm:$0xf0]  ;;  %v5206_v23 = vor.u32 %v6580_v14, %v5205_v13  ;;  %v5498_v14 = vor.u32 %v6650_v6, %v5495_v7  ;;  %v5130_v17 = vor.u32 %v6558_v10, %v5127_v11 }
  0x88   :  { %1264 = vmatmul.bf16.vlgmr.msra.gmra.mxu0 %v7261_v55  ;;  %5501 = vmatmul.msk.bf16.vlgmr.msra.gmra.mxu1 %vm1097_vm0, %v7279_v38  ;;  %v5223_v16 = vld [vmem:[#allocation6 + $0x258] sm:$0xf0] }
  0x89   :  { %1355 = vmatpush.bf16.msrb.mxu1 %v5366_v29  ;;  %1302 = vmatmul.bf16.vlgmr.msra.gmra.mxu2 %v7255_v46  ;;  %v5175_v29 = vld [vmem:[#allocation6 + $0x1f8] sm:$0xf0] }
  0x8a   :  { %1374 = vmatpush.bf16.msrb.mxu2 %v5494_v19  ;;  %1321 = vmatmul.bf16.vlgmr.msra.gmra.mxu3 %v7257_v51  ;;  %v6598_v19 = vld [vmem:[#allocation6 + $0x2cc] sm:$0xf]  ;;  %v5178_v41 = vor.u32 %v6570_v28, %v5175_v29  ;;  %v5335_v32 = vld [vmem:[#allocation6 + $0x338] sm:$0xf0] }
  0x8b   :  { %1389 = vmatpush.bf16.msrb.mxu3 %v5050_v25  ;;  %1336 = vmatpush.bf16.msrb.mxu0 %v5238_v58  ;;  %v4967_v25 = vld [vmem:[#allocation6 + $0x58] sm:$0xf0]  ;;  %v6550_v29 = vld [vmem:[#allocation6 + $0x14c] sm:$0xf] }
  0x8c   :  { %v4970_v37 = vor.u32 %v6518_v22, %v4967_v25  ;;  %v6578_v25 = vld [vmem:[#allocation6 + $0x22c] sm:$0xf]  ;;  %v5095_v33 = vld [vmem:[#allocation6 + $0x158] sm:$0xf0] }
  0x8d   :  { %1356 = vmatpush.bf16.msrb.mxu1 %v5350_v44  ;;  %v5159_v44 = vld [vmem:[#allocation6 + $0x1d8] sm:$0xf0]  ;;  %v5210_v35 = vor.u32 %v6578_v25, %v5207_v26 }
  0x8e   :  { %1375 = vmatpush.bf16.msrb.mxu2 %v5478_v30  ;;  %v5290_v30 = vor.u32 %v6598_v19, %v5287_v20  ;;  %v6614_v19 = vld [vmem:[#allocation6 + $0x34c] sm:$0xf]  ;;  %v5351_v20 = vld [vmem:[#allocation6 + $0x358] sm:$0xf0] }
  0x8f   :  { %1390 = vmatpush.bf16.msrb.mxu3 %v5034_v39  ;;  %1337 = vmatpush.bf16.msrb.mxu0 %v5222_v9  ;;  %v6514_v39 = vld [vmem:[#allocation6 + $0x2c] sm:$0xf]  ;;  %v5146_v9 = vor.u32 %v6562_v62, %v5143_v63  ;;  %v5354_v27 = vor.u32 %v6614_v19, %v5351_v20  ;;  %v5063_v62 = vld [vmem:[#allocation6 + $0x118] sm:$0xf0] }
  0x90   :  { %v4954_v58 = vor.u32 %v6514_v39, %v4951_v40  ;;  %v6574_v39 = vld [vmem:[#allocation6 + $0x20c] sm:$0xf]  ;;  %v5191_v40 = vld [vmem:[#allocation6 + $0x218] sm:$0xf0] }
  0x91   :  { %1357 = vmatpush.bf16.msrb.mxu1 %v5334_v1  ;;  %v5386_v1 = vor.u32 %v6622_v54, %v5383_v57  ;;  %v5194_v54 = vor.u32 %v6574_v39, %v5191_v40  ;;  %v6638_v57 = vld [vmem:[#allocation6 + $0x40c] sm:$0xf] }
  0x92   :  { %1376 = vmatpush.bf16.msrb.mxu2 %v5462_v53  ;;  %v5255_v53 = vld [vmem:[#allocation6 + $0x298] sm:$0xf0] }
  0x93   :  { %1391 = vmatpush.bf16.msrb.mxu3 %v5018_v61  ;;  %1338 = vmatpush.bf16.msrb.mxu0 %v5206_v23  ;;  %v5162_v61 = vor.u32 %v6566_v43, %v5159_v44  ;;  %v5258_v0 = vor.u32 %v6590_v50, %v5255_v53  ;;  %v6646_v23 = vld [vmem:[#allocation6 + $0x44c] sm:$0xf]  ;;  %v5098_v43 = vor.u32 %v6550_v29, %v5095_v33  ;;  %v5319_v50 = vld [vmem:[#allocation6 + $0x318] sm:$0xf0] }
  0x94   :  { %v6546_v44 = vld [vmem:[#allocation6 + $0x12c] sm:$0xf]  ;;  %v5079_v53 = vld [vmem:[#allocation6 + $0x138] sm:$0xf0] }
  0x95   :  { %1358 = vmatpush.bf16.msrb.mxu1 %v5318_v15  ;;  %v6582_v15 = vld [vmem:[#allocation6 + $0x24c] sm:$0xf] }
  0x96   :  { %1377 = vmatpush.bf16.msrb.mxu2 %v5446_v5  ;;  %v5367_v5 = vld [vmem:[#allocation6 + $0x378] sm:$0xf0]  ;;  %v5226_v22 = vor.u32 %v6582_v15, %v5223_v16 }
  0x97   :  { %1392 = vmatpush.bf16.msrb.mxu3 %v5002_v12  ;;  %1339 = vmatpush.bf16.msrb.mxu0 %v5190_v36  ;;  %v5242_v12 = vor.u32 %v6586_v2, %v5239_v3  ;;  %v5370_v13 = vor.u32 %v6618_v4, %v5367_v5  ;;  %v6642_v36 = vld [vmem:[#allocation6 + $0x42c] sm:$0xf] }
  0x98   :  { %1269 = vmatmul.bf16.gmra.mxu0 %v7273_v56  ;;  %5502 = vmatmul.msk.bf16.gmra.mxu1 %vm1097_vm0, %v7286_v34 }
  0x99   :  { %1427 = vmatpush.bf16.msra.mxu1 %v5306_v18  ;;  %1307 = vmatmul.bf16.gmra.mxu2 %v7267_v42  ;;  %v6554_v18 = vld [vmem:[#allocation6 + $0x16c] sm:$0xf] }
  0x9a   :  { %1446 = vmatpush.bf16.msra.mxu2 %v5434_v8  ;;  %1326 = vmatmul.bf16.gmra.mxu3 %v7269_v48  ;;  %v4938_v8 = vor.u32 %v6510_v59, %v4935_v60  ;;  %v5082_v60 = vor.u32 %v6546_v44, %v5079_v53  ;;  %v5749_v53 = vld [vmem:[#allocation9 + $0x1e0] sm:$0xf] }
  0x9b   :  { %1393 = vmatpush.bf16.msrb.mxu3 %v4986_v24  ;;  %1408 = vmatpush.bf16.msra.mxu0 %v5178_v41  ;;  %v5479_v24 = vld [vmem:[#allocation6 + $0x458] sm:$0xf0]  ;;  %v5338_v41 = vor.u32 %v6610_v31, %v5335_v32 }
  0x9d   :  { %1428 = vmatpush.bf16.msra.mxu1 %v5290_v30  ;;  %v5482_v30 = vor.u32 %v6646_v23, %v5479_v24 }
  0x9e   :  { %1447 = vmatpush.bf16.msra.mxu2 %v5418_v21  ;;  %v5111_v21 = vld [vmem:[#allocation6 + $0x178] sm:$0xf0] }
  0x9f   :  { %1394 = vmatpush.bf16.msrb.mxu3 %v4970_v37  ;;  %1409 = vmatpush.bf16.msra.mxu0 %v5162_v61  ;;  %v5114_v28 = vor.u32 %v6554_v18, %v5111_v21  ;;  %v5463_v37 = vld [vmem:[#allocation6 + $0x438] sm:$0xf0]  ;;  %v6542_v61 = vld [vmem:[#allocation6 + $0x10c] sm:$0xf] }
  0xa0   :  { %v5066_v63 = vor.u32 %v6542_v61, %v5063_v62 }
  0xa1   :  { %1429 = vmatpush.bf16.msra.mxu1 %v5274_v45  ;;  %v5466_v45 = vor.u32 %v6642_v36, %v5463_v37 }
  0xa2   :  { %1448 = vmatpush.bf16.msra.mxu2 %v5402_v47  ;;  %v6606_v47 = vld [vmem:[#allocation6 + $0x30c] sm:$0xf] }
  0xa3   :  { %1395 = vmatpush.bf16.msrb.mxu3 %v4954_v58  ;;  %1410 = vmatpush.bf16.msra.mxu0 %v5146_v9  ;;  %v5447_v58 = vld [vmem:[#allocation6 + $0x418] sm:$0xf0]  ;;  %v5322_v59 = vor.u32 %v6606_v47, %v5319_v50  ;;  %v5621_v47 = vld [vmem:[#allocation9 + $0xe0] sm:$0xf]  ;;  %v6683_v50 = vld [vmem:[#allocation9 + $0xec] sm:$0xf0] }
  0xa5   :  { %1430 = vmatpush.bf16.msra.mxu1 %v5258_v0  ;;  %v7313_v0 = vld [vmem:[#allocation8] sm:$0xf] }
  0xa6   :  { %1449 = vmatpush.bf16.msra.mxu2 %v5386_v1  ;;  %v7316_v1 = vperm.slane %v7313_v0, 0 }
  0xa7   :  { %1396 = vmatpush.bf16.msrb.mxu3 %v4938_v8  ;;  %1411 = vmatpush.bf16.msra.mxu0 %v5130_v17 }
  0xa8   :  { %1340 = vmatmul.bf16.vlgmr.msrb.gmra.mxu0 %v7259_v52  ;;  %1359 = vmatmul.bf16.vlgmr.msrb.gmra.mxu1 %v7261_v55 }
  0xa9   :  { %1431 = vmatpush.bf16.msra.mxu1 %v5242_v12  ;;  %5503 = vmatmul.msk.bf16.vlgmr.msrb.gmra.mxu2 %vm1097_vm0, %v7279_v38 }
  0xaa   :  { %1450 = vmatpush.bf16.msra.mxu2 %v5370_v13  ;;  %1397 = vmatmul.bf16.vlgmr.msrb.gmra.mxu3 %v7255_v46  ;;  %v5450_v46 = vor.u32 %v6638_v57, %v5447_v58  ;;  %v7371_v58 = vor.u32 %v6683_v50, %v5621_v47  ;;  %v6771_v47 = vld [vmem:[#allocation9 + $0x3ac] sm:$0xf0] }
  0xab   :  { %1469 = vmatpush.bf16.msra.mxu3 %v5498_v14  ;;  %1412 = vmatpush.bf16.msra.mxu0 %v5114_v28 }
  0xac   :  { %9486 = vst [vmem:[#allocation24_spill] sm:$0xff] %v7371_v58 }
  0xad   :  { %1432 = vmatpush.bf16.msra.mxu1 %v5226_v22 }
  0xae   :  { %1451 = vmatpush.bf16.msra.mxu2 %v5354_v27 }
  0xaf   :  { %1470 = vmatpush.bf16.msra.mxu3 %v5482_v30  ;;  %1413 = vmatpush.bf16.msra.mxu0 %v5098_v43 }
  0xb1   :  { %1433 = vmatpush.bf16.msra.mxu1 %v5210_v35 }
  0xb2   :  { %1452 = vmatpush.bf16.msra.mxu2 %v5338_v41 }
  0xb3   :  { %1471 = vmatpush.bf16.msra.mxu3 %v5466_v45  ;;  %1414 = vmatpush.bf16.msra.mxu0 %v5082_v60  ;;  %v5877_v60 = vld [vmem:[#allocation9 + $0x2e0] sm:$0xf] }
  0xb5   :  { %1434 = vmatpush.bf16.msra.mxu1 %v5194_v54 }
  0xb6   :  { %1453 = vmatpush.bf16.msra.mxu2 %v5322_v59  ;;  %v6715_v59 = vld [vmem:[#allocation9 + $0x1ec] sm:$0xf0] }
  0xb7   :  { %1472 = vmatpush.bf16.msra.mxu3 %v5450_v46  ;;  %1415 = vmatpush.bf16.msra.mxu0 %v5066_v63  ;;  %v6747_v46 = vld [vmem:[#allocation9 + $0x2ec] sm:$0xf0]  ;;  %v7373_v61 = vor.u32 %v6715_v59, %v5749_v53  ;;  %v6005_v63 = vld [vmem:[#allocation9 + $0x3e0] sm:$0xf] }
  0xb8   :  { %1345 = vmatmul.bf16.gmra.mxu0 %v7271_v49  ;;  %1364 = vmatmul.bf16.gmra.mxu1 %v7273_v56  ;;  %v7375_v62 = vor.u32 %v6747_v46, %v5877_v60  ;;  %v5701_v59 = vld [vmem:[#allocation9 + $0x180] sm:$0xf]  ;;  %v6703_v46 = vld [vmem:[#allocation9 + $0x18c] sm:$0xf0] }
  0xb9   :  { %5504 = vmatmul.msk.bf16.gmra.mxu2 %vm1097_vm0, %v7286_v34  ;;  %9487 = vst [vmem:[#allocation25_spill] sm:$0xff] %v7373_v61  ;;  %2703 = vmatpush.bf16.msrb.mxu1 %v7373_v61 }
  0xba   :  { %1402 = vmatmul.bf16.gmra.mxu3 %v7267_v42  ;;  %9488 = vst [vmem:[#allocation26_spill] sm:$0xff] %v7375_v62  ;;  %2716 = vmatpush.bf16.msrb.mxu2 %v7375_v62  ;;  %v5639_v62 = vld [vmem:[#allocation9 + $0x110] sm:$0xf0] }
  0xbb   :  { %2690 = vmatpush.bf16.msrb.mxu0 %v7371_v58 }
  0xc5   :  { %v1113_v2 = vpop.f32.mrf.mxu0  ;;  %v1132_v4 = vpop.f32.mrf.mxu1 }
  0xc6   :  { %v1114_v3 = vadd.f32 %v1113_v2, %v7316_v1  ;;  %v6779_v2 = vld [vmem:[#allocation9 + $0x3ec] sm:$0xf0] }
  0xc8   :  { %v1133_v5 = vadd.f32 %v1132_v4, %v1114_v3  ;;  %1416 = vmatmul.bf16.vlgmr.msra.gmra.mxu0 %v7257_v51  ;;  %1435 = vmatmul.bf16.vlgmr.msra.gmra.mxu1 %v7259_v52  ;;  %v7378_v4 = vor.u32 %v6779_v2, %v6005_v63  ;;  %v5829_v63 = vld [vmem:[#allocation9 + $0x280] sm:$0xf]  ;;  %v6735_v2 = vld [vmem:[#allocation9 + $0x28c] sm:$0xf0] }
  0xc9   :  { %1454 = vmatmul.bf16.vlgmr.msra.gmra.mxu2 %v7261_v55 }
  0xca   :  { %5505 = vmatmul.msk.bf16.vlgmr.msra.gmra.mxu3 %vm1097_vm0, %v7279_v38  ;;  %9489 = vst [vmem:[#allocation27_spill] sm:$0xff] %v7378_v4 }
  0xcb   :  { %2729 = vmatpush.bf16.msrb.mxu3 %v7378_v4  ;;  %v6783_v4 = vld [vmem:[#allocation9 + $0x40c] sm:$0xf0] }
  0xcc   :  { %v1151_v42 = vpop.f32.mrf.mxu2 }
  0xcd   :  { %v1152_v6 = vadd.f32 %v1151_v42, %v1133_v5  ;;  %v1170_v7 = vpop.f32.mrf.mxu3  ;;  %v7324_v8 = vpop.f32.mrf.mxu0  ;;  %v5605_v5 = vld [vmem:[#allocation9 + $0xc0] sm:$0xf]  ;;  %v6679_v42 = vld [vmem:[#allocation9 + $0xcc] sm:$0xf0] }
  0xce   :  { %v7326_v9 = vpop.f32.mrf.mxu1 }
  0xcf   :  { %v1171_v10 = vadd.f32 %v1170_v7, %v1152_v6  ;;  %v5733_v6 = vld [vmem:[#allocation9 + $0x1c0] sm:$0xf]  ;;  %v7382_v7 = vor.u32 %v6679_v42, %v5605_v5  ;;  %v7421_v5 = vor.u32 %v6735_v2, %v5829_v63  ;;  %v6663_v63 = vld [vmem:[#allocation9 + $0x4c] sm:$0xf0] }
  0xd0   :  { %v5957_v42 = vld [vmem:[#allocation9 + $0x380] sm:$0xf] }
  0xd1   :  { %9490 = vst [vmem:[#allocation28_spill] sm:$0xff] %v7382_v7  ;;  %2691 = vmatpush.bf16.msrb.mxu0 %v7382_v7  ;;  %v5669_v2 = vld [vmem:[#allocation9 + $0x140] sm:$0xf]  ;;  %v6787_v7 = vld [vmem:[#allocation9 + $0x42c] sm:$0xf0] }
  0xd2   :  { %9500 = vst [vmem:[#allocation38_spill] sm:$0xff] %v7421_v5 }
  0xd4   :  { %v7328_v11 = vpop.f32.mrf.mxu2 }
  0xd5   :  { %v7330_v12 = vpop.f32.mrf.mxu3  ;;  %v1118_v51 = vpop.f32.mrf.mxu0 }
  0xd6   :  { %v1119_v52 = vadd.f32 %v1118_v51, %v7316_v1  ;;  %v1137_v13 = vpop.f32.mrf.mxu1  ;;  %v5861_v51 = vld [vmem:[#allocation9 + $0x2c0] sm:$0xf] }
  0xd8   :  { %v1138_v55 = vadd.f32 %v1137_v13, %v1119_v52  ;;  %1421 = vmatmul.bf16.gmra.mxu0 %v7269_v48  ;;  %1440 = vmatmul.bf16.gmra.mxu1 %v7271_v49  ;;  %v6743_v52 = vld [vmem:[#allocation9 + $0x2cc] sm:$0xf0] }
  0xd9   :  { %1459 = vmatmul.bf16.gmra.mxu2 %v7273_v56  ;;  %v7347_v56 = vperm.slane %v7313_v0, 1 }
  0xda   :  { %5506 = vmatmul.msk.bf16.gmra.mxu3 %vm1097_vm0, %v7286_v34 }
  0xdc   :  { %v1156_v38 = vpop.f32.mrf.mxu2 }
  0xdd   :  { %v1157_v14 = vadd.f32 %v1156_v38, %v1138_v55  ;;  %v1175_v15 = vpop.f32.mrf.mxu3  ;;  %v7338_v16 = vpop.f32.mrf.mxu0 }
  0xde   :  { %v7340_v17 = vpop.f32.mrf.mxu1 }
  0xdf   :  { %v1176_v18 = vadd.f32 %v1175_v15, %v1157_v14  ;;  %v7387_v14 = vor.u32 %v6743_v52, %v5861_v51  ;;  %v5989_v15 = vld [vmem:[#allocation9 + $0x3c0] sm:$0xf] }
  0xe1   :  { %9492 = vst [vmem:[#allocation30_spill] sm:$0xff] %v7387_v14  ;;  %2717 = vmatpush.bf16.msrb.mxu2 %v7387_v14  ;;  %v6181_v14 = vld [vmem:[#allocation9 + $0x540] sm:$0xf] }
  0xe4   :  { %v7342_v19 = vpop.f32.mrf.mxu2 }
  0xe5   :  { %v7344_v20 = vpop.f32.mrf.mxu3  ;;  %v1189_v48 = vpop.f32.mrf.mxu0 }
  0xe6   :  { %v1190_v49 = vadd.f32 %v1189_v48, %v1171_v10  ;;  %v1208_v21 = vpop.f32.mrf.mxu1  ;;  %v6711_v10 = vld [vmem:[#allocation9 + $0x1cc] sm:$0xf0] }
  0xe7   :  { %v1209_v34 = vadd.f32 %v1208_v21, %v7347_v56  ;;  %v7385_v38 = vor.u32 %v6711_v10, %v5733_v6  ;;  %v6767_v6 = vld [vmem:[#allocation9 + $0x38c] sm:$0xf0] }
  0xe8   :  { %v1484_v13 = vmax.f32 %v1190_v49, 0.0  ;;  %v7423_v10 = vor.u32 %v6767_v6, %v5957_v42  ;;  %v6695_v6 = vld [vmem:[#allocation9 + $0x14c] sm:$0xf0] }
  0xe9   :  { %9491 = vst [vmem:[#allocation29_spill] sm:$0xff] %v7385_v38  ;;  %2704 = vmatpush.bf16.msrb.mxu1 %v7385_v38 }
  0xea   :  { %9501 = vst [vmem:[#allocation39_spill] sm:$0xff] %v7423_v10 }
  0xec   :  { %v1227_v22 = vpop.f32.mrf.mxu2 }
  0xed   :  { %v1228_v23 = vadd.f32 %v1227_v22, %v1209_v34  ;;  %v1246_v24 = vpop.f32.mrf.mxu3  ;;  %v7350_v25 = vpop.f32.mrf.mxu0 }
  0xee   :  { %v7352_v26 = vpop.f32.mrf.mxu1 }
  0xef   :  { %v1247_v27 = vadd.f32 %v1246_v24, %v1228_v23  ;;  %v5589_v23 = vld [vmem:[#allocation9 + $0xa0] sm:$0xf]  ;;  %v6675_v24 = vld [vmem:[#allocation9 + $0xac] sm:$0xf0] }
  0xf4   :  { %v7354_v28 = vpop.f32.mrf.mxu2 }
  0xf5   :  { %v7356_v29 = vpop.f32.mrf.mxu3  ;;  %v1194_v30 = vpop.f32.mrf.mxu0 }
  0xf6   :  { %v7358_v31 = vadd.f32 %v1194_v30, %v1176_v18  ;;  %v1213_v32 = vpop.f32.mrf.mxu1  ;;  %v6775_v18 = vld [vmem:[#allocation9 + $0x3cc] sm:$0xf0] }
  0xf7   :  { %v1214_v33 = vadd.f32 %v1213_v32, %v7347_v56  ;;  %v7389_v48 = vor.u32 %v6775_v18, %v5989_v15  ;;  %v7405_v32 = vor.u32 %v6675_v24, %v5589_v23  ;;  %v6667_v15 = vld [vmem:[#allocation9 + $0x6c] sm:$0xf0]  ;;  %v5685_v18 = vld [vmem:[#allocation9 + $0x160] sm:$0xf] }
  0xf9   :  { %9493 = vst [vmem:[#allocation31_spill] sm:$0xff] %v7389_v48  ;;  %2730 = vmatpush.bf16.msrb.mxu3 %v7389_v48  ;;  %2692 = vmatpush.bf16.msrb.mxu0 %v7405_v32  ;;  %v6791_v48 = vld [vmem:[#allocation9 + $0x44c] sm:$0xf0] }
  0xfa   :  { %9494 = vst [vmem:[#allocation32_spill] sm:$0xff] %v7405_v32  ;;  %v6795_v32 = vld [vmem:[#allocation9 + $0x46c] sm:$0xf0] }
  0xfc   :  { %v1232_v35 = vpop.f32.mrf.mxu2 }
  0xfd   :  { %v1233_v36 = vadd.f32 %v1232_v35, %v1214_v33  ;;  %v1251_v37 = vpop.f32.mrf.mxu3  ;;  %v7361_v39 = vpop.f32.mrf.mxu0  ;;  %v6707_v33 = vld [vmem:[#allocation9 + $0x1ac] sm:$0xf0]  ;;  %v5845_v35 = vld [vmem:[#allocation9 + $0x2a0] sm:$0xf] }
  0xfe   :  { %v7363_v40 = vpop.f32.mrf.mxu1 }
  0xff   :  { %v7365_v41 = vadd.f32 %v1251_v37, %v1233_v36  ;;  %v6739_v37 = vld [vmem:[#allocation9 + $0x2ac] sm:$0xf0] }
 0x100   :  { %v7410_v50 = vor.u32 %v6739_v37, %v5845_v35  ;;  %v5813_v35 = vld [vmem:[#allocation9 + $0x260] sm:$0xf]  ;;  %v6731_v37 = vld [vmem:[#allocation9 + $0x26c] sm:$0xf0] }
 0x102   :  { %9496 = vst [vmem:[#allocation34_spill] sm:$0xff] %v7410_v50  ;;  %2718 = vmatpush.bf16.msrb.mxu2 %v7410_v50  ;;  %v6213_v50 = vld [vmem:[#allocation9 + $0x580] sm:$0xf] }
 0x104   :  { %v7367_v43 = vpop.f32.mrf.mxu2 }
 0x105   :  { %v7369_v44 = vpop.f32.mrf.mxu3  ;;  %v1265_v45 = vpop.f32.mrf.mxu0 }
 0x106   :  { %v1266_v54 = vadd.f32 %v1265_v45, %v1247_v27  ;;  %v1284_v57 = vpop.f32.mrf.mxu1  ;;  %v5717_v27 = vld [vmem:[#allocation9 + $0x1a0] sm:$0xf]  ;;  %2719 = vmatpush.bf16.msrb.mxu2 %v7421_v5 }
 0x107   :  { %v7407_v36 = vor.u32 %v6707_v33, %v5717_v27  ;;  %v5973_v45 = vld [vmem:[#allocation9 + $0x3a0] sm:$0xf]  ;;  %v6699_v33 = vld [vmem:[#allocation9 + $0x16c] sm:$0xf0] }
 0x108   :  { %v1285_v3 = vadd.f32 %v1284_v57, %v1266_v54  ;;  %v7412_v53 = vor.u32 %v6771_v47, %v5973_v45  ;;  %v5573_v54 = vld [vmem:[#allocation9 + $0x80] sm:$0xf]  ;;  %v6671_v57 = vld [vmem:[#allocation9 + $0x8c] sm:$0xf0]  ;;  %v7436_v45 = vor.u32 %v6699_v33, %v5685_v18  ;;  %v7438_v47 = vor.u32 %v6731_v37, %v5813_v35 }
 0x109   :  { %9495 = vst [vmem:[#allocation33_spill] sm:$0xff] %v7407_v36  ;;  %2705 = vmatpush.bf16.msrb.mxu1 %v7407_v36  ;;  %v7415_v60 = vor.u32 %v6671_v57, %v5573_v54  ;;  %v5941_v54 = vld [vmem:[#allocation9 + $0x360] sm:$0xf]  ;;  %v6763_v57 = vld [vmem:[#allocation9 + $0x36c] sm:$0xf0] }
 0x10a   :  { %v1485_v55 = vmax.f32 %v1285_v3, 0.0  ;;  %9497 = vst [vmem:[#allocation35_spill] sm:$0xff] %v7412_v53  ;;  %2731 = vmatpush.bf16.msrb.mxu3 %v7412_v53  ;;  %v7419_v3 = vor.u32 %v6703_v46, %v5701_v59  ;;  %v5541_v46 = vld [vmem:[#allocation9 + $0x40] sm:$0xf]  ;;  %2720 = vmatpush.bf16.msrb.mxu2 %v7438_v47  ;;  %v6759_v35 = vld [vmem:[#allocation9 + $0x34c] sm:$0xf0] }
 0x10b   :  { %9498 = vst [vmem:[#allocation36_spill] sm:$0xff] %v7415_v60  ;;  %2693 = vmatpush.bf16.msrb.mxu0 %v7415_v60  ;;  %v7444_v42 = vor.u32 %v6663_v63, %v5541_v46  ;;  %v5925_v33 = vld [vmem:[#allocation9 + $0x340] sm:$0xf]  ;;  %v6659_v63 = vld [vmem:[#allocation9 + $0x2c] sm:$0xf0] }
 0x10c   :  { %v7391_v21 = vmax.f32 %v1484_v13, %v1485_v55  ;;  %v7393_v34 = vpop.f32.mrf.mxu2  ;;  %9499 = vst [vmem:[#allocation37_spill] sm:$0xff] %v7419_v3  ;;  %v5557_v55 = vld [vmem:[#allocation9 + $0x60] sm:$0xf]  ;;  %v7453_v37 = vor.u32 %v6759_v35, %v5925_v33  ;;  %v6803_v60 = vld [vmem:[#allocation9 + $0x4ac] sm:$0xf0] }
 0x10d   :  { %v7396_v22 = vpop.f32.mrf.mxu3  ;;  %v7398_v49 = vpop.f32.mrf.mxu0  ;;  %2706 = vmatpush.bf16.msrb.mxu1 %v7419_v3  ;;  %v7434_v27 = vor.u32 %v6667_v15, %v5557_v55  ;;  %9503 = vst [vmem:[#allocation41_spill] sm:$0xff] %v7436_v45  ;;  %v6727_v55 = vld [vmem:[#allocation9 + $0x24c] sm:$0xf0]  ;;  %v1492_v15 = vmax.f32 %v7358_v31, 0.0  ;;  %v5525_v46 = vld [vmem:[#allocation9 + $0x20] sm:$0xf] }
 0x10e   :  { %v7402_v30 = vpop.f32.mrf.mxu1  ;;  %2732 = vmatpush.bf16.msrb.mxu3 %v7423_v10  ;;  %9504 = vst [vmem:[#allocation42_spill] sm:$0xff] %v7438_v47  ;;  %v5509_v47 = vld [vmem:[#allocation9] sm:$0xf]  ;;  %v6681_v10 = vld [vmem:[#allocation9 + $0xe4] sm:$0xf] }
 0x10f   :  { %9502 = vst [vmem:[#allocation40_spill] sm:$0xff] %v7434_v27  ;;  %2694 = vmatpush.bf16.msrb.mxu0 %v7434_v27  ;;  %v6719_v27 = vld [vmem:[#allocation9 + $0x20c] sm:$0xf0]  ;;  %v6245_v3 = vld [vmem:[#allocation9 + $0x5c0] sm:$0xf] }
 0x110   :  { %9506 = vst [vmem:[#allocation44_spill] sm:$0xff] %v7444_v42  ;;  %v6799_v53 = vld [vmem:[#allocation9 + $0x48c] sm:$0xf0] }
 0x111   :  { %2707 = vmatpush.bf16.msrb.mxu1 %v7436_v45  ;;  %9509 = vst [vmem:[#allocation47_spill] sm:$0xff] %v7453_v37  ;;  %v6655_v45 = vld [vmem:[#allocation9 + $0xc] sm:$0xf0] }
 0x113   :  { %2695 = vmatpush.bf16.msrb.mxu0 %v7444_v42  ;;  %v5909_v42 = vld [vmem:[#allocation9 + $0x320] sm:$0xf] }
 0x114   :  { %v7425_v51 = vpop.f32.mrf.mxu2 }
 0x115   :  { %v7428_v52 = vpop.f32.mrf.mxu3  ;;  %v1270_v13 = vpop.f32.mrf.mxu0 }
 0x116   :  { %v1271_v23 = vadd.f32 %v1270_v13, %v7365_v41  ;;  %v1289_v24 = vpop.f32.mrf.mxu1  ;;  %v7441_v41 = vor.u32 %v6763_v57, %v5941_v54  ;;  %v5797_v13 = vld [vmem:[#allocation9 + $0x240] sm:$0xf] }
 0x118   :  { %v1290_v59 = vadd.f32 %v1289_v24, %v1271_v23  ;;  %9505 = vst [vmem:[#allocation43_spill] sm:$0xff] %v7441_v41  ;;  %2733 = vmatpush.bf16.msrb.mxu3 %v7441_v41  ;;  %v7449_v23 = vor.u32 %v6695_v6, %v5669_v2  ;;  %v7451_v24 = vor.u32 %v6727_v55, %v5797_v13  ;;  %v5653_v2 = vld [vmem:[#allocation9 + $0x120] sm:$0xf]  ;;  %v6691_v55 = vld [vmem:[#allocation9 + $0x12c] sm:$0xf0] }
 0x119   :  { %v7469_v13 = vor.u32 %v6659_v63, %v5525_v46  ;;  %v7471_v33 = vor.u32 %v6691_v55, %v5653_v2  ;;  %v7479_v46 = vor.u32 %v6655_v45, %v5509_v47  ;;  %v6687_v63 = vld [vmem:[#allocation9 + $0x10c] sm:$0xf0] }
 0x11a   :  { %v1493_v18 = vmax.f32 %v1290_v59, 0.0  ;;  %9507 = vst [vmem:[#allocation45_spill] sm:$0xff] %v7449_v23  ;;  %2708 = vmatpush.bf16.msrb.mxu1 %v7449_v23  ;;  %2721 = vmatpush.bf16.msrb.mxu2 %v7451_v24  ;;  %v6755_v23 = vld [vmem:[#allocation9 + $0x32c] sm:$0xf0] }
 0x11b   :  { %9508 = vst [vmem:[#allocation46_spill] sm:$0xff] %v7451_v24  ;;  %2696 = vmatpush.bf16.msrb.mxu0 %v7469_v13  ;;  %v7476_v41 = vor.u32 %v6755_v23, %v5909_v42  ;;  %v5637_v24 = vld [vmem:[#allocation9 + $0x100] sm:$0xf]  ;;  %v6751_v23 = vld [vmem:[#allocation9 + $0x30c] sm:$0xf0] }
 0x11c   :  { %v7455_v54 = vmax.f32 %v1492_v15, %v1493_v18  ;;  %v7457_v57 = vpop.f32.mrf.mxu2  ;;  %2734 = vmatpush.bf16.msrb.mxu3 %v7453_v37  ;;  %9510 = vst [vmem:[#allocation48_spill] sm:$0xff] %v7469_v13  ;;  %v5781_v15 = vld [vmem:[#allocation9 + $0x220] sm:$0xf]  ;;  %v6723_v18 = vld [vmem:[#allocation9 + $0x22c] sm:$0xf0]  ;;  %v7483_v2 = vor.u32 %v6687_v63, %v5637_v24 }
 0x11d   :  { %v7460_v31 = vpop.f32.mrf.mxu3  ;;  %v7462_v59 = vpop.f32.mrf.mxu0  ;;  %9511 = vst [vmem:[#allocation49_spill] sm:$0xff] %v7471_v33  ;;  %v7473_v35 = vor.u32 %v6723_v18, %v5781_v15  ;;  %v5765_v37 = vld [vmem:[#allocation9 + $0x200] sm:$0xf]  ;;  %v6811_v13 = vld [vmem:[#allocation9 + $0x4ec] sm:$0xf0] }
 0x11e   :  { %v7465_v6 = vpop.f32.mrf.mxu1  ;;  %9513 = vst [vmem:[#allocation51_spill] sm:$0xff] %v7476_v41  ;;  %2709 = vmatpush.bf16.msrb.mxu1 %v7471_v33  ;;  %v7485_v55 = vor.u32 %v6719_v27, %v5765_v37  ;;  %v5893_v42 = vld [vmem:[#allocation9 + $0x300] sm:$0xf] }
 0x11f   :  { %9512 = vst [vmem:[#allocation50_spill] sm:$0xff] %v7473_v35  ;;  %2722 = vmatpush.bf16.msrb.mxu2 %v7473_v35  ;;  %v7487_v15 = vor.u32 %v6751_v23, %v5893_v42  ;;  %v6133_v18 = vld [vmem:[#allocation9 + $0x4e0] sm:$0xf]  ;;  %2697 = vmatpush.bf16.msrb.mxu0 %v7479_v46  ;;  %v6843_v35 = vld [vmem:[#allocation9 + $0x5ec] sm:$0xf0] }
 0x120   :  { %9514 = vst [vmem:[#allocation52_spill] sm:$0xff] %v7479_v46  ;;  %2735 = vmatpush.bf16.msrb.mxu3 %v7476_v41  ;;  %v6261_v33 = vld [vmem:[#allocation9 + $0x5e0] sm:$0xf]  ;;  %v7492_v47 = vor.u32 %v6811_v13, %v6133_v18  ;;  %v5623_v41 = vld [vmem:[#allocation9 + $0xf0] sm:$0xf0] }
 0x121   :  { %9515 = vst [vmem:[#allocation53_spill] sm:$0xff] %v7483_v2  ;;  %v7499_v37 = vor.u32 %v6843_v35, %v6261_v33  ;;  %v7501_v63 = vor.u32 %v6681_v10, %v5623_v41  ;;  %v6713_v42 = vld [vmem:[#allocation9 + $0x1e4] sm:$0xf]  ;;  %v5751_v23 = vld [vmem:[#allocation9 + $0x1f0] sm:$0xf0] }
 0x122   :  { %9516 = vst [vmem:[#allocation54_spill] sm:$0xff] %v7485_v55  ;;  %2710 = vmatpush.bf16.msrb.mxu1 %v7483_v2  ;;  %v7507_v13 = vor.u32 %v6713_v42, %v5751_v23  ;;  %v6117_v18 = vld [vmem:[#allocation9 + $0x4c0] sm:$0xf]  ;;  %v6807_v46 = vld [vmem:[#allocation9 + $0x4cc] sm:$0xf0] }
 0x123   :  { %9517 = vst [vmem:[#allocation55_spill] sm:$0xff] %v7487_v15  ;;  %2723 = vmatpush.bf16.msrb.mxu2 %v7485_v55  ;;  %2742 = vmatpush.bf16.msra.mxu0 %v7492_v47  ;;  %v7511_v33 = vor.u32 %v6807_v46, %v6117_v18  ;;  %v6839_v10 = vld [vmem:[#allocation9 + $0x5cc] sm:$0xf0]  ;;  %v6677_v41 = vld [vmem:[#allocation9 + $0xc4] sm:$0xf] }
 0x124   :  { %v7489_v45 = vpop.f32.mrf.mxu2  ;;  %9518 = vst [vmem:[#allocation56_spill] sm:$0xff] %v7492_v47  ;;  %2736 = vmatpush.bf16.msrb.mxu3 %v7487_v15  ;;  %v5607_v35 = vld [vmem:[#allocation9 + $0xd0] sm:$0xf0]  ;;  %v7515_v55 = vor.u32 %v6839_v10, %v6245_v3  ;;  %v6709_v23 = vld [vmem:[#allocation9 + $0x1c4] sm:$0xf] }
 0x125   :  { %v7494_v24 = vpop.f32.mrf.mxu3  ;;  %v7496_v27 = vpop.f32.mrf.mxu0  ;;  %9519 = vst [vmem:[#allocation57_spill] sm:$0xff] %v7499_v37  ;;  %v7517_v42 = vor.u32 %v6677_v41, %v5607_v35  ;;  %v5735_v15 = vld [vmem:[#allocation9 + $0x1d0] sm:$0xf0]  ;;  %v6101_v47 = vld [vmem:[#allocation9 + $0x4a0] sm:$0xf] }
 0x126   :  { %9520 = vst [vmem:[#allocation58_spill] sm:$0xff] %v7501_v63  ;;  %v7503_v5 = vpop.f32.mrf.mxu1  ;;  %2755 = vmatpush.bf16.msra.mxu1 %v7499_v37  ;;  %v7519_v2 = vor.u32 %v6709_v23, %v5735_v15  ;;  %v6229_v37 = vld [vmem:[#allocation9 + $0x5a0] sm:$0xf]  ;;  %v7523_v46 = vor.u32 %v6803_v60, %v6101_v47  ;;  %v6835_v18 = vld [vmem:[#allocation9 + $0x5ac] sm:$0xf0] }
 0x127   :  { %9521 = vst [vmem:[#allocation59_spill] sm:$0xff] %v7507_v13  ;;  %2768 = vmatpush.bf16.msra.mxu2 %v7501_v63  ;;  %2743 = vmatpush.bf16.msra.mxu0 %v7511_v33  ;;  %v6673_v63 = vld [vmem:[#allocation9 + $0xa4] sm:$0xf]  ;;  %v7529_v15 = vor.u32 %v6835_v18, %v6229_v37  ;;  %v5719_v35 = vld [vmem:[#allocation9 + $0x1b0] sm:$0xf0] }
 0x128   :  { %9522 = vst [vmem:[#allocation60_spill] sm:$0xff] %v7511_v33  ;;  %2781 = vmatpush.bf16.msra.mxu3 %v7507_v13  ;;  %v5591_v13 = vld [vmem:[#allocation9 + $0xb0] sm:$0xf0]  ;;  %v6705_v41 = vld [vmem:[#allocation9 + $0x1a4] sm:$0xf] }
 0x129   :  { %9523 = vst [vmem:[#allocation61_spill] sm:$0xff] %v7515_v55  ;;  %v7531_v10 = vor.u32 %v6673_v63, %v5591_v13  ;;  %v7537_v60 = vor.u32 %v6705_v41, %v5719_v35  ;;  %v6085_v33 = vld [vmem:[#allocation9 + $0x480] sm:$0xf]  ;;  %v6831_v63 = vld [vmem:[#allocation9 + $0x58c] sm:$0xf0] }
 0x12a   :  { %9524 = vst [vmem:[#allocation62_spill] sm:$0xff] %v7517_v42  ;;  %2756 = vmatpush.bf16.msra.mxu1 %v7515_v55  ;;  %v7543_v37 = vor.u32 %v6799_v53, %v6085_v33  ;;  %v6669_v13 = vld [vmem:[#allocation9 + $0x84] sm:$0xf]  ;;  %v7547_v18 = vor.u32 %v6831_v63, %v6213_v50  ;;  %v5575_v41 = vld [vmem:[#allocation9 + $0x90] sm:$0xf0] }
 0x12b   :  { %9525 = vst [vmem:[#allocation63_spill] sm:$0xff] %v7519_v2  ;;  %2769 = vmatpush.bf16.msra.mxu2 %v7517_v42  ;;  %2744 = vmatpush.bf16.msra.mxu0 %v7523_v46  ;;  %v6701_v35 = vld [vmem:[#allocation9 + $0x184] sm:$0xf]  ;;  %v7549_v42 = vor.u32 %v6669_v13, %v5575_v41  ;;  %v6827_v33 = vld [vmem:[#allocation9 + $0x56c] sm:$0xf0] }
 0x12c   :  { %9526 = vst [vmem:[#allocation64_spill] sm:$0xff] %v7523_v46  ;;  %v7525_v3 = vpop.f32.mrf.mxu2  ;;  %2782 = vmatpush.bf16.msra.mxu3 %v7519_v2  ;;  %v5703_v2 = vld [vmem:[#allocation9 + $0x190] sm:$0xf0]  ;;  %v6069_v46 = vld [vmem:[#allocation9 + $0x460] sm:$0xf] }
 0x12d   :  { %9527 = vst [vmem:[#allocation65_spill] sm:$0xff] %v7529_v15  ;;  %v7533_v23 = vpop.f32.mrf.mxu3  ;;  %v7535_v55 = vpop.f32.mrf.mxu0  ;;  %v7551_v36 = vor.u32 %v6701_v35, %v5703_v2  ;;  %v7555_v53 = vor.u32 %v6795_v32, %v6069_v46  ;;  %v5559_v50 = vld [vmem:[#allocation9 + $0x70] sm:$0xf0]  ;;  %v6697_v41 = vld [vmem:[#allocation9 + $0x164] sm:$0xf] }
 0x12e   :  { %9528 = vst [vmem:[#allocation66_spill] sm:$0xff] %v7531_v10  ;;  %v7539_v47 = vpop.f32.mrf.mxu1  ;;  %2757 = vmatpush.bf16.msra.mxu1 %v7529_v15  ;;  %v6197_v15 = vld [vmem:[#allocation9 + $0x560] sm:$0xf]  ;;  %v5687_v35 = vld [vmem:[#allocation9 + $0x170] sm:$0xf0] }
 0x12f   :  { %9529 = vst [vmem:[#allocation67_spill] sm:$0xff] %v7537_v60  ;;  %2770 = vmatpush.bf16.msra.mxu2 %v7531_v10  ;;  %2745 = vmatpush.bf16.msra.mxu0 %v7543_v37  ;;  %v7561_v2 = vor.u32 %v6827_v33, %v6197_v15  ;;  %v7569_v32 = vor.u32 %v6697_v41, %v5687_v35  ;;  %v6053_v10 = vld [vmem:[#allocation9 + $0x440] sm:$0xf]  ;;  %v6661_v33 = vld [vmem:[#allocation9 + $0x44] sm:$0xf] }
 0x130   :  { %9530 = vst [vmem:[#allocation68_spill] sm:$0xff] %v7543_v37  ;;  %2783 = vmatpush.bf16.msra.mxu3 %v7537_v60  ;;  %v6665_v60 = vld [vmem:[#allocation9 + $0x64] sm:$0xf]  ;;  %v7575_v15 = vor.u32 %v6791_v48, %v6053_v10  ;;  %v5543_v41 = vld [vmem:[#allocation9 + $0x50] sm:$0xf0] }
 0x131   :  { %9531 = vst [vmem:[#allocation69_spill] sm:$0xff] %v7547_v18  ;;  %v7563_v13 = vor.u32 %v6665_v60, %v5559_v50  ;;  %v6823_v60 = vld [vmem:[#allocation9 + $0x54c] sm:$0xf0]  ;;  %v6693_v35 = vld [vmem:[#allocation9 + $0x144] sm:$0xf] }
 0x132   :  { %9532 = vst [vmem:[#allocation70_spill] sm:$0xff] %v7549_v42  ;;  %2758 = vmatpush.bf16.msra.mxu1 %v7547_v18  ;;  %v7579_v50 = vor.u32 %v6823_v60, %v6181_v14  ;;  %v6819_v10 = vld [vmem:[#allocation9 + $0x52c] sm:$0xf0]  ;;  %v5527_v14 = vld [vmem:[#allocation9 + $0x30] sm:$0xf0] }
 0x133   :  { %9533 = vst [vmem:[#allocation71_spill] sm:$0xff] %v7551_v36  ;;  %2771 = vmatpush.bf16.msra.mxu2 %v7549_v42  ;;  %2746 = vmatpush.bf16.msra.mxu0 %v7555_v53  ;;  %v7581_v42 = vor.u32 %v6661_v33, %v5543_v41  ;;  %v6689_v41 = vld [vmem:[#allocation9 + $0x124] sm:$0xf] }
 0x134   :  { %9534 = vst [vmem:[#allocation72_spill] sm:$0xff] %v7555_v53  ;;  %v7557_v63 = vpop.f32.mrf.mxu2  ;;  %2784 = vmatpush.bf16.msra.mxu3 %v7551_v36  ;;  %v5671_v36 = vld [vmem:[#allocation9 + $0x150] sm:$0xf0]  ;;  %v6037_v53 = vld [vmem:[#allocation9 + $0x420] sm:$0xf] }
 0x135   :  { %9535 = vst [vmem:[#allocation73_spill] sm:$0xff] %v7561_v2  ;;  %v7565_v37 = vpop.f32.mrf.mxu3  ;;  %v7567_v18 = vpop.f32.mrf.mxu0  ;;  %v7583_v38 = vor.u32 %v6693_v35, %v5671_v36  ;;  %v7587_v48 = vor.u32 %v6787_v7, %v6037_v53  ;;  %v5655_v35 = vld [vmem:[#allocation9 + $0x130] sm:$0xf0] }
 0x136   :  { %9536 = vst [vmem:[#allocation74_spill] sm:$0xff] %v7563_v13  ;;  %v7571_v46 = vpop.f32.mrf.mxu1  ;;  %2759 = vmatpush.bf16.msra.mxu1 %v7561_v2  ;;  %v6165_v2 = vld [vmem:[#allocation9 + $0x520] sm:$0xf] }
 0x137   :  { %9537 = vst [vmem:[#allocation75_spill] sm:$0xff] %v7569_v32  ;;  %2772 = vmatpush.bf16.msra.mxu2 %v7563_v13  ;;  %2747 = vmatpush.bf16.msra.mxu0 %v7575_v15  ;;  %v7593_v36 = vor.u32 %v6819_v10, %v6165_v2  ;;  %v6653_v10 = vld [vmem:[#allocation9 + $0x4] sm:$0xf] }
 0x138   :  { %9538 = vst [vmem:[#allocation76_spill] sm:$0xff] %v7575_v15  ;;  %2785 = vmatpush.bf16.msra.mxu3 %v7569_v32  ;;  %v6657_v32 = vld [vmem:[#allocation9 + $0x24] sm:$0xf]  ;;  %v7598_v15 = vperm.slane %v7313_v0, 2 }
 0x139   :  { %9539 = vst [vmem:[#allocation77_spill] sm:$0xff] %v7579_v50  ;;  %v7595_v33 = vor.u32 %v6657_v32, %v5527_v14  ;;  %v6815_v32 = vld [vmem:[#allocation9 + $0x50c] sm:$0xf0] }
 0x13a   :  { %9540 = vst [vmem:[#allocation78_spill] sm:$0xff] %v7581_v42  ;;  %2760 = vmatpush.bf16.msra.mxu1 %v7579_v50  ;;  %v7604_v50 = vor.u32 %v6689_v41, %v5655_v35  ;;  %v5511_v41 = vld [vmem:[#allocation9 + $0x10] sm:$0xf0]  ;;  %v6685_v35 = vld [vmem:[#allocation9 + $0x104] sm:$0xf]  ;;  %v1304_v61 = vadd.f32 %v7393_v34, %v7598_v15 }
 0x13b   :  { %9541 = vst [vmem:[#allocation79_spill] sm:$0xff] %v7583_v38  ;;  %2773 = vmatpush.bf16.msra.mxu2 %v7581_v42  ;;  %v6021_v42 = vld [vmem:[#allocation9 + $0x400] sm:$0xf]  ;;  %2748 = vmatpush.bf16.msra.mxu0 %v7587_v48 }
 0x13c   :  { %9542 = vst [vmem:[#allocation80_spill] sm:$0xff] %v7587_v48  ;;  %v7589_v60 = vpop.f32.mrf.mxu2  ;;  %2786 = vmatpush.bf16.msra.mxu3 %v7583_v38  ;;  %v6149_v38 = vld [vmem:[#allocation9 + $0x500] sm:$0xf]  ;;  %v7610_v2 = vor.u32 %v6783_v4, %v6021_v42  ;;  %v7619_v48 = vperm.slane %v7313_v0, 3  ;;  %v7623_v4 = vor.u32 %v6685_v35, %v5639_v62  ;;  %v1211_v62 = vadd.f32 %v7352_v26, %v7347_v56 }
 0x13d   :  { %9543 = vst [vmem:[#allocation81_spill] sm:$0xff] %v7593_v36  ;;  %v7600_v7 = vpop.f32.mrf.mxu3  ;;  %v7602_v53 = vpop.f32.mrf.mxu0  ;;  %v7614_v14 = vor.u32 %v6815_v32, %v6149_v38  ;;  %v1323_v38 = vadd.f32 %v7396_v22, %v1304_v61  ;;  %v1306_v61 = vadd.f32 %v7425_v51, %v7598_v15 }
 0x13e   :  { %9544 = vst [vmem:[#allocation82_spill] sm:$0xff] %v7604_v50  ;;  %v7606_v13 = vpop.f32.mrf.mxu1  ;;  %2761 = vmatpush.bf16.msra.mxu1 %v7593_v36  ;;  %v7621_v36 = vor.u32 %v6653_v10, %v5511_v41  ;;  %v1399_v0 = vadd.f32 %v7533_v23, %v7619_v48 }
 0x13f   :  { %9545 = vst [vmem:[#allocation83_spill] sm:$0xff] %v7610_v2  ;;  %2774 = vmatpush.bf16.msra.mxu2 %v7595_v33  ;;  %2749 = vmatpush.bf16.msra.mxu0 %v7610_v2  ;;  %v1342_v41 = vadd.f32 %v7496_v27, %v1323_v38 }
 0x140   :  { %2787 = vmatpush.bf16.msra.mxu3 %v7604_v50  ;;  %9546 = vst [vmem:[#allocation84_spill] sm:$0xff] %v7614_v14  ;;  %v1325_v50 = vadd.f32 %v7428_v52, %v1306_v61  ;;  %v1309_v52 = vadd.f32 %v7457_v57, %v7598_v15 }
 0x141   :  { %9547 = vst [vmem:[#allocation85_spill] sm:$0xff] %v7621_v36  ;;  %v1361_v22 = vadd.f32 %v7503_v5, %v1342_v41 }
 0x142   :  { %9548 = vst [vmem:[#allocation86_spill] sm:$0xff] %v7623_v4  ;;  %2762 = vmatpush.bf16.msra.mxu1 %v7614_v14  ;;  %v1328_v57 = vadd.f32 %v7460_v31, %v1309_v52 }
 0x143   :  { %2775 = vmatpush.bf16.msra.mxu2 %v7621_v36  ;;  %v1116_v36 = vadd.f32 %v7324_v8, %v7316_v1  ;;  %v1380_v27 = vadd.f32 %v7525_v3, %v1361_v22  ;;  %v1401_v8 = vadd.f32 %v7565_v37, %v7619_v48  ;;  %v1121_v37 = vadd.f32 %v7338_v16, %v7316_v1 }
 0x144   :  { %v7627_v42 = vpop.f32.mrf.mxu2  ;;  %2788 = vmatpush.bf16.msra.mxu3 %v7623_v4  ;;  %v1230_v4 = vadd.f32 %v7354_v28, %v1211_v62 }
 0x145   :  { %v7634_v34 = vpop.f32.mrf.mxu3  ;;  %v1417_v32 = vpop.f32.mrf.mxu0  ;;  %v1135_v14 = vadd.f32 %v7326_v9, %v1116_v36  ;;  %v1344_v9 = vadd.f32 %v7535_v55, %v1325_v50  ;;  %v1216_v50 = vadd.f32 %v7363_v40, %v7347_v56  ;;  %v1347_v56 = vadd.f32 %v7567_v18, %v1328_v57  ;;  %v5879_v18 = vld [vmem:[#allocation9 + $0x2f0] sm:$0xf0] }
 0x146   :  { %v1436_v10 = vpop.f32.mrf.mxu1  ;;  %v1418_v35 = vadd.f32 %v1417_v32, %v1399_v0  ;;  %v1249_v2 = vadd.f32 %v7356_v29, %v1230_v4  ;;  %v1486_v4 = vmax.f32 %v1380_v27, 0.0  ;;  %v1311_v27 = vadd.f32 %v7489_v45, %v7598_v15 }
 0x147   :  { %v1154_v51 = vadd.f32 %v7328_v11, %v1135_v14  ;;  %v1363_v11 = vadd.f32 %v7539_v47, %v1344_v9  ;;  %v6809_v9 = vld [vmem:[#allocation9 + $0x4e4] sm:$0xf] }
 0x148   :  { %v1437_v23 = vadd.f32 %v1436_v10, %v1418_v35  ;;  %v1268_v5 = vadd.f32 %v7398_v49, %v1249_v2  ;;  %v1140_v35 = vadd.f32 %v7340_v17, %v1121_v37  ;;  %v6745_v17 = vld [vmem:[#allocation9 + $0x2e4] sm:$0xf]  ;;  %v5863_v37 = vld [vmem:[#allocation9 + $0x2d0] sm:$0xf0] }
 0x149   :  { %v1173_v62 = vadd.f32 %v7330_v12, %v1154_v51  ;;  %v1382_v41 = vadd.f32 %v7557_v63, %v1363_v11  ;;  %v1404_v12 = vadd.f32 %v7600_v7, %v7619_v48  ;;  %v6007_v51 = vld [vmem:[#allocation9 + $0x3f0] sm:$0xf0] }
 0x14a   :  { %v1287_v10 = vadd.f32 %v7402_v30, %v1268_v5  ;;  %v1159_v63 = vadd.f32 %v7342_v19, %v1140_v35  ;;  %v1406_v19 = vadd.f32 %v7634_v34, %v7619_v48  ;;  %v6119_v35 = vld [vmem:[#allocation9 + $0x4d0] sm:$0xf0] }
 0x14b   :  { %v1192_v55 = vadd.f32 %v7350_v25, %v1173_v62  ;;  %v1235_v25 = vadd.f32 %v7367_v43, %v1216_v50  ;;  %v1490_v7 = vmax.f32 %v1382_v41, 0.0  ;;  %v1366_v43 = vadd.f32 %v7571_v46, %v1347_v56  ;;  %v6741_v62 = vld [vmem:[#allocation9 + $0x2c4] sm:$0xf]  ;;  %v6247_v56 = vld [vmem:[#allocation9 + $0x5d0] sm:$0xf0] }
 0x14c   :  { %v1455_v26 = vpop.f32.mrf.mxu2  ;;  %v1489_v22 = vmax.f32 %v1287_v10, 0.0 }
 0x14d   :  { %v1456_v38 = vadd.f32 %v1455_v26, %v1437_v23  ;;  %v1474_v28 = vpop.f32.mrf.mxu3  ;;  %v1419_v0 = vpop.f32.mrf.mxu0  ;;  %v1488_v23 = vmax.f32 %v1192_v55, 0.0  ;;  %v1385_v15 = vadd.f32 %v7589_v60, %v1366_v43  ;;  %v5975_v43 = vld [vmem:[#allocation9 + $0x3b0] sm:$0xf0] }
 0x14e   :  { %v1438_v32 = vpop.f32.mrf.mxu1  ;;  %v1420_v29 = vadd.f32 %v1419_v0, %v1401_v8  ;;  %v6777_v0 = vld [vmem:[#allocation9 + $0x3e4] sm:$0xf] }
 0x14f   :  { %v1475_v36 = vadd.f32 %v1474_v28, %v1456_v38  ;;  %v1501_v8 = vmax.f32 %v1488_v23, %v1489_v22  ;;  %v6837_v22 = vld [vmem:[#allocation9 + $0x5c4] sm:$0xf] }
 0x150   :  { %v1439_v49 = vadd.f32 %v1438_v32, %v1420_v29  ;;  %v1178_v32 = vadd.f32 %v7344_v20, %v1159_v63  ;;  %v1330_v20 = vadd.f32 %v7494_v24, %v1311_v27 }
 0x151   :  { %v1487_v3 = vmax.f32 %v1475_v36, 0.0  ;;  %v6841_v36 = vld [vmem:[#allocation9 + $0x5e4] sm:$0xf] }
 0x152   :  { %v1349_v24 = vadd.f32 %v7602_v53, %v1330_v20  ;;  %v1197_v53 = vadd.f32 %v7361_v39, %v1178_v32  ;;  %v6833_v32 = vld [vmem:[#allocation9 + $0x5a4] sm:$0xf] }
 0x153   :  { %v1504_v14 = vmax.f32 %v1486_v4, %v1487_v3  ;;  %v6263_v3 = vld [vmem:[#allocation9 + $0x5f0] sm:$0xf0] }
 0x154   :  { %v1457_v2 = vpop.f32.mrf.mxu2  ;;  %v1368_v39 = vadd.f32 %v7606_v13, %v1349_v24  ;;  %v1496_v13 = vmax.f32 %v1197_v53, 0.0  ;;  %v5943_v24 = vld [vmem:[#allocation9 + $0x370] sm:$0xf0] }
 0x155   :  { %v1508_v1 = vmax.f32 %v7391_v21, %v1504_v14  ;;  %v1458_v16 = vadd.f32 %v1457_v2, %v1439_v49  ;;  %v1476_v30 = vpop.f32.mrf.mxu3  ;;  %v1422_v47 = vpop.f32.mrf.mxu0  ;;  %v1254_v21 = vadd.f32 %v7369_v44, %v1235_v25  ;;  %v6135_v44 = vld [vmem:[#allocation9 + $0x4f0] sm:$0xf0]  ;;  %v7683_v14 = vor.u32 %v6745_v17, %v5879_v18  ;;  %v6773_v2 = vld [vmem:[#allocation9 + $0x3c4] sm:$0xf] }
 0x156   :  { %v1441_v61 = vpop.f32.mrf.mxu1  ;;  %v1423_v31 = vadd.f32 %v1422_v47, %v1404_v12  ;;  %v7685_v49 = vor.u32 %v6777_v0, %v6007_v51  ;;  %v6805_v47 = vld [vmem:[#allocation9 + $0x4c4] sm:$0xf]  ;;  %v1494_v25 = vmax.f32 %v1385_v15, 0.0  ;;  %v7717_v17 = vor.u32 %v6837_v22, %v6247_v56  ;;  %v6103_v51 = vld [vmem:[#allocation9 + $0x4b0] sm:$0xf0] }
 0x157   :  { %1512 = vst [vmem:[#allocation2] sm:$0xff] %v1508_v1  ;;  %v1477_v40 = vadd.f32 %v1476_v30, %v1458_v16  ;;  %v1273_v45 = vadd.f32 %v7462_v59, %v1254_v21  ;;  %v7696_v1 = vor.u32 %v6809_v9, %v6135_v44  ;;  %v7698_v16 = vor.u32 %v6841_v36, %v6263_v3  ;;  %v5991_v30 = vld [vmem:[#allocation9 + $0x3d0] sm:$0xf0]  ;;  %v6825_v56 = vld [vmem:[#allocation9 + $0x564] sm:$0xf] }
 0x158   :  { %v1442_v28 = vadd.f32 %v1441_v61, %v1423_v31  ;;  %9549 = vst [vmem:[#allocation87_spill] sm:$0xff] %v7683_v14  ;;  %v7706_v31 = vor.u32 %v6741_v62, %v5863_v37  ;;  %v5847_v21 = vld [vmem:[#allocation9 + $0x2b0] sm:$0xf0]  ;;  %v7715_v27 = vor.u32 %v6805_v47, %v6119_v35  ;;  %v6829_v62 = vld [vmem:[#allocation9 + $0x584] sm:$0xf] }
 0x159   :  { %v1491_v26 = vmax.f32 %v1477_v40, 0.0  ;;  %9550 = vst [vmem:[#allocation88_spill] sm:$0xff] %v7685_v49  ;;  %v1292_v40 = vadd.f32 %v7465_v6, %v1273_v45  ;;  %v6733_v45 = vld [vmem:[#allocation9 + $0x284] sm:$0xf]  ;;  %v6087_v3 = vld [vmem:[#allocation9 + $0x490] sm:$0xf0] }
 0x15a   :  { %9551 = vst [vmem:[#allocation89_spill] sm:$0xff] %v7696_v1  ;;  %v6215_v37 = vld [vmem:[#allocation9 + $0x590] sm:$0xf0] }
 0x15b   :  { %v1505_v38 = vmax.f32 %v1490_v7, %v1491_v26  ;;  %9552 = vst [vmem:[#allocation90_spill] sm:$0xff] %v7698_v16  ;;  %v7710_v7 = vor.u32 %v6773_v2, %v5991_v30  ;;  %v6737_v26 = vld [vmem:[#allocation9 + $0x2a4] sm:$0xf]  ;;  %v1497_v9 = vmax.f32 %v1292_v40, 0.0  ;;  %v6071_v22 = vld [vmem:[#allocation9 + $0x470] sm:$0xf0] }
 0x15c   :  { %v1460_v5 = vpop.f32.mrf.mxu2  ;;  %9553 = vst [vmem:[#allocation91_spill] sm:$0xff] %v7706_v31  ;;  %v7723_v44 = vor.u32 %v6737_v26, %v5847_v21  ;;  %v6761_v2 = vld [vmem:[#allocation9 + $0x364] sm:$0xf]  ;;  %v6199_v53 = vld [vmem:[#allocation9 + $0x570] sm:$0xf0] }
 0x15d   :  { %v1509_v29 = vmax.f32 %v1501_v8, %v1505_v38  ;;  %v1461_v46 = vadd.f32 %v1460_v5, %v1442_v28  ;;  %v1424_v52 = vpop.f32.mrf.mxu0  ;;  %v1479_v4 = vpop.f32.mrf.mxu3  ;;  %9554 = vst [vmem:[#allocation92_spill] sm:$0xff] %v7710_v7  ;;  %v6769_v8 = vld [vmem:[#allocation9 + $0x3a4] sm:$0xf]  ;;  %v1387_v5 = vadd.f32 %v7627_v42, %v1368_v39  ;;  %v7753_v21 = vor.u32 %v6761_v2, %v5943_v24 }
 0x15e   :  { %v1425_v10 = vadd.f32 %v1424_v52, %v1406_v19  ;;  %v1516_v11 = vld [vmem:[#allocation2] sm:$0x3]  ;;  %v1517_v48 = vld [vmem:[#allocation2 + $0x2] sm:$0x3]  ;;  %v1518_v34 = vld [vmem:[#allocation2 + $0x4] sm:$0x3]  ;;  %v1443_v41 = vpop.f32.mrf.mxu1  ;;  %v7725_v36 = vor.u32 %v6769_v8, %v5975_v43 }
 0x15f   :  { %1513 = vst [vmem:[#allocation2 + $0x8] sm:$0xff] %v1509_v29  ;;  %v1480_v59 = vadd.f32 %v1479_v4, %v1461_v46  ;;  %v7687_v60 = vpack.c.bf16 %v1516_v11, %v1516_v11  ;;  %v7689_v55 = vpack.c.bf16 %v1517_v48, %v1517_v48  ;;  %v7691_v50 = vpack.c.bf16 %v1518_v34, %v1518_v34  ;;  %v1519_v57 = vld [vmem:[#allocation2 + $0x6] sm:$0x3]  ;;  %v6801_v38 = vld [vmem:[#allocation9 + $0x4a4] sm:$0xf] }
 0x160   :  { %v7694_v12 = vpack.c.bf16 %v1519_v57, %v1519_v57  ;;  %v1444_v23 = vadd.f32 %v1443_v41, %v1425_v10  ;;  %9555 = vst [vmem:[#allocation93_spill] sm:$0xff] %v7715_v27  ;;  %v6231_v19 = vld [vmem:[#allocation9 + $0x5b0] sm:$0xf0]  ;;  %v7729_v29 = vor.u32 %v6801_v38, %v6103_v51  ;;  %v6765_v46 = vld [vmem:[#allocation9 + $0x384] sm:$0xf]  ;;  %v1498_v20 = vmax.f32 %v1387_v5, 0.0 }
 0x161   :  { %v1495_v61 = vmax.f32 %v1480_v59, 0.0  ;;  %2698 = vmatmul.bf16.vlgmr.msrb.gmra.mxu0 %v7687_v60  ;;  %2711 = vmatmul.bf16.vlgmr.msrb.gmra.mxu1 %v7689_v55  ;;  %9556 = vst [vmem:[#allocation94_spill] sm:$0xff] %v7717_v17  ;;  %v7731_v42 = vor.u32 %v6833_v32, %v6231_v19  ;;  %v5959_v52 = vld [vmem:[#allocation9 + $0x390] sm:$0xf0]  ;;  %v6797_v4 = vld [vmem:[#allocation9 + $0x484] sm:$0xf]  ;;  %v1503_v48 = vmax.f32 %v1496_v13, %v1497_v9 }
 0x162   :  { %2724 = vmatmul.bf16.vlgmr.msrb.gmra.mxu2 %v7691_v50  ;;  %2737 = vmatmul.bf16.vlgmr.msrb.gmra.mxu3 %v7694_v12  ;;  %9557 = vst [vmem:[#allocation95_spill] sm:$0xff] %v7723_v44  ;;  %v6729_v11 = vld [vmem:[#allocation9 + $0x264] sm:$0xf]  ;;  %v7737_v59 = vor.u32 %v6765_v46, %v5959_v52  ;;  %v5815_v57 = vld [vmem:[#allocation9 + $0x270] sm:$0xf0]  ;;  %v7741_v35 = vor.u32 %v6797_v4, %v6087_v3 }
 0x163   :  { %v1506_v63 = vmax.f32 %v1494_v25, %v1495_v61  ;;  %2794 = vmatpush.bf16.msrb.mxu0 %v7683_v14  ;;  %2807 = vmatpush.bf16.msrb.mxu1 %v7685_v49  ;;  %9558 = vst [vmem:[#allocation96_spill] sm:$0xff] %v7725_v36  ;;  %v7743_v25 = vor.u32 %v6829_v62, %v6215_v37  ;;  %v6793_v61 = vld [vmem:[#allocation9 + $0x464] sm:$0xf]  ;;  %v6183_v32 = vld [vmem:[#allocation9 + $0x550] sm:$0xf0] }
 0x164   :  { %2820 = vmatpush.bf16.msrb.mxu2 %v7696_v1  ;;  %2833 = vmatpush.bf16.msrb.mxu3 %v7698_v16  ;;  %v1462_v6 = vpop.f32.mrf.mxu2  ;;  %9559 = vst [vmem:[#allocation97_spill] sm:$0xff] %v7729_v29  ;;  %v6725_v39 = vld [vmem:[#allocation9 + $0x244] sm:$0xf]  ;;  %v7757_v43 = vor.u32 %v6793_v61, %v6071_v22  ;;  %v7759_v38 = vor.u32 %v6825_v56, %v6199_v53  ;;  %v5783_v9 = vld [vmem:[#allocation9 + $0x230] sm:$0xf0] }
 0x165   :  { %v1510_v28 = vmax.f32 %v7455_v54, %v1506_v63  ;;  %v1463_v18 = vadd.f32 %v1462_v6, %v1444_v23  ;;  %v1481_v0 = vpop.f32.mrf.mxu3  ;;  %v5831_v54 = vld [vmem:[#allocation9 + $0x290] sm:$0xf0]  ;;  %9560 = vst [vmem:[#allocation98_spill] sm:$0xff] %v7731_v42  ;;  %v7745_v63 = vor.u32 %v6729_v11, %v5815_v57  ;;  %v6757_v8 = vld [vmem:[#allocation9 + $0x344] sm:$0xf] }
 0x166   :  { %v7735_v34 = vor.u32 %v6733_v45, %v5831_v54  ;;  %9562 = vst [vmem:[#allocation100_spill] sm:$0xff] %v7737_v59  ;;  %v1520_v41 = vld [vmem:[#allocation2 + $0x8] sm:$0x3]  ;;  %v1521_v30 = vld [vmem:[#allocation2 + $0xa] sm:$0x3] }
 0x167   :  { %1514 = vst [vmem:[#allocation2 + $0x10] sm:$0xff] %v1510_v28  ;;  %2795 = vmatpush.bf16.msrb.mxu0 %v7706_v31  ;;  %2808 = vmatpush.bf16.msrb.mxu1 %v7710_v7  ;;  %v1482_v15 = vadd.f32 %v1481_v0, %v1463_v18  ;;  %v7747_v23 = vpack.c.bf16 %v1520_v41, %v1520_v41  ;;  %v5799_v6 = vld [vmem:[#allocation9 + $0x250] sm:$0xf0]  ;;  %v6789_v18 = vld [vmem:[#allocation9 + $0x444] sm:$0xf] }
 0x168   :  { %2821 = vmatpush.bf16.msrb.mxu2 %v7715_v27  ;;  %2834 = vmatpush.bf16.msrb.mxu3 %v7717_v17  ;;  %9561 = vst [vmem:[#allocation99_spill] sm:$0xff] %v7735_v34  ;;  %v7749_v26 = vpack.c.bf16 %v1521_v30, %v1521_v30  ;;  %v5927_v28 = vld [vmem:[#allocation9 + $0x350] sm:$0xf0]  ;;  %v6821_v51 = vld [vmem:[#allocation9 + $0x544] sm:$0xf]  ;;  %v7767_v19 = vor.u32 %v6725_v39, %v5799_v6 }
 0x169   :  { %v1499_v10 = vmax.f32 %v1482_v15, 0.0  ;;  %9563 = vst [vmem:[#allocation101_spill] sm:$0xff] %v7741_v35  ;;  %v6055_v0 = vld [vmem:[#allocation9 + $0x450] sm:$0xf0]  ;;  %v7769_v13 = vor.u32 %v6757_v8, %v5927_v28  ;;  %v6721_v5 = vld [vmem:[#allocation9 + $0x224] sm:$0xf]  ;;  %v7775_v54 = vor.u32 %v6821_v51, %v6183_v32 }
 0x16a   :  { %9564 = vst [vmem:[#allocation102_spill] sm:$0xff] %v7743_v25  ;;  %v7773_v45 = vor.u32 %v6789_v18, %v6055_v0  ;;  %v6753_v15 = vld [vmem:[#allocation9 + $0x324] sm:$0xf]  ;;  %v5911_v46 = vld [vmem:[#allocation9 + $0x330] sm:$0xf0] }
 0x16b   :  { %2796 = vmatpush.bf16.msrb.mxu0 %v7723_v44  ;;  %2809 = vmatpush.bf16.msrb.mxu1 %v7725_v36  ;;  %v1507_v47 = vmax.f32 %v1498_v20, %v1499_v10  ;;  %9565 = vst [vmem:[#allocation103_spill] sm:$0xff] %v7745_v63  ;;  %v6785_v52 = vld [vmem:[#allocation9 + $0x424] sm:$0xf]  ;;  %v6039_v4 = vld [vmem:[#allocation9 + $0x430] sm:$0xf0]  ;;  %v7779_v20 = vor.u32 %v6721_v5, %v5783_v9 }
 0x16c   :  { %2822 = vmatpush.bf16.msrb.mxu2 %v7729_v29  ;;  %2835 = vmatpush.bf16.msrb.mxu3 %v7731_v42  ;;  %9566 = vst [vmem:[#allocation104_spill] sm:$0xff] %v7753_v21  ;;  %v6817_v3 = vld [vmem:[#allocation9 + $0x524] sm:$0xf]  ;;  %v6167_v62 = vld [vmem:[#allocation9 + $0x530] sm:$0xf0]  ;;  %v7781_v10 = vor.u32 %v6753_v15, %v5911_v46  ;;  %v7785_v2 = vor.u32 %v6785_v52, %v6039_v4 }
 0x16d   :  { %v1511_v40 = vmax.f32 %v1503_v48, %v1507_v47  ;;  %9567 = vst [vmem:[#allocation105_spill] sm:$0xff] %v7757_v43  ;;  %v6717_v37 = vld [vmem:[#allocation9 + $0x204] sm:$0xf]  ;;  %v5767_v11 = vld [vmem:[#allocation9 + $0x210] sm:$0xf0]  ;;  %v7787_v24 = vor.u32 %v6817_v3, %v6167_v62 }
 0x16e   :  { %9568 = vst [vmem:[#allocation106_spill] sm:$0xff] %v7759_v38  ;;  %v6749_v48 = vld [vmem:[#allocation9 + $0x304] sm:$0xf]  ;;  %v5895_v57 = vld [vmem:[#allocation9 + $0x310] sm:$0xf0]  ;;  %v7791_v6 = vor.u32 %v6717_v37, %v5767_v11 }
 0x16f   :  { %2797 = vmatpush.bf16.msrb.mxu0 %v7735_v34  ;;  %2810 = vmatpush.bf16.msrb.mxu1 %v7737_v59  ;;  %1515 = vst [vmem:[#allocation2 + $0x18] sm:$0xff] %v1511_v40  ;;  %v6781_v41 = vld [vmem:[#allocation9 + $0x404] sm:$0xf]  ;;  %v6023_v30 = vld [vmem:[#allocation9 + $0x410] sm:$0xf0]  ;;  %v7793_v8 = vor.u32 %v6749_v48, %v5895_v57 }
 0x170   :  { %2823 = vmatpush.bf16.msrb.mxu2 %v7741_v35  ;;  %2836 = vmatpush.bf16.msrb.mxu3 %v7743_v25  ;;  %9569 = vst [vmem:[#allocation107_spill] sm:$0xff] %v7767_v19  ;;  %v6813_v47 = vld [vmem:[#allocation9 + $0x504] sm:$0xf]  ;;  %v6151_v61 = vld [vmem:[#allocation9 + $0x510] sm:$0xf0]  ;;  %v7797_v51 = vor.u32 %v6781_v41, %v6023_v30 }
 0x171   :  { %2750 = vmatmul.bf16.vlgmr.msra.gmra.mxu0 %v7747_v23  ;;  %2763 = vmatmul.bf16.vlgmr.msra.gmra.mxu1 %v7749_v26  ;;  %9570 = vst [vmem:[#allocation108_spill] sm:$0xff] %v7769_v13  ;;  %v5629_v22 = vld [vmem:[#allocation9 + $0xe8] sm:$0xf]  ;;  %v6684_v56 = vld [vmem:[#allocation9 + $0xf4] sm:$0xf0]  ;;  %v7799_v32 = vor.u32 %v6813_v47, %v6151_v61 }
 0x172   :  { %2776 = vmatmul.bf16.vlgmr.msra.gmra.mxu2 %v7687_v60  ;;  %2789 = vmatmul.bf16.vlgmr.msra.gmra.mxu3 %v7689_v55  ;;  %9571 = vst [vmem:[#allocation109_spill] sm:$0xff] %v7773_v45  ;;  %v5757_v53 = vld [vmem:[#allocation9 + $0x1e8] sm:$0xf]  ;;  %v6716_v40 = vld [vmem:[#allocation9 + $0x1f4] sm:$0xf0]  ;;  %v7801_v5 = vor.u32 %v6684_v56, %v5629_v22 }
 0x173   :  { %2798 = vmatpush.bf16.msrb.mxu0 %v7745_v63  ;;  %2811 = vmatpush.bf16.msrb.mxu1 %v7753_v21  ;;  %9572 = vst [vmem:[#allocation110_spill] sm:$0xff] %v7775_v54  ;;  %v5885_v39 = vld [vmem:[#allocation9 + $0x2e8] sm:$0xf]  ;;  %v6748_v28 = vld [vmem:[#allocation9 + $0x2f4] sm:$0xf0]  ;;  %v7803_v9 = vor.u32 %v6716_v40, %v5757_v53 }
 0x174   :  { %2824 = vmatpush.bf16.msrb.mxu2 %v7757_v43  ;;  %2837 = vmatpush.bf16.msrb.mxu3 %v7759_v38  ;;  %9573 = vst [vmem:[#allocation111_spill] sm:$0xff] %v7779_v20  ;;  %v6013_v18 = vld [vmem:[#allocation9 + $0x3e8] sm:$0xf]  ;;  %v6780_v0 = vld [vmem:[#allocation9 + $0x3f4] sm:$0xf0]  ;;  %v7805_v52 = vor.u32 %v6748_v28, %v5885_v39 }
 0x175   :  { %9574 = vst [vmem:[#allocation112_spill] sm:$0xff] %v7781_v10  ;;  %v5613_v15 = vld [vmem:[#allocation9 + $0xc8] sm:$0xf]  ;;  %v6680_v46 = vld [vmem:[#allocation9 + $0xd4] sm:$0xf0]  ;;  %v7807_v4 = vor.u32 %v6780_v0, %v6013_v18 }
 0x176   :  { %9575 = vst [vmem:[#allocation113_spill] sm:$0xff] %v7785_v2  ;;  %v5741_v3 = vld [vmem:[#allocation9 + $0x1c8] sm:$0xf]  ;;  %v6712_v62 = vld [vmem:[#allocation9 + $0x1d4] sm:$0xf0]  ;;  %v7815_v41 = vor.u32 %v6680_v46, %v5613_v15 }
 0x177   :  { %2799 = vmatpush.bf16.msrb.mxu0 %v7767_v19  ;;  %2812 = vmatpush.bf16.msrb.mxu1 %v7769_v13  ;;  %9576 = vst [vmem:[#allocation114_spill] sm:$0xff] %v7787_v24  ;;  %v5869_v37 = vld [vmem:[#allocation9 + $0x2c8] sm:$0xf]  ;;  %v6744_v11 = vld [vmem:[#allocation9 + $0x2d4] sm:$0xf0]  ;;  %v7817_v30 = vor.u32 %v6712_v62, %v5741_v3 }
 0x178   :  { %2825 = vmatpush.bf16.msrb.mxu2 %v7773_v45  ;;  %2838 = vmatpush.bf16.msrb.mxu3 %v7775_v54  ;;  %9577 = vst [vmem:[#allocation115_spill] sm:$0xff] %v7791_v6  ;;  %v5997_v48 = vld [vmem:[#allocation9 + $0x3c8] sm:$0xf]  ;;  %v6776_v57 = vld [vmem:[#allocation9 + $0x3d4] sm:$0xf0]  ;;  %v7821_v22 = vor.u32 %v6744_v11, %v5869_v37 }
 0x179   :  { %9578 = vst [vmem:[#allocation116_spill] sm:$0xff] %v7793_v8  ;;  %v5597_v47 = vld [vmem:[#allocation9 + $0xa8] sm:$0xf]  ;;  %v6676_v61 = vld [vmem:[#allocation9 + $0xb4] sm:$0xf0]  ;;  %v7823_v56 = vor.u32 %v6776_v57, %v5997_v48 }
 0x17a   :  { %9579 = vst [vmem:[#allocation117_spill] sm:$0xff] %v7797_v51  ;;  %v5725_v53 = vld [vmem:[#allocation9 + $0x1a8] sm:$0xf]  ;;  %v6708_v40 = vld [vmem:[#allocation9 + $0x1b4] sm:$0xf0]  ;;  %v7831_v15 = vor.u32 %v6676_v61, %v5597_v47 }
 0x17b   :  { %2800 = vmatpush.bf16.msrb.mxu0 %v7779_v20  ;;  %2813 = vmatpush.bf16.msrb.mxu1 %v7781_v10  ;;  %9580 = vst [vmem:[#allocation118_spill] sm:$0xff] %v7799_v32  ;;  %v5853_v39 = vld [vmem:[#allocation9 + $0x2a8] sm:$0xf]  ;;  %v6740_v28 = vld [vmem:[#allocation9 + $0x2b4] sm:$0xf0]  ;;  %v7833_v46 = vor.u32 %v6708_v40, %v5725_v53 }
 0x17c   :  { %2826 = vmatpush.bf16.msrb.mxu2 %v7785_v2  ;;  %2839 = vmatpush.bf16.msrb.mxu3 %v7787_v24  ;;  %9581 = vst [vmem:[#allocation119_spill] sm:$0xff] %v7801_v5  ;;  %v5981_v18 = vld [vmem:[#allocation9 + $0x3a8] sm:$0xf]  ;;  %v6772_v0 = vld [vmem:[#allocation9 + $0x3b4] sm:$0xf0]  ;;  %v7837_v37 = vor.u32 %v6740_v28, %v5853_v39 }
 0x17d   :  { %9582 = vst [vmem:[#allocation120_spill] sm:$0xff] %v7803_v9  ;;  %v5581_v3 = vld [vmem:[#allocation9 + $0x88] sm:$0xf]  ;;  %v6672_v62 = vld [vmem:[#allocation9 + $0x94] sm:$0xf0]  ;;  %v7839_v11 = vor.u32 %v6772_v0, %v5981_v18 }
 0x17e   :  { %9583 = vst [vmem:[#allocation121_spill] sm:$0xff] %v7805_v52  ;;  %v5709_v48 = vld [vmem:[#allocation9 + $0x188] sm:$0xf]  ;;  %v6704_v57 = vld [vmem:[#allocation9 + $0x194] sm:$0xf0]  ;;  %v7843_v47 = vor.u32 %v6672_v62, %v5581_v3 }
 0x17f   :  { %9584 = vst [vmem:[#allocation122_spill] sm:$0xff] %v7807_v4  ;;  %2801 = vmatpush.bf16.msrb.mxu0 %v7791_v6  ;;  %2814 = vmatpush.bf16.msrb.mxu1 %v7793_v8  ;;  %v7845_v61 = vor.u32 %v6704_v57, %v5709_v48  ;;  %v5565_v53 = vld [vmem:[#allocation9 + $0x68] sm:$0xf]  ;;  %v6668_v40 = vld [vmem:[#allocation9 + $0x74] sm:$0xf0] }
 0x180   :  { %2827 = vmatpush.bf16.msrb.mxu2 %v7797_v51  ;;  %2840 = vmatpush.bf16.msrb.mxu3 %v7799_v32  ;;  %9585 = vst [vmem:[#allocation123_spill] sm:$0xff] %v7815_v41  ;;  %v5693_v18 = vld [vmem:[#allocation9 + $0x168] sm:$0xf]  ;;  %v6700_v0 = vld [vmem:[#allocation9 + $0x174] sm:$0xf0]  ;;  %v7855_v3 = vor.u32 %v6668_v40, %v5565_v53 }
 0x181   :  { %9586 = vst [vmem:[#allocation124_spill] sm:$0xff] %v7817_v30  ;;  %v7857_v62 = vor.u32 %v6700_v0, %v5693_v18  ;;  %v5549_v48 = vld [vmem:[#allocation9 + $0x48] sm:$0xf]  ;;  %v6664_v57 = vld [vmem:[#allocation9 + $0x54] sm:$0xf0] }
 0x182   :  { %9587 = vst [vmem:[#allocation125_spill] sm:$0xff] %v7821_v22  ;;  %2802 = vmatmul.bf16.vlgmr.msrb.gmra.mxu0 %v7691_v50  ;;  %2815 = vmatmul.bf16.vlgmr.msrb.gmra.mxu1 %v7694_v12  ;;  %v7867_v53 = vor.u32 %v6664_v57, %v5549_v48  ;;  %v5533_v18 = vld [vmem:[#allocation9 + $0x28] sm:$0xf]  ;;  %v6660_v0 = vld [vmem:[#allocation9 + $0x34] sm:$0xf0] }
 0x183   :  { %2846 = vmatpush.bf16.msra.mxu0 %v7801_v5  ;;  %2859 = vmatpush.bf16.msra.mxu1 %v7803_v9  ;;  %9588 = vst [vmem:[#allocation126_spill] sm:$0xff] %v7823_v56  ;;  %v5517_v48 = vld [vmem:[#allocation9 + $0x8] sm:$0xf]  ;;  %v7879_v57 = vor.u32 %v6660_v0, %v5533_v18  ;;  %v6752_v9 = vld [vmem:[#allocation9 + $0x314] sm:$0xf0] }
 0x184   :  { %2872 = vmatpush.bf16.msra.mxu2 %v7805_v52  ;;  %2885 = vmatpush.bf16.msra.mxu3 %v7807_v4  ;;  %9589 = vst [vmem:[#allocation127_spill] sm:$0xff] %v7831_v15  ;;  %v5837_v4 = vld [vmem:[#allocation9 + $0x288] sm:$0xf]  ;;  %v6812_v18 = vld [vmem:[#allocation9 + $0x4f4] sm:$0xf0] }
 0x185   :  { %2828 = vmatmul.bf16.vlgmr.msrb.gmra.mxu2 %v7747_v23  ;;  %2841 = vmatmul.bf16.vlgmr.msrb.gmra.mxu3 %v7749_v26  ;;  %9590 = vst [vmem:[#allocation128_spill] sm:$0xff] %v7833_v46  ;;  %v5965_v52 = vld [vmem:[#allocation9 + $0x388] sm:$0xf]  ;;  %v6840_v51 = vld [vmem:[#allocation9 + $0x5d4] sm:$0xf0] }
 0x186   :  { %9591 = vst [vmem:[#allocation129_spill] sm:$0xff] %v7837_v37  ;;  %v6269_v0 = vld [vmem:[#allocation9 + $0x5e8] sm:$0xf]  ;;  %v6678_v8 = vld [vmem:[#allocation9 + $0xcc] sm:$0xf] }
 0x187   :  { %2847 = vmatpush.bf16.msra.mxu0 %v7815_v41  ;;  %2860 = vmatpush.bf16.msra.mxu1 %v7817_v30  ;;  %9592 = vst [vmem:[#allocation130_spill] sm:$0xff] %v7839_v11  ;;  %v6736_v41 = vld [vmem:[#allocation9 + $0x294] sm:$0xf0] }
 0x188   :  { %2873 = vmatpush.bf16.msra.mxu2 %v7821_v22  ;;  %2886 = vmatpush.bf16.msra.mxu3 %v7823_v56  ;;  %v6768_v30 = vld [vmem:[#allocation9 + $0x394] sm:$0xf0]  ;;  %9593 = vst [vmem:[#allocation131_spill] sm:$0xff] %v7843_v47  ;;  %v7849_v39 = vor.u32 %v6736_v41, %v5837_v4  ;;  %v5821_v56 = vld [vmem:[#allocation9 + $0x268] sm:$0xf] }
 0x189   :  { %9594 = vst [vmem:[#allocation132_spill] sm:$0xff] %v7845_v61  ;;  %v7851_v28 = vor.u32 %v6768_v30, %v5965_v52  ;;  %v5949_v22 = vld [vmem:[#allocation9 + $0x368] sm:$0xf]  ;;  %v6696_v30 = vld [vmem:[#allocation9 + $0x154] sm:$0xf0] }
 0x18a   :  { %9595 = vst [vmem:[#allocation133_spill] sm:$0xff] %v7849_v39  ;;  %v5677_v41 = vld [vmem:[#allocation9 + $0x148] sm:$0xf] }
 0x18b   :  { %2848 = vmatpush.bf16.msra.mxu0 %v7831_v15  ;;  %2861 = vmatpush.bf16.msra.mxu1 %v7833_v46  ;;  %9596 = vst [vmem:[#allocation134_spill] sm:$0xff] %v7851_v28  ;;  %v6732_v15 = vld [vmem:[#allocation9 + $0x274] sm:$0xf0]  ;;  %v7869_v40 = vor.u32 %v6696_v30, %v5677_v41 }
 0x18c   :  { %2874 = vmatpush.bf16.msra.mxu2 %v7837_v37  ;;  %2887 = vmatpush.bf16.msra.mxu3 %v7839_v11  ;;  %v6764_v46 = vld [vmem:[#allocation9 + $0x374] sm:$0xf0]  ;;  %9597 = vst [vmem:[#allocation135_spill] sm:$0xff] %v7855_v3  ;;  %v7861_v52 = vor.u32 %v6732_v15, %v5821_v56  ;;  %v5805_v11 = vld [vmem:[#allocation9 + $0x248] sm:$0xf] }
 0x18d   :  { %9598 = vst [vmem:[#allocation136_spill] sm:$0xff] %v7857_v62  ;;  %v7863_v4 = vor.u32 %v6764_v46, %v5949_v22  ;;  %v5933_v37 = vld [vmem:[#allocation9 + $0x348] sm:$0xf]  ;;  %v6692_v46 = vld [vmem:[#allocation9 + $0x134] sm:$0xf0] }
 0x18e   :  { %9599 = vst [vmem:[#allocation137_spill] sm:$0xff] %v7861_v52  ;;  %v5661_v15 = vld [vmem:[#allocation9 + $0x128] sm:$0xf]  ;;  %v6656_v30 = vld [vmem:[#allocation9 + $0x14] sm:$0xf0] }
 0x18f   :  { %2849 = vmatpush.bf16.msra.mxu0 %v7843_v47  ;;  %2862 = vmatpush.bf16.msra.mxu1 %v7845_v61  ;;  %9600 = vst [vmem:[#allocation138_spill] sm:$0xff] %v7863_v4  ;;  %v6728_v47 = vld [vmem:[#allocation9 + $0x254] sm:$0xf0]  ;;  %v7881_v41 = vor.u32 %v6692_v46, %v5661_v15  ;;  %v6682_v46 = vld [vmem:[#allocation9 + $0xec] sm:$0xf] }
 0x190   :  { %2875 = vmatpush.bf16.msra.mxu2 %v7849_v39  ;;  %2888 = vmatpush.bf16.msra.mxu3 %v7851_v28  ;;  %v6760_v61 = vld [vmem:[#allocation9 + $0x354] sm:$0xf0]  ;;  %9601 = vst [vmem:[#allocation139_spill] sm:$0xff] %v7867_v53  ;;  %v7873_v22 = vor.u32 %v6728_v47, %v5805_v11  ;;  %v5789_v28 = vld [vmem:[#allocation9 + $0x228] sm:$0xf] }
 0x191   :  { %9602 = vst [vmem:[#allocation140_spill] sm:$0xff] %v7869_v40  ;;  %v7875_v56 = vor.u32 %v6760_v61, %v5933_v37  ;;  %v5917_v39 = vld [vmem:[#allocation9 + $0x328] sm:$0xf]  ;;  %v6688_v47 = vld [vmem:[#allocation9 + $0x114] sm:$0xf0] }
 0x192   :  { %9603 = vst [vmem:[#allocation141_spill] sm:$0xff] %v7873_v22  ;;  %v5645_v11 = vld [vmem:[#allocation9 + $0x108] sm:$0xf]  ;;  %v6844_v15 = vld [vmem:[#allocation9 + $0x5f4] sm:$0xf0] }
 0x193   :  { %2850 = vmatpush.bf16.msra.mxu0 %v7855_v3  ;;  %2863 = vmatpush.bf16.msra.mxu1 %v7857_v62  ;;  %9604 = vst [vmem:[#allocation142_spill] sm:$0xff] %v7875_v56  ;;  %v6724_v3 = vld [vmem:[#allocation9 + $0x234] sm:$0xf0] }
 0x194   :  { %2876 = vmatpush.bf16.msra.mxu2 %v7861_v52  ;;  %2889 = vmatpush.bf16.msra.mxu3 %v7863_v4  ;;  %v6756_v62 = vld [vmem:[#allocation9 + $0x334] sm:$0xf0]  ;;  %9605 = vst [vmem:[#allocation143_spill] sm:$0xff] %v7879_v57  ;;  %v7885_v37 = vor.u32 %v6724_v3, %v5789_v28  ;;  %v5773_v4 = vld [vmem:[#allocation9 + $0x208] sm:$0xf] }
 0x195   :  { %9606 = vst [vmem:[#allocation144_spill] sm:$0xff] %v7881_v41  ;;  %v7887_v61 = vor.u32 %v6756_v62, %v5917_v39  ;;  %v6720_v52 = vld [vmem:[#allocation9 + $0x214] sm:$0xf0]  ;;  %v5631_v28 = vld [vmem:[#allocation9 + $0xf8] sm:$0xf0] }
 0x196   :  { %9607 = vst [vmem:[#allocation145_spill] sm:$0xff] %v7885_v37  ;;  %v6714_v39 = vld [vmem:[#allocation9 + $0x1ec] sm:$0xf]  ;;  %v5759_v3 = vld [vmem:[#allocation9 + $0x1f8] sm:$0xf0]  ;;  %v7897_v62 = vor.u32 %v6720_v52, %v5773_v4 }
 0x197   :  { %2851 = vmatpush.bf16.msra.mxu0 %v7867_v53  ;;  %2864 = vmatpush.bf16.msra.mxu1 %v7869_v40  ;;  %9608 = vst [vmem:[#allocation146_spill] sm:$0xff] %v7887_v61  ;;  %v5901_v53 = vld [vmem:[#allocation9 + $0x308] sm:$0xf]  ;;  %v5615_v52 = vld [vmem:[#allocation9 + $0xd8] sm:$0xf0] }
 0x198   :  { %2877 = vmatpush.bf16.msra.mxu2 %v7873_v22  ;;  %2890 = vmatpush.bf16.msra.mxu3 %v7875_v56  ;;  %v6141_v40 = vld [vmem:[#allocation9 + $0x4e8] sm:$0xf]  ;;  %v7891_v22 = vor.u32 %v6656_v30, %v5517_v48  ;;  %v7893_v56 = vor.u32 %v6688_v47, %v5645_v11  ;;  %9611 = vst [vmem:[#allocation149_spill] sm:$0xff] %v7897_v62  ;;  %v6808_v48 = vld [vmem:[#allocation9 + $0x4d4] sm:$0xf0] }
 0x199   :  { %v7899_v5 = vor.u32 %v6752_v9, %v5901_v53  ;;  %v7901_v32 = vor.u32 %v6812_v18, %v6141_v40  ;;  %v7905_v30 = vor.u32 %v6682_v46, %v5631_v28  ;;  %v7907_v11 = vor.u32 %v6714_v39, %v5759_v3  ;;  %v6253_v47 = vld [vmem:[#allocation9 + $0x5c8] sm:$0xf]  ;;  %v6710_v9 = vld [vmem:[#allocation9 + $0x1cc] sm:$0xf]  ;;  %v5743_v4 = vld [vmem:[#allocation9 + $0x1d8] sm:$0xf0] }
 0x19a   :  { %9609 = vst [vmem:[#allocation147_spill] sm:$0xff] %v7891_v22  ;;  %v7917_v40 = vor.u32 %v6840_v51, %v6253_v47  ;;  %v6109_v18 = vld [vmem:[#allocation9 + $0x4a8] sm:$0xf]  ;;  %v7923_v46 = vor.u32 %v6710_v9, %v5743_v4  ;;  %v6836_v39 = vld [vmem:[#allocation9 + $0x5b4] sm:$0xf0] }
 0x19b   :  { %2852 = vmatpush.bf16.msra.mxu0 %v7879_v57  ;;  %2865 = vmatpush.bf16.msra.mxu1 %v7881_v41  ;;  %9610 = vst [vmem:[#allocation148_spill] sm:$0xff] %v7893_v56  ;;  %v7903_v57 = vor.u32 %v6844_v15, %v6269_v0  ;;  %v6125_v41 = vld [vmem:[#allocation9 + $0x4c8] sm:$0xf]  ;;  %v6804_v0 = vld [vmem:[#allocation9 + $0x4b4] sm:$0xf0]  ;;  %v7921_v15 = vor.u32 %v6678_v8, %v5615_v52 }
 0x19c   :  { %2878 = vmatpush.bf16.msra.mxu2 %v7885_v37  ;;  %2891 = vmatpush.bf16.msra.mxu3 %v7887_v61  ;;  %9612 = vst [vmem:[#allocation150_spill] sm:$0xff] %v7899_v5  ;;  %v7915_v53 = vor.u32 %v6808_v48, %v6125_v41  ;;  %v6237_v28 = vld [vmem:[#allocation9 + $0x5a8] sm:$0xf]  ;;  %v6674_v3 = vld [vmem:[#allocation9 + $0xac] sm:$0xf]  ;;  %v7931_v8 = vor.u32 %v6804_v0, %v6109_v18 }
 0x19d   :  { %9613 = vst [vmem:[#allocation151_spill] sm:$0xff] %v7901_v32  ;;  %v5599_v41 = vld [vmem:[#allocation9 + $0xb8] sm:$0xf0]  ;;  %v6706_v51 = vld [vmem:[#allocation9 + $0x1ac] sm:$0xf]  ;;  %v7933_v47 = vor.u32 %v6836_v39, %v6237_v28 }
 0x19e   :  { %9614 = vst [vmem:[#allocation152_spill] sm:$0xff] %v7903_v57  ;;  %v5727_v48 = vld [vmem:[#allocation9 + $0x1b8] sm:$0xf0]  ;;  %v6093_v52 = vld [vmem:[#allocation9 + $0x488] sm:$0xf]  ;;  %v7937_v4 = vor.u32 %v6674_v3, %v5599_v41 }
 0x19f   :  { %9615 = vst [vmem:[#allocation153_spill] sm:$0xff] %v7905_v30  ;;  %2853 = vmatpush.bf16.msra.mxu0 %v7891_v22  ;;  %2866 = vmatpush.bf16.msra.mxu1 %v7893_v56  ;;  %v6800_v9 = vld [vmem:[#allocation9 + $0x494] sm:$0xf0]  ;;  %v6077_v28 = vld [vmem:[#allocation9 + $0x468] sm:$0xf] }
 0x1a0   :  { %9616 = vst [vmem:[#allocation154_spill] sm:$0xff] %v7907_v11  ;;  %2879 = vmatpush.bf16.msra.mxu2 %v7897_v62  ;;  %2892 = vmatpush.bf16.msra.mxu3 %v7899_v5  ;;  %v6702_v5 = vld [vmem:[#allocation9 + $0x18c] sm:$0xf]  ;;  %v7943_v18 = vor.u32 %v6800_v9, %v6093_v52  ;;  %v6796_v39 = vld [vmem:[#allocation9 + $0x474] sm:$0xf0] }
 0x1a1   :  { %9617 = vst [vmem:[#allocation155_spill] sm:$0xff] %v7915_v53  ;;  %v6061_v52 = vld [vmem:[#allocation9 + $0x448] sm:$0xf]  ;;  %v6792_v9 = vld [vmem:[#allocation9 + $0x454] sm:$0xf0] }
 0x1a2   :  { %9618 = vst [vmem:[#allocation156_spill] sm:$0xff] %v7917_v40  ;;  %2854 = vmatmul.bf16.vlgmr.msra.gmra.mxu0 %v7687_v60  ;;  %2867 = vmatmul.bf16.vlgmr.msra.gmra.mxu1 %v7689_v55  ;;  %v5647_v62 = vld [vmem:[#allocation9 + $0x118] sm:$0xf0]  ;;  %v6806_v37 = vld [vmem:[#allocation9 + $0x4cc] sm:$0xf] }
 0x1a3   :  { %2898 = vmatpush.bf16.msrb.mxu0 %v7901_v32  ;;  %2911 = vmatpush.bf16.msrb.mxu1 %v7903_v57  ;;  %9619 = vst [vmem:[#allocation157_spill] sm:$0xff] %v7921_v15  ;;  %v6832_v57 = vld [vmem:[#allocation9 + $0x594] sm:$0xf0]  ;;  %v6670_v32 = vld [vmem:[#allocation9 + $0x8c] sm:$0xf] }
 0x1a4   :  { %2924 = vmatpush.bf16.msrb.mxu2 %v7905_v30  ;;  %2937 = vmatpush.bf16.msrb.mxu3 %v7907_v11  ;;  %9620 = vst [vmem:[#allocation158_spill] sm:$0xff] %v7923_v46  ;;  %v7939_v11 = vor.u32 %v6706_v51, %v5727_v48  ;;  %v6221_v30 = vld [vmem:[#allocation9 + $0x588] sm:$0xf]  ;;  %v6828_v48 = vld [vmem:[#allocation9 + $0x574] sm:$0xf0] }
 0x1a5   :  { %2880 = vmatmul.bf16.vlgmr.msra.gmra.mxu2 %v7691_v50  ;;  %2893 = vmatmul.bf16.vlgmr.msra.gmra.mxu3 %v7694_v12  ;;  %9621 = vst [vmem:[#allocation159_spill] sm:$0xff] %v7931_v8  ;;  %v7945_v0 = vor.u32 %v6832_v57, %v6221_v30  ;;  %v6205_v51 = vld [vmem:[#allocation9 + $0x568] sm:$0xf]  ;;  %v7955_v57 = vor.u32 %v6796_v39, %v6077_v28  ;;  %v5999_v61 = vld [vmem:[#allocation9 + $0x3d8] sm:$0xf0] }
 0x1a6   :  { %9622 = vst [vmem:[#allocation160_spill] sm:$0xff] %v7933_v47  ;;  %v7957_v30 = vor.u32 %v6828_v48, %v6205_v51  ;;  %v7967_v28 = vor.u32 %v6792_v9, %v6061_v52  ;;  %v6045_v51 = vld [vmem:[#allocation9 + $0x428] sm:$0xf]  ;;  %v6788_v48 = vld [vmem:[#allocation9 + $0x434] sm:$0xf0] }
 0x1a7   :  { %2899 = vmatpush.bf16.msrb.mxu0 %v7915_v53  ;;  %2912 = vmatpush.bf16.msrb.mxu1 %v7917_v40  ;;  %9623 = vst [vmem:[#allocation161_spill] sm:$0xff] %v7937_v4  ;;  %v5583_v53 = vld [vmem:[#allocation9 + $0x98] sm:$0xf0]  ;;  %v6029_v52 = vld [vmem:[#allocation9 + $0x408] sm:$0xf]  ;;  %v7979_v9 = vor.u32 %v6788_v48, %v6045_v51 }
 0x1a8   :  { %2925 = vmatpush.bf16.msrb.mxu2 %v7921_v15  ;;  %2938 = vmatpush.bf16.msrb.mxu3 %v7923_v46  ;;  %9624 = vst [vmem:[#allocation162_spill] sm:$0xff] %v7939_v11  ;;  %v5711_v40 = vld [vmem:[#allocation9 + $0x198] sm:$0xf0]  ;;  %v7949_v3 = vor.u32 %v6670_v32, %v5583_v53  ;;  %v6666_v46 = vld [vmem:[#allocation9 + $0x6c] sm:$0xf] }
 0x1a9   :  { %9625 = vst [vmem:[#allocation163_spill] sm:$0xff] %v7943_v18  ;;  %v7951_v41 = vor.u32 %v6702_v5, %v5711_v40  ;;  %v6698_v15 = vld [vmem:[#allocation9 + $0x16c] sm:$0xf]  ;;  %v6189_v53 = vld [vmem:[#allocation9 + $0x548] sm:$0xf] }
 0x1aa   :  { %9626 = vst [vmem:[#allocation164_spill] sm:$0xff] %v7945_v0  ;;  %v6824_v40 = vld [vmem:[#allocation9 + $0x554] sm:$0xf0]  ;;  %v5887_v51 = vld [vmem:[#allocation9 + $0x2f8] sm:$0xf0] }
 0x1ab   :  { %2900 = vmatpush.bf16.msrb.mxu0 %v7931_v8  ;;  %2913 = vmatpush.bf16.msrb.mxu1 %v7933_v47  ;;  %9627 = vst [vmem:[#allocation165_spill] sm:$0xff] %v7949_v3  ;;  %v5567_v8 = vld [vmem:[#allocation9 + $0x78] sm:$0xf0]  ;;  %v7969_v39 = vor.u32 %v6824_v40, %v6189_v53  ;;  %v6784_v40 = vld [vmem:[#allocation9 + $0x414] sm:$0xf0] }
 0x1ac   :  { %2926 = vmatpush.bf16.msrb.mxu2 %v7937_v4  ;;  %2939 = vmatpush.bf16.msrb.mxu3 %v7939_v11  ;;  %9628 = vst [vmem:[#allocation166_spill] sm:$0xff] %v7951_v41  ;;  %v5695_v47 = vld [vmem:[#allocation9 + $0x178] sm:$0xf0]  ;;  %v7961_v32 = vor.u32 %v6666_v46, %v5567_v8  ;;  %v6662_v11 = vld [vmem:[#allocation9 + $0x4c] sm:$0xf] }
 0x1ad   :  { %9629 = vst [vmem:[#allocation167_spill] sm:$0xff] %v7955_v57  ;;  %v7963_v5 = vor.u32 %v6698_v15, %v5695_v47  ;;  %v6694_v4 = vld [vmem:[#allocation9 + $0x14c] sm:$0xf]  ;;  %v6173_v8 = vld [vmem:[#allocation9 + $0x528] sm:$0xf] }
 0x1ae   :  { %9630 = vst [vmem:[#allocation168_spill] sm:$0xff] %v7957_v30  ;;  %v6820_v47 = vld [vmem:[#allocation9 + $0x534] sm:$0xf0]  ;;  %v6778_v48 = vld [vmem:[#allocation9 + $0x3ec] sm:$0xf] }
 0x1af   :  { %2901 = vmatpush.bf16.msrb.mxu0 %v7943_v18  ;;  %2914 = vmatpush.bf16.msrb.mxu1 %v7945_v0  ;;  %9631 = vst [vmem:[#allocation169_spill] sm:$0xff] %v7961_v32  ;;  %v5551_v18 = vld [vmem:[#allocation9 + $0x58] sm:$0xf0]  ;;  %v7981_v53 = vor.u32 %v6820_v47, %v6173_v8  ;;  %v6810_v47 = vld [vmem:[#allocation9 + $0x4ec] sm:$0xf] }
 0x1b0   :  { %2927 = vmatpush.bf16.msrb.mxu2 %v7949_v3  ;;  %2940 = vmatpush.bf16.msrb.mxu3 %v7951_v41  ;;  %9632 = vst [vmem:[#allocation170_spill] sm:$0xff] %v7963_v5  ;;  %v5679_v0 = vld [vmem:[#allocation9 + $0x158] sm:$0xf0]  ;;  %v7973_v15 = vor.u32 %v6662_v11, %v5551_v18  ;;  %v6658_v41 = vld [vmem:[#allocation9 + $0x2c] sm:$0xf] }
 0x1b1   :  { %9633 = vst [vmem:[#allocation171_spill] sm:$0xff] %v7967_v28  ;;  %v7975_v46 = vor.u32 %v6694_v4, %v5679_v0  ;;  %v6690_v3 = vld [vmem:[#allocation9 + $0x12c] sm:$0xf]  ;;  %v6157_v11 = vld [vmem:[#allocation9 + $0x508] sm:$0xf] }
 0x1b2   :  { %9634 = vst [vmem:[#allocation172_spill] sm:$0xff] %v7969_v39  ;;  %v6816_v18 = vld [vmem:[#allocation9 + $0x514] sm:$0xf0]  ;;  %v6015_v8 = vld [vmem:[#allocation9 + $0x3f8] sm:$0xf0] }
 0x1b3   :  { %2902 = vmatpush.bf16.msrb.mxu0 %v7955_v57  ;;  %2915 = vmatpush.bf16.msrb.mxu1 %v7957_v30  ;;  %9635 = vst [vmem:[#allocation173_spill] sm:$0xff] %v7973_v15  ;;  %v5535_v57 = vld [vmem:[#allocation9 + $0x38] sm:$0xf0] }
 0x1b4   :  { %2928 = vmatpush.bf16.msrb.mxu2 %v7961_v32  ;;  %2941 = vmatpush.bf16.msrb.mxu3 %v7963_v5  ;;  %9636 = vst [vmem:[#allocation174_spill] sm:$0xff] %v7975_v46  ;;  %v5663_v30 = vld [vmem:[#allocation9 + $0x138] sm:$0xf0]  ;;  %v7985_v4 = vor.u32 %v6658_v41, %v5535_v57  ;;  %v6654_v5 = vld [vmem:[#allocation9 + $0xc] sm:$0xf] }
 0x1b5   :  { %9637 = vst [vmem:[#allocation175_spill] sm:$0xff] %v7979_v9  ;;  %v7987_v0 = vor.u32 %v6690_v3, %v5663_v30  ;;  %v5519_v32 = vld [vmem:[#allocation9 + $0x18] sm:$0xf0]  ;;  %v6842_v3 = vld [vmem:[#allocation9 + $0x5ec] sm:$0xf] }
 0x1b6   :  { %9638 = vst [vmem:[#allocation176_spill] sm:$0xff] %v7981_v53  ;;  %v6143_v41 = vld [vmem:[#allocation9 + $0x4f8] sm:$0xf0]  ;;  %v7997_v30 = vor.u32 %v6654_v5, %v5519_v32 }
 0x1b7   :  { %2903 = vmatpush.bf16.msrb.mxu0 %v7967_v28  ;;  %2916 = vmatpush.bf16.msrb.mxu1 %v7969_v39  ;;  %9639 = vst [vmem:[#allocation177_spill] sm:$0xff] %v7987_v0  ;;  %v6686_v28 = vld [vmem:[#allocation9 + $0x10c] sm:$0xf]  ;;  %v6271_v57 = vld [vmem:[#allocation9 + $0x5f8] sm:$0xf0] }
 0x1b8   :  { %2929 = vmatpush.bf16.msrb.mxu2 %v7973_v15  ;;  %2942 = vmatpush.bf16.msrb.mxu3 %v7975_v46  ;;  %v6746_v39 = vld [vmem:[#allocation9 + $0x2ec] sm:$0xf]  ;;  %v7991_v15 = vor.u32 %v6784_v40, %v6029_v52  ;;  %v7993_v46 = vor.u32 %v6816_v18, %v6157_v11  ;;  %9642 = vst [vmem:[#allocation180_spill] sm:$0xff] %v7997_v30  ;;  %v5871_v52 = vld [vmem:[#allocation9 + $0x2d8] sm:$0xf0] }
 0x1b9   :  { %v7999_v56 = vor.u32 %v6686_v28, %v5647_v62  ;;  %v8001_v22 = vor.u32 %v6746_v39, %v5887_v51  ;;  %v8005_v40 = vor.u32 %v6810_v47, %v6143_v41  ;;  %v8007_v11 = vor.u32 %v6842_v3, %v6271_v57  ;;  %v6774_v18 = vld [vmem:[#allocation9 + $0x3cc] sm:$0xf]  ;;  %v6127_v32 = vld [vmem:[#allocation9 + $0x4d8] sm:$0xf0] }
 0x1ba   :  { %9640 = vst [vmem:[#allocation178_spill] sm:$0xff] %v7991_v15  ;;  %v6838_v62 = vld [vmem:[#allocation9 + $0x5cc] sm:$0xf]  ;;  %v6255_v5 = vld [vmem:[#allocation9 + $0x5d8] sm:$0xf0]  ;;  %v8017_v39 = vor.u32 %v6774_v18, %v5999_v61 }
 0x1bb   :  { %2904 = vmatpush.bf16.msrb.mxu0 %v7979_v9  ;;  %2917 = vmatpush.bf16.msrb.mxu1 %v7981_v53  ;;  %9641 = vst [vmem:[#allocation179_spill] sm:$0xff] %v7993_v46  ;;  %v8003_v9 = vor.u32 %v6778_v48, %v6015_v8  ;;  %v6742_v53 = vld [vmem:[#allocation9 + $0x2cc] sm:$0xf]  ;;  %v5855_v48 = vld [vmem:[#allocation9 + $0x2b8] sm:$0xf0]  ;;  %v8021_v8 = vor.u32 %v6806_v37, %v6127_v32 }
 0x1bc   :  { %2930 = vmatpush.bf16.msrb.mxu2 %v7985_v4  ;;  %2943 = vmatpush.bf16.msrb.mxu3 %v7987_v0  ;;  %9643 = vst [vmem:[#allocation181_spill] sm:$0xff] %v7999_v56  ;;  %v8015_v28 = vor.u32 %v6742_v53, %v5871_v52  ;;  %v6738_v51 = vld [vmem:[#allocation9 + $0x2ac] sm:$0xf]  ;;  %v8023_v47 = vor.u32 %v6838_v62, %v6255_v5  ;;  %v5983_v3 = vld [vmem:[#allocation9 + $0x3b8] sm:$0xf0] }
 0x1bd   :  { %9644 = vst [vmem:[#allocation182_spill] sm:$0xff] %v8001_v22  ;;  %v6770_v41 = vld [vmem:[#allocation9 + $0x3ac] sm:$0xf]  ;;  %v6111_v53 = vld [vmem:[#allocation9 + $0x4b8] sm:$0xf0]  ;;  %v8031_v37 = vor.u32 %v6738_v51, %v5855_v48 }
 0x1be   :  { %9645 = vst [vmem:[#allocation183_spill] sm:$0xff] %v8003_v9  ;;  %v6802_v57 = vld [vmem:[#allocation9 + $0x4ac] sm:$0xf]  ;;  %v6239_v52 = vld [vmem:[#allocation9 + $0x5b8] sm:$0xf0]  ;;  %v8033_v18 = vor.u32 %v6770_v41, %v5983_v3 }
 0x1bf   :  { %9646 = vst [vmem:[#allocation184_spill] sm:$0xff] %v8005_v40  ;;  %2905 = vmatpush.bf16.msrb.mxu0 %v7991_v15  ;;  %2918 = vmatpush.bf16.msrb.mxu1 %v7993_v46  ;;  %v6834_v61 = vld [vmem:[#allocation9 + $0x5ac] sm:$0xf]  ;;  %v5839_v62 = vld [vmem:[#allocation9 + $0x298] sm:$0xf0]  ;;  %v8037_v5 = vor.u32 %v6802_v57, %v6111_v53 }
 0x1c0   :  { %9647 = vst [vmem:[#allocation185_spill] sm:$0xff] %v8007_v11  ;;  %2931 = vmatpush.bf16.msrb.mxu2 %v7997_v30  ;;  %2944 = vmatpush.bf16.msrb.mxu3 %v7999_v56  ;;  %v6734_v32 = vld [vmem:[#allocation9 + $0x28c] sm:$0xf]  ;;  %v5823_v3 = vld [vmem:[#allocation9 + $0x278] sm:$0xf0] }
 0x1c1   :  { %9648 = vst [vmem:[#allocation186_spill] sm:$0xff] %v8015_v28  ;;  %v8043_v51 = vor.u32 %v6734_v32, %v5839_v62  ;;  %v6730_v41 = vld [vmem:[#allocation9 + $0x26c] sm:$0xf] }
 0x1c2   :  { %9649 = vst [vmem:[#allocation187_spill] sm:$0xff] %v8017_v39  ;;  %2906 = vmatmul.bf16.vlgmr.msrb.gmra.mxu0 %v7747_v23  ;;  %2919 = vmatmul.bf16.vlgmr.msrb.gmra.mxu1 %v7749_v26  ;;  %v8055_v32 = vor.u32 %v6730_v41, %v5823_v3 }
 0x1c3   :  { %2950 = vmatpush.bf16.msra.mxu0 %v8001_v22  ;;  %2963 = vmatpush.bf16.msra.mxu1 %v8003_v9  ;;  %9650 = vst [vmem:[#allocation188_spill] sm:$0xff] %v8021_v8  ;;  %v6830_v9 = vld [vmem:[#allocation9 + $0x58c] sm:$0xf] }
 0x1c4   :  { %2976 = vmatpush.bf16.msra.mxu2 %v8005_v40  ;;  %2989 = vmatpush.bf16.msra.mxu3 %v8007_v11  ;;  %9651 = vst [vmem:[#allocation189_spill] sm:$0xff] %v8023_v47  ;;  %v8039_v11 = vor.u32 %v6834_v61, %v6239_v52  ;;  %v6798_v40 = vld [vmem:[#allocation9 + $0x48c] sm:$0xf]  ;;  %v5951_v52 = vld [vmem:[#allocation9 + $0x378] sm:$0xf0] }
 0x1c5   :  { %2932 = vmatmul.bf16.vlgmr.msrb.gmra.mxu2 %v7687_v60  ;;  %2945 = vmatmul.bf16.vlgmr.msrb.gmra.mxu3 %v7689_v55  ;;  %9652 = vst [vmem:[#allocation190_spill] sm:$0xff] %v8031_v37  ;;  %v6766_v60 = vld [vmem:[#allocation9 + $0x38c] sm:$0xf]  ;;  %v5967_v55 = vld [vmem:[#allocation9 + $0x398] sm:$0xf0] }
 0x1c6   :  { %9653 = vst [vmem:[#allocation191_spill] sm:$0xff] %v8033_v18  ;;  %v8045_v48 = vor.u32 %v6766_v60, %v5967_v55  ;;  %v6762_v61 = vld [vmem:[#allocation9 + $0x36c] sm:$0xf]  ;;  %v5807_v55 = vld [vmem:[#allocation9 + $0x258] sm:$0xf0] }
 0x1c7   :  { %2951 = vmatpush.bf16.msra.mxu0 %v8015_v28  ;;  %2964 = vmatpush.bf16.msra.mxu1 %v8017_v39  ;;  %9654 = vst [vmem:[#allocation192_spill] sm:$0xff] %v8037_v5  ;;  %v6095_v28 = vld [vmem:[#allocation9 + $0x498] sm:$0xf0]  ;;  %v8057_v62 = vor.u32 %v6762_v61, %v5951_v52  ;;  %v6726_v60 = vld [vmem:[#allocation9 + $0x24c] sm:$0xf] }
 0x1c8   :  { %2977 = vmatpush.bf16.msra.mxu2 %v8021_v8  ;;  %2990 = vmatpush.bf16.msra.mxu3 %v8023_v47  ;;  %9655 = vst [vmem:[#allocation193_spill] sm:$0xff] %v8039_v11  ;;  %v6223_v39 = vld [vmem:[#allocation9 + $0x598] sm:$0xf0]  ;;  %v8049_v57 = vor.u32 %v6798_v40, %v6095_v28  ;;  %v6794_v47 = vld [vmem:[#allocation9 + $0x46c] sm:$0xf]  ;;  %v8067_v41 = vor.u32 %v6726_v60, %v5807_v55 }
 0x1c9   :  { %9656 = vst [vmem:[#allocation194_spill] sm:$0xff] %v8043_v51  ;;  %v8051_v53 = vor.u32 %v6830_v9, %v6223_v39  ;;  %v6826_v8 = vld [vmem:[#allocation9 + $0x56c] sm:$0xf]  ;;  %v5935_v39 = vld [vmem:[#allocation9 + $0x358] sm:$0xf0] }
 0x1ca   :  { %9657 = vst [vmem:[#allocation195_spill] sm:$0xff] %v8045_v48  ;;  %v6758_v28 = vld [vmem:[#allocation9 + $0x34c] sm:$0xf]  ;;  %v5791_v52 = vld [vmem:[#allocation9 + $0x238] sm:$0xf0] }
 0x1cb   :  { %2952 = vmatpush.bf16.msra.mxu0 %v8031_v37  ;;  %2965 = vmatpush.bf16.msra.mxu1 %v8033_v18  ;;  %9658 = vst [vmem:[#allocation196_spill] sm:$0xff] %v8049_v57  ;;  %v6079_v37 = vld [vmem:[#allocation9 + $0x478] sm:$0xf0]  ;;  %v8069_v3 = vor.u32 %v6758_v28, %v5935_v39  ;;  %v6722_v61 = vld [vmem:[#allocation9 + $0x22c] sm:$0xf] }
 0x1cc   :  { %2978 = vmatpush.bf16.msra.mxu2 %v8037_v5  ;;  %2991 = vmatpush.bf16.msra.mxu3 %v8039_v11  ;;  %9659 = vst [vmem:[#allocation197_spill] sm:$0xff] %v8051_v53  ;;  %v6207_v18 = vld [vmem:[#allocation9 + $0x578] sm:$0xf0]  ;;  %v8061_v9 = vor.u32 %v6794_v47, %v6079_v37  ;;  %v6790_v11 = vld [vmem:[#allocation9 + $0x44c] sm:$0xf]  ;;  %v8079_v60 = vor.u32 %v6722_v61, %v5791_v52 }
 0x1cd   :  { %9660 = vst [vmem:[#allocation198_spill] sm:$0xff] %v8055_v32  ;;  %v8063_v40 = vor.u32 %v6826_v8, %v6207_v18  ;;  %v6822_v5 = vld [vmem:[#allocation9 + $0x54c] sm:$0xf]  ;;  %v5919_v18 = vld [vmem:[#allocation9 + $0x338] sm:$0xf0] }
 0x1ce   :  { %9661 = vst [vmem:[#allocation199_spill] sm:$0xff] %v8057_v62  ;;  %v6754_v37 = vld [vmem:[#allocation9 + $0x32c] sm:$0xf]  ;;  %v5775_v39 = vld [vmem:[#allocation9 + $0x218] sm:$0xf0] }
 0x1cf   :  { %2953 = vmatpush.bf16.msra.mxu0 %v8043_v51  ;;  %2966 = vmatpush.bf16.msra.mxu1 %v8045_v48  ;;  %9662 = vst [vmem:[#allocation200_spill] sm:$0xff] %v8061_v9  ;;  %v6063_v51 = vld [vmem:[#allocation9 + $0x458] sm:$0xf0]  ;;  %v8081_v55 = vor.u32 %v6754_v37, %v5919_v18  ;;  %v6718_v28 = vld [vmem:[#allocation9 + $0x20c] sm:$0xf] }
 0x1d0   :  { %2979 = vmatpush.bf16.msra.mxu2 %v8049_v57  ;;  %2992 = vmatpush.bf16.msra.mxu3 %v8051_v53  ;;  %9663 = vst [vmem:[#allocation201_spill] sm:$0xff] %v8063_v40  ;;  %v6191_v48 = vld [vmem:[#allocation9 + $0x558] sm:$0xf0]  ;;  %v8073_v8 = vor.u32 %v6790_v11, %v6063_v51  ;;  %v6786_v53 = vld [vmem:[#allocation9 + $0x42c] sm:$0xf]  ;;  %v8091_v61 = vor.u32 %v6718_v28, %v5775_v39 }
 0x1d1   :  { %9664 = vst [vmem:[#allocation202_spill] sm:$0xff] %v8067_v41  ;;  %v8075_v47 = vor.u32 %v6822_v5, %v6191_v48  ;;  %v6818_v57 = vld [vmem:[#allocation9 + $0x52c] sm:$0xf]  ;;  %v5903_v48 = vld [vmem:[#allocation9 + $0x318] sm:$0xf0] }
 0x1d2   :  { %9665 = vst [vmem:[#allocation203_spill] sm:$0xff] %v8069_v3  ;;  %v6750_v51 = vld [vmem:[#allocation9 + $0x30c] sm:$0xf] }
 0x1d3   :  { %2954 = vmatpush.bf16.msra.mxu0 %v8055_v32  ;;  %2967 = vmatpush.bf16.msra.mxu1 %v8057_v62  ;;  %9666 = vst [vmem:[#allocation204_spill] sm:$0xff] %v8073_v8  ;;  %v6047_v32 = vld [vmem:[#allocation9 + $0x438] sm:$0xf0]  ;;  %v8093_v52 = vor.u32 %v6750_v51, %v5903_v48  ;;  %v9679_v18 = vld [vmem:[#allocation28_spill] sm:$0xff]  ;;  %v9680_v28 = vld [vmem:[#allocation29_spill] sm:$0xff] }
 0x1d4   :  { %2980 = vmatpush.bf16.msra.mxu2 %v8061_v9  ;;  %2993 = vmatpush.bf16.msra.mxu3 %v8063_v40  ;;  %9667 = vst [vmem:[#allocation205_spill] sm:$0xff] %v8075_v47  ;;  %v6175_v62 = vld [vmem:[#allocation9 + $0x538] sm:$0xf0]  ;;  %v8085_v11 = vor.u32 %v6786_v53, %v6047_v32  ;;  %v6782_v40 = vld [vmem:[#allocation9 + $0x40c] sm:$0xf] }
 0x1d5   :  { %9668 = vst [vmem:[#allocation206_spill] sm:$0xff] %v8079_v60  ;;  %v8087_v5 = vor.u32 %v6818_v57, %v6175_v62  ;;  %v6814_v9 = vld [vmem:[#allocation9 + $0x50c] sm:$0xf]  ;;  %v8101_v32 = vld [vmem:[#allocation11] sm:$0xf]  ;;  %v9681_v51 = vld [vmem:[#allocation30_spill] sm:$0xff] }
 0x1d6   :  { %9669 = vst [vmem:[#allocation207_spill] sm:$0xff] %v8081_v55  ;;  %v9676_v62 = vld [vmem:[#allocation25_spill] sm:$0xff]  ;;  %v8110_v37 = vperm.slane %v8101_v32, 0  ;;  %v9682_v48 = vld [vmem:[#allocation31_spill] sm:$0xff] }
 0x1d7   :  { %2955 = vmatpush.bf16.msra.mxu0 %v8067_v41  ;;  %2968 = vmatpush.bf16.msra.mxu1 %v8069_v3  ;;  %9670 = vst [vmem:[#allocation208_spill] sm:$0xff] %v8085_v11  ;;  %v6031_v41 = vld [vmem:[#allocation9 + $0x418] sm:$0xf0] }
 0x1d8   :  { %2981 = vmatpush.bf16.msra.mxu2 %v8073_v8  ;;  %2994 = vmatpush.bf16.msra.mxu3 %v8075_v47  ;;  %9671 = vst [vmem:[#allocation209_spill] sm:$0xff] %v8087_v5  ;;  %v6159_v3 = vld [vmem:[#allocation9 + $0x518] sm:$0xf0]  ;;  %v8097_v57 = vor.u32 %v6782_v40, %v6031_v41 }
 0x1d9   :  { %9672 = vst [vmem:[#allocation210_spill] sm:$0xff] %v8091_v61  ;;  %v8099_v53 = vor.u32 %v6814_v9, %v6159_v3  ;;  %v9677_v40 = vld [vmem:[#allocation26_spill] sm:$0xff]  ;;  %v9678_v9 = vld [vmem:[#allocation27_spill] sm:$0xff] }
 0x1da   :  { %9673 = vst [vmem:[#allocation211_spill] sm:$0xff] %v8093_v52 }
 0x1db   :  { %2956 = vmatpush.bf16.msra.mxu0 %v8079_v60  ;;  %2969 = vmatpush.bf16.msra.mxu1 %v8081_v55  ;;  %9674 = vst [vmem:[#allocation212_spill] sm:$0xff] %v8097_v57 }
 0x1dc   :  { %2982 = vmatpush.bf16.msra.mxu2 %v8085_v11  ;;  %2995 = vmatpush.bf16.msra.mxu3 %v8087_v5  ;;  %9675 = vst [vmem:[#allocation213_spill] sm:$0xff] %v8099_v53  ;;  %v9687_v5 = vld [vmem:[#allocation36_spill] sm:$0xff] }
 0x1de   :  { %v2699_v41 = vpop.f32.mrf.mxu0  ;;  %v2712_v3 = vpop.f32.mrf.mxu1 }
 0x1df   :  { %2957 = vmatpush.bf16.msra.mxu0 %v8091_v61  ;;  %2970 = vmatpush.bf16.msra.mxu1 %v8093_v52  ;;  %v2700_v39 = vadd.f32 %v2699_v41, %v8110_v37  ;;  %v9688_v41 = vld [vmem:[#allocation37_spill] sm:$0xff] }
 0x1e0   :  { %2983 = vmatpush.bf16.msra.mxu2 %v8097_v57  ;;  %2996 = vmatpush.bf16.msra.mxu3 %v8099_v53  ;;  %v9686_v53 = vld [vmem:[#allocation35_spill] sm:$0xff] }
 0x1e2   :  { %2958 = vmatmul.bf16.vlgmr.msra.gmra.mxu0 %v7691_v50  ;;  %2971 = vmatmul.bf16.vlgmr.msra.gmra.mxu1 %v7694_v12 }
 0x1e3   :  { %3013 = vmatpush.bf16.msrb.mxu0 %v7371_v58  ;;  %3026 = vmatpush.bf16.msrb.mxu1 %v9676_v62  ;;  %v9684_v62 = vld [vmem:[#allocation33_spill] sm:$0xff]  ;;  %v9685_v58 = vld [vmem:[#allocation34_spill] sm:$0xff] }
 0x1e4   :  { %3039 = vmatpush.bf16.msrb.mxu2 %v9677_v40  ;;  %3052 = vmatpush.bf16.msrb.mxu3 %v9678_v9  ;;  %v2713_v9 = vadd.f32 %v2712_v3, %v2700_v39  ;;  %v9683_v40 = vld [vmem:[#allocation32_spill] sm:$0xff]  ;;  %v9690_v3 = vld [vmem:[#allocation39_spill] sm:$0xff] }
 0x1e5   :  { %2984 = vmatmul.bf16.vlgmr.msra.gmra.mxu2 %v7747_v23  ;;  %2997 = vmatmul.bf16.vlgmr.msra.gmra.mxu3 %v7749_v26  ;;  %v2725_v57 = vpop.f32.mrf.mxu2  ;;  %v2738_v52 = vpop.f32.mrf.mxu3 }
 0x1e6   :  { %v2701_v61 = vpop.f32.mrf.mxu0 }
 0x1e7   :  { %3014 = vmatpush.bf16.msrb.mxu0 %v9679_v18  ;;  %3027 = vmatpush.bf16.msrb.mxu1 %v9680_v28  ;;  %v2726_v18 = vadd.f32 %v2725_v57, %v2713_v9  ;;  %v2714_v28 = vpop.f32.mrf.mxu1 }
 0x1e8   :  { %3040 = vmatpush.bf16.msrb.mxu2 %v9681_v51  ;;  %3053 = vmatpush.bf16.msrb.mxu3 %v9682_v48  ;;  %v9689_v51 = vld [vmem:[#allocation38_spill] sm:$0xff] }
 0x1e9   :  { %v2739_v39 = vadd.f32 %v2738_v52, %v2726_v18  ;;  %v9697_v48 = vld [vmem:[#allocation46_spill] sm:$0xff]  ;;  %v9698_v52 = vld [vmem:[#allocation47_spill] sm:$0xff] }
 0x1eb   :  { %3015 = vmatpush.bf16.msrb.mxu0 %v9683_v40  ;;  %3028 = vmatpush.bf16.msrb.mxu1 %v9684_v62  ;;  %v9691_v40 = vld [vmem:[#allocation40_spill] sm:$0xff]  ;;  %v9692_v62 = vld [vmem:[#allocation41_spill] sm:$0xff] }
 0x1ec   :  { %3041 = vmatpush.bf16.msrb.mxu2 %v9685_v58  ;;  %3054 = vmatpush.bf16.msrb.mxu3 %v9686_v53  ;;  %v9693_v58 = vld [vmem:[#allocation42_spill] sm:$0xff]  ;;  %v9694_v53 = vld [vmem:[#allocation43_spill] sm:$0xff] }
 0x1ed   :  { %v2727_v57 = vpop.f32.mrf.mxu2  ;;  %v2740_v61 = vpop.f32.mrf.mxu3 }
 0x1ee   :  { %v2751_v9 = vpop.f32.mrf.mxu0  ;;  %v9702_v57 = vld [vmem:[#allocation50_spill] sm:$0xff]  ;;  %v9703_v61 = vld [vmem:[#allocation51_spill] sm:$0xff] }
 0x1ef   :  { %3016 = vmatpush.bf16.msrb.mxu0 %v9687_v5  ;;  %3029 = vmatpush.bf16.msrb.mxu1 %v9688_v41  ;;  %v2764_v28 = vpop.f32.mrf.mxu1  ;;  %v9695_v5 = vld [vmem:[#allocation44_spill] sm:$0xff]  ;;  %v9696_v41 = vld [vmem:[#allocation45_spill] sm:$0xff] }
 0x1f0   :  { %3042 = vmatpush.bf16.msrb.mxu2 %v9689_v51  ;;  %3055 = vmatpush.bf16.msrb.mxu3 %v9690_v3  ;;  %v2752_v51 = vadd.f32 %v2751_v9, %v2739_v39  ;;  %v9711_v3 = vld [vmem:[#allocation59_spill] sm:$0xff] }
 0x1f2   :  { %v2765_v18 = vadd.f32 %v2764_v28, %v2752_v51  ;;  %v9705_v51 = vld [vmem:[#allocation53_spill] sm:$0xff]  ;;  %v9706_v28 = vld [vmem:[#allocation54_spill] sm:$0xff] }
 0x1f3   :  { %3017 = vmatpush.bf16.msrb.mxu0 %v9691_v40  ;;  %3030 = vmatpush.bf16.msrb.mxu1 %v9692_v62  ;;  %v8140_v62 = vperm.slane %v8101_v32, 1 }
 0x1f4   :  { %3043 = vmatpush.bf16.msrb.mxu2 %v9693_v58  ;;  %3056 = vmatpush.bf16.msrb.mxu3 %v9694_v53  ;;  %v9700_v58 = vld [vmem:[#allocation48_spill] sm:$0xff]  ;;  %v9701_v53 = vld [vmem:[#allocation49_spill] sm:$0xff] }
 0x1f5   :  { %9699 = vst [vmem:[#allocation214_spill] sm:$0xff] %v8140_v62  ;;  %v2790_v40 = vpop.f32.mrf.mxu3 }
 0x1f6   :  { %v2753_v9 = vpop.f32.mrf.mxu0 }
 0x1f7   :  { %3018 = vmatpush.bf16.msrb.mxu0 %v9695_v5  ;;  %3031 = vmatpush.bf16.msrb.mxu1 %v9696_v41  ;;  %v2777_v5 = vpop.f32.mrf.mxu2  ;;  %v9704_v41 = vld [vmem:[#allocation52_spill] sm:$0xff]  ;;  %v9714_v9 = vld [vmem:[#allocation62_spill] sm:$0xff] }
 0x1f8   :  { %3044 = vmatpush.bf16.msrb.mxu2 %v9697_v48  ;;  %3057 = vmatpush.bf16.msrb.mxu3 %v9698_v52  ;;  %v2778_v39 = vadd.f32 %v2777_v5, %v8140_v62  ;;  %v2766_v48 = vpop.f32.mrf.mxu1  ;;  %v9707_v52 = vld [vmem:[#allocation55_spill] sm:$0xff]  ;;  %v9712_v5 = vld [vmem:[#allocation60_spill] sm:$0xff] }
 0x1f9   :  { %v9713_v48 = vld [vmem:[#allocation61_spill] sm:$0xff]  ;;  %v9720_v62 = vld [vmem:[#allocation68_spill] sm:$0xff] }
 0x1fb   :  { %3019 = vmatpush.bf16.msrb.mxu0 %v9700_v58  ;;  %3032 = vmatpush.bf16.msrb.mxu1 %v9701_v53  ;;  %v2791_v58 = vadd.f32 %v2790_v40, %v2778_v39  ;;  %v9708_v53 = vld [vmem:[#allocation56_spill] sm:$0xff] }
 0x1fc   :  { %3045 = vmatpush.bf16.msrb.mxu2 %v9702_v57  ;;  %3058 = vmatpush.bf16.msrb.mxu3 %v9703_v61  ;;  %v9709_v57 = vld [vmem:[#allocation57_spill] sm:$0xff]  ;;  %v9710_v61 = vld [vmem:[#allocation58_spill] sm:$0xff] }
 0x1fd   :  { %v2792_v39 = vpop.f32.mrf.mxu3 }
 0x1fe   :  { %v9722_v39 = vld [vmem:[#allocation70_spill] sm:$0xff] }
 0x1ff   :  { %3020 = vmatpush.bf16.msrb.mxu0 %v9704_v41  ;;  %3033 = vmatpush.bf16.msrb.mxu1 %v9705_v51  ;;  %v2779_v40 = vpop.f32.mrf.mxu2  ;;  %v9718_v51 = vld [vmem:[#allocation66_spill] sm:$0xff]  ;;  %v9719_v41 = vld [vmem:[#allocation67_spill] sm:$0xff] }
 0x200   :  { %3046 = vmatpush.bf16.msrb.mxu2 %v9706_v28  ;;  %3059 = vmatpush.bf16.msrb.mxu3 %v9707_v52  ;;  %v9717_v52 = vld [vmem:[#allocation65_spill] sm:$0xff] }
 0x201   :  { %v9721_v40 = vld [vmem:[#allocation69_spill] sm:$0xff] }
 0x202   :  { %3021 = vmatmul.bf16.vlgmr.msrb.gmra.mxu0 %v7691_v50  ;;  %3034 = vmatmul.bf16.vlgmr.msrb.gmra.mxu1 %v7694_v12 }
 0x203   :  { %3065 = vmatpush.bf16.msra.mxu0 %v9708_v53  ;;  %3078 = vmatpush.bf16.msra.mxu1 %v9709_v57  ;;  %v9715_v57 = vld [vmem:[#allocation63_spill] sm:$0xff]  ;;  %v9716_v53 = vld [vmem:[#allocation64_spill] sm:$0xff] }
 0x204   :  { %3091 = vmatpush.bf16.msra.mxu2 %v9710_v61  ;;  %3104 = vmatpush.bf16.msra.mxu3 %v9711_v3  ;;  %v2803_v61 = vpop.f32.mrf.mxu0  ;;  %v2816_v3 = vpop.f32.mrf.mxu1 }
 0x205   :  { %3047 = vmatmul.bf16.vlgmr.msrb.gmra.mxu2 %v7747_v23  ;;  %3060 = vmatmul.bf16.vlgmr.msrb.gmra.mxu3 %v7749_v26  ;;  %v2804_v28 = vadd.f32 %v2803_v61, %v2791_v58  ;;  %v9725_v58 = vld [vmem:[#allocation73_spill] sm:$0xff]  ;;  %v9726_v61 = vld [vmem:[#allocation74_spill] sm:$0xff] }
 0x207   :  { %3066 = vmatpush.bf16.msra.mxu0 %v9712_v5  ;;  %3079 = vmatpush.bf16.msra.mxu1 %v9713_v48  ;;  %v2817_v5 = vadd.f32 %v2816_v3, %v2804_v28  ;;  %v9727_v3 = vld [vmem:[#allocation75_spill] sm:$0xff] }
 0x208   :  { %3092 = vmatpush.bf16.msra.mxu2 %v9714_v9  ;;  %3105 = vmatpush.bf16.msra.mxu3 %v9715_v57  ;;  %v9723_v9 = vld [vmem:[#allocation71_spill] sm:$0xff]  ;;  %v2829_v57 = vpop.f32.mrf.mxu2  ;;  %v2842_v48 = vpop.f32.mrf.mxu3 }
 0x209   :  { %v2830_v11 = vadd.f32 %v2829_v57, %v2817_v5  ;;  %v9730_v57 = vld [vmem:[#allocation78_spill] sm:$0xff] }
 0x20b   :  { %3067 = vmatpush.bf16.msra.mxu0 %v9716_v53  ;;  %3080 = vmatpush.bf16.msra.mxu1 %v9717_v52  ;;  %v9724_v52 = vld [vmem:[#allocation72_spill] sm:$0xff]  ;;  %v2843_v28 = vadd.f32 %v2842_v48, %v2830_v11  ;;  %v9734_v11 = vld [vmem:[#allocation82_spill] sm:$0xff] }
 0x20c   :  { %3093 = vmatpush.bf16.msra.mxu2 %v9718_v51  ;;  %3106 = vmatpush.bf16.msra.mxu3 %v9719_v41  ;;  %v2805_v53 = vpop.f32.mrf.mxu0  ;;  %v2818_v55 = vpop.f32.mrf.mxu1  ;;  %v9728_v41 = vld [vmem:[#allocation76_spill] sm:$0xff]  ;;  %v3010_v48 = vld [vmem:[#allocation2 + $0xe] sm:$0x3] }
 0x20d   :  { %v9731_v55 = vld [vmem:[#allocation79_spill] sm:$0xff] }
 0x20f   :  { %3068 = vmatpush.bf16.msra.mxu0 %v9720_v62  ;;  %3081 = vmatpush.bf16.msra.mxu1 %v9721_v40  ;;  %v3002_v62 = vmax.f32 %v2765_v18, 0.0  ;;  %v3003_v40 = vmax.f32 %v2843_v28, 0.0  ;;  %v3009_v18 = vld [vmem:[#allocation2 + $0xc] sm:$0x3]  ;;  %v9735_v28 = vld [vmem:[#allocation83_spill] sm:$0xff] }
 0x210   :  { %3094 = vmatpush.bf16.msra.mxu2 %v9722_v39  ;;  %3107 = vmatpush.bf16.msra.mxu3 %v9723_v9  ;;  %v9729_v39 = vld [vmem:[#allocation77_spill] sm:$0xff]  ;;  %v2831_v53 = vpop.f32.mrf.mxu2  ;;  %v2844_v5 = vpop.f32.mrf.mxu3 }
 0x211   :  { %v8177_v9 = vmax.f32 %v3002_v62, %v3003_v40  ;;  %v9736_v62 = vld [vmem:[#allocation84_spill] sm:$0xff]  ;;  %v9737_v40 = vld [vmem:[#allocation85_spill] sm:$0xff]  ;;  %v8189_v53 = vpack.c.bf16 %v3009_v18, %v3009_v18  ;;  %v8191_v5 = vpack.c.bf16 %v3010_v48, %v3010_v48  ;;  %v8204_v18 = vperm.slane %v8101_v32, 2 }
 0x213   :  { %3069 = vmatpush.bf16.msra.mxu0 %v9724_v52  ;;  %3082 = vmatpush.bf16.msra.mxu1 %v9725_v58  ;;  %v9732_v58 = vld [vmem:[#allocation80_spill] sm:$0xff] }
 0x214   :  { %3095 = vmatpush.bf16.msra.mxu2 %v9726_v61  ;;  %3108 = vmatpush.bf16.msra.mxu3 %v9727_v3  ;;  %v9733_v61 = vld [vmem:[#allocation81_spill] sm:$0xff] }
 0x217   :  { %3070 = vmatpush.bf16.msra.mxu0 %v9728_v41  ;;  %3083 = vmatpush.bf16.msra.mxu1 %v9729_v39 }
 0x218   :  { %3096 = vmatpush.bf16.msra.mxu2 %v9730_v57  ;;  %3109 = vmatpush.bf16.msra.mxu3 %v9731_v55  ;;  %v9738_v57 = vld [vmem:[#allocation86_spill] sm:$0xff] }
 0x21b   :  { %3071 = vmatpush.bf16.msra.mxu0 %v9732_v58  ;;  %3084 = vmatpush.bf16.msra.mxu1 %v9733_v61 }
 0x21c   :  { %3097 = vmatpush.bf16.msra.mxu2 %v7595_v33  ;;  %3110 = vmatpush.bf16.msra.mxu3 %v9734_v11 }
 0x21f   :  { %3072 = vmatpush.bf16.msra.mxu0 %v9735_v28  ;;  %3085 = vmatpush.bf16.msra.mxu1 %v9736_v62  ;;  %v2855_v48 = vpop.f32.mrf.mxu0 }
 0x220   :  { %3098 = vmatpush.bf16.msra.mxu2 %v9737_v40  ;;  %3111 = vmatpush.bf16.msra.mxu3 %v9738_v57 }
 0x222   :  { %3073 = vmatmul.bf16.vlgmr.msra.gmra.mxu0 %v8189_v53  ;;  %3086 = vmatmul.bf16.vlgmr.msra.gmra.mxu1 %v8191_v5 }
 0x223   :  { %3117 = vmatpush.bf16.msrb.mxu0 %v7683_v14  ;;  %3130 = vmatpush.bf16.msrb.mxu1 %v7685_v49 }
 0x224   :  { %3143 = vmatpush.bf16.msrb.mxu2 %v7696_v1  ;;  %3156 = vmatpush.bf16.msrb.mxu3 %v7698_v16  ;;  %v2868_v16 = vpop.f32.mrf.mxu1  ;;  %v2856_v1 = vadd.f32 %v2855_v48, %v8204_v18  ;;  %v9744_v48 = vld [vmem:[#allocation121_spill] sm:$0xff] }
 0x225   :  { %3099 = vmatmul.bf16.vlgmr.msra.gmra.mxu2 %v7691_v50  ;;  %3112 = vmatmul.bf16.vlgmr.msra.gmra.mxu3 %v7694_v12 }
 0x227   :  { %3118 = vmatpush.bf16.msrb.mxu0 %v7706_v31  ;;  %3131 = vmatpush.bf16.msrb.mxu1 %v7710_v7  ;;  %v2869_v7 = vadd.f32 %v2868_v16, %v2856_v1  ;;  %v2857_v31 = vpop.f32.mrf.mxu0 }
 0x228   :  { %3144 = vmatpush.bf16.msrb.mxu2 %v7715_v27  ;;  %3157 = vmatpush.bf16.msrb.mxu3 %v7717_v17  ;;  %v2881_v17 = vpop.f32.mrf.mxu2  ;;  %v2894_v27 = vpop.f32.mrf.mxu3 }
 0x22b   :  { %3119 = vmatpush.bf16.msrb.mxu0 %v7723_v44  ;;  %3132 = vmatpush.bf16.msrb.mxu1 %v7725_v36  ;;  %v2882_v44 = vadd.f32 %v2881_v17, %v2869_v7  ;;  %v9739_v7 = vld [vmem:[#allocation116_spill] sm:$0xff]  ;;  %v9741_v17 = vld [vmem:[#allocation118_spill] sm:$0xff] }
 0x22c   :  { %3145 = vmatpush.bf16.msrb.mxu2 %v7729_v29  ;;  %3158 = vmatpush.bf16.msrb.mxu3 %v7731_v42  ;;  %v2870_v36 = vpop.f32.mrf.mxu1 }
 0x22d   :  { %v2895_v1 = vadd.f32 %v2894_v27, %v2882_v44  ;;  %v9740_v27 = vld [vmem:[#allocation117_spill] sm:$0xff]  ;;  %v9742_v44 = vld [vmem:[#allocation119_spill] sm:$0xff]  ;;  %v9743_v36 = vld [vmem:[#allocation120_spill] sm:$0xff] }
 0x22f   :  { %3120 = vmatpush.bf16.msrb.mxu0 %v7735_v34  ;;  %3133 = vmatpush.bf16.msrb.mxu1 %v7737_v59 }
 0x230   :  { %3146 = vmatpush.bf16.msrb.mxu2 %v7741_v35  ;;  %3159 = vmatpush.bf16.msrb.mxu3 %v7743_v25  ;;  %v2883_v16 = vpop.f32.mrf.mxu2  ;;  %v2896_v31 = vpop.f32.mrf.mxu3 }
 0x231   :  { %v9745_v16 = vld [vmem:[#allocation122_spill] sm:$0xff]  ;;  %v9746_v31 = vld [vmem:[#allocation123_spill] sm:$0xff] }
 0x233   :  { %3121 = vmatpush.bf16.msrb.mxu0 %v7745_v63  ;;  %3134 = vmatpush.bf16.msrb.mxu1 %v7753_v21 }
 0x234   :  { %3147 = vmatpush.bf16.msrb.mxu2 %v7757_v43  ;;  %3160 = vmatpush.bf16.msrb.mxu3 %v7759_v38 }
 0x237   :  { %3122 = vmatpush.bf16.msrb.mxu0 %v7767_v19  ;;  %3135 = vmatpush.bf16.msrb.mxu1 %v7769_v13 }
 0x238   :  { %3148 = vmatpush.bf16.msrb.mxu2 %v7773_v45  ;;  %3161 = vmatpush.bf16.msrb.mxu3 %v7775_v54  ;;  %v9766_v54 = vld [vmem:[#allocation142_spill] sm:$0xff] }
 0x23b   :  { %3123 = vmatpush.bf16.msrb.mxu0 %v7779_v20  ;;  %3136 = vmatpush.bf16.msrb.mxu1 %v7781_v10  ;;  %v9758_v20 = vld [vmem:[#allocation134_spill] sm:$0xff] }
 0x23c   :  { %3149 = vmatpush.bf16.msrb.mxu2 %v7785_v2  ;;  %3162 = vmatpush.bf16.msrb.mxu3 %v7787_v24  ;;  %v9752_v24 = vld [vmem:[#allocation129_spill] sm:$0xff]  ;;  %v9753_v2 = vld [vmem:[#allocation130_spill] sm:$0xff] }
 0x23f   :  { %3124 = vmatpush.bf16.msrb.mxu0 %v7791_v6  ;;  %3137 = vmatpush.bf16.msrb.mxu1 %v9739_v7  ;;  %v9750_v7 = vld [vmem:[#allocation127_spill] sm:$0xff] }
 0x240   :  { %3150 = vmatpush.bf16.msrb.mxu2 %v9740_v27  ;;  %3163 = vmatpush.bf16.msrb.mxu3 %v9741_v17  ;;  %v9747_v27 = vld [vmem:[#allocation124_spill] sm:$0xff]  ;;  %v9748_v17 = vld [vmem:[#allocation125_spill] sm:$0xff] }
 0x242   :  { %3125 = vmatmul.bf16.vlgmr.msrb.gmra.mxu0 %v7747_v23  ;;  %3138 = vmatmul.bf16.vlgmr.msrb.gmra.mxu1 %v7749_v26 }
 0x243   :  { %3169 = vmatpush.bf16.msra.mxu0 %v9742_v44  ;;  %3182 = vmatpush.bf16.msra.mxu1 %v9743_v36  ;;  %v9749_v44 = vld [vmem:[#allocation126_spill] sm:$0xff]  ;;  %v2907_v36 = vpop.f32.mrf.mxu0 }
 0x244   :  { %3195 = vmatpush.bf16.msra.mxu2 %v9744_v48  ;;  %3208 = vmatpush.bf16.msra.mxu3 %v9745_v16  ;;  %v2920_v48 = vpop.f32.mrf.mxu1  ;;  %v9751_v16 = vld [vmem:[#allocation128_spill] sm:$0xff]  ;;  %v2908_v6 = vadd.f32 %v2907_v36, %v2895_v1 }
 0x245   :  { %3151 = vmatmul.bf16.vlgmr.msrb.gmra.mxu2 %v8189_v53  ;;  %3164 = vmatmul.bf16.vlgmr.msrb.gmra.mxu3 %v8191_v5 }
 0x246   :  { %v8249_v10 = vadd.f32 %v2920_v48, %v2908_v6  ;;  %v9760_v6 = vld [vmem:[#allocation136_spill] sm:$0xff]  ;;  %v9762_v48 = vld [vmem:[#allocation138_spill] sm:$0xff] }
 0x247   :  { %3170 = vmatpush.bf16.msra.mxu0 %v9746_v31  ;;  %3183 = vmatpush.bf16.msra.mxu1 %v9747_v27  ;;  %v8252_v31 = vperm.slane %v8101_v32, 3  ;;  %v9755_v27 = vld [vmem:[#allocation131_spill] sm:$0xff]  ;;  %v9761_v32 = vld [vmem:[#allocation137_spill] sm:$0xff] }
 0x248   :  { %3196 = vmatpush.bf16.msra.mxu2 %v9748_v17  ;;  %3209 = vmatpush.bf16.msra.mxu3 %v9749_v44  ;;  %v9756_v17 = vld [vmem:[#allocation132_spill] sm:$0xff]  ;;  %v9757_v44 = vld [vmem:[#allocation133_spill] sm:$0xff] }
 0x249   :  { %9754 = vst [vmem:[#allocation66_spill] sm:$0xff] %v8252_v31 }
 0x24b   :  { %3171 = vmatpush.bf16.msra.mxu0 %v9750_v7  ;;  %3184 = vmatpush.bf16.msra.mxu1 %v9751_v16  ;;  %v2933_v7 = vpop.f32.mrf.mxu2  ;;  %v2946_v16 = vpop.f32.mrf.mxu3 }
 0x24c   :  { %3197 = vmatpush.bf16.msra.mxu2 %v9752_v24  ;;  %3210 = vmatpush.bf16.msra.mxu3 %v9753_v2  ;;  %v2934_v1 = vadd.f32 %v2933_v7, %v8252_v31  ;;  %v2909_v36 = vpop.f32.mrf.mxu0  ;;  %v2922_v24 = vpop.f32.mrf.mxu1  ;;  %v9759_v2 = vld [vmem:[#allocation135_spill] sm:$0xff] }
 0x24d   :  { %v9767_v24 = vld [vmem:[#allocation143_spill] sm:$0xff] }
 0x24f   :  { %3172 = vmatpush.bf16.msra.mxu0 %v9755_v27  ;;  %3185 = vmatpush.bf16.msra.mxu1 %v9756_v17  ;;  %v2947_v27 = vadd.f32 %v2946_v16, %v2934_v1  ;;  %v9763_v17 = vld [vmem:[#allocation139_spill] sm:$0xff]  ;;  %v9772_v16 = vld [vmem:[#allocation148_spill] sm:$0xff]  ;;  %v9773_v1 = vld [vmem:[#allocation149_spill] sm:$0xff] }
 0x250   :  { %3198 = vmatpush.bf16.msra.mxu2 %v9757_v44  ;;  %3211 = vmatpush.bf16.msra.mxu3 %v9758_v20  ;;  %v9764_v44 = vld [vmem:[#allocation140_spill] sm:$0xff]  ;;  %v9765_v20 = vld [vmem:[#allocation141_spill] sm:$0xff] }
 0x253   :  { %3173 = vmatpush.bf16.msra.mxu0 %v9759_v2  ;;  %3186 = vmatpush.bf16.msra.mxu1 %v9760_v6  ;;  %v2935_v7 = vpop.f32.mrf.mxu2  ;;  %v2948_v36 = vpop.f32.mrf.mxu3  ;;  %v9768_v2 = vld [vmem:[#allocation144_spill] sm:$0xff]  ;;  %v9769_v6 = vld [vmem:[#allocation145_spill] sm:$0xff] }
 0x254   :  { %3199 = vmatpush.bf16.msra.mxu2 %v9761_v32  ;;  %3212 = vmatpush.bf16.msra.mxu3 %v9762_v48  ;;  %v9770_v32 = vld [vmem:[#allocation146_spill] sm:$0xff]  ;;  %v9771_v48 = vld [vmem:[#allocation147_spill] sm:$0xff]  ;;  %v9776_v7 = vld [vmem:[#allocation152_spill] sm:$0xff] }
 0x255   :  { %v9777_v36 = vld [vmem:[#allocation153_spill] sm:$0xff] }
 0x257   :  { %3174 = vmatpush.bf16.msra.mxu0 %v9763_v17  ;;  %3187 = vmatpush.bf16.msra.mxu1 %v9764_v44  ;;  %v9774_v44 = vld [vmem:[#allocation150_spill] sm:$0xff]  ;;  %v9787_v17 = vld [vmem:[#allocation163_spill] sm:$0xff] }
 0x258   :  { %3200 = vmatpush.bf16.msra.mxu2 %v9765_v20  ;;  %3213 = vmatpush.bf16.msra.mxu3 %v9766_v54  ;;  %v9775_v20 = vld [vmem:[#allocation151_spill] sm:$0xff] }
 0x25b   :  { %3175 = vmatpush.bf16.msra.mxu0 %v9767_v24  ;;  %3188 = vmatpush.bf16.msra.mxu1 %v9768_v2  ;;  %v9778_v24 = vld [vmem:[#allocation154_spill] sm:$0xff] }
 0x25c   :  { %3201 = vmatpush.bf16.msra.mxu2 %v9769_v6  ;;  %3214 = vmatpush.bf16.msra.mxu3 %v9770_v32  ;;  %v9785_v6 = vld [vmem:[#allocation161_spill] sm:$0xff]  ;;  %v9786_v2 = vld [vmem:[#allocation162_spill] sm:$0xff] }
 0x25f   :  { %3176 = vmatpush.bf16.msra.mxu0 %v9771_v48  ;;  %3189 = vmatpush.bf16.msra.mxu1 %v9772_v16  ;;  %v9779_v16 = vld [vmem:[#allocation155_spill] sm:$0xff] }
 0x260   :  { %3202 = vmatpush.bf16.msra.mxu2 %v9773_v1  ;;  %3215 = vmatpush.bf16.msra.mxu3 %v9774_v44  ;;  %v9780_v1 = vld [vmem:[#allocation156_spill] sm:$0xff]  ;;  %v9781_v44 = vld [vmem:[#allocation157_spill] sm:$0xff]  ;;  %v9783_v48 = vld [vmem:[#allocation159_spill] sm:$0xff] }
 0x262   :  { %3177 = vmatmul.bf16.vlgmr.msra.gmra.mxu0 %v7691_v50  ;;  %3190 = vmatmul.bf16.vlgmr.msra.gmra.mxu1 %v7694_v12 }
 0x263   :  { %3221 = vmatpush.bf16.msrb.mxu0 %v9775_v20  ;;  %3234 = vmatpush.bf16.msrb.mxu1 %v9776_v7  ;;  %v9782_v20 = vld [vmem:[#allocation158_spill] sm:$0xff]  ;;  %v2959_v7 = vpop.f32.mrf.mxu0 }
 0x264   :  { %3247 = vmatpush.bf16.msrb.mxu2 %v9777_v36  ;;  %3260 = vmatpush.bf16.msrb.mxu3 %v9778_v24  ;;  %v2972_v36 = vpop.f32.mrf.mxu1  ;;  %v9784_v24 = vld [vmem:[#allocation160_spill] sm:$0xff]  ;;  %v2960_v32 = vadd.f32 %v2959_v7, %v2947_v27  ;;  %v9793_v7 = vld [vmem:[#allocation169_spill] sm:$0xff] }
 0x265   :  { %3203 = vmatmul.bf16.vlgmr.msra.gmra.mxu2 %v7747_v23  ;;  %3216 = vmatmul.bf16.vlgmr.msra.gmra.mxu3 %v7749_v26  ;;  %v9792_v27 = vld [vmem:[#allocation168_spill] sm:$0xff] }
 0x266   :  { %v2973_v54 = vadd.f32 %v2972_v36, %v2960_v32  ;;  %v9794_v32 = vld [vmem:[#allocation170_spill] sm:$0xff] }
 0x267   :  { %3222 = vmatpush.bf16.msrb.mxu0 %v9779_v16  ;;  %3235 = vmatpush.bf16.msrb.mxu1 %v9780_v1  ;;  %v9788_v16 = vld [vmem:[#allocation164_spill] sm:$0xff]  ;;  %v9789_v1 = vld [vmem:[#allocation165_spill] sm:$0xff] }
 0x268   :  { %3248 = vmatpush.bf16.msrb.mxu2 %v9781_v44  ;;  %3261 = vmatpush.bf16.msrb.mxu3 %v9782_v20  ;;  %v9790_v44 = vld [vmem:[#allocation166_spill] sm:$0xff]  ;;  %v2985_v20 = vpop.f32.mrf.mxu2  ;;  %v2998_v31 = vpop.f32.mrf.mxu3 }
 0x269   :  { %v2986_v45 = vadd.f32 %v2985_v20, %v2973_v54  ;;  %v9797_v54 = vld [vmem:[#allocation173_spill] sm:$0xff] }
 0x26b   :  { %3223 = vmatpush.bf16.msrb.mxu0 %v9783_v48  ;;  %3236 = vmatpush.bf16.msrb.mxu1 %v9784_v24  ;;  %v2961_v48 = vpop.f32.mrf.mxu0  ;;  %v9791_v24 = vld [vmem:[#allocation167_spill] sm:$0xff]  ;;  %v2999_v36 = vadd.f32 %v2998_v31, %v2986_v45  ;;  %v9801_v45 = vld [vmem:[#allocation176_spill] sm:$0xff] }
 0x26c   :  { %3249 = vmatpush.bf16.msrb.mxu2 %v9785_v6  ;;  %3262 = vmatpush.bf16.msrb.mxu3 %v9786_v2  ;;  %v2974_v13 = vpop.f32.mrf.mxu1  ;;  %v9806_v31 = vld [vmem:[#allocation187_spill] sm:$0xff] }
 0x26d   :  { %v9798_v13 = vld [vmem:[#allocation174_spill] sm:$0xff] }
 0x26f   :  { %3224 = vmatpush.bf16.msrb.mxu0 %v9787_v17  ;;  %3237 = vmatpush.bf16.msrb.mxu1 %v9788_v16  ;;  %v3004_v16 = vmax.f32 %v8249_v10, 0.0  ;;  %v3005_v17 = vmax.f32 %v2999_v36, 0.0  ;;  %v9802_v10 = vld [vmem:[#allocation183_spill] sm:$0xff]  ;;  %v9808_v36 = vld [vmem:[#allocation189_spill] sm:$0xff] }
 0x270   :  { %3250 = vmatpush.bf16.msrb.mxu2 %v9789_v1  ;;  %3263 = vmatpush.bf16.msrb.mxu3 %v9790_v44  ;;  %v9795_v1 = vld [vmem:[#allocation171_spill] sm:$0xff]  ;;  %v9796_v44 = vld [vmem:[#allocation172_spill] sm:$0xff]  ;;  %v2987_v20 = vpop.f32.mrf.mxu2  ;;  %v3000_v48 = vpop.f32.mrf.mxu3 }
 0x271   :  { %v3007_v2 = vmax.f32 %v3004_v16, %v3005_v17  ;;  %v9805_v17 = vld [vmem:[#allocation186_spill] sm:$0xff]  ;;  %v9807_v16 = vld [vmem:[#allocation188_spill] sm:$0xff] }
 0x273   :  { %3225 = vmatpush.bf16.msrb.mxu0 %v9791_v24  ;;  %3238 = vmatpush.bf16.msrb.mxu1 %v9792_v27  ;;  %v8305_v27 = vmax.f32 %v8177_v9, %v3007_v2  ;;  %v9803_v2 = vld [vmem:[#allocation184_spill] sm:$0xff]  ;;  %v9804_v9 = vld [vmem:[#allocation185_spill] sm:$0xff] }
 0x274   :  { %3251 = vmatpush.bf16.msrb.mxu2 %v9793_v7  ;;  %3264 = vmatpush.bf16.msrb.mxu3 %v9794_v32  ;;  %v9800_v7 = vld [vmem:[#allocation175_spill] sm:$0xff] }
 0x275   :  { %9799 = vst [vmem:[#allocation72_spill] sm:$0xff] %v8305_v27  ;;  %v9809_v27 = vld [vmem:[#allocation190_spill] sm:$0xff] }
 0x277   :  { %3226 = vmatpush.bf16.msrb.mxu0 %v9795_v1  ;;  %3239 = vmatpush.bf16.msrb.mxu1 %v9796_v44 }
 0x278   :  { %3252 = vmatpush.bf16.msrb.mxu2 %v9797_v54  ;;  %3265 = vmatpush.bf16.msrb.mxu3 %v9798_v13 }
 0x27b   :  { %3227 = vmatpush.bf16.msrb.mxu0 %v9800_v7  ;;  %3240 = vmatpush.bf16.msrb.mxu1 %v9801_v45 }
 0x27c   :  { %3253 = vmatpush.bf16.msrb.mxu2 %v7985_v4  ;;  %3266 = vmatpush.bf16.msrb.mxu3 %v7987_v0 }
 0x27f   :  { %3228 = vmatpush.bf16.msrb.mxu0 %v7991_v15  ;;  %3241 = vmatpush.bf16.msrb.mxu1 %v7993_v46  ;;  %v3022_v20 = vpop.f32.mrf.mxu0  ;;  %v3035_v48 = vpop.f32.mrf.mxu1  ;;  %v9817_v46 = vld [vmem:[#allocation198_spill] sm:$0xff] }
 0x280   :  { %3254 = vmatpush.bf16.msrb.mxu2 %v7997_v30  ;;  %3267 = vmatpush.bf16.msrb.mxu3 %v7999_v56 }
 0x282   :  { %3229 = vmatmul.bf16.vlgmr.msrb.gmra.mxu0 %v8189_v53  ;;  %3242 = vmatmul.bf16.vlgmr.msrb.gmra.mxu1 %v8191_v5 }
 0x283   :  { %3273 = vmatpush.bf16.msra.mxu0 %v8001_v22  ;;  %3286 = vmatpush.bf16.msra.mxu1 %v9802_v10  ;;  %v9811_v10 = vld [vmem:[#allocation192_spill] sm:$0xff] }
 0x284   :  { %3299 = vmatpush.bf16.msra.mxu2 %v9803_v2  ;;  %3312 = vmatpush.bf16.msra.mxu3 %v9804_v9  ;;  %v9810_v9 = vld [vmem:[#allocation191_spill] sm:$0xff]  ;;  %v3023_v2 = vadd.f32 %v3022_v20, %v8110_v37 }
 0x285   :  { %3255 = vmatmul.bf16.vlgmr.msrb.gmra.mxu2 %v7691_v50  ;;  %3268 = vmatmul.bf16.vlgmr.msrb.gmra.mxu3 %v7694_v12  ;;  %v9812_v50 = vld [vmem:[#allocation193_spill] sm:$0xff]  ;;  %v9818_v20 = vld [vmem:[#allocation199_spill] sm:$0xff] }
 0x286   :  { %v3036_v12 = vadd.f32 %v3035_v48, %v3023_v2  ;;  %v9820_v2 = vld [vmem:[#allocation201_spill] sm:$0xff] }
 0x287   :  { %3274 = vmatpush.bf16.msra.mxu0 %v9805_v17  ;;  %3287 = vmatpush.bf16.msra.mxu1 %v9806_v31  ;;  %v9813_v17 = vld [vmem:[#allocation194_spill] sm:$0xff]  ;;  %v9814_v31 = vld [vmem:[#allocation195_spill] sm:$0xff]  ;;  %v3024_v30 = vpop.f32.mrf.mxu0 }
 0x288   :  { %3300 = vmatpush.bf16.msra.mxu2 %v9807_v16  ;;  %3313 = vmatpush.bf16.msra.mxu3 %v9808_v36  ;;  %v9815_v16 = vld [vmem:[#allocation196_spill] sm:$0xff]  ;;  %v9816_v36 = vld [vmem:[#allocation197_spill] sm:$0xff]  ;;  %v3048_v22 = vpop.f32.mrf.mxu2  ;;  %v3061_v56 = vpop.f32.mrf.mxu3 }
 0x28b   :  { %3275 = vmatpush.bf16.msra.mxu0 %v9809_v27  ;;  %3288 = vmatpush.bf16.msra.mxu1 %v9810_v9  ;;  %v3049_v27 = vadd.f32 %v3048_v22, %v3036_v12  ;;  %v3037_v9 = vpop.f32.mrf.mxu1  ;;  %v9824_v12 = vld [vmem:[#allocation208_spill] sm:$0xff] }
 0x28c   :  { %3301 = vmatpush.bf16.msra.mxu2 %v9811_v10  ;;  %3314 = vmatpush.bf16.msra.mxu3 %v9812_v50  ;;  %v9819_v10 = vld [vmem:[#allocation200_spill] sm:$0xff]  ;;  %v9823_v9 = vld [vmem:[#allocation207_spill] sm:$0xff] }
 0x28d   :  { %v3062_v48 = vadd.f32 %v3061_v56, %v3049_v27  ;;  %v9827_v56 = vld [vmem:[#allocation211_spill] sm:$0xff]  ;;  %v9828_v27 = vld [vmem:[#allocation212_spill] sm:$0xff] }
 0x28f   :  { %3276 = vmatpush.bf16.msra.mxu0 %v9813_v17  ;;  %3289 = vmatpush.bf16.msra.mxu1 %v9814_v31  ;;  %v9821_v17 = vld [vmem:[#allocation202_spill] sm:$0xff]  ;;  %v9822_v31 = vld [vmem:[#allocation203_spill] sm:$0xff] }
 0x290   :  { %3302 = vmatpush.bf16.msra.mxu2 %v9815_v16  ;;  %3315 = vmatpush.bf16.msra.mxu3 %v9816_v36  ;;  %v3050_v22 = vpop.f32.mrf.mxu2  ;;  %v3063_v30 = vpop.f32.mrf.mxu3 }
 0x291   :  { %v9831_v22 = vld [vmem:[#allocation25_spill] sm:$0xff]  ;;  %v9832_v30 = vld [vmem:[#allocation26_spill] sm:$0xff] }
 0x293   :  { %3277 = vmatpush.bf16.msra.mxu0 %v9817_v46  ;;  %3290 = vmatpush.bf16.msra.mxu1 %v9818_v20 }
 0x294   :  { %3303 = vmatpush.bf16.msra.mxu2 %v9819_v10  ;;  %3316 = vmatpush.bf16.msra.mxu3 %v9820_v2  ;;  %v9825_v10 = vld [vmem:[#allocation209_spill] sm:$0xff]  ;;  %v9826_v2 = vld [vmem:[#allocation210_spill] sm:$0xff] }
 0x297   :  { %3278 = vmatpush.bf16.msra.mxu0 %v9821_v17  ;;  %3291 = vmatpush.bf16.msra.mxu1 %v9822_v31  ;;  %v9829_v31 = vld [vmem:[#allocation213_spill] sm:$0xff] }
 0x298   :  { %3304 = vmatpush.bf16.msra.mxu2 %v8073_v8  ;;  %3317 = vmatpush.bf16.msra.mxu3 %v8075_v47  ;;  %v9830_v8 = vld [vmem:[#allocation24_spill] sm:$0xff] }
 0x29b   :  { %3279 = vmatpush.bf16.msra.mxu0 %v8079_v60  ;;  %3292 = vmatpush.bf16.msra.mxu1 %v9823_v9  ;;  %v9833_v60 = vld [vmem:[#allocation27_spill] sm:$0xff] }
 0x29c   :  { %3305 = vmatpush.bf16.msra.mxu2 %v9824_v12  ;;  %3318 = vmatpush.bf16.msra.mxu3 %v9825_v10  ;;  %v9840_v12 = vld [vmem:[#allocation34_spill] sm:$0xff]  ;;  %v9841_v9 = vld [vmem:[#allocation35_spill] sm:$0xff] }
 0x29f   :  { %3280 = vmatpush.bf16.msra.mxu0 %v9826_v2  ;;  %3293 = vmatpush.bf16.msra.mxu1 %v9827_v56  ;;  %v9834_v56 = vld [vmem:[#allocation28_spill] sm:$0xff] }
 0x2a0   :  { %3306 = vmatpush.bf16.msra.mxu2 %v9828_v27  ;;  %3319 = vmatpush.bf16.msra.mxu3 %v9829_v31  ;;  %v9835_v27 = vld [vmem:[#allocation29_spill] sm:$0xff]  ;;  %v9836_v31 = vld [vmem:[#allocation30_spill] sm:$0xff]  ;;  %v9838_v2 = vld [vmem:[#allocation32_spill] sm:$0xff] }
 0x2a2   :  { %3281 = vmatmul.bf16.vlgmr.msra.gmra.mxu0 %v7747_v23  ;;  %3294 = vmatmul.bf16.vlgmr.msra.gmra.mxu1 %v7749_v26 }
 0x2a3   :  { %3336 = vmatpush.bf16.msrb.mxu0 %v9830_v8  ;;  %3349 = vmatpush.bf16.msrb.mxu1 %v9831_v22  ;;  %v9837_v8 = vld [vmem:[#allocation31_spill] sm:$0xff]  ;;  %v3074_v22 = vpop.f32.mrf.mxu0 }
 0x2a4   :  { %3362 = vmatpush.bf16.msrb.mxu2 %v9832_v30  ;;  %3375 = vmatpush.bf16.msrb.mxu3 %v9833_v60  ;;  %v3087_v30 = vpop.f32.mrf.mxu1  ;;  %v9839_v60 = vld [vmem:[#allocation33_spill] sm:$0xff]  ;;  %v3075_v10 = vadd.f32 %v3074_v22, %v3062_v48  ;;  %v9847_v22 = vld [vmem:[#allocation40_spill] sm:$0xff] }
 0x2a5   :  { %3307 = vmatmul.bf16.vlgmr.msra.gmra.mxu2 %v8189_v53  ;;  %3320 = vmatmul.bf16.vlgmr.msra.gmra.mxu3 %v8191_v5 }
 0x2a6   :  { %v8368_v47 = vadd.f32 %v3087_v30, %v3075_v10  ;;  %v9849_v10 = vld [vmem:[#allocation42_spill] sm:$0xff]  ;;  %v9850_v30 = vld [vmem:[#allocation43_spill] sm:$0xff] }
 0x2a7   :  { %3337 = vmatpush.bf16.msrb.mxu0 %v9834_v56  ;;  %3350 = vmatpush.bf16.msrb.mxu1 %v9835_v27  ;;  %v9842_v56 = vld [vmem:[#allocation36_spill] sm:$0xff]  ;;  %v9843_v27 = vld [vmem:[#allocation37_spill] sm:$0xff] }
 0x2a8   :  { %3363 = vmatpush.bf16.msrb.mxu2 %v9836_v31  ;;  %3376 = vmatpush.bf16.msrb.mxu3 %v9837_v8  ;;  %v9844_v31 = vld [vmem:[#allocation38_spill] sm:$0xff]  ;;  %v9845_v8 = vld [vmem:[#allocation39_spill] sm:$0xff]  ;;  %v3100_v17 = vpop.f32.mrf.mxu2  ;;  %v3113_v20 = vpop.f32.mrf.mxu3 }
 0x2ab   :  { %3338 = vmatpush.bf16.msrb.mxu0 %v9838_v2  ;;  %3351 = vmatpush.bf16.msrb.mxu1 %v9839_v60  ;;  %v9846_v2 = vld [vmem:[#allocation214_spill] sm:$0xff]  ;;  %v3076_v60 = vpop.f32.mrf.mxu0 }
 0x2ac   :  { %3364 = vmatpush.bf16.msrb.mxu2 %v9840_v12  ;;  %3377 = vmatpush.bf16.msrb.mxu3 %v9841_v9  ;;  %v3101_v46 = vadd.f32 %v3100_v17, %v9846_v2  ;;  %v3089_v48 = vpop.f32.mrf.mxu1  ;;  %v9848_v12 = vld [vmem:[#allocation41_spill] sm:$0xff]  ;;  %v9854_v9 = vld [vmem:[#allocation47_spill] sm:$0xff] }
 0x2ad   :  { %v9855_v48 = vld [vmem:[#allocation48_spill] sm:$0xff] }
 0x2af   :  { %3339 = vmatpush.bf16.msrb.mxu0 %v9842_v56  ;;  %3352 = vmatpush.bf16.msrb.mxu1 %v9843_v27  ;;  %v3114_v56 = vadd.f32 %v3113_v20, %v3101_v46  ;;  %v9851_v27 = vld [vmem:[#allocation44_spill] sm:$0xff]  ;;  %v9860_v46 = vld [vmem:[#allocation53_spill] sm:$0xff]  ;;  %v9861_v20 = vld [vmem:[#allocation54_spill] sm:$0xff] }
 0x2b0   :  { %3365 = vmatpush.bf16.msrb.mxu2 %v9844_v31  ;;  %3378 = vmatpush.bf16.msrb.mxu3 %v9845_v8  ;;  %v9852_v31 = vld [vmem:[#allocation45_spill] sm:$0xff]  ;;  %v9853_v8 = vld [vmem:[#allocation46_spill] sm:$0xff]  ;;  %v3102_v17 = vpop.f32.mrf.mxu2  ;;  %v3115_v60 = vpop.f32.mrf.mxu3 }
 0x2b1   :  { %v9864_v17 = vld [vmem:[#allocation57_spill] sm:$0xff]  ;;  %v9865_v60 = vld [vmem:[#allocation58_spill] sm:$0xff] }
 0x2b3   :  { %3340 = vmatpush.bf16.msrb.mxu0 %v9847_v22  ;;  %3353 = vmatpush.bf16.msrb.mxu1 %v9848_v12  ;;  %v9856_v22 = vld [vmem:[#allocation49_spill] sm:$0xff]  ;;  %v9857_v12 = vld [vmem:[#allocation50_spill] sm:$0xff] }
 0x2b4   :  { %3366 = vmatpush.bf16.msrb.mxu2 %v9849_v10  ;;  %3379 = vmatpush.bf16.msrb.mxu3 %v9850_v30  ;;  %v9858_v10 = vld [vmem:[#allocation51_spill] sm:$0xff]  ;;  %v9859_v30 = vld [vmem:[#allocation52_spill] sm:$0xff] }
 0x2b7   :  { %3341 = vmatpush.bf16.msrb.mxu0 %v9851_v27  ;;  %3354 = vmatpush.bf16.msrb.mxu1 %v9852_v31  ;;  %v9862_v31 = vld [vmem:[#allocation55_spill] sm:$0xff] }
 0x2b8   :  { %3367 = vmatpush.bf16.msrb.mxu2 %v9853_v8  ;;  %3380 = vmatpush.bf16.msrb.mxu3 %v9854_v9  ;;  %v9863_v8 = vld [vmem:[#allocation56_spill] sm:$0xff] }
 0x2b9   :  { %v9874_v9 = vld [vmem:[#allocation68_spill] sm:$0xff] }
 0x2bb   :  { %3342 = vmatpush.bf16.msrb.mxu0 %v9855_v48  ;;  %3355 = vmatpush.bf16.msrb.mxu1 %v9856_v22  ;;  %v9866_v48 = vld [vmem:[#allocation59_spill] sm:$0xff] }
 0x2bc   :  { %3368 = vmatpush.bf16.msrb.mxu2 %v9857_v12  ;;  %3381 = vmatpush.bf16.msrb.mxu3 %v9858_v10  ;;  %v9873_v12 = vld [vmem:[#allocation67_spill] sm:$0xff] }
 0x2bf   :  { %3343 = vmatpush.bf16.msrb.mxu0 %v9859_v30  ;;  %3356 = vmatpush.bf16.msrb.mxu1 %v9860_v46  ;;  %v9867_v46 = vld [vmem:[#allocation60_spill] sm:$0xff] }
 0x2c0   :  { %3369 = vmatpush.bf16.msrb.mxu2 %v9861_v20  ;;  %3382 = vmatpush.bf16.msrb.mxu3 %v9862_v31  ;;  %v9868_v20 = vld [vmem:[#allocation61_spill] sm:$0xff]  ;;  %v9869_v31 = vld [vmem:[#allocation62_spill] sm:$0xff]  ;;  %v9871_v30 = vld [vmem:[#allocation64_spill] sm:$0xff] }
 0x2c2   :  { %3344 = vmatmul.bf16.vlgmr.msrb.gmra.mxu0 %v7747_v23  ;;  %3357 = vmatmul.bf16.vlgmr.msrb.gmra.mxu1 %v7749_v26 }
 0x2c3   :  { %3388 = vmatpush.bf16.msra.mxu0 %v9863_v8  ;;  %3401 = vmatpush.bf16.msra.mxu1 %v9864_v17  ;;  %v9870_v8 = vld [vmem:[#allocation63_spill] sm:$0xff]  ;;  %v3126_v17 = vpop.f32.mrf.mxu0 }
 0x2c4   :  { %3414 = vmatpush.bf16.msra.mxu2 %v9865_v60  ;;  %3427 = vmatpush.bf16.msra.mxu3 %v9866_v48  ;;  %v3139_v60 = vpop.f32.mrf.mxu1  ;;  %v9872_v48 = vld [vmem:[#allocation65_spill] sm:$0xff]  ;;  %v3127_v10 = vadd.f32 %v3126_v17, %v3114_v56  ;;  %v9879_v17 = vld [vmem:[#allocation74_spill] sm:$0xff] }
 0x2c5   :  { %3370 = vmatmul.bf16.vlgmr.msrb.gmra.mxu2 %v8189_v53  ;;  %3383 = vmatmul.bf16.vlgmr.msrb.gmra.mxu3 %v8191_v5  ;;  %v9878_v56 = vld [vmem:[#allocation73_spill] sm:$0xff] }
 0x2c6   :  { %v3140_v22 = vadd.f32 %v3139_v60, %v3127_v10  ;;  %v3325_v60 = vmax.f32 %v8368_v47, 0.0  ;;  %v3332_v47 = vld [vmem:[#allocation2 + $0x10] sm:$0x3] }
 0x2c7   :  { %3389 = vmatpush.bf16.msra.mxu0 %v9867_v46  ;;  %3402 = vmatpush.bf16.msra.mxu1 %v9868_v20  ;;  %v9875_v46 = vld [vmem:[#allocation69_spill] sm:$0xff]  ;;  %v9876_v20 = vld [vmem:[#allocation70_spill] sm:$0xff] }
 0x2c8   :  { %3415 = vmatpush.bf16.msra.mxu2 %v9869_v31  ;;  %3428 = vmatpush.bf16.msra.mxu3 %v9870_v8  ;;  %v9877_v31 = vld [vmem:[#allocation71_spill] sm:$0xff]  ;;  %v3152_v8 = vpop.f32.mrf.mxu2  ;;  %v3165_v27 = vpop.f32.mrf.mxu3 }
 0x2c9   :  { %v3153_v2 = vadd.f32 %v3152_v8, %v3140_v22  ;;  %v9880_v8 = vld [vmem:[#allocation78_spill] sm:$0xff] }
 0x2cb   :  { %3390 = vmatpush.bf16.msra.mxu0 %v9871_v30  ;;  %3403 = vmatpush.bf16.msra.mxu1 %v9872_v48  ;;  %v3128_v30 = vpop.f32.mrf.mxu0  ;;  %v3166_v10 = vadd.f32 %v3165_v27, %v3153_v2  ;;  %v3333_v2 = vld [vmem:[#allocation2 + $0x12] sm:$0x3]  ;;  %v8430_v27 = vpack.c.bf16 %v3332_v47, %v3332_v47  ;;  %v9886_v47 = vld [vmem:[#allocation94_spill] sm:$0xff] }
 0x2cc   :  { %3416 = vmatpush.bf16.msra.mxu2 %v9718_v51  ;;  %3429 = vmatpush.bf16.msra.mxu3 %v9873_v12  ;;  %v3141_v36 = vpop.f32.mrf.mxu1  ;;  %v8432_v30 = vpack.c.bf16 %v3333_v2, %v3333_v2 }
 0x2cf   :  { %3391 = vmatpush.bf16.msra.mxu0 %v9874_v9  ;;  %3404 = vmatpush.bf16.msra.mxu1 %v9875_v46  ;;  %v3326_v46 = vmax.f32 %v3166_v10, 0.0  ;;  %v9882_v10 = vld [vmem:[#allocation90_spill] sm:$0xff] }
 0x2d0   :  { %3417 = vmatpush.bf16.msra.mxu2 %v9876_v20  ;;  %3430 = vmatpush.bf16.msra.mxu3 %v9877_v31  ;;  %v3154_v36 = vpop.f32.mrf.mxu2  ;;  %v3167_v22 = vpop.f32.mrf.mxu3 }
 0x2d1   :  { %v8418_v31 = vmax.f32 %v3325_v60, %v3326_v46  ;;  %v9881_v46 = vld [vmem:[#allocation89_spill] sm:$0xff]  ;;  %v9883_v60 = vld [vmem:[#allocation91_spill] sm:$0xff]  ;;  %v9884_v36 = vld [vmem:[#allocation92_spill] sm:$0xff] }
 0x2d2   :  { %v9885_v22 = vld [vmem:[#allocation93_spill] sm:$0xff] }
 0x2d3   :  { %3392 = vmatpush.bf16.msra.mxu0 %v9724_v52  ;;  %3405 = vmatpush.bf16.msra.mxu1 %v9878_v56 }
 0x2d4   :  { %3418 = vmatpush.bf16.msra.mxu2 %v9879_v17  ;;  %3431 = vmatpush.bf16.msra.mxu3 %v9727_v3 }
 0x2d7   :  { %3393 = vmatpush.bf16.msra.mxu0 %v9728_v41  ;;  %3406 = vmatpush.bf16.msra.mxu1 %v9729_v39 }
 0x2d8   :  { %3419 = vmatpush.bf16.msra.mxu2 %v9880_v8  ;;  %3432 = vmatpush.bf16.msra.mxu3 %v9731_v55 }
 0x2db   :  { %3394 = vmatpush.bf16.msra.mxu0 %v9732_v58  ;;  %3407 = vmatpush.bf16.msra.mxu1 %v9733_v61 }
 0x2dc   :  { %3420 = vmatpush.bf16.msra.mxu2 %v7595_v33  ;;  %3433 = vmatpush.bf16.msra.mxu3 %v9734_v11 }
 0x2df   :  { %3395 = vmatpush.bf16.msra.mxu0 %v9735_v28  ;;  %3408 = vmatpush.bf16.msra.mxu1 %v9736_v62  ;;  %v3178_v2 = vpop.f32.mrf.mxu0 }
 0x2e0   :  { %3421 = vmatpush.bf16.msra.mxu2 %v9737_v40  ;;  %3434 = vmatpush.bf16.msra.mxu3 %v9738_v57 }
 0x2e2   :  { %3396 = vmatmul.bf16.vlgmr.msra.gmra.mxu0 %v8430_v27  ;;  %3409 = vmatmul.bf16.vlgmr.msra.gmra.mxu1 %v8432_v30 }
 0x2e3   :  { %3440 = vmatpush.bf16.msrb.mxu0 %v7683_v14  ;;  %3453 = vmatpush.bf16.msrb.mxu1 %v7685_v49  ;;  %v9887_v49 = vld [vmem:[#allocation95_spill] sm:$0xff]  ;;  %v3179_v14 = vadd.f32 %v3178_v2, %v8204_v18  ;;  %v9890_v2 = vld [vmem:[#allocation109_spill] sm:$0xff] }
 0x2e4   :  { %3466 = vmatpush.bf16.msrb.mxu2 %v9881_v46  ;;  %3479 = vmatpush.bf16.msrb.mxu3 %v9882_v10  ;;  %v3191_v46 = vpop.f32.mrf.mxu1  ;;  %v9888_v10 = vld [vmem:[#allocation96_spill] sm:$0xff] }
 0x2e5   :  { %3422 = vmatmul.bf16.vlgmr.msra.gmra.mxu2 %v7747_v23  ;;  %3435 = vmatmul.bf16.vlgmr.msra.gmra.mxu3 %v7749_v26  ;;  %v3192_v57 = vadd.f32 %v3191_v46, %v3179_v14  ;;  %v9889_v46 = vld [vmem:[#allocation108_spill] sm:$0xff] }
 0x2e7   :  { %3441 = vmatpush.bf16.msrb.mxu0 %v9883_v60  ;;  %3454 = vmatpush.bf16.msrb.mxu1 %v9884_v36  ;;  %v3180_v36 = vpop.f32.mrf.mxu0 }
 0x2e8   :  { %3467 = vmatpush.bf16.msrb.mxu2 %v9885_v22  ;;  %3480 = vmatpush.bf16.msrb.mxu3 %v9886_v47  ;;  %v3204_v47 = vpop.f32.mrf.mxu2  ;;  %v3217_v22 = vpop.f32.mrf.mxu3 }
 0x2eb   :  { %3442 = vmatpush.bf16.msrb.mxu0 %v9887_v49  ;;  %3455 = vmatpush.bf16.msrb.mxu1 %v9888_v10  ;;  %v3205_v49 = vadd.f32 %v3204_v47, %v3192_v57  ;;  %v9893_v47 = vld [vmem:[#allocation112_spill] sm:$0xff] }
 0x2ec   :  { %3468 = vmatpush.bf16.msrb.mxu2 %v7729_v29  ;;  %3481 = vmatpush.bf16.msrb.mxu3 %v7731_v42  ;;  %v3193_v10 = vpop.f32.mrf.mxu1 }
 0x2ed   :  { %v3218_v14 = vadd.f32 %v3217_v22, %v3205_v49  ;;  %v9892_v10 = vld [vmem:[#allocation111_spill] sm:$0xff]  ;;  %v9897_v49 = vld [vmem:[#allocation116_spill] sm:$0xff]  ;;  %v9898_v22 = vld [vmem:[#allocation117_spill] sm:$0xff] }
 0x2ef   :  { %3443 = vmatpush.bf16.msrb.mxu0 %v7735_v34  ;;  %3456 = vmatpush.bf16.msrb.mxu1 %v7737_v59 }
 0x2f0   :  { %3469 = vmatpush.bf16.msrb.mxu2 %v7741_v35  ;;  %3482 = vmatpush.bf16.msrb.mxu3 %v7743_v25  ;;  %v9891_v25 = vld [vmem:[#allocation110_spill] sm:$0xff]  ;;  %v3206_v57 = vpop.f32.mrf.mxu2  ;;  %v3219_v36 = vpop.f32.mrf.mxu3 }
 0x2f1   :  { %v9901_v57 = vld [vmem:[#allocation120_spill] sm:$0xff]  ;;  %v9902_v36 = vld [vmem:[#allocation121_spill] sm:$0xff] }
 0x2f3   :  { %3444 = vmatpush.bf16.msrb.mxu0 %v7745_v63  ;;  %3457 = vmatpush.bf16.msrb.mxu1 %v7753_v21  ;;  %v9894_v21 = vld [vmem:[#allocation113_spill] sm:$0xff] }
 0x2f4   :  { %3470 = vmatpush.bf16.msrb.mxu2 %v7757_v43  ;;  %3483 = vmatpush.bf16.msrb.mxu3 %v7759_v38  ;;  %v9895_v43 = vld [vmem:[#allocation114_spill] sm:$0xff]  ;;  %v9896_v38 = vld [vmem:[#allocation115_spill] sm:$0xff] }
 0x2f7   :  { %3445 = vmatpush.bf16.msrb.mxu0 %v7767_v19  ;;  %3458 = vmatpush.bf16.msrb.mxu1 %v9889_v46  ;;  %v9899_v46 = vld [vmem:[#allocation118_spill] sm:$0xff] }
 0x2f8   :  { %3471 = vmatpush.bf16.msrb.mxu2 %v9890_v2  ;;  %3484 = vmatpush.bf16.msrb.mxu3 %v9891_v25  ;;  %v9900_v2 = vld [vmem:[#allocation119_spill] sm:$0xff] }
 0x2fb   :  { %3446 = vmatpush.bf16.msrb.mxu0 %v9892_v10  ;;  %3459 = vmatpush.bf16.msrb.mxu1 %v9893_v47  ;;  %v9903_v10 = vld [vmem:[#allocation122_spill] sm:$0xff] }
 0x2fc   :  { %3472 = vmatpush.bf16.msrb.mxu2 %v9894_v21  ;;  %3485 = vmatpush.bf16.msrb.mxu3 %v9895_v43  ;;  %v9910_v21 = vld [vmem:[#allocation129_spill] sm:$0xff]  ;;  %v9911_v47 = vld [vmem:[#allocation130_spill] sm:$0xff] }
 0x2ff   :  { %3447 = vmatpush.bf16.msrb.mxu0 %v9896_v38  ;;  %3460 = vmatpush.bf16.msrb.mxu1 %v9897_v49  ;;  %v9904_v49 = vld [vmem:[#allocation123_spill] sm:$0xff] }
 0x300   :  { %3473 = vmatpush.bf16.msrb.mxu2 %v9898_v22  ;;  %3486 = vmatpush.bf16.msrb.mxu3 %v9899_v46  ;;  %v9905_v22 = vld [vmem:[#allocation124_spill] sm:$0xff]  ;;  %v9906_v46 = vld [vmem:[#allocation125_spill] sm:$0xff]  ;;  %v9908_v38 = vld [vmem:[#allocation127_spill] sm:$0xff] }
 0x302   :  { %3448 = vmatmul.bf16.vlgmr.msrb.gmra.mxu0 %v8189_v53  ;;  %3461 = vmatmul.bf16.vlgmr.msrb.gmra.mxu1 %v8191_v5 }
 0x303   :  { %3492 = vmatpush.bf16.msra.mxu0 %v9900_v2  ;;  %3505 = vmatpush.bf16.msra.mxu1 %v9901_v57  ;;  %v9907_v2 = vld [vmem:[#allocation126_spill] sm:$0xff]  ;;  %v3230_v57 = vpop.f32.mrf.mxu0 }
 0x304   :  { %3518 = vmatpush.bf16.msra.mxu2 %v9902_v36  ;;  %3531 = vmatpush.bf16.msra.mxu3 %v9903_v10  ;;  %v3243_v36 = vpop.f32.mrf.mxu1  ;;  %v9909_v10 = vld [vmem:[#allocation128_spill] sm:$0xff]  ;;  %v3231_v43 = vadd.f32 %v3230_v57, %v3218_v14  ;;  %v9917_v57 = vld [vmem:[#allocation135_spill] sm:$0xff] }
 0x305   :  { %3474 = vmatmul.bf16.vlgmr.msrb.gmra.mxu2 %v8430_v27  ;;  %3487 = vmatmul.bf16.vlgmr.msrb.gmra.mxu3 %v8432_v30 }
 0x306   :  { %v8487_v25 = vadd.f32 %v3243_v36, %v3231_v43  ;;  %v9919_v43 = vld [vmem:[#allocation137_spill] sm:$0xff]  ;;  %v9920_v36 = vld [vmem:[#allocation138_spill] sm:$0xff] }
 0x307   :  { %3493 = vmatpush.bf16.msra.mxu0 %v9904_v49  ;;  %3506 = vmatpush.bf16.msra.mxu1 %v9905_v22  ;;  %v9912_v49 = vld [vmem:[#allocation131_spill] sm:$0xff]  ;;  %v9913_v22 = vld [vmem:[#allocation132_spill] sm:$0xff] }
 0x308   :  { %3519 = vmatpush.bf16.msra.mxu2 %v9906_v46  ;;  %3532 = vmatpush.bf16.msra.mxu3 %v9907_v2  ;;  %v9914_v46 = vld [vmem:[#allocation133_spill] sm:$0xff]  ;;  %v9915_v2 = vld [vmem:[#allocation134_spill] sm:$0xff]  ;;  %v3256_v19 = vpop.f32.mrf.mxu2  ;;  %v3269_v63 = vpop.f32.mrf.mxu3 }
 0x30b   :  { %3494 = vmatpush.bf16.msra.mxu0 %v9908_v38  ;;  %3507 = vmatpush.bf16.msra.mxu1 %v9909_v10  ;;  %v9916_v38 = vld [vmem:[#allocation66_spill] sm:$0xff]  ;;  %v3232_v10 = vpop.f32.mrf.mxu0 }
 0x30c   :  { %3520 = vmatpush.bf16.msra.mxu2 %v9910_v21  ;;  %3533 = vmatpush.bf16.msra.mxu3 %v9911_v47  ;;  %v3257_v35 = vadd.f32 %v3256_v19, %v9916_v38  ;;  %v3245_v14 = vpop.f32.mrf.mxu1  ;;  %v9918_v21 = vld [vmem:[#allocation136_spill] sm:$0xff]  ;;  %v9924_v47 = vld [vmem:[#allocation142_spill] sm:$0xff] }
 0x30d   :  { %v9925_v14 = vld [vmem:[#allocation143_spill] sm:$0xff] }
 0x30f   :  { %3495 = vmatpush.bf16.msra.mxu0 %v9912_v49  ;;  %3508 = vmatpush.bf16.msra.mxu1 %v9913_v22  ;;  %v3270_v49 = vadd.f32 %v3269_v63, %v3257_v35  ;;  %v9921_v22 = vld [vmem:[#allocation139_spill] sm:$0xff]  ;;  %v9930_v35 = vld [vmem:[#allocation148_spill] sm:$0xff]  ;;  %v9931_v63 = vld [vmem:[#allocation149_spill] sm:$0xff] }
 0x310   :  { %3521 = vmatpush.bf16.msra.mxu2 %v9914_v46  ;;  %3534 = vmatpush.bf16.msra.mxu3 %v9915_v2  ;;  %v9922_v46 = vld [vmem:[#allocation140_spill] sm:$0xff]  ;;  %v9923_v2 = vld [vmem:[#allocation141_spill] sm:$0xff]  ;;  %v3258_v19 = vpop.f32.mrf.mxu2  ;;  %v3271_v10 = vpop.f32.mrf.mxu3 }
 0x311   :  { %v9934_v19 = vld [vmem:[#allocation152_spill] sm:$0xff]  ;;  %v9935_v10 = vld [vmem:[#allocation153_spill] sm:$0xff] }
 0x313   :  { %3496 = vmatpush.bf16.msra.mxu0 %v9917_v57  ;;  %3509 = vmatpush.bf16.msra.mxu1 %v9918_v21  ;;  %v9926_v57 = vld [vmem:[#allocation144_spill] sm:$0xff]  ;;  %v9927_v21 = vld [vmem:[#allocation145_spill] sm:$0xff] }
 0x314   :  { %3522 = vmatpush.bf16.msra.mxu2 %v9919_v43  ;;  %3535 = vmatpush.bf16.msra.mxu3 %v9920_v36  ;;  %v9928_v43 = vld [vmem:[#allocation146_spill] sm:$0xff]  ;;  %v9929_v36 = vld [vmem:[#allocation147_spill] sm:$0xff] }
 0x317   :  { %3497 = vmatpush.bf16.msra.mxu0 %v9921_v22  ;;  %3510 = vmatpush.bf16.msra.mxu1 %v9922_v46  ;;  %v9932_v46 = vld [vmem:[#allocation150_spill] sm:$0xff] }
 0x318   :  { %3523 = vmatpush.bf16.msra.mxu2 %v9923_v2  ;;  %3536 = vmatpush.bf16.msra.mxu3 %v9924_v47  ;;  %v9933_v2 = vld [vmem:[#allocation151_spill] sm:$0xff] }
 0x319   :  { %v9944_v47 = vld [vmem:[#allocation163_spill] sm:$0xff] }
 0x31b   :  { %3498 = vmatpush.bf16.msra.mxu0 %v9925_v14  ;;  %3511 = vmatpush.bf16.msra.mxu1 %v9926_v57  ;;  %v9936_v14 = vld [vmem:[#allocation154_spill] sm:$0xff] }
 0x31c   :  { %3524 = vmatpush.bf16.msra.mxu2 %v9927_v21  ;;  %3537 = vmatpush.bf16.msra.mxu3 %v9928_v43  ;;  %v9943_v21 = vld [vmem:[#allocation162_spill] sm:$0xff] }
 0x31f   :  { %3499 = vmatpush.bf16.msra.mxu0 %v9929_v36  ;;  %3512 = vmatpush.bf16.msra.mxu1 %v9930_v35  ;;  %v9937_v35 = vld [vmem:[#allocation155_spill] sm:$0xff] }
 0x320   :  { %3525 = vmatpush.bf16.msra.mxu2 %v9931_v63  ;;  %3538 = vmatpush.bf16.msra.mxu3 %v9932_v46  ;;  %v9938_v63 = vld [vmem:[#allocation156_spill] sm:$0xff]  ;;  %v9939_v46 = vld [vmem:[#allocation157_spill] sm:$0xff]  ;;  %v9941_v36 = vld [vmem:[#allocation159_spill] sm:$0xff] }
 0x322   :  { %3500 = vmatmul.bf16.vlgmr.msra.gmra.mxu0 %v7747_v23  ;;  %3513 = vmatmul.bf16.vlgmr.msra.gmra.mxu1 %v7749_v26 }
 0x323   :  { %3544 = vmatpush.bf16.msrb.mxu0 %v9933_v2  ;;  %3557 = vmatpush.bf16.msrb.mxu1 %v9934_v19  ;;  %v9940_v2 = vld [vmem:[#allocation158_spill] sm:$0xff]  ;;  %v3282_v19 = vpop.f32.mrf.mxu0 }
 0x324   :  { %3570 = vmatpush.bf16.msrb.mxu2 %v9935_v10  ;;  %3583 = vmatpush.bf16.msrb.mxu3 %v9936_v14  ;;  %v3295_v10 = vpop.f32.mrf.mxu1  ;;  %v9942_v14 = vld [vmem:[#allocation160_spill] sm:$0xff]  ;;  %v3283_v43 = vadd.f32 %v3282_v19, %v3270_v49  ;;  %v9949_v19 = vld [vmem:[#allocation169_spill] sm:$0xff] }
 0x325   :  { %3526 = vmatmul.bf16.vlgmr.msra.gmra.mxu2 %v8189_v53  ;;  %3539 = vmatmul.bf16.vlgmr.msra.gmra.mxu3 %v8191_v5  ;;  %v9948_v49 = vld [vmem:[#allocation168_spill] sm:$0xff] }
 0x326   :  { %v3296_v57 = vadd.f32 %v3295_v10, %v3283_v43  ;;  %v3327_v10 = vmax.f32 %v8487_v25, 0.0  ;;  %v9951_v25 = vld [vmem:[#allocation179_spill] sm:$0xff] }
 0x327   :  { %3545 = vmatpush.bf16.msrb.mxu0 %v9937_v35  ;;  %3558 = vmatpush.bf16.msrb.mxu1 %v9938_v63  ;;  %v9945_v35 = vld [vmem:[#allocation164_spill] sm:$0xff]  ;;  %v9946_v63 = vld [vmem:[#allocation165_spill] sm:$0xff] }
 0x328   :  { %3571 = vmatpush.bf16.msrb.mxu2 %v9939_v46  ;;  %3584 = vmatpush.bf16.msrb.mxu3 %v9940_v2  ;;  %v9947_v46 = vld [vmem:[#allocation166_spill] sm:$0xff]  ;;  %v3308_v2 = vpop.f32.mrf.mxu2  ;;  %v3321_v22 = vpop.f32.mrf.mxu3 }
 0x329   :  { %v3309_v38 = vadd.f32 %v3308_v2, %v3296_v57 }
 0x32b   :  { %3546 = vmatpush.bf16.msrb.mxu0 %v9941_v36  ;;  %3559 = vmatpush.bf16.msrb.mxu1 %v9942_v14  ;;  %v3284_v36 = vpop.f32.mrf.mxu0  ;;  %v3322_v43 = vadd.f32 %v3321_v22, %v3309_v38  ;;  %v9952_v38 = vld [vmem:[#allocation180_spill] sm:$0xff]  ;;  %v9953_v22 = vld [vmem:[#allocation181_spill] sm:$0xff] }
 0x32c   :  { %3572 = vmatpush.bf16.msrb.mxu2 %v9785_v6  ;;  %3585 = vmatpush.bf16.msrb.mxu3 %v9943_v21  ;;  %v3297_v59 = vpop.f32.mrf.mxu1  ;;  %v9954_v36 = vld [vmem:[#allocation182_spill] sm:$0xff] }
 0x32f   :  { %3547 = vmatpush.bf16.msrb.mxu0 %v9944_v47  ;;  %3560 = vmatpush.bf16.msrb.mxu1 %v9945_v35  ;;  %v3328_v35 = vmax.f32 %v3322_v43, 0.0  ;;  %v9958_v43 = vld [vmem:[#allocation186_spill] sm:$0xff] }
 0x330   :  { %3573 = vmatpush.bf16.msrb.mxu2 %v9946_v63  ;;  %3586 = vmatpush.bf16.msrb.mxu3 %v9947_v46  ;;  %v3310_v59 = vpop.f32.mrf.mxu2  ;;  %v3323_v2 = vpop.f32.mrf.mxu3 }
 0x331   :  { %v3330_v46 = vmax.f32 %v3327_v10, %v3328_v35  ;;  %v9957_v35 = vld [vmem:[#allocation185_spill] sm:$0xff]  ;;  %v9959_v10 = vld [vmem:[#allocation187_spill] sm:$0xff]  ;;  %v9960_v59 = vld [vmem:[#allocation188_spill] sm:$0xff] }
 0x332   :  { %v9961_v2 = vld [vmem:[#allocation189_spill] sm:$0xff] }
 0x333   :  { %3548 = vmatpush.bf16.msrb.mxu0 %v9791_v24  ;;  %3561 = vmatpush.bf16.msrb.mxu1 %v9948_v49  ;;  %v8540_v57 = vmax.f32 %v8418_v31, %v3330_v46  ;;  %v9955_v31 = vld [vmem:[#allocation183_spill] sm:$0xff]  ;;  %v9956_v46 = vld [vmem:[#allocation184_spill] sm:$0xff] }
 0x334   :  { %3574 = vmatpush.bf16.msrb.mxu2 %v9949_v19  ;;  %3587 = vmatpush.bf16.msrb.mxu3 %v9794_v32 }
 0x335   :  { %9950 = vst [vmem:[#allocation75_spill] sm:$0xff] %v8540_v57 }
 0x337   :  { %3549 = vmatpush.bf16.msrb.mxu0 %v9795_v1  ;;  %3562 = vmatpush.bf16.msrb.mxu1 %v9796_v44 }
 0x338   :  { %3575 = vmatpush.bf16.msrb.mxu2 %v9797_v54  ;;  %3588 = vmatpush.bf16.msrb.mxu3 %v9798_v13 }
 0x33b   :  { %3550 = vmatpush.bf16.msrb.mxu0 %v9800_v7  ;;  %3563 = vmatpush.bf16.msrb.mxu1 %v9801_v45 }
 0x33c   :  { %3576 = vmatpush.bf16.msrb.mxu2 %v7985_v4  ;;  %3589 = vmatpush.bf16.msrb.mxu3 %v7987_v0 }
 0x33f   :  { %3551 = vmatpush.bf16.msrb.mxu0 %v7991_v15  ;;  %3564 = vmatpush.bf16.msrb.mxu1 %v9951_v25  ;;  %v3345_v57 = vpop.f32.mrf.mxu0  ;;  %v9968_v25 = vld [vmem:[#allocation198_spill] sm:$0xff] }
 0x340   :  { %3577 = vmatpush.bf16.msrb.mxu2 %v9952_v38  ;;  %3590 = vmatpush.bf16.msrb.mxu3 %v9953_v22  ;;  %v9964_v22 = vld [vmem:[#allocation192_spill] sm:$0xff] }
 0x342   :  { %3552 = vmatmul.bf16.vlgmr.msrb.gmra.mxu0 %v8430_v27  ;;  %3565 = vmatmul.bf16.vlgmr.msrb.gmra.mxu1 %v8432_v30 }
 0x343   :  { %3596 = vmatpush.bf16.msra.mxu0 %v9954_v36  ;;  %3609 = vmatpush.bf16.msra.mxu1 %v9955_v31  ;;  %v9962_v31 = vld [vmem:[#allocation190_spill] sm:$0xff]  ;;  %v3346_v36 = vadd.f32 %v3345_v57, %v8110_v37  ;;  %v9969_v57 = vld [vmem:[#allocation199_spill] sm:$0xff] }
 0x344   :  { %3622 = vmatpush.bf16.msra.mxu2 %v9956_v46  ;;  %3635 = vmatpush.bf16.msra.mxu3 %v9957_v35  ;;  %v3358_v46 = vpop.f32.mrf.mxu1  ;;  %v9963_v35 = vld [vmem:[#allocation191_spill] sm:$0xff] }
 0x345   :  { %3578 = vmatmul.bf16.vlgmr.msrb.gmra.mxu2 %v7747_v23  ;;  %3591 = vmatmul.bf16.vlgmr.msrb.gmra.mxu3 %v7749_v26  ;;  %v3359_v23 = vadd.f32 %v3358_v46, %v3346_v36  ;;  %v9965_v26 = vld [vmem:[#allocation194_spill] sm:$0xff]  ;;  %v9971_v36 = vld [vmem:[#allocation201_spill] sm:$0xff] }
 0x347   :  { %3597 = vmatpush.bf16.msra.mxu0 %v9958_v43  ;;  %3610 = vmatpush.bf16.msra.mxu1 %v9959_v10  ;;  %v9966_v10 = vld [vmem:[#allocation195_spill] sm:$0xff]  ;;  %v3347_v38 = vpop.f32.mrf.mxu0 }
 0x348   :  { %3623 = vmatpush.bf16.msra.mxu2 %v9960_v59  ;;  %3636 = vmatpush.bf16.msra.mxu3 %v9961_v2  ;;  %v9967_v2 = vld [vmem:[#allocation197_spill] sm:$0xff]  ;;  %v3371_v59 = vpop.f32.mrf.mxu2  ;;  %v3384_v43 = vpop.f32.mrf.mxu3 }
 0x34b   :  { %3598 = vmatpush.bf16.msra.mxu0 %v9962_v31  ;;  %3611 = vmatpush.bf16.msra.mxu1 %v9963_v35  ;;  %v3372_v31 = vadd.f32 %v3371_v59, %v3359_v23  ;;  %v9977_v23 = vld [vmem:[#allocation207_spill] sm:$0xff] }
 0x34c   :  { %3624 = vmatpush.bf16.msra.mxu2 %v9964_v22  ;;  %3637 = vmatpush.bf16.msra.mxu3 %v9812_v50  ;;  %v3360_v35 = vpop.f32.mrf.mxu1  ;;  %v9970_v22 = vld [vmem:[#allocation200_spill] sm:$0xff] }
 0x34d   :  { %v3385_v46 = vadd.f32 %v3384_v43, %v3372_v31  ;;  %v9976_v35 = vld [vmem:[#allocation206_spill] sm:$0xff]  ;;  %v9981_v31 = vld [vmem:[#allocation211_spill] sm:$0xff]  ;;  %v9982_v43 = vld [vmem:[#allocation212_spill] sm:$0xff] }
 0x34f   :  { %3599 = vmatpush.bf16.msra.mxu0 %v9965_v26  ;;  %3612 = vmatpush.bf16.msra.mxu1 %v9966_v10  ;;  %v9972_v26 = vld [vmem:[#allocation202_spill] sm:$0xff]  ;;  %v9973_v10 = vld [vmem:[#allocation203_spill] sm:$0xff] }
 0x350   :  { %3625 = vmatpush.bf16.msra.mxu2 %v9815_v16  ;;  %3638 = vmatpush.bf16.msra.mxu3 %v9967_v2  ;;  %v9974_v16 = vld [vmem:[#allocation204_spill] sm:$0xff]  ;;  %v9975_v2 = vld [vmem:[#allocation205_spill] sm:$0xff]  ;;  %v3373_v59 = vpop.f32.mrf.mxu2  ;;  %v3386_v38 = vpop.f32.mrf.mxu3 }
 0x351   :  { %v9985_v59 = vld [vmem:[#allocation25_spill] sm:$0xff]  ;;  %v9986_v38 = vld [vmem:[#allocation26_spill] sm:$0xff] }
 0x353   :  { %3600 = vmatpush.bf16.msra.mxu0 %v9968_v25  ;;  %3613 = vmatpush.bf16.msra.mxu1 %v9969_v57  ;;  %v9978_v57 = vld [vmem:[#allocation208_spill] sm:$0xff] }
 0x354   :  { %3626 = vmatpush.bf16.msra.mxu2 %v9970_v22  ;;  %3639 = vmatpush.bf16.msra.mxu3 %v9971_v36  ;;  %v9979_v22 = vld [vmem:[#allocation209_spill] sm:$0xff]  ;;  %v9980_v36 = vld [vmem:[#allocation210_spill] sm:$0xff] }
 0x357   :  { %3601 = vmatpush.bf16.msra.mxu0 %v9972_v26  ;;  %3614 = vmatpush.bf16.msra.mxu1 %v9973_v10  ;;  %v9983_v10 = vld [vmem:[#allocation213_spill] sm:$0xff] }
 0x358   :  { %3627 = vmatpush.bf16.msra.mxu2 %v9974_v16  ;;  %3640 = vmatpush.bf16.msra.mxu3 %v9975_v2  ;;  %v9984_v16 = vld [vmem:[#allocation24_spill] sm:$0xff] }
 0x35b   :  { %3602 = vmatpush.bf16.msra.mxu0 %v9976_v35  ;;  %3615 = vmatpush.bf16.msra.mxu1 %v9977_v23  ;;  %v9987_v35 = vld [vmem:[#allocation27_spill] sm:$0xff] }
 0x35c   :  { %3628 = vmatpush.bf16.msra.mxu2 %v9978_v57  ;;  %3641 = vmatpush.bf16.msra.mxu3 %v9979_v22  ;;  %v9994_v57 = vld [vmem:[#allocation34_spill] sm:$0xff]  ;;  %v9995_v23 = vld [vmem:[#allocation35_spill] sm:$0xff] }
 0x35f   :  { %3603 = vmatpush.bf16.msra.mxu0 %v9980_v36  ;;  %3616 = vmatpush.bf16.msra.mxu1 %v9981_v31  ;;  %v9988_v31 = vld [vmem:[#allocation28_spill] sm:$0xff] }
 0x360   :  { %3629 = vmatpush.bf16.msra.mxu2 %v9982_v43  ;;  %3642 = vmatpush.bf16.msra.mxu3 %v9983_v10  ;;  %v9989_v43 = vld [vmem:[#allocation29_spill] sm:$0xff]  ;;  %v9990_v10 = vld [vmem:[#allocation30_spill] sm:$0xff]  ;;  %v9992_v36 = vld [vmem:[#allocation32_spill] sm:$0xff] }
 0x362   :  { %3604 = vmatmul.bf16.vlgmr.msra.gmra.mxu0 %v8189_v53  ;;  %3617 = vmatmul.bf16.vlgmr.msra.gmra.mxu1 %v8191_v5 }
 0x363   :  { %3659 = vmatpush.bf16.msrb.mxu0 %v9984_v16  ;;  %3672 = vmatpush.bf16.msrb.mxu1 %v9985_v59  ;;  %v9991_v16 = vld [vmem:[#allocation31_spill] sm:$0xff]  ;;  %v3397_v59 = vpop.f32.mrf.mxu0 }
 0x364   :  { %3685 = vmatpush.bf16.msrb.mxu2 %v9986_v38  ;;  %3698 = vmatpush.bf16.msrb.mxu3 %v9987_v35  ;;  %v3410_v38 = vpop.f32.mrf.mxu1  ;;  %v9993_v35 = vld [vmem:[#allocation33_spill] sm:$0xff]  ;;  %v3398_v22 = vadd.f32 %v3397_v59, %v3385_v46  ;;  %v10001_v59 = vld [vmem:[#allocation40_spill] sm:$0xff] }
 0x365   :  { %3630 = vmatmul.bf16.vlgmr.msra.gmra.mxu2 %v8430_v27  ;;  %3643 = vmatmul.bf16.vlgmr.msra.gmra.mxu3 %v8432_v30 }
 0x366   :  { %v8603_v2 = vadd.f32 %v3410_v38, %v3398_v22  ;;  %v10003_v22 = vld [vmem:[#allocation42_spill] sm:$0xff]  ;;  %v10004_v38 = vld [vmem:[#allocation43_spill] sm:$0xff] }
 0x367   :  { %3660 = vmatpush.bf16.msrb.mxu0 %v9988_v31  ;;  %3673 = vmatpush.bf16.msrb.mxu1 %v9989_v43  ;;  %v9996_v31 = vld [vmem:[#allocation36_spill] sm:$0xff]  ;;  %v9997_v43 = vld [vmem:[#allocation37_spill] sm:$0xff] }
 0x368   :  { %3686 = vmatpush.bf16.msrb.mxu2 %v9990_v10  ;;  %3699 = vmatpush.bf16.msrb.mxu3 %v9991_v16  ;;  %v9998_v10 = vld [vmem:[#allocation38_spill] sm:$0xff]  ;;  %v9999_v16 = vld [vmem:[#allocation39_spill] sm:$0xff]  ;;  %v3423_v26 = vpop.f32.mrf.mxu2  ;;  %v3436_v25 = vpop.f32.mrf.mxu3 }
 0x36b   :  { %3661 = vmatpush.bf16.msrb.mxu0 %v9992_v36  ;;  %3674 = vmatpush.bf16.msrb.mxu1 %v9993_v35  ;;  %v10000_v36 = vld [vmem:[#allocation214_spill] sm:$0xff]  ;;  %v3399_v35 = vpop.f32.mrf.mxu0 }
 0x36c   :  { %3687 = vmatpush.bf16.msrb.mxu2 %v9994_v57  ;;  %3700 = vmatpush.bf16.msrb.mxu3 %v9995_v23  ;;  %v3424_v50 = vadd.f32 %v3423_v26, %v10000_v36  ;;  %v3412_v46 = vpop.f32.mrf.mxu1  ;;  %v10002_v57 = vld [vmem:[#allocation41_spill] sm:$0xff]  ;;  %v10008_v23 = vld [vmem:[#allocation47_spill] sm:$0xff] }
 0x36d   :  { %v10009_v46 = vld [vmem:[#allocation48_spill] sm:$0xff] }
 0x36f   :  { %3662 = vmatpush.bf16.msrb.mxu0 %v9996_v31  ;;  %3675 = vmatpush.bf16.msrb.mxu1 %v9997_v43  ;;  %v3437_v31 = vadd.f32 %v3436_v25, %v3424_v50  ;;  %v10005_v43 = vld [vmem:[#allocation44_spill] sm:$0xff]  ;;  %v10014_v50 = vld [vmem:[#allocation53_spill] sm:$0xff]  ;;  %v10015_v25 = vld [vmem:[#allocation54_spill] sm:$0xff] }
 0x370   :  { %3688 = vmatpush.bf16.msrb.mxu2 %v9998_v10  ;;  %3701 = vmatpush.bf16.msrb.mxu3 %v9999_v16  ;;  %v10006_v10 = vld [vmem:[#allocation45_spill] sm:$0xff]  ;;  %v10007_v16 = vld [vmem:[#allocation46_spill] sm:$0xff]  ;;  %v3425_v26 = vpop.f32.mrf.mxu2  ;;  %v3438_v35 = vpop.f32.mrf.mxu3 }
 0x371   :  { %v10018_v26 = vld [vmem:[#allocation57_spill] sm:$0xff]  ;;  %v10019_v35 = vld [vmem:[#allocation58_spill] sm:$0xff] }
 0x373   :  { %3663 = vmatpush.bf16.msrb.mxu0 %v10001_v59  ;;  %3676 = vmatpush.bf16.msrb.mxu1 %v10002_v57  ;;  %v10010_v59 = vld [vmem:[#allocation49_spill] sm:$0xff]  ;;  %v10011_v57 = vld [vmem:[#allocation50_spill] sm:$0xff] }
 0x374   :  { %3689 = vmatpush.bf16.msrb.mxu2 %v10003_v22  ;;  %3702 = vmatpush.bf16.msrb.mxu3 %v10004_v38  ;;  %v10012_v22 = vld [vmem:[#allocation51_spill] sm:$0xff]  ;;  %v10013_v38 = vld [vmem:[#allocation52_spill] sm:$0xff] }
 0x377   :  { %3664 = vmatpush.bf16.msrb.mxu0 %v10005_v43  ;;  %3677 = vmatpush.bf16.msrb.mxu1 %v10006_v10  ;;  %v10016_v10 = vld [vmem:[#allocation55_spill] sm:$0xff] }
 0x378   :  { %3690 = vmatpush.bf16.msrb.mxu2 %v10007_v16  ;;  %3703 = vmatpush.bf16.msrb.mxu3 %v10008_v23  ;;  %v10017_v16 = vld [vmem:[#allocation56_spill] sm:$0xff] }
 0x37b   :  { %3665 = vmatpush.bf16.msrb.mxu0 %v10009_v46  ;;  %3678 = vmatpush.bf16.msrb.mxu1 %v10010_v59  ;;  %v10020_v46 = vld [vmem:[#allocation59_spill] sm:$0xff] }
 0x37c   :  { %3691 = vmatpush.bf16.msrb.mxu2 %v10011_v57  ;;  %3704 = vmatpush.bf16.msrb.mxu3 %v10012_v22 }
 0x37f   :  { %3666 = vmatpush.bf16.msrb.mxu0 %v10013_v38  ;;  %3679 = vmatpush.bf16.msrb.mxu1 %v10014_v50  ;;  %v10021_v50 = vld [vmem:[#allocation60_spill] sm:$0xff] }
 0x380   :  { %3692 = vmatpush.bf16.msrb.mxu2 %v10015_v25  ;;  %3705 = vmatpush.bf16.msrb.mxu3 %v10016_v10  ;;  %v10022_v25 = vld [vmem:[#allocation61_spill] sm:$0xff]  ;;  %v10023_v10 = vld [vmem:[#allocation62_spill] sm:$0xff]  ;;  %v10025_v38 = vld [vmem:[#allocation64_spill] sm:$0xff] }
 0x382   :  { %3667 = vmatmul.bf16.vlgmr.msrb.gmra.mxu0 %v8189_v53  ;;  %3680 = vmatmul.bf16.vlgmr.msrb.gmra.mxu1 %v8191_v5 }
 0x383   :  { %3711 = vmatpush.bf16.msra.mxu0 %v10017_v16  ;;  %3724 = vmatpush.bf16.msra.mxu1 %v10018_v26  ;;  %v10024_v16 = vld [vmem:[#allocation63_spill] sm:$0xff]  ;;  %v3449_v26 = vpop.f32.mrf.mxu0 }
 0x384   :  { %3737 = vmatpush.bf16.msra.mxu2 %v10019_v35  ;;  %3750 = vmatpush.bf16.msra.mxu3 %v10020_v46  ;;  %v3462_v35 = vpop.f32.mrf.mxu1  ;;  %v3450_v46 = vadd.f32 %v3449_v26, %v3437_v31 }
 0x385   :  { %3693 = vmatmul.bf16.vlgmr.msrb.gmra.mxu2 %v8430_v27  ;;  %3706 = vmatmul.bf16.vlgmr.msrb.gmra.mxu3 %v8432_v30 }
 0x386   :  { %v3463_v22 = vadd.f32 %v3462_v35, %v3450_v46  ;;  %v3648_v46 = vmax.f32 %v8603_v2, 0.0  ;;  %v3655_v2 = vld [vmem:[#allocation2 + $0x14] sm:$0x3] }
 0x387   :  { %3712 = vmatpush.bf16.msra.mxu0 %v10021_v50  ;;  %3725 = vmatpush.bf16.msra.mxu1 %v10022_v25  ;;  %v10026_v50 = vld [vmem:[#allocation69_spill] sm:$0xff] }
 0x388   :  { %3738 = vmatpush.bf16.msra.mxu2 %v10023_v10  ;;  %3751 = vmatpush.bf16.msra.mxu3 %v10024_v16  ;;  %v10027_v10 = vld [vmem:[#allocation71_spill] sm:$0xff]  ;;  %v3475_v16 = vpop.f32.mrf.mxu2  ;;  %v3488_v25 = vpop.f32.mrf.mxu3 }
 0x389   :  { %v3476_v57 = vadd.f32 %v3475_v16, %v3463_v22  ;;  %v10028_v22 = vld [vmem:[#allocation86_spill] sm:$0xff] }
 0x38b   :  { %3713 = vmatpush.bf16.msra.mxu0 %v10025_v38  ;;  %3726 = vmatpush.bf16.msra.mxu1 %v9872_v48  ;;  %v3451_v38 = vpop.f32.mrf.mxu0  ;;  %v3489_v31 = vadd.f32 %v3488_v25, %v3476_v57  ;;  %v3656_v57 = vld [vmem:[#allocation2 + $0x16] sm:$0x3]  ;;  %v10030_v25 = vld [vmem:[#allocation88_spill] sm:$0xff] }
 0x38c   :  { %3739 = vmatpush.bf16.msra.mxu2 %v9718_v51  ;;  %3752 = vmatpush.bf16.msra.mxu3 %v9873_v12  ;;  %v3464_v59 = vpop.f32.mrf.mxu1  ;;  %v10029_v38 = vld [vmem:[#allocation87_spill] sm:$0xff] }
 0x38d   :  { %v3649_v26 = vmax.f32 %v3489_v31, 0.0  ;;  %v8667_v31 = vpack.c.bf16 %v3655_v2, %v3655_v2  ;;  %v10034_v2 = vld [vmem:[#allocation93_spill] sm:$0xff] }
 0x38f   :  { %3714 = vmatpush.bf16.msra.mxu0 %v9874_v9  ;;  %3727 = vmatpush.bf16.msra.mxu1 %v10026_v50  ;;  %v8653_v35 = vmax.f32 %v3648_v46, %v3649_v26  ;;  %v8669_v46 = vpack.c.bf16 %v3656_v57, %v3656_v57  ;;  %v10031_v26 = vld [vmem:[#allocation89_spill] sm:$0xff]  ;;  %v10035_v57 = vld [vmem:[#allocation94_spill] sm:$0xff] }
 0x390   :  { %3740 = vmatpush.bf16.msra.mxu2 %v9876_v20  ;;  %3753 = vmatpush.bf16.msra.mxu3 %v10027_v10  ;;  %v3477_v16 = vpop.f32.mrf.mxu2  ;;  %v3490_v59 = vpop.f32.mrf.mxu3 }
 0x391   :  { %v10032_v16 = vld [vmem:[#allocation90_spill] sm:$0xff]  ;;  %v10033_v59 = vld [vmem:[#allocation92_spill] sm:$0xff] }
 0x393   :  { %3715 = vmatpush.bf16.msra.mxu0 %v9724_v52  ;;  %3728 = vmatpush.bf16.msra.mxu1 %v9878_v56 }
 0x394   :  { %3741 = vmatpush.bf16.msra.mxu2 %v9879_v17  ;;  %3754 = vmatpush.bf16.msra.mxu3 %v9727_v3 }
 0x397   :  { %3716 = vmatpush.bf16.msra.mxu0 %v9728_v41  ;;  %3729 = vmatpush.bf16.msra.mxu1 %v9729_v39 }
 0x398   :  { %3742 = vmatpush.bf16.msra.mxu2 %v9880_v8  ;;  %3755 = vmatpush.bf16.msra.mxu3 %v9731_v55 }
 0x39b   :  { %3717 = vmatpush.bf16.msra.mxu0 %v9732_v58  ;;  %3730 = vmatpush.bf16.msra.mxu1 %v9733_v61 }
 0x39c   :  { %3743 = vmatpush.bf16.msra.mxu2 %v7595_v33  ;;  %3756 = vmatpush.bf16.msra.mxu3 %v9734_v11  ;;  %v10041_v11 = vld [vmem:[#allocation103_spill] sm:$0xff] }
 0x39f   :  { %3718 = vmatpush.bf16.msra.mxu0 %v9735_v28  ;;  %3731 = vmatpush.bf16.msra.mxu1 %v9736_v62 }
 0x3a0   :  { %3744 = vmatpush.bf16.msra.mxu2 %v9737_v40  ;;  %3757 = vmatpush.bf16.msra.mxu3 %v10028_v22 }
 0x3a2   :  { %3719 = vmatmul.bf16.vlgmr.msra.gmra.mxu0 %v8667_v31  ;;  %3732 = vmatmul.bf16.vlgmr.msra.gmra.mxu1 %v8669_v46 }
 0x3a3   :  { %3763 = vmatpush.bf16.msrb.mxu0 %v10029_v38  ;;  %3776 = vmatpush.bf16.msrb.mxu1 %v10030_v25  ;;  %v3501_v25 = vpop.f32.mrf.mxu0  ;;  %v10036_v38 = vld [vmem:[#allocation95_spill] sm:$0xff] }
 0x3a4   :  { %3789 = vmatpush.bf16.msrb.mxu2 %v10031_v26  ;;  %3802 = vmatpush.bf16.msrb.mxu3 %v10032_v16  ;;  %v3514_v26 = vpop.f32.mrf.mxu1  ;;  %v10037_v16 = vld [vmem:[#allocation96_spill] sm:$0xff]  ;;  %v3502_v22 = vadd.f32 %v3501_v25, %v8204_v18 }
 0x3a5   :  { %3745 = vmatmul.bf16.vlgmr.msra.gmra.mxu2 %v8189_v53  ;;  %3758 = vmatmul.bf16.vlgmr.msra.gmra.mxu3 %v8191_v5  ;;  %v10042_v25 = vld [vmem:[#allocation104_spill] sm:$0xff] }
 0x3a6   :  { %v3515_v40 = vadd.f32 %v3514_v26, %v3502_v22  ;;  %v10044_v22 = vld [vmem:[#allocation106_spill] sm:$0xff] }
 0x3a7   :  { %3764 = vmatpush.bf16.msrb.mxu0 %v9883_v60  ;;  %3777 = vmatpush.bf16.msrb.mxu1 %v10033_v59  ;;  %v10038_v59 = vld [vmem:[#allocation100_spill] sm:$0xff] }
 0x3a8   :  { %3790 = vmatpush.bf16.msrb.mxu2 %v10034_v2  ;;  %3803 = vmatpush.bf16.msrb.mxu3 %v10035_v57  ;;  %v10039_v2 = vld [vmem:[#allocation101_spill] sm:$0xff]  ;;  %v10040_v57 = vld [vmem:[#allocation102_spill] sm:$0xff]  ;;  %v3527_v60 = vpop.f32.mrf.mxu2  ;;  %v3540_v62 = vpop.f32.mrf.mxu3 }
 0x3ab   :  { %3765 = vmatpush.bf16.msrb.mxu0 %v10036_v38  ;;  %3778 = vmatpush.bf16.msrb.mxu1 %v10037_v16  ;;  %v3528_v38 = vadd.f32 %v3527_v60, %v3515_v40  ;;  %v3503_v28 = vpop.f32.mrf.mxu0  ;;  %v10049_v60 = vld [vmem:[#allocation111_spill] sm:$0xff] }
 0x3ac   :  { %3791 = vmatpush.bf16.msrb.mxu2 %v7729_v29  ;;  %3804 = vmatpush.bf16.msrb.mxu3 %v7731_v42  ;;  %v3516_v16 = vpop.f32.mrf.mxu1  ;;  %v10043_v29 = vld [vmem:[#allocation105_spill] sm:$0xff] }
 0x3ad   :  { %v3541_v26 = vadd.f32 %v3540_v62, %v3528_v38  ;;  %v10050_v16 = vld [vmem:[#allocation112_spill] sm:$0xff]  ;;  %v10055_v38 = vld [vmem:[#allocation117_spill] sm:$0xff] }
 0x3ae   :  { %v10054_v62 = vld [vmem:[#allocation116_spill] sm:$0xff] }
 0x3af   :  { %3766 = vmatpush.bf16.msrb.mxu0 %v7735_v34  ;;  %3779 = vmatpush.bf16.msrb.mxu1 %v10038_v59  ;;  %v10045_v34 = vld [vmem:[#allocation107_spill] sm:$0xff]  ;;  %v10046_v59 = vld [vmem:[#allocation108_spill] sm:$0xff] }
 0x3b0   :  { %3792 = vmatpush.bf16.msrb.mxu2 %v10039_v2  ;;  %3805 = vmatpush.bf16.msrb.mxu3 %v10040_v57  ;;  %v10047_v2 = vld [vmem:[#allocation109_spill] sm:$0xff]  ;;  %v10048_v57 = vld [vmem:[#allocation110_spill] sm:$0xff]  ;;  %v3529_v40 = vpop.f32.mrf.mxu2  ;;  %v3542_v28 = vpop.f32.mrf.mxu3 }
 0x3b1   :  { %v10058_v40 = vld [vmem:[#allocation120_spill] sm:$0xff]  ;;  %v10059_v28 = vld [vmem:[#allocation121_spill] sm:$0xff] }
 0x3b3   :  { %3767 = vmatpush.bf16.msrb.mxu0 %v10041_v11  ;;  %3780 = vmatpush.bf16.msrb.mxu1 %v10042_v25  ;;  %v10051_v25 = vld [vmem:[#allocation113_spill] sm:$0xff] }
 0x3b4   :  { %3793 = vmatpush.bf16.msrb.mxu2 %v10043_v29  ;;  %3806 = vmatpush.bf16.msrb.mxu3 %v10044_v22  ;;  %v10052_v29 = vld [vmem:[#allocation114_spill] sm:$0xff]  ;;  %v10053_v22 = vld [vmem:[#allocation115_spill] sm:$0xff] }
 0x3b7   :  { %3768 = vmatpush.bf16.msrb.mxu0 %v10045_v34  ;;  %3781 = vmatpush.bf16.msrb.mxu1 %v10046_v59  ;;  %v10056_v59 = vld [vmem:[#allocation118_spill] sm:$0xff] }
 0x3b8   :  { %3794 = vmatpush.bf16.msrb.mxu2 %v10047_v2  ;;  %3807 = vmatpush.bf16.msrb.mxu3 %v10048_v57  ;;  %v10057_v2 = vld [vmem:[#allocation119_spill] sm:$0xff] }
 0x3bb   :  { %3769 = vmatpush.bf16.msrb.mxu0 %v10049_v60  ;;  %3782 = vmatpush.bf16.msrb.mxu1 %v10050_v16  ;;  %v10060_v60 = vld [vmem:[#allocation122_spill] sm:$0xff] }
 0x3bc   :  { %3795 = vmatpush.bf16.msrb.mxu2 %v10051_v25  ;;  %3808 = vmatpush.bf16.msrb.mxu3 %v10052_v29  ;;  %v10067_v25 = vld [vmem:[#allocation129_spill] sm:$0xff]  ;;  %v10068_v16 = vld [vmem:[#allocation130_spill] sm:$0xff] }
 0x3bf   :  { %3770 = vmatpush.bf16.msrb.mxu0 %v10053_v22  ;;  %3783 = vmatpush.bf16.msrb.mxu1 %v10054_v62  ;;  %v10061_v62 = vld [vmem:[#allocation123_spill] sm:$0xff] }
 0x3c0   :  { %3796 = vmatpush.bf16.msrb.mxu2 %v10055_v38  ;;  %3809 = vmatpush.bf16.msrb.mxu3 %v10056_v59  ;;  %v10062_v38 = vld [vmem:[#allocation124_spill] sm:$0xff]  ;;  %v10063_v59 = vld [vmem:[#allocation125_spill] sm:$0xff]  ;;  %v10065_v22 = vld [vmem:[#allocation127_spill] sm:$0xff] }
 0x3c2   :  { %3771 = vmatmul.bf16.vlgmr.msrb.gmra.mxu0 %v8430_v27  ;;  %3784 = vmatmul.bf16.vlgmr.msrb.gmra.mxu1 %v8432_v30 }
 0x3c3   :  { %3815 = vmatpush.bf16.msra.mxu0 %v10057_v2  ;;  %3828 = vmatpush.bf16.msra.mxu1 %v10058_v40  ;;  %v10064_v2 = vld [vmem:[#allocation126_spill] sm:$0xff]  ;;  %v3553_v40 = vpop.f32.mrf.mxu0 }
 0x3c4   :  { %3841 = vmatpush.bf16.msra.mxu2 %v10059_v28  ;;  %3854 = vmatpush.bf16.msra.mxu3 %v10060_v60  ;;  %v3566_v28 = vpop.f32.mrf.mxu1  ;;  %v10066_v60 = vld [vmem:[#allocation128_spill] sm:$0xff]  ;;  %v3554_v29 = vadd.f32 %v3553_v40, %v3541_v26  ;;  %v10074_v40 = vld [vmem:[#allocation135_spill] sm:$0xff] }
 0x3c5   :  { %3797 = vmatmul.bf16.vlgmr.msrb.gmra.mxu2 %v8667_v31  ;;  %3810 = vmatmul.bf16.vlgmr.msrb.gmra.mxu3 %v8669_v46 }
 0x3c6   :  { %v8722_v57 = vadd.f32 %v3566_v28, %v3554_v29  ;;  %v10076_v29 = vld [vmem:[#allocation137_spill] sm:$0xff]  ;;  %v10077_v28 = vld [vmem:[#allocation138_spill] sm:$0xff] }
 0x3c7   :  { %3816 = vmatpush.bf16.msra.mxu0 %v10061_v62  ;;  %3829 = vmatpush.bf16.msra.mxu1 %v10062_v38  ;;  %v10069_v62 = vld [vmem:[#allocation131_spill] sm:$0xff]  ;;  %v10070_v38 = vld [vmem:[#allocation132_spill] sm:$0xff] }
 0x3c8   :  { %3842 = vmatpush.bf16.msra.mxu2 %v10063_v59  ;;  %3855 = vmatpush.bf16.msra.mxu3 %v10064_v2  ;;  %v10071_v59 = vld [vmem:[#allocation133_spill] sm:$0xff]  ;;  %v10072_v2 = vld [vmem:[#allocation134_spill] sm:$0xff]  ;;  %v3579_v34 = vpop.f32.mrf.mxu2  ;;  %v3592_v11 = vpop.f32.mrf.mxu3 }
 0x3cb   :  { %3817 = vmatpush.bf16.msra.mxu0 %v10065_v22  ;;  %3830 = vmatpush.bf16.msra.mxu1 %v10066_v60  ;;  %v10073_v22 = vld [vmem:[#allocation66_spill] sm:$0xff]  ;;  %v3555_v60 = vpop.f32.mrf.mxu0 }
 0x3cc   :  { %3843 = vmatpush.bf16.msra.mxu2 %v10067_v25  ;;  %3856 = vmatpush.bf16.msra.mxu3 %v10068_v16  ;;  %v3580_v42 = vadd.f32 %v3579_v34, %v10073_v22  ;;  %v3568_v26 = vpop.f32.mrf.mxu1  ;;  %v10075_v25 = vld [vmem:[#allocation136_spill] sm:$0xff]  ;;  %v10081_v16 = vld [vmem:[#allocation142_spill] sm:$0xff] }
 0x3cd   :  { %v10082_v26 = vld [vmem:[#allocation143_spill] sm:$0xff] }
 0x3cf   :  { %3818 = vmatpush.bf16.msra.mxu0 %v10069_v62  ;;  %3831 = vmatpush.bf16.msra.mxu1 %v10070_v38  ;;  %v3593_v62 = vadd.f32 %v3592_v11, %v3580_v42  ;;  %v10078_v38 = vld [vmem:[#allocation139_spill] sm:$0xff]  ;;  %v10087_v42 = vld [vmem:[#allocation148_spill] sm:$0xff]  ;;  %v10088_v11 = vld [vmem:[#allocation149_spill] sm:$0xff] }
 0x3d0   :  { %3844 = vmatpush.bf16.msra.mxu2 %v10071_v59  ;;  %3857 = vmatpush.bf16.msra.mxu3 %v10072_v2  ;;  %v10079_v59 = vld [vmem:[#allocation140_spill] sm:$0xff]  ;;  %v10080_v2 = vld [vmem:[#allocation141_spill] sm:$0xff]  ;;  %v3581_v34 = vpop.f32.mrf.mxu2  ;;  %v3594_v60 = vpop.f32.mrf.mxu3 }
 0x3d1   :  { %v10091_v34 = vld [vmem:[#allocation152_spill] sm:$0xff]  ;;  %v10092_v60 = vld [vmem:[#allocation153_spill] sm:$0xff] }
 0x3d3   :  { %3819 = vmatpush.bf16.msra.mxu0 %v10074_v40  ;;  %3832 = vmatpush.bf16.msra.mxu1 %v10075_v25  ;;  %v10083_v40 = vld [vmem:[#allocation144_spill] sm:$0xff]  ;;  %v10084_v25 = vld [vmem:[#allocation145_spill] sm:$0xff] }
 0x3d4   :  { %3845 = vmatpush.bf16.msra.mxu2 %v10076_v29  ;;  %3858 = vmatpush.bf16.msra.mxu3 %v10077_v28  ;;  %v10085_v29 = vld [vmem:[#allocation146_spill] sm:$0xff]  ;;  %v10086_v28 = vld [vmem:[#allocation147_spill] sm:$0xff] }
 0x3d7   :  { %3820 = vmatpush.bf16.msra.mxu0 %v10078_v38  ;;  %3833 = vmatpush.bf16.msra.mxu1 %v10079_v59  ;;  %v10089_v59 = vld [vmem:[#allocation150_spill] sm:$0xff] }
 0x3d8   :  { %3846 = vmatpush.bf16.msra.mxu2 %v10080_v2  ;;  %3859 = vmatpush.bf16.msra.mxu3 %v10081_v16  ;;  %v10090_v2 = vld [vmem:[#allocation151_spill] sm:$0xff] }
 0x3db   :  { %3821 = vmatpush.bf16.msra.mxu0 %v10082_v26  ;;  %3834 = vmatpush.bf16.msra.mxu1 %v10083_v40  ;;  %v10093_v26 = vld [vmem:[#allocation154_spill] sm:$0xff] }
 0x3dc   :  { %3847 = vmatpush.bf16.msra.mxu2 %v10084_v25  ;;  %3860 = vmatpush.bf16.msra.mxu3 %v10085_v29 }
 0x3df   :  { %3822 = vmatpush.bf16.msra.mxu0 %v10086_v28  ;;  %3835 = vmatpush.bf16.msra.mxu1 %v10087_v42  ;;  %v10094_v42 = vld [vmem:[#allocation155_spill] sm:$0xff] }
 0x3e0   :  { %3848 = vmatpush.bf16.msra.mxu2 %v10088_v11  ;;  %3861 = vmatpush.bf16.msra.mxu3 %v10089_v59  ;;  %v10095_v11 = vld [vmem:[#allocation156_spill] sm:$0xff]  ;;  %v10096_v59 = vld [vmem:[#allocation157_spill] sm:$0xff]  ;;  %v10098_v28 = vld [vmem:[#allocation159_spill] sm:$0xff] }
 0x3e2   :  { %3823 = vmatmul.bf16.vlgmr.msra.gmra.mxu0 %v8189_v53  ;;  %3836 = vmatmul.bf16.vlgmr.msra.gmra.mxu1 %v8191_v5 }
 0x3e3   :  { %3867 = vmatpush.bf16.msrb.mxu0 %v10090_v2  ;;  %3880 = vmatpush.bf16.msrb.mxu1 %v10091_v34  ;;  %v10097_v2 = vld [vmem:[#allocation158_spill] sm:$0xff]  ;;  %v3605_v34 = vpop.f32.mrf.mxu0 }
 0x3e4   :  { %3893 = vmatpush.bf16.msrb.mxu2 %v10092_v60  ;;  %3906 = vmatpush.bf16.msrb.mxu3 %v10093_v26  ;;  %v3618_v60 = vpop.f32.mrf.mxu1  ;;  %v3606_v26 = vadd.f32 %v3605_v34, %v3593_v62 }
 0x3e5   :  { %3849 = vmatmul.bf16.vlgmr.msra.gmra.mxu2 %v8430_v27  ;;  %3862 = vmatmul.bf16.vlgmr.msra.gmra.mxu3 %v8432_v30 }
 0x3e6   :  { %v3619_v29 = vadd.f32 %v3618_v60, %v3606_v26  ;;  %v3650_v26 = vmax.f32 %v8722_v57, 0.0  ;;  %v10102_v57 = vld [vmem:[#allocation179_spill] sm:$0xff] }
 0x3e7   :  { %3868 = vmatpush.bf16.msrb.mxu0 %v10094_v42  ;;  %3881 = vmatpush.bf16.msrb.mxu1 %v10095_v11  ;;  %v10099_v42 = vld [vmem:[#allocation164_spill] sm:$0xff] }
 0x3e8   :  { %3894 = vmatpush.bf16.msrb.mxu2 %v10096_v59  ;;  %3907 = vmatpush.bf16.msrb.mxu3 %v10097_v2  ;;  %v10100_v59 = vld [vmem:[#allocation166_spill] sm:$0xff]  ;;  %v3631_v2 = vpop.f32.mrf.mxu2  ;;  %v3644_v11 = vpop.f32.mrf.mxu3 }
 0x3e9   :  { %v3632_v25 = vadd.f32 %v3631_v2, %v3619_v29 }
 0x3eb   :  { %3869 = vmatpush.bf16.msrb.mxu0 %v10098_v28  ;;  %3882 = vmatpush.bf16.msrb.mxu1 %v9942_v14  ;;  %v3607_v28 = vpop.f32.mrf.mxu0  ;;  %v3645_v62 = vadd.f32 %v3644_v11, %v3632_v25  ;;  %v10103_v25 = vld [vmem:[#allocation180_spill] sm:$0xff]  ;;  %v10105_v11 = vld [vmem:[#allocation182_spill] sm:$0xff] }
 0x3ec   :  { %3895 = vmatpush.bf16.msrb.mxu2 %v9785_v6  ;;  %3908 = vmatpush.bf16.msrb.mxu3 %v9943_v21  ;;  %v3620_v40 = vpop.f32.mrf.mxu1  ;;  %v10104_v28 = vld [vmem:[#allocation181_spill] sm:$0xff] }
 0x3ed   :  { %v3651_v34 = vmax.f32 %v3645_v62, 0.0  ;;  %v10107_v62 = vld [vmem:[#allocation184_spill] sm:$0xff] }
 0x3ef   :  { %3870 = vmatpush.bf16.msrb.mxu0 %v9944_v47  ;;  %3883 = vmatpush.bf16.msrb.mxu1 %v10099_v42  ;;  %v3653_v60 = vmax.f32 %v3650_v26, %v3651_v34  ;;  %v10108_v26 = vld [vmem:[#allocation185_spill] sm:$0xff]  ;;  %v10109_v34 = vld [vmem:[#allocation186_spill] sm:$0xff] }
 0x3f0   :  { %3896 = vmatpush.bf16.msrb.mxu2 %v9946_v63  ;;  %3909 = vmatpush.bf16.msrb.mxu3 %v10100_v59  ;;  %v3633_v2 = vpop.f32.mrf.mxu2  ;;  %v3646_v40 = vpop.f32.mrf.mxu3 }
 0x3f1   :  { %v8775_v29 = vmax.f32 %v8653_v35, %v3653_v60  ;;  %v10106_v35 = vld [vmem:[#allocation183_spill] sm:$0xff]  ;;  %v10111_v2 = vld [vmem:[#allocation188_spill] sm:$0xff]  ;;  %v10112_v40 = vld [vmem:[#allocation189_spill] sm:$0xff] }
 0x3f2   :  { %v10110_v60 = vld [vmem:[#allocation187_spill] sm:$0xff] }
 0x3f3   :  { %3871 = vmatpush.bf16.msrb.mxu0 %v9791_v24  ;;  %3884 = vmatpush.bf16.msrb.mxu1 %v9948_v49  ;;  %10101 = vst [vmem:[#allocation76_spill] sm:$0xff] %v8775_v29 }
 0x3f4   :  { %3897 = vmatpush.bf16.msrb.mxu2 %v9949_v19  ;;  %3910 = vmatpush.bf16.msrb.mxu3 %v9794_v32 }
 0x3f7   :  { %3872 = vmatpush.bf16.msrb.mxu0 %v9795_v1  ;;  %3885 = vmatpush.bf16.msrb.mxu1 %v9796_v44 }
 0x3f8   :  { %3898 = vmatpush.bf16.msrb.mxu2 %v9797_v54  ;;  %3911 = vmatpush.bf16.msrb.mxu3 %v9798_v13 }
 0x3fb   :  { %3873 = vmatpush.bf16.msrb.mxu0 %v9800_v7  ;;  %3886 = vmatpush.bf16.msrb.mxu1 %v9801_v45 }
 0x3fc   :  { %3899 = vmatpush.bf16.msrb.mxu2 %v7985_v4  ;;  %3912 = vmatpush.bf16.msrb.mxu3 %v7987_v0  ;;  %v10121_v0 = vld [vmem:[#allocation198_spill] sm:$0xff] }
 0x3ff   :  { %3874 = vmatpush.bf16.msrb.mxu0 %v7991_v15  ;;  %3887 = vmatpush.bf16.msrb.mxu1 %v10102_v57  ;;  %v3668_v29 = vpop.f32.mrf.mxu0 }
 0x400   :  { %3900 = vmatpush.bf16.msrb.mxu2 %v10103_v25  ;;  %3913 = vmatpush.bf16.msrb.mxu3 %v10104_v28  ;;  %v10115_v28 = vld [vmem:[#allocation192_spill] sm:$0xff] }
 0x402   :  { %3875 = vmatmul.bf16.vlgmr.msrb.gmra.mxu0 %v8667_v31  ;;  %3888 = vmatmul.bf16.vlgmr.msrb.gmra.mxu1 %v8669_v46 }
 0x403   :  { %3919 = vmatpush.bf16.msra.mxu0 %v10105_v11  ;;  %3932 = vmatpush.bf16.msra.mxu1 %v10106_v35  ;;  %v10113_v35 = vld [vmem:[#allocation190_spill] sm:$0xff]  ;;  %v3669_v11 = vadd.f32 %v3668_v29, %v8110_v37  ;;  %v10122_v29 = vld [vmem:[#allocation199_spill] sm:$0xff] }
 0x404   :  { %3945 = vmatpush.bf16.msra.mxu2 %v10107_v62  ;;  %3958 = vmatpush.bf16.msra.mxu3 %v10108_v26  ;;  %v3681_v62 = vpop.f32.mrf.mxu1  ;;  %v10114_v26 = vld [vmem:[#allocation191_spill] sm:$0xff] }
 0x405   :  { %3901 = vmatmul.bf16.vlgmr.msrb.gmra.mxu2 %v8189_v53  ;;  %3914 = vmatmul.bf16.vlgmr.msrb.gmra.mxu3 %v8191_v5  ;;  %v10116_v53 = vld [vmem:[#allocation193_spill] sm:$0xff]  ;;  %v3682_v5 = vadd.f32 %v3681_v62, %v3669_v11 }
 0x406   :  { %v10124_v11 = vld [vmem:[#allocation201_spill] sm:$0xff] }
 0x407   :  { %3920 = vmatpush.bf16.msra.mxu0 %v10109_v34  ;;  %3933 = vmatpush.bf16.msra.mxu1 %v10110_v60  ;;  %v10117_v34 = vld [vmem:[#allocation194_spill] sm:$0xff]  ;;  %v10118_v60 = vld [vmem:[#allocation195_spill] sm:$0xff]  ;;  %v3670_v15 = vpop.f32.mrf.mxu0 }
 0x408   :  { %3946 = vmatpush.bf16.msra.mxu2 %v10111_v2  ;;  %3959 = vmatpush.bf16.msra.mxu3 %v10112_v40  ;;  %v10119_v2 = vld [vmem:[#allocation196_spill] sm:$0xff]  ;;  %v10120_v40 = vld [vmem:[#allocation197_spill] sm:$0xff]  ;;  %v3694_v25 = vpop.f32.mrf.mxu2  ;;  %v3707_v57 = vpop.f32.mrf.mxu3 }
 0x40b   :  { %3921 = vmatpush.bf16.msra.mxu0 %v10113_v35  ;;  %3934 = vmatpush.bf16.msra.mxu1 %v10114_v26  ;;  %v3695_v35 = vadd.f32 %v3694_v25, %v3682_v5  ;;  %v10130_v5 = vld [vmem:[#allocation207_spill] sm:$0xff] }
 0x40c   :  { %3947 = vmatpush.bf16.msra.mxu2 %v10115_v28  ;;  %3960 = vmatpush.bf16.msra.mxu3 %v10116_v53  ;;  %v3683_v26 = vpop.f32.mrf.mxu1  ;;  %v10123_v28 = vld [vmem:[#allocation200_spill] sm:$0xff] }
 0x40d   :  { %v3708_v62 = vadd.f32 %v3707_v57, %v3695_v35  ;;  %v10129_v26 = vld [vmem:[#allocation206_spill] sm:$0xff]  ;;  %v10134_v57 = vld [vmem:[#allocation211_spill] sm:$0xff]  ;;  %v10135_v35 = vld [vmem:[#allocation212_spill] sm:$0xff] }
 0x40f   :  { %3922 = vmatpush.bf16.msra.mxu0 %v10117_v34  ;;  %3935 = vmatpush.bf16.msra.mxu1 %v10118_v60  ;;  %v10125_v34 = vld [vmem:[#allocation202_spill] sm:$0xff]  ;;  %v10126_v60 = vld [vmem:[#allocation203_spill] sm:$0xff] }
 0x410   :  { %3948 = vmatpush.bf16.msra.mxu2 %v10119_v2  ;;  %3961 = vmatpush.bf16.msra.mxu3 %v10120_v40  ;;  %v10127_v2 = vld [vmem:[#allocation204_spill] sm:$0xff]  ;;  %v10128_v40 = vld [vmem:[#allocation205_spill] sm:$0xff]  ;;  %v3696_v25 = vpop.f32.mrf.mxu2  ;;  %v3709_v15 = vpop.f32.mrf.mxu3 }
 0x411   :  { %v10138_v25 = vld [vmem:[#allocation25_spill] sm:$0xff]  ;;  %v10139_v15 = vld [vmem:[#allocation26_spill] sm:$0xff] }
 0x413   :  { %3923 = vmatpush.bf16.msra.mxu0 %v10121_v0  ;;  %3936 = vmatpush.bf16.msra.mxu1 %v10122_v29  ;;  %v10131_v29 = vld [vmem:[#allocation208_spill] sm:$0xff] }
 0x414   :  { %3949 = vmatpush.bf16.msra.mxu2 %v10123_v28  ;;  %3962 = vmatpush.bf16.msra.mxu3 %v10124_v11  ;;  %v10132_v28 = vld [vmem:[#allocation209_spill] sm:$0xff]  ;;  %v10133_v11 = vld [vmem:[#allocation210_spill] sm:$0xff] }
 0x417   :  { %3924 = vmatpush.bf16.msra.mxu0 %v10125_v34  ;;  %3937 = vmatpush.bf16.msra.mxu1 %v10126_v60  ;;  %v10136_v60 = vld [vmem:[#allocation213_spill] sm:$0xff] }
 0x418   :  { %3950 = vmatpush.bf16.msra.mxu2 %v10127_v2  ;;  %3963 = vmatpush.bf16.msra.mxu3 %v10128_v40  ;;  %v10137_v2 = vld [vmem:[#allocation24_spill] sm:$0xff] }
 0x41b   :  { %3925 = vmatpush.bf16.msra.mxu0 %v10129_v26  ;;  %3938 = vmatpush.bf16.msra.mxu1 %v10130_v5  ;;  %v10140_v26 = vld [vmem:[#allocation27_spill] sm:$0xff] }
 0x41c   :  { %3951 = vmatpush.bf16.msra.mxu2 %v10131_v29  ;;  %3964 = vmatpush.bf16.msra.mxu3 %v10132_v28  ;;  %v10147_v29 = vld [vmem:[#allocation34_spill] sm:$0xff]  ;;  %v10148_v5 = vld [vmem:[#allocation35_spill] sm:$0xff] }
 0x41f   :  { %3926 = vmatpush.bf16.msra.mxu0 %v10133_v11  ;;  %3939 = vmatpush.bf16.msra.mxu1 %v10134_v57  ;;  %v10141_v57 = vld [vmem:[#allocation28_spill] sm:$0xff] }
 0x420   :  { %3952 = vmatpush.bf16.msra.mxu2 %v10135_v35  ;;  %3965 = vmatpush.bf16.msra.mxu3 %v10136_v60  ;;  %v10142_v35 = vld [vmem:[#allocation29_spill] sm:$0xff]  ;;  %v10143_v60 = vld [vmem:[#allocation30_spill] sm:$0xff]  ;;  %v10145_v11 = vld [vmem:[#allocation32_spill] sm:$0xff] }
 0x422   :  { %3927 = vmatmul.bf16.vlgmr.msra.gmra.mxu0 %v8430_v27  ;;  %3940 = vmatmul.bf16.vlgmr.msra.gmra.mxu1 %v8432_v30 }
 0x423   :  { %3982 = vmatpush.bf16.msrb.mxu0 %v10137_v2  ;;  %3995 = vmatpush.bf16.msrb.mxu1 %v10138_v25  ;;  %v10144_v2 = vld [vmem:[#allocation31_spill] sm:$0xff]  ;;  %v3720_v25 = vpop.f32.mrf.mxu0 }
 0x424   :  { %4008 = vmatpush.bf16.msrb.mxu2 %v10139_v15  ;;  %4021 = vmatpush.bf16.msrb.mxu3 %v10140_v26  ;;  %v3733_v15 = vpop.f32.mrf.mxu1  ;;  %v10146_v26 = vld [vmem:[#allocation33_spill] sm:$0xff]  ;;  %v3721_v28 = vadd.f32 %v3720_v25, %v3708_v62  ;;  %v10153_v25 = vld [vmem:[#allocation40_spill] sm:$0xff] }
 0x425   :  { %3953 = vmatmul.bf16.vlgmr.msra.gmra.mxu2 %v8667_v31  ;;  %3966 = vmatmul.bf16.vlgmr.msra.gmra.mxu3 %v8669_v46 }
 0x426   :  { %v8838_v40 = vadd.f32 %v3733_v15, %v3721_v28  ;;  %v10155_v28 = vld [vmem:[#allocation42_spill] sm:$0xff] }
 0x427   :  { %3983 = vmatpush.bf16.msrb.mxu0 %v10141_v57  ;;  %3996 = vmatpush.bf16.msrb.mxu1 %v10142_v35  ;;  %v10149_v57 = vld [vmem:[#allocation36_spill] sm:$0xff]  ;;  %v10150_v35 = vld [vmem:[#allocation37_spill] sm:$0xff] }
 0x428   :  { %4009 = vmatpush.bf16.msrb.mxu2 %v10143_v60  ;;  %4022 = vmatpush.bf16.msrb.mxu3 %v10144_v2  ;;  %v10151_v60 = vld [vmem:[#allocation38_spill] sm:$0xff]  ;;  %v10152_v2 = vld [vmem:[#allocation39_spill] sm:$0xff]  ;;  %v3746_v34 = vpop.f32.mrf.mxu2  ;;  %v3759_v0 = vpop.f32.mrf.mxu3 }
 0x42b   :  { %3984 = vmatpush.bf16.msrb.mxu0 %v10145_v11  ;;  %3997 = vmatpush.bf16.msrb.mxu1 %v10146_v26  ;;  %v3747_v11 = vadd.f32 %v3746_v34, %v10000_v36  ;;  %v3722_v26 = vpop.f32.mrf.mxu0 }
 0x42c   :  { %4010 = vmatpush.bf16.msrb.mxu2 %v10147_v29  ;;  %4023 = vmatpush.bf16.msrb.mxu3 %v10148_v5  ;;  %v3735_v62 = vpop.f32.mrf.mxu1  ;;  %v10154_v29 = vld [vmem:[#allocation41_spill] sm:$0xff]  ;;  %v10156_v5 = vld [vmem:[#allocation43_spill] sm:$0xff] }
 0x42d   :  { %v3760_v15 = vadd.f32 %v3759_v0, %v3747_v11  ;;  %v10160_v26 = vld [vmem:[#allocation49_spill] sm:$0xff]  ;;  %v10161_v62 = vld [vmem:[#allocation50_spill] sm:$0xff]  ;;  %v10166_v11 = vld [vmem:[#allocation55_spill] sm:$0xff] }
 0x42e   :  { %v10164_v0 = vld [vmem:[#allocation53_spill] sm:$0xff] }
 0x42f   :  { %3985 = vmatpush.bf16.msrb.mxu0 %v10149_v57  ;;  %3998 = vmatpush.bf16.msrb.mxu1 %v10150_v35  ;;  %v10157_v57 = vld [vmem:[#allocation45_spill] sm:$0xff]  ;;  %v10158_v35 = vld [vmem:[#allocation46_spill] sm:$0xff] }
 0x430   :  { %4011 = vmatpush.bf16.msrb.mxu2 %v10151_v60  ;;  %4024 = vmatpush.bf16.msrb.mxu3 %v10152_v2  ;;  %v3748_v34 = vpop.f32.mrf.mxu2  ;;  %v3761_v60 = vpop.f32.mrf.mxu3  ;;  %v10159_v2 = vld [vmem:[#allocation48_spill] sm:$0xff] }
 0x431   :  { %v10172_v34 = vld [vmem:[#allocation61_spill] sm:$0xff]  ;;  %v10173_v60 = vld [vmem:[#allocation62_spill] sm:$0xff] }
 0x433   :  { %3986 = vmatpush.bf16.msrb.mxu0 %v10153_v25  ;;  %3999 = vmatpush.bf16.msrb.mxu1 %v10154_v29  ;;  %v10162_v25 = vld [vmem:[#allocation51_spill] sm:$0xff]  ;;  %v10163_v29 = vld [vmem:[#allocation52_spill] sm:$0xff] }
 0x434   :  { %4012 = vmatpush.bf16.msrb.mxu2 %v10155_v28  ;;  %4025 = vmatpush.bf16.msrb.mxu3 %v10156_v5  ;;  %v10167_v28 = vld [vmem:[#allocation56_spill] sm:$0xff]  ;;  %v10169_v5 = vld [vmem:[#allocation58_spill] sm:$0xff] }
 0x437   :  { %3987 = vmatpush.bf16.msrb.mxu0 %v10005_v43  ;;  %4000 = vmatpush.bf16.msrb.mxu1 %v10157_v57  ;;  %v10165_v43 = vld [vmem:[#allocation54_spill] sm:$0xff]  ;;  %v10170_v57 = vld [vmem:[#allocation59_spill] sm:$0xff] }
 0x438   :  { %4013 = vmatpush.bf16.msrb.mxu2 %v10158_v35  ;;  %4026 = vmatpush.bf16.msrb.mxu3 %v10008_v23  ;;  %v10168_v23 = vld [vmem:[#allocation57_spill] sm:$0xff]  ;;  %v10171_v35 = vld [vmem:[#allocation60_spill] sm:$0xff] }
 0x43b   :  { %3988 = vmatpush.bf16.msrb.mxu0 %v10159_v2  ;;  %4001 = vmatpush.bf16.msrb.mxu1 %v10160_v26  ;;  %v10174_v2 = vld [vmem:[#allocation63_spill] sm:$0xff] }
 0x43c   :  { %4014 = vmatpush.bf16.msrb.mxu2 %v10161_v62  ;;  %4027 = vmatpush.bf16.msrb.mxu3 %v10162_v25  ;;  %v10175_v25 = vld [vmem:[#allocation64_spill] sm:$0xff] }
 0x43f   :  { %3989 = vmatpush.bf16.msrb.mxu0 %v10163_v29  ;;  %4002 = vmatpush.bf16.msrb.mxu1 %v10164_v0  ;;  %v3772_v26 = vpop.f32.mrf.mxu0  ;;  %v3785_v62 = vpop.f32.mrf.mxu1 }
 0x440   :  { %4015 = vmatpush.bf16.msrb.mxu2 %v10165_v43  ;;  %4028 = vmatpush.bf16.msrb.mxu3 %v10166_v11  ;;  %v3773_v29 = vadd.f32 %v3772_v26, %v3760_v15  ;;  %v10185_v15 = vld [vmem:[#allocation91_spill] sm:$0xff] }
 0x441   :  { %v10189_v26 = vld [vmem:[#allocation95_spill] sm:$0xff] }
 0x442   :  { %3990 = vmatmul.bf16.vlgmr.msrb.gmra.mxu0 %v8430_v27  ;;  %4003 = vmatmul.bf16.vlgmr.msrb.gmra.mxu1 %v8432_v30  ;;  %v3786_v0 = vadd.f32 %v3785_v62, %v3773_v29  ;;  %v10190_v62 = vld [vmem:[#allocation96_spill] sm:$0xff]  ;;  %v10191_v29 = vld [vmem:[#allocation97_spill] sm:$0xff] }
 0x443   :  { %4034 = vmatpush.bf16.msra.mxu0 %v10167_v28  ;;  %4047 = vmatpush.bf16.msra.mxu1 %v10168_v23 }
 0x444   :  { %4060 = vmatpush.bf16.msra.mxu2 %v10169_v5  ;;  %4073 = vmatpush.bf16.msra.mxu3 %v10170_v57  ;;  %v10186_v57 = vld [vmem:[#allocation92_spill] sm:$0xff] }
 0x445   :  { %4016 = vmatmul.bf16.vlgmr.msrb.gmra.mxu2 %v8667_v31  ;;  %4029 = vmatmul.bf16.vlgmr.msrb.gmra.mxu3 %v8669_v46 }
 0x447   :  { %4035 = vmatpush.bf16.msra.mxu0 %v10171_v35  ;;  %4048 = vmatpush.bf16.msra.mxu1 %v10172_v34  ;;  %v3774_v23 = vpop.f32.mrf.mxu0  ;;  %v3787_v5 = vpop.f32.mrf.mxu1  ;;  %v10187_v35 = vld [vmem:[#allocation93_spill] sm:$0xff]  ;;  %v10188_v34 = vld [vmem:[#allocation94_spill] sm:$0xff] }
 0x448   :  { %4061 = vmatpush.bf16.msra.mxu2 %v10173_v60  ;;  %4074 = vmatpush.bf16.msra.mxu3 %v10174_v2  ;;  %v3798_v43 = vpop.f32.mrf.mxu2  ;;  %v3811_v11 = vpop.f32.mrf.mxu3  ;;  %v10195_v23 = vld [vmem:[#allocation101_spill] sm:$0xff]  ;;  %v10196_v5 = vld [vmem:[#allocation102_spill] sm:$0xff] }
 0x449   :  { %v3799_v28 = vadd.f32 %v3798_v43, %v3786_v0  ;;  %v10192_v0 = vld [vmem:[#allocation98_spill] sm:$0xff] }
 0x44b   :  { %4036 = vmatpush.bf16.msra.mxu0 %v10175_v25  ;;  %4049 = vmatpush.bf16.msra.mxu1 %v9872_v48 }
 0x44c   :  { %4062 = vmatpush.bf16.msra.mxu2 %v9718_v51  ;;  %4075 = vmatpush.bf16.msra.mxu3 %v9873_v12  ;;  %v3812_v51 = vadd.f32 %v3811_v11, %v3799_v28  ;;  %v10193_v11 = vld [vmem:[#allocation99_spill] sm:$0xff]  ;;  %v10194_v28 = vld [vmem:[#allocation100_spill] sm:$0xff] }
 0x44e   :  { %v3972_v12 = vmax.f32 %v3812_v51, 0.0 }
 0x44f   :  { %4037 = vmatpush.bf16.msra.mxu0 %v9874_v9  ;;  %4050 = vmatpush.bf16.msra.mxu1 %v10026_v50  ;;  %v3971_v9 = vmax.f32 %v8838_v40, 0.0  ;;  %v10182_v50 = vld [vmem:[#allocation88_spill] sm:$0xff]  ;;  %v10184_v40 = vld [vmem:[#allocation90_spill] sm:$0xff] }
 0x450   :  { %4063 = vmatpush.bf16.msra.mxu2 %v9876_v20  ;;  %4076 = vmatpush.bf16.msra.mxu3 %v10027_v10  ;;  %v3813_v20 = vpop.f32.mrf.mxu3  ;;  %v10179_v10 = vld [vmem:[#allocation85_spill] sm:$0xff] }
 0x451   :  { %v8888_v48 = vmax.f32 %v3971_v9, %v3972_v12 }
 0x453   :  { %4038 = vmatpush.bf16.msra.mxu0 %v9724_v52  ;;  %4051 = vmatpush.bf16.msra.mxu1 %v9878_v56  ;;  %v3800_v52 = vpop.f32.mrf.mxu2  ;;  %v3978_v56 = vld [vmem:[#allocation2 + $0x18] sm:$0x3] }
 0x454   :  { %4064 = vmatpush.bf16.msra.mxu2 %v9879_v17  ;;  %4077 = vmatpush.bf16.msra.mxu3 %v9727_v3  ;;  %v10176_v3 = vld [vmem:[#allocation82_spill] sm:$0xff]  ;;  %v10177_v17 = vld [vmem:[#allocation83_spill] sm:$0xff] }
 0x457   :  { %4039 = vmatpush.bf16.msra.mxu0 %v9728_v41  ;;  %4052 = vmatpush.bf16.msra.mxu1 %v9729_v39  ;;  %v3979_v41 = vld [vmem:[#allocation2 + $0x1a] sm:$0x3] }
 0x458   :  { %4065 = vmatpush.bf16.msra.mxu2 %v9880_v8  ;;  %4078 = vmatpush.bf16.msra.mxu3 %v9731_v55  ;;  %v10178_v39 = vld [vmem:[#allocation84_spill] sm:$0xff]  ;;  %v10180_v8 = vld [vmem:[#allocation86_spill] sm:$0xff]  ;;  %v10181_v55 = vld [vmem:[#allocation87_spill] sm:$0xff] }
 0x45b   :  { %4040 = vmatpush.bf16.msra.mxu0 %v9732_v58  ;;  %4053 = vmatpush.bf16.msra.mxu1 %v9733_v61  ;;  %v8902_v58 = vpack.c.bf16 %v3978_v56, %v3978_v56  ;;  %v8904_v61 = vpack.c.bf16 %v3979_v41, %v3979_v41  ;;  %v10198_v56 = vld [vmem:[#allocation104_spill] sm:$0xff]  ;;  %v10199_v41 = vld [vmem:[#allocation105_spill] sm:$0xff] }
 0x45c   :  { %4066 = vmatpush.bf16.msra.mxu2 %v7595_v33  ;;  %4079 = vmatpush.bf16.msra.mxu3 %v10176_v3  ;;  %v10183_v33 = vld [vmem:[#allocation89_spill] sm:$0xff]  ;;  %v10197_v3 = vld [vmem:[#allocation103_spill] sm:$0xff] }
 0x45f   :  { %4041 = vmatpush.bf16.msra.mxu0 %v10177_v17  ;;  %4054 = vmatpush.bf16.msra.mxu1 %v10178_v39  ;;  %v3824_v60 = vpop.f32.mrf.mxu0  ;;  %v3837_v2 = vpop.f32.mrf.mxu1  ;;  %v10200_v17 = vld [vmem:[#allocation106_spill] sm:$0xff] }
 0x460   :  { %4067 = vmatpush.bf16.msra.mxu2 %v10179_v10  ;;  %4080 = vmatpush.bf16.msra.mxu3 %v10180_v8  ;;  %v3825_v25 = vadd.f32 %v3824_v60, %v8204_v18  ;;  %v10201_v10 = vld [vmem:[#allocation107_spill] sm:$0xff]  ;;  %v10202_v8 = vld [vmem:[#allocation108_spill] sm:$0xff] }
 0x461   :  { %v10209_v60 = vld [vmem:[#allocation115_spill] sm:$0xff] }
 0x462   :  { %4042 = vmatmul.bf16.vlgmr.msra.gmra.mxu0 %v8902_v58  ;;  %4055 = vmatmul.bf16.vlgmr.msra.gmra.mxu1 %v8904_v61  ;;  %v3838_v43 = vadd.f32 %v3837_v2, %v3825_v25  ;;  %v10210_v2 = vld [vmem:[#allocation116_spill] sm:$0xff]  ;;  %v10213_v25 = vld [vmem:[#allocation119_spill] sm:$0xff] }
 0x463   :  { %4086 = vmatpush.bf16.msrb.mxu0 %v10181_v55  ;;  %4099 = vmatpush.bf16.msrb.mxu1 %v10182_v50  ;;  %v10203_v55 = vld [vmem:[#allocation109_spill] sm:$0xff]  ;;  %v10204_v50 = vld [vmem:[#allocation110_spill] sm:$0xff] }
 0x464   :  { %4112 = vmatpush.bf16.msrb.mxu2 %v10183_v33  ;;  %4125 = vmatpush.bf16.msrb.mxu3 %v10184_v40 }
 0x465   :  { %4068 = vmatmul.bf16.vlgmr.msra.gmra.mxu2 %v8430_v27  ;;  %4081 = vmatmul.bf16.vlgmr.msra.gmra.mxu3 %v8432_v30 }
 0x467   :  { %4087 = vmatpush.bf16.msrb.mxu0 %v10185_v15  ;;  %4100 = vmatpush.bf16.msrb.mxu1 %v10186_v57  ;;  %v3826_v52 = vpop.f32.mrf.mxu0  ;;  %v3839_v20 = vpop.f32.mrf.mxu1  ;;  %v10205_v15 = vld [vmem:[#allocation111_spill] sm:$0xff]  ;;  %v10206_v57 = vld [vmem:[#allocation112_spill] sm:$0xff] }
 0x468   :  { %4113 = vmatpush.bf16.msrb.mxu2 %v10187_v35  ;;  %4126 = vmatpush.bf16.msrb.mxu3 %v10188_v34  ;;  %v3850_v51 = vpop.f32.mrf.mxu2  ;;  %v3863_v9 = vpop.f32.mrf.mxu3  ;;  %v10207_v35 = vld [vmem:[#allocation113_spill] sm:$0xff]  ;;  %v10208_v34 = vld [vmem:[#allocation114_spill] sm:$0xff]  ;;  %v10222_v52 = vld [vmem:[#allocation128_spill] sm:$0xff] }
 0x469   :  { %v3851_v12 = vadd.f32 %v3850_v51, %v3838_v43  ;;  %v10216_v43 = vld [vmem:[#allocation122_spill] sm:$0xff] }
 0x46b   :  { %4088 = vmatpush.bf16.msrb.mxu0 %v10189_v26  ;;  %4101 = vmatpush.bf16.msrb.mxu1 %v10190_v62  ;;  %v3864_v39 = vadd.f32 %v3863_v9, %v3851_v12  ;;  %v10211_v26 = vld [vmem:[#allocation117_spill] sm:$0xff]  ;;  %v10212_v62 = vld [vmem:[#allocation118_spill] sm:$0xff]  ;;  %v10221_v12 = vld [vmem:[#allocation127_spill] sm:$0xff] }
 0x46c   :  { %4114 = vmatpush.bf16.msrb.mxu2 %v10191_v29  ;;  %4127 = vmatpush.bf16.msrb.mxu3 %v10192_v0  ;;  %v10214_v29 = vld [vmem:[#allocation120_spill] sm:$0xff]  ;;  %v10215_v0 = vld [vmem:[#allocation121_spill] sm:$0xff] }
 0x46f   :  { %4089 = vmatpush.bf16.msrb.mxu0 %v10193_v11  ;;  %4102 = vmatpush.bf16.msrb.mxu1 %v10194_v28  ;;  %v10217_v11 = vld [vmem:[#allocation123_spill] sm:$0xff]  ;;  %v10218_v28 = vld [vmem:[#allocation124_spill] sm:$0xff] }
 0x470   :  { %4115 = vmatpush.bf16.msrb.mxu2 %v10195_v23  ;;  %4128 = vmatpush.bf16.msrb.mxu3 %v10196_v5  ;;  %v3852_v33 = vpop.f32.mrf.mxu2  ;;  %v3865_v40 = vpop.f32.mrf.mxu3  ;;  %v10219_v23 = vld [vmem:[#allocation125_spill] sm:$0xff]  ;;  %v10220_v5 = vld [vmem:[#allocation126_spill] sm:$0xff] }
 0x473   :  { %4090 = vmatpush.bf16.msrb.mxu0 %v10197_v3  ;;  %4103 = vmatpush.bf16.msrb.mxu1 %v10198_v56  ;;  %v10223_v3 = vld [vmem:[#allocation129_spill] sm:$0xff]  ;;  %v10224_v56 = vld [vmem:[#allocation130_spill] sm:$0xff] }
 0x474   :  { %4116 = vmatpush.bf16.msrb.mxu2 %v10199_v41  ;;  %4129 = vmatpush.bf16.msrb.mxu3 %v10200_v17  ;;  %v10225_v17 = vld [vmem:[#allocation131_spill] sm:$0xff] }
 0x477   :  { %4091 = vmatpush.bf16.msrb.mxu0 %v10201_v10  ;;  %4104 = vmatpush.bf16.msrb.mxu1 %v10202_v8  ;;  %v10226_v10 = vld [vmem:[#allocation132_spill] sm:$0xff]  ;;  %v10227_v8 = vld [vmem:[#allocation133_spill] sm:$0xff] }
 0x478   :  { %4117 = vmatpush.bf16.msrb.mxu2 %v10203_v55  ;;  %4130 = vmatpush.bf16.msrb.mxu3 %v10204_v50  ;;  %v10228_v55 = vld [vmem:[#allocation134_spill] sm:$0xff] }
 0x47b   :  { %4092 = vmatpush.bf16.msrb.mxu0 %v10205_v15  ;;  %4105 = vmatpush.bf16.msrb.mxu1 %v10206_v57  ;;  %v10229_v57 = vld [vmem:[#allocation135_spill] sm:$0xff] }
 0x47c   :  { %4118 = vmatpush.bf16.msrb.mxu2 %v10207_v35  ;;  %4131 = vmatpush.bf16.msrb.mxu3 %v10208_v34  ;;  %v10230_v35 = vld [vmem:[#allocation136_spill] sm:$0xff]  ;;  %v10231_v34 = vld [vmem:[#allocation137_spill] sm:$0xff] }
 0x47f   :  { %4093 = vmatpush.bf16.msrb.mxu0 %v10209_v60  ;;  %4106 = vmatpush.bf16.msrb.mxu1 %v10210_v2  ;;  %v3876_v51 = vpop.f32.mrf.mxu0  ;;  %v3889_v9 = vpop.f32.mrf.mxu1  ;;  %v10232_v60 = vld [vmem:[#allocation138_spill] sm:$0xff] }
 0x480   :  { %4119 = vmatpush.bf16.msrb.mxu2 %v10211_v26  ;;  %4132 = vmatpush.bf16.msrb.mxu3 %v10212_v62  ;;  %v3877_v20 = vadd.f32 %v3876_v51, %v3864_v39  ;;  %v10233_v26 = vld [vmem:[#allocation140_spill] sm:$0xff]  ;;  %v10234_v62 = vld [vmem:[#allocation141_spill] sm:$0xff]  ;;  %v10242_v51 = vld [vmem:[#allocation150_spill] sm:$0xff] }
 0x482   :  { %4094 = vmatmul.bf16.vlgmr.msrb.gmra.mxu0 %v8667_v31  ;;  %4107 = vmatmul.bf16.vlgmr.msrb.gmra.mxu1 %v8669_v46  ;;  %v8957_v41 = vadd.f32 %v3889_v9, %v3877_v20  ;;  %v10243_v9 = vld [vmem:[#allocation151_spill] sm:$0xff] }
 0x483   :  { %4138 = vmatpush.bf16.msra.mxu0 %v10213_v25  ;;  %4151 = vmatpush.bf16.msra.mxu1 %v10214_v29  ;;  %v10247_v20 = vld [vmem:[#allocation155_spill] sm:$0xff] }
 0x484   :  { %4164 = vmatpush.bf16.msra.mxu2 %v10215_v0  ;;  %4177 = vmatpush.bf16.msra.mxu3 %v10216_v43  ;;  %v10235_v0 = vld [vmem:[#allocation143_spill] sm:$0xff]  ;;  %v10236_v43 = vld [vmem:[#allocation144_spill] sm:$0xff] }
 0x485   :  { %4120 = vmatmul.bf16.vlgmr.msrb.gmra.mxu2 %v8902_v58  ;;  %4133 = vmatmul.bf16.vlgmr.msrb.gmra.mxu3 %v8904_v61 }
 0x487   :  { %4139 = vmatpush.bf16.msra.mxu0 %v10217_v11  ;;  %4152 = vmatpush.bf16.msra.mxu1 %v10218_v28  ;;  %v3878_v15 = vpop.f32.mrf.mxu0  ;;  %v3891_v39 = vpop.f32.mrf.mxu1  ;;  %v10237_v11 = vld [vmem:[#allocation145_spill] sm:$0xff]  ;;  %v10238_v28 = vld [vmem:[#allocation146_spill] sm:$0xff] }
 0x488   :  { %4165 = vmatpush.bf16.msra.mxu2 %v10219_v23  ;;  %4178 = vmatpush.bf16.msra.mxu3 %v10220_v5  ;;  %v3902_v50 = vpop.f32.mrf.mxu2  ;;  %v3915_v33 = vpop.f32.mrf.mxu3  ;;  %v10239_v23 = vld [vmem:[#allocation147_spill] sm:$0xff]  ;;  %v10240_v5 = vld [vmem:[#allocation148_spill] sm:$0xff] }
 0x489   :  { %v3903_v40 = vadd.f32 %v3902_v50, %v10073_v22 }
 0x48b   :  { %4140 = vmatpush.bf16.msra.mxu0 %v10221_v12  ;;  %4153 = vmatpush.bf16.msra.mxu1 %v10222_v52  ;;  %v3916_v2 = vadd.f32 %v3915_v33, %v3903_v40  ;;  %v10245_v12 = vld [vmem:[#allocation153_spill] sm:$0xff]  ;;  %v10246_v52 = vld [vmem:[#allocation154_spill] sm:$0xff] }
 0x48c   :  { %4166 = vmatpush.bf16.msra.mxu2 %v10223_v3  ;;  %4179 = vmatpush.bf16.msra.mxu3 %v10224_v56  ;;  %v10248_v3 = vld [vmem:[#allocation156_spill] sm:$0xff]  ;;  %v10249_v56 = vld [vmem:[#allocation157_spill] sm:$0xff] }
 0x48f   :  { %4141 = vmatpush.bf16.msra.mxu0 %v10225_v17  ;;  %4154 = vmatpush.bf16.msra.mxu1 %v10226_v10  ;;  %v10250_v17 = vld [vmem:[#allocation158_spill] sm:$0xff] }
 0x490   :  { %4167 = vmatpush.bf16.msra.mxu2 %v10227_v8  ;;  %4180 = vmatpush.bf16.msra.mxu3 %v10228_v55  ;;  %v3904_v25 = vpop.f32.mrf.mxu2  ;;  %v3917_v29 = vpop.f32.mrf.mxu3  ;;  %v10251_v55 = vld [vmem:[#allocation159_spill] sm:$0xff] }
 0x491   :  { %v10267_v25 = vld [vmem:[#allocation192_spill] sm:$0xff]  ;;  %v10269_v29 = vld [vmem:[#allocation195_spill] sm:$0xff] }
 0x493   :  { %4142 = vmatpush.bf16.msra.mxu0 %v10229_v57  ;;  %4155 = vmatpush.bf16.msra.mxu1 %v10230_v35 }
 0x494   :  { %4168 = vmatpush.bf16.msra.mxu2 %v10231_v34  ;;  %4181 = vmatpush.bf16.msra.mxu3 %v10232_v60 }
 0x497   :  { %4143 = vmatpush.bf16.msra.mxu0 %v10078_v38  ;;  %4156 = vmatpush.bf16.msra.mxu1 %v10233_v26  ;;  %v10241_v38 = vld [vmem:[#allocation149_spill] sm:$0xff]  ;;  %v10266_v26 = vld [vmem:[#allocation191_spill] sm:$0xff] }
 0x498   :  { %4169 = vmatpush.bf16.msra.mxu2 %v10234_v62  ;;  %4182 = vmatpush.bf16.msra.mxu3 %v10081_v16  ;;  %v10244_v16 = vld [vmem:[#allocation152_spill] sm:$0xff] }
 0x49b   :  { %4144 = vmatpush.bf16.msra.mxu0 %v10235_v0  ;;  %4157 = vmatpush.bf16.msra.mxu1 %v10236_v43  ;;  %v10270_v0 = vld [vmem:[#allocation196_spill] sm:$0xff]  ;;  %v10271_v43 = vld [vmem:[#allocation197_spill] sm:$0xff] }
 0x49c   :  { %4170 = vmatpush.bf16.msra.mxu2 %v10237_v11  ;;  %4183 = vmatpush.bf16.msra.mxu3 %v10238_v28 }
 0x49f   :  { %4145 = vmatpush.bf16.msra.mxu0 %v10239_v23  ;;  %4158 = vmatpush.bf16.msra.mxu1 %v10240_v5  ;;  %v3928_v10 = vpop.f32.mrf.mxu0  ;;  %v3941_v8 = vpop.f32.mrf.mxu1 }
 0x4a0   :  { %4171 = vmatpush.bf16.msra.mxu2 %v10241_v38  ;;  %4184 = vmatpush.bf16.msra.mxu3 %v10242_v51  ;;  %v3929_v50 = vadd.f32 %v3928_v10, %v3916_v2  ;;  %v10265_v2 = vld [vmem:[#allocation190_spill] sm:$0xff] }
 0x4a1   :  { %v10272_v51 = vld [vmem:[#allocation198_spill] sm:$0xff] }
 0x4a2   :  { %4146 = vmatmul.bf16.vlgmr.msra.gmra.mxu0 %v8430_v27  ;;  %4159 = vmatmul.bf16.vlgmr.msra.gmra.mxu1 %v8432_v30  ;;  %v3942_v33 = vadd.f32 %v3941_v8, %v3929_v50  ;;  %v10280_v10 = vld [vmem:[#allocation206_spill] sm:$0xff]  ;;  %v10281_v8 = vld [vmem:[#allocation207_spill] sm:$0xff]  ;;  %v10283_v50 = vld [vmem:[#allocation209_spill] sm:$0xff] }
 0x4a3   :  { %4190 = vmatpush.bf16.msrb.mxu0 %v10243_v9  ;;  %4203 = vmatpush.bf16.msrb.mxu1 %v10244_v16  ;;  %v10274_v9 = vld [vmem:[#allocation200_spill] sm:$0xff] }
 0x4a4   :  { %4216 = vmatpush.bf16.msrb.mxu2 %v10245_v12  ;;  %4229 = vmatpush.bf16.msrb.mxu3 %v10246_v52  ;;  %v10276_v12 = vld [vmem:[#allocation202_spill] sm:$0xff]  ;;  %v10277_v52 = vld [vmem:[#allocation203_spill] sm:$0xff] }
 0x4a5   :  { %4172 = vmatmul.bf16.vlgmr.msra.gmra.mxu2 %v8667_v31  ;;  %4185 = vmatmul.bf16.vlgmr.msra.gmra.mxu3 %v8669_v46 }
 0x4a7   :  { %4191 = vmatpush.bf16.msrb.mxu0 %v10247_v20  ;;  %4204 = vmatpush.bf16.msrb.mxu1 %v10248_v3  ;;  %v3930_v57 = vpop.f32.mrf.mxu0  ;;  %v3943_v35 = vpop.f32.mrf.mxu1  ;;  %v10278_v20 = vld [vmem:[#allocation204_spill] sm:$0xff]  ;;  %v10279_v3 = vld [vmem:[#allocation205_spill] sm:$0xff] }
 0x4a8   :  { %4217 = vmatpush.bf16.msrb.mxu2 %v10249_v56  ;;  %4230 = vmatpush.bf16.msrb.mxu3 %v10250_v17  ;;  %v3954_v40 = vpop.f32.mrf.mxu2  ;;  %v3967_v15 = vpop.f32.mrf.mxu3  ;;  %v10284_v57 = vld [vmem:[#allocation210_spill] sm:$0xff]  ;;  %v10285_v35 = vld [vmem:[#allocation211_spill] sm:$0xff] }
 0x4a9   :  { %v3955_v39 = vadd.f32 %v3954_v40, %v3942_v33  ;;  %v6852_v33 = vld [vmem:[#allocation12 + $0x38] sm:$0xff] }
 0x4aa   :  { %v6860_v40 = vld [vmem:[#allocation12 + $0x78] sm:$0xff] }
 0x4ab   :  { %4192 = vmatpush.bf16.msrb.mxu0 %v10251_v55  ;;  %4205 = vmatpush.bf16.msrb.mxu1 %v9942_v14  ;;  %v10282_v55 = vld [vmem:[#allocation208_spill] sm:$0xff] }
 0x4ac   :  { %4218 = vmatpush.bf16.msrb.mxu2 %v9785_v6  ;;  %4231 = vmatpush.bf16.msrb.mxu3 %v9943_v21  ;;  %v3968_v21 = vadd.f32 %v3967_v15, %v3955_v39  ;;  %v3973_v6 = vmax.f32 %v8957_v41, 0.0  ;;  %v10264_v41 = vld [vmem:[#allocation189_spill] sm:$0xff]  ;;  %v6868_v15 = vld [vmem:[#allocation12 + $0xb8] sm:$0xff] }
 0x4ad   :  { %v6876_v39 = vld [vmem:[#allocation12 + $0xf8] sm:$0xff] }
 0x4af   :  { %4193 = vmatpush.bf16.msrb.mxu0 %v9944_v47  ;;  %4206 = vmatpush.bf16.msrb.mxu1 %v10099_v42  ;;  %v3974_v47 = vmax.f32 %v3968_v21, 0.0  ;;  %v10259_v42 = vld [vmem:[#allocation184_spill] sm:$0xff] }
 0x4b0   :  { %4219 = vmatpush.bf16.msrb.mxu2 %v9946_v63  ;;  %4232 = vmatpush.bf16.msrb.mxu3 %v10100_v59  ;;  %v3969_v63 = vpop.f32.mrf.mxu3  ;;  %v10258_v59 = vld [vmem:[#allocation183_spill] sm:$0xff]  ;;  %v10286_v21 = vld [vmem:[#allocation212_spill] sm:$0xff] }
 0x4b1   :  { %v3976_v14 = vmax.f32 %v3973_v6, %v3974_v47  ;;  %v10287_v6 = vld [vmem:[#allocation213_spill] sm:$0xff] }
 0x4b2   :  { %v6851_v47 = vld [vmem:[#allocation12 + $0x30] sm:$0xff] }
 0x4b3   :  { %4194 = vmatpush.bf16.msrb.mxu0 %v9791_v24  ;;  %4207 = vmatpush.bf16.msrb.mxu1 %v9948_v49  ;;  %v3956_v24 = vpop.f32.mrf.mxu2  ;;  %v9010_v49 = vmax.f32 %v8888_v48, %v3976_v14  ;;  %v10263_v48 = vld [vmem:[#allocation188_spill] sm:$0xff]  ;;  %v6859_v14 = vld [vmem:[#allocation12 + $0x70] sm:$0xff] }
 0x4b4   :  { %4220 = vmatpush.bf16.msrb.mxu2 %v9949_v19  ;;  %4233 = vmatpush.bf16.msrb.mxu3 %v9794_v32  ;;  %v10252_v32 = vld [vmem:[#allocation177_spill] sm:$0xff]  ;;  %v10257_v19 = vld [vmem:[#allocation182_spill] sm:$0xff] }
 0x4b5   :  { %v6867_v24 = vld [vmem:[#allocation12 + $0xb0] sm:$0xff] }
 0x4b6   :  { %v6875_v63 = vld [vmem:[#allocation12 + $0xf0] sm:$0xff] }
 0x4b7   :  { %4195 = vmatpush.bf16.msrb.mxu0 %v9795_v1  ;;  %4208 = vmatpush.bf16.msrb.mxu1 %v9796_v44  ;;  %v10253_v1 = vld [vmem:[#allocation178_spill] sm:$0xff]  ;;  %v10254_v44 = vld [vmem:[#allocation179_spill] sm:$0xff] }
 0x4b8   :  { %4221 = vmatpush.bf16.msrb.mxu2 %v9797_v54  ;;  %4234 = vmatpush.bf16.msrb.mxu3 %v9798_v13  ;;  %v10255_v54 = vld [vmem:[#allocation180_spill] sm:$0xff]  ;;  %v10256_v13 = vld [vmem:[#allocation181_spill] sm:$0xff] }
 0x4bb   :  { %4196 = vmatpush.bf16.msrb.mxu0 %v9800_v7  ;;  %4209 = vmatpush.bf16.msrb.mxu1 %v9801_v45  ;;  %v10260_v7 = vld [vmem:[#allocation185_spill] sm:$0xff]  ;;  %v10262_v45 = vld [vmem:[#allocation187_spill] sm:$0xff] }
 0x4bc   :  { %4222 = vmatpush.bf16.msrb.mxu2 %v7985_v4  ;;  %4235 = vmatpush.bf16.msrb.mxu3 %v10252_v32  ;;  %v10261_v4 = vld [vmem:[#allocation186_spill] sm:$0xff]  ;;  %v6850_v32 = vld [vmem:[#allocation12 + $0x28] sm:$0xff] }
 0x4bf   :  { %4197 = vmatpush.bf16.msrb.mxu0 %v10253_v1  ;;  %4210 = vmatpush.bf16.msrb.mxu1 %v10254_v44  ;;  %v3991_v34 = vpop.f32.mrf.mxu0  ;;  %v4004_v60 = vpop.f32.mrf.mxu1  ;;  %v6858_v1 = vld [vmem:[#allocation12 + $0x68] sm:$0xff] }
 0x4c0   :  { %4223 = vmatpush.bf16.msrb.mxu2 %v10255_v54  ;;  %4236 = vmatpush.bf16.msrb.mxu3 %v10256_v13  ;;  %v3992_v62 = vadd.f32 %v3991_v34, %v8110_v37  ;;  %v10273_v37 = vld [vmem:[#allocation199_spill] sm:$0xff]  ;;  %v6866_v44 = vld [vmem:[#allocation12 + $0xa8] sm:$0xff] }
 0x4c1   :  { %v6874_v54 = vld [vmem:[#allocation12 + $0xe8] sm:$0xff] }
 0x4c2   :  { %4198 = vmatmul.bf16.vlgmr.msrb.gmra.mxu0 %v8902_v58  ;;  %4211 = vmatmul.bf16.vlgmr.msrb.gmra.mxu1 %v8904_v61 }
 0x4c3   :  { %4242 = vmatpush.bf16.msra.mxu0 %v10257_v19  ;;  %4255 = vmatpush.bf16.msra.mxu1 %v10258_v59 }
 0x4c4   :  { %4268 = vmatpush.bf16.msra.mxu2 %v10259_v42  ;;  %4281 = vmatpush.bf16.msra.mxu3 %v10260_v7  ;;  %v6857_v42 = vld [vmem:[#allocation12 + $0x60] sm:$0xff]  ;;  %v6848_v7 = vld [vmem:[#allocation12 + $0x18] sm:$0xff] }
 0x4c5   :  { %4224 = vmatmul.bf16.vlgmr.msrb.gmra.mxu2 %v8430_v27  ;;  %4237 = vmatmul.bf16.vlgmr.msrb.gmra.mxu3 %v8432_v30  ;;  %v4005_v27 = vadd.f32 %v4004_v60, %v3992_v62  ;;  %v10268_v30 = vld [vmem:[#allocation194_spill] sm:$0xff] }
 0x4c6   :  { %v6847_v62 = vld [vmem:[#allocation12 + $0x10] sm:$0xff] }
 0x4c7   :  { %4243 = vmatpush.bf16.msra.mxu0 %v10261_v4  ;;  %4256 = vmatpush.bf16.msra.mxu1 %v10262_v45  ;;  %v3993_v5 = vpop.f32.mrf.mxu0  ;;  %v4006_v38 = vpop.f32.mrf.mxu1  ;;  %v6856_v4 = vld [vmem:[#allocation12 + $0x58] sm:$0xff] }
 0x4c8   :  { %4269 = vmatpush.bf16.msra.mxu2 %v10263_v48  ;;  %4282 = vmatpush.bf16.msra.mxu3 %v10264_v41  ;;  %v4017_v11 = vpop.f32.mrf.mxu2  ;;  %v4030_v28 = vpop.f32.mrf.mxu3  ;;  %v6864_v45 = vld [vmem:[#allocation12 + $0x98] sm:$0xff]  ;;  %v6845_v5 = vld [vmem:[#allocation12] sm:$0xff] }
 0x4c9   :  { %v4018_v23 = vadd.f32 %v4017_v11, %v4005_v27  ;;  %v6872_v48 = vld [vmem:[#allocation12 + $0xd8] sm:$0xff]  ;;  %v6862_v11 = vld [vmem:[#allocation12 + $0x88] sm:$0xff]  ;;  %v6853_v38 = vld [vmem:[#allocation12 + $0x40] sm:$0xff] }
 0x4cb   :  { %4244 = vmatpush.bf16.msra.mxu0 %v10265_v2  ;;  %4257 = vmatpush.bf16.msra.mxu1 %v10266_v26  ;;  %v4031_v16 = vadd.f32 %v4030_v28, %v4018_v23  ;;  %v6870_v28 = vld [vmem:[#allocation12 + $0xc8] sm:$0xff] }
 0x4cc   :  { %4270 = vmatpush.bf16.msra.mxu2 %v10267_v25  ;;  %4283 = vmatpush.bf16.msra.mxu3 %v10116_v53  ;;  %v10275_v53 = vld [vmem:[#allocation201_spill] sm:$0xff] }
 0x4cd   :  { %v6855_v25 = vld [vmem:[#allocation12 + $0x50] sm:$0xff] }
 0x4cf   :  { %4245 = vmatpush.bf16.msra.mxu0 %v10268_v30  ;;  %4258 = vmatpush.bf16.msra.mxu1 %v10269_v29  ;;  %v6863_v30 = vld [vmem:[#allocation12 + $0x90] sm:$0xff] }
 0x4d0   :  { %4271 = vmatpush.bf16.msra.mxu2 %v10270_v0  ;;  %4284 = vmatpush.bf16.msra.mxu3 %v10271_v43  ;;  %v4019_v56 = vpop.f32.mrf.mxu2  ;;  %v4032_v17 = vpop.f32.mrf.mxu3  ;;  %v6871_v29 = vld [vmem:[#allocation12 + $0xd0] sm:$0xff]  ;;  %v6846_v0 = vld [vmem:[#allocation12 + $0x8] sm:$0xff] }
 0x4d1   :  { %v6854_v43 = vld [vmem:[#allocation12 + $0x48] sm:$0xff] }
 0x4d3   :  { %4246 = vmatpush.bf16.msra.mxu0 %v10272_v51  ;;  %4259 = vmatpush.bf16.msra.mxu1 %v10273_v37  ;;  %v6861_v51 = vld [vmem:[#allocation12 + $0x80] sm:$0xff] }
 0x4d4   :  { %4272 = vmatpush.bf16.msra.mxu2 %v10274_v9  ;;  %4285 = vmatpush.bf16.msra.mxu3 %v10275_v53  ;;  %v6869_v37 = vld [vmem:[#allocation12 + $0xc0] sm:$0xff] }
 0x4d5   :  { %v10288_v9 = vld [vmem:[#allocation72_spill] sm:$0xff] }
 0x4d6   :  { %v4301_v53 = vpack.c.bf16 %v10288_v9, %v10288_v9 }
 0x4d7   :  { %4247 = vmatpush.bf16.msra.mxu0 %v10276_v12  ;;  %4260 = vmatpush.bf16.msra.mxu1 %v10277_v52  ;;  %v10290_v52 = vld [vmem:[#allocation76_spill] sm:$0xff] }
 0x4d8   :  { %4273 = vmatpush.bf16.msra.mxu2 %v10278_v20  ;;  %4286 = vmatpush.bf16.msra.mxu3 %v10279_v3  ;;  %v4303_v20 = vpack.c.bf16 %v10290_v52, %v10290_v52  ;;  %v4304_v3 = vpack.c.bf16 %v9010_v49, %v9010_v49 }
 0x4db   :  { %4248 = vmatpush.bf16.msra.mxu0 %v10280_v10  ;;  %4261 = vmatpush.bf16.msra.mxu1 %v10281_v8 }
 0x4dc   :  { %4274 = vmatpush.bf16.msra.mxu2 %v10282_v55  ;;  %4287 = vmatpush.bf16.msra.mxu3 %v10283_v50 }
 0x4df   :  { %4249 = vmatpush.bf16.msra.mxu0 %v10284_v57  ;;  %4262 = vmatpush.bf16.msra.mxu1 %v10285_v35  ;;  %v4043_v13 = vpop.f32.mrf.mxu0  ;;  %v4056_v19 = vpop.f32.mrf.mxu1 }
 0x4e0   :  { %4275 = vmatpush.bf16.msra.mxu2 %v10286_v21  ;;  %4288 = vmatpush.bf16.msra.mxu3 %v10287_v6  ;;  %v4044_v59 = vadd.f32 %v4043_v13, %v4031_v16  ;;  %v10289_v16 = vld [vmem:[#allocation75_spill] sm:$0xff] }
 0x4e1   :  { %v4302_v12 = vpack.c.bf16 %v10289_v16, %v10289_v16 }
 0x4e2   :  { %4250 = vmatmul.bf16.vlgmr.msra.gmra.mxu0 %v8667_v31  ;;  %4263 = vmatmul.bf16.vlgmr.msra.gmra.mxu1 %v8669_v46  ;;  %v6849_v31 = vld [vmem:[#allocation12 + $0x20] sm:$0xff] }
 0x4e3   :  { %4630 = vmatpush.bf16.msrb.mxu0 %v6852_v33  ;;  %4643 = vmatpush.bf16.msrb.mxu1 %v6860_v40  ;;  %v6865_v46 = vld [vmem:[#allocation12 + $0xa0] sm:$0xff] }
 0x4e4   :  { %4656 = vmatpush.bf16.msrb.mxu2 %v6868_v15  ;;  %4669 = vmatpush.bf16.msrb.mxu3 %v6876_v39 }
 0x4e5   :  { %4276 = vmatmul.bf16.vlgmr.msra.gmra.mxu2 %v8902_v58  ;;  %4289 = vmatmul.bf16.vlgmr.msra.gmra.mxu3 %v8904_v61  ;;  %v6873_v58 = vld [vmem:[#allocation12 + $0xe0] sm:$0xff]  ;;  %v9061_v61 = vadd.f32 %v4056_v19, %v4044_v59  ;;  %v6883_v19 = vld [vmem:[#allocation12 + $0x130] sm:$0xff]  ;;  %v6882_v59 = vld [vmem:[#allocation12 + $0x128] sm:$0xff] }
 0x4e7   :  { %4631 = vmatpush.bf16.msrb.mxu0 %v6851_v47  ;;  %4644 = vmatpush.bf16.msrb.mxu1 %v6859_v14  ;;  %v4045_v2 = vpop.f32.mrf.mxu0  ;;  %v4058_v26 = vpop.f32.mrf.mxu1  ;;  %v4294_v57 = vmax.f32 %v9061_v61, 0.0  ;;  %v6879_v61 = vld [vmem:[#allocation12 + $0x110] sm:$0xff] }
 0x4e8   :  { %4657 = vmatpush.bf16.msrb.mxu2 %v6867_v24  ;;  %4670 = vmatpush.bf16.msrb.mxu3 %v6875_v63  ;;  %v4069_v41 = vpop.f32.mrf.mxu2  ;;  %v4082_v34 = vpop.f32.mrf.mxu3 }
 0x4e9   :  { %v4070_v60 = vadd.f32 %v4069_v41, %v10000_v36  ;;  %v6878_v41 = vld [vmem:[#allocation12 + $0x108] sm:$0xff] }
 0x4eb   :  { %4632 = vmatpush.bf16.msrb.mxu0 %v6850_v32  ;;  %4645 = vmatpush.bf16.msrb.mxu1 %v6858_v1  ;;  %v4083_v27 = vadd.f32 %v4082_v34, %v4070_v60  ;;  %v6877_v34 = vld [vmem:[#allocation12 + $0x100] sm:$0xff] }
 0x4ec   :  { %4658 = vmatpush.bf16.msrb.mxu2 %v6866_v44  ;;  %4671 = vmatpush.bf16.msrb.mxu3 %v6874_v54  ;;  %v6884_v44 = vld [vmem:[#allocation12 + $0x138] sm:$0xff] }
 0x4ef   :  { %4633 = vmatpush.bf16.msrb.mxu0 %v6849_v31  ;;  %4646 = vmatpush.bf16.msrb.mxu1 %v6857_v42  ;;  %v6881_v31 = vld [vmem:[#allocation12 + $0x120] sm:$0xff] }
 0x4f0   :  { %4659 = vmatpush.bf16.msrb.mxu2 %v6865_v46  ;;  %4672 = vmatpush.bf16.msrb.mxu3 %v6873_v58  ;;  %v4071_v36 = vpop.f32.mrf.mxu2  ;;  %v4084_v23 = vpop.f32.mrf.mxu3  ;;  %v6880_v58 = vld [vmem:[#allocation12 + $0x118] sm:$0xff] }
 0x4f3   :  { %4634 = vmatpush.bf16.msrb.mxu0 %v6848_v7  ;;  %4647 = vmatpush.bf16.msrb.mxu1 %v6856_v4 }
 0x4f4   :  { %4660 = vmatpush.bf16.msrb.mxu2 %v6864_v45  ;;  %4673 = vmatpush.bf16.msrb.mxu3 %v6872_v48 }
 0x4f7   :  { %4635 = vmatpush.bf16.msrb.mxu0 %v6847_v62  ;;  %4648 = vmatpush.bf16.msrb.mxu1 %v6855_v25 }
 0x4f8   :  { %4661 = vmatpush.bf16.msrb.mxu2 %v6863_v30  ;;  %4674 = vmatpush.bf16.msrb.mxu3 %v6871_v29 }
 0x4fb   :  { %4636 = vmatpush.bf16.msrb.mxu0 %v6846_v0  ;;  %4649 = vmatpush.bf16.msrb.mxu1 %v6854_v43 }
 0x4fc   :  { %4662 = vmatpush.bf16.msrb.mxu2 %v6862_v11  ;;  %4675 = vmatpush.bf16.msrb.mxu3 %v6870_v28 }
 0x4ff   :  { %4637 = vmatpush.bf16.msrb.mxu0 %v6845_v5  ;;  %4650 = vmatpush.bf16.msrb.mxu1 %v6853_v38  ;;  %v4095_v56 = vpop.f32.mrf.mxu0  ;;  %v4108_v17 = vpop.f32.mrf.mxu1 }
 0x500   :  { %4663 = vmatpush.bf16.msrb.mxu2 %v6861_v51  ;;  %4676 = vmatpush.bf16.msrb.mxu3 %v6869_v37  ;;  %v4096_v10 = vadd.f32 %v4095_v56, %v4083_v27 }
 0x502   :  { %4638 = vmatmul.bf16.vlgmr.msrb.gmra.mxu0 %v4301_v53  ;;  %4651 = vmatmul.bf16.vlgmr.msrb.gmra.mxu1 %v4302_v12  ;;  %v4109_v8 = vadd.f32 %v4108_v17, %v4096_v10  ;;  %v6892_v12 = vld [vmem:[#allocation14 + $0x38] sm:$0xff]  ;;  %v6890_v10 = vld [vmem:[#allocation14 + $0x28] sm:$0xff] }
 0x503   :  { %4664 = vmatmul.bf16.vlgmr.msrb.gmra.mxu2 %v4303_v20  ;;  %4677 = vmatmul.bf16.vlgmr.msrb.gmra.mxu3 %v4304_v3 }
 0x504   :  { %4682 = vmatpush.bf16.msra.mxu0 %v6884_v44  ;;  %4765 = vmatpush.bf16.msra.mxu1 %v6892_v12  ;;  %v6900_v44 = vld [vmem:[#allocation15 + $0x38] sm:$0xff] }
 0x505   :  { %4848 = vmatpush.bf16.msra.mxu2 %v6900_v44 }
 0x507   :  { %v4097_v40 = vpop.f32.mrf.mxu0  ;;  %v4110_v15 = vpop.f32.mrf.mxu1 }
 0x508   :  { %v4121_v55 = vpop.f32.mrf.mxu2  ;;  %v4134_v50 = vpop.f32.mrf.mxu3  ;;  %4683 = vmatpush.bf16.msra.mxu0 %v6883_v19  ;;  %v6897_v19 = vld [vmem:[#allocation15 + $0x20] sm:$0xff] }
 0x509   :  { %v4122_v33 = vadd.f32 %v4121_v55, %v4109_v8  ;;  %v6889_v8 = vld [vmem:[#allocation14 + $0x20] sm:$0xff]  ;;  %v6916_v55 = vld [vmem:[%s9093_s6] ss:$0 sm:$0xff] }
 0x50b   :  { %v4135_v39 = vadd.f32 %v4134_v50, %v4122_v33  ;;  %v6888_v50 = vld [vmem:[#allocation14 + $0x18] sm:$0xff] }
 0x50c   :  { %4684 = vmatpush.bf16.msra.mxu0 %v6882_v59  ;;  %v6896_v59 = vld [vmem:[#allocation15 + $0x18] sm:$0xff] }
 0x50d   :  { %v4295_v35 = vmax.f32 %v4135_v39, 0.0  ;;  %v6887_v39 = vld [vmem:[#allocation14 + $0x10] sm:$0xff] }
 0x50f   :  { %v4298_v21 = vmax.f32 %v4294_v57, %v4295_v35 }
 0x510   :  { %v4123_v6 = vpop.f32.mrf.mxu2  ;;  %v4136_v49 = vpop.f32.mrf.mxu3  ;;  %4685 = vmatpush.bf16.msra.mxu0 %v6881_v31  ;;  %v6895_v31 = vld [vmem:[#allocation15 + $0x10] sm:$0xff] }
 0x514   :  { %4686 = vmatpush.bf16.msra.mxu0 %v6880_v58 }
 0x518   :  { %4687 = vmatpush.bf16.msra.mxu0 %v6879_v61 }
 0x51c   :  { %4688 = vmatpush.bf16.msra.mxu0 %v6878_v41 }
 0x51f   :  { %v4147_v47 = vpop.f32.mrf.mxu0  ;;  %v4160_v14 = vpop.f32.mrf.mxu1 }
 0x520   :  { %4689 = vmatpush.bf16.msra.mxu0 %v6877_v34  ;;  %v4148_v26 = vadd.f32 %v4147_v47, %v8204_v18 }
 0x522   :  { %v4161_v62 = vadd.f32 %v4160_v14, %v4148_v26 }
 0x527   :  { %v4149_v32 = vpop.f32.mrf.mxu0  ;;  %v4162_v1 = vpop.f32.mrf.mxu1 }
 0x528   :  { %v4173_v24 = vpop.f32.mrf.mxu2  ;;  %v4186_v63 = vpop.f32.mrf.mxu3  ;;  %v6886_v32 = vld [vmem:[#allocation14 + $0x8] sm:$0xff]  ;;  %v6885_v1 = vld [vmem:[#allocation14] sm:$0xff] }
 0x529   :  { %v4174_v27 = vadd.f32 %v4173_v24, %v4161_v62  ;;  %v6918_v62 = vld [vmem:[%s9097_s10] ss:$0 sm:$0xff] }
 0x52b   :  { %v4187_v43 = vadd.f32 %v4186_v63, %v4174_v27 }
 0x530   :  { %v4175_v54 = vpop.f32.mrf.mxu2  ;;  %v4188_v13 = vpop.f32.mrf.mxu3 }
 0x531   :  { %v6899_v54 = vld [vmem:[#allocation15 + $0x30] sm:$0xff]  ;;  %v6898_v13 = vld [vmem:[#allocation15 + $0x28] sm:$0xff] }
 0x532   :  { %4849 = vmatpush.bf16.msra.mxu2 %v6899_v54 }
 0x536   :  { %4850 = vmatpush.bf16.msra.mxu2 %v6898_v13 }
 0x53a   :  { %4851 = vmatpush.bf16.msra.mxu2 %v6897_v19 }
 0x53e   :  { %4852 = vmatpush.bf16.msra.mxu2 %v6896_v59 }
 0x53f   :  { %v4199_v42 = vpop.f32.mrf.mxu0  ;;  %v4212_v46 = vpop.f32.mrf.mxu1 }
 0x540   :  { %v4200_v28 = vadd.f32 %v4199_v42, %v4187_v43 }
 0x542   :  { %v4213_v38 = vadd.f32 %v4212_v46, %v4200_v28  ;;  %4853 = vmatpush.bf16.msra.mxu2 %v6895_v31 }
 0x544   :  { %v4296_v16 = vmax.f32 %v4213_v38, 0.0 }
 0x547   :  { %v4201_v45 = vpop.f32.mrf.mxu0  ;;  %v4214_v48 = vpop.f32.mrf.mxu1 }
 0x548   :  { %v4225_v7 = vpop.f32.mrf.mxu2  ;;  %v4238_v4 = vpop.f32.mrf.mxu3  ;;  %v6893_v45 = vld [vmem:[#allocation15] sm:$0xff]  ;;  %v6917_v48 = vld [vmem:[%s9095_s8] ss:$0 sm:$0xff] }
 0x549   :  { %v4226_v25 = vadd.f32 %v4225_v7, %v10073_v22  ;;  %v6891_v22 = vld [vmem:[#allocation14 + $0x30] sm:$0xff] }
 0x54a   :  { %4766 = vmatpush.bf16.msra.mxu1 %v6891_v22 }
 0x54b   :  { %v4239_v30 = vadd.f32 %v4238_v4, %v4226_v25  ;;  %v6894_v4 = vld [vmem:[#allocation15 + $0x8] sm:$0xff] }
 0x54c   :  { %4854 = vmatpush.bf16.msra.mxu2 %v6894_v4 }
 0x54e   :  { %4767 = vmatpush.bf16.msra.mxu1 %v6890_v10 }
 0x550   :  { %v4227_v60 = vpop.f32.mrf.mxu2  ;;  %v4240_v2 = vpop.f32.mrf.mxu3  ;;  %4855 = vmatpush.bf16.msra.mxu2 %v6893_v45 }
 0x552   :  { %4768 = vmatpush.bf16.msra.mxu1 %v6889_v8 }
 0x556   :  { %4769 = vmatpush.bf16.msra.mxu1 %v6888_v50 }
 0x55a   :  { %4770 = vmatpush.bf16.msra.mxu1 %v6887_v39 }
 0x55e   :  { %4771 = vmatpush.bf16.msra.mxu1 %v6886_v32 }
 0x55f   :  { %v4251_v29 = vpop.f32.mrf.mxu0  ;;  %v4264_v0 = vpop.f32.mrf.mxu1 }
 0x560   :  { %v4252_v11 = vadd.f32 %v4251_v29, %v4239_v30 }
 0x562   :  { %v4265_v36 = vadd.f32 %v4264_v0, %v4252_v11  ;;  %4772 = vmatpush.bf16.msra.mxu1 %v6885_v1 }
 0x567   :  { %v4253_v37 = vpop.f32.mrf.mxu0  ;;  %v4266_v9 = vpop.f32.mrf.mxu1 }
 0x568   :  { %v4277_v23 = vpop.f32.mrf.mxu2  ;;  %v4290_v5 = vpop.f32.mrf.mxu3 }
 0x569   :  { %v4278_v51 = vadd.f32 %v4277_v23, %v4265_v36 }
 0x56b   :  { %v4291_v53 = vadd.f32 %v4290_v5, %v4278_v51 }
 0x56d   :  { %v4297_v18 = vmax.f32 %v4291_v53, 0.0 }
 0x56f   :  { %v4299_v52 = vmax.f32 %v4296_v16, %v4297_v18 }
 0x570   :  { %v4279_v20 = vpop.f32.mrf.mxu2  ;;  %v4292_v3 = vpop.f32.mrf.mxu3 }
 0x571   :  { %v4300_v56 = vmax.f32 %v4298_v21, %v4299_v52 }
 0x573   :  { %v4305_v17 = vpack.c.bf16 %v4300_v56, %v4300_v56 }
 0x575   :  { %4690 = vmatmul.bf16.vlgmr.msra.gmra.mxu0 %v4305_v17 }
 0x57f   :  { %v4639_v33 = vpop.f32.mrf.mxu0  ;;  %v4652_v40 = vpop.f32.mrf.mxu1 }
 0x580   :  { %v4640_v15 = vadd.f32 %v6916_v55, %v4639_v33 }
 0x582   :  { %v4653_v57 = vadd.f32 %v4652_v40, %v4640_v15 }
 0x586   :  { %v4665_v35 = vpop.f32.mrf.mxu2  ;;  %v4678_v21 = vpop.f32.mrf.mxu3 }
 0x587   :  { %v4666_v6 = vadd.f32 %v4665_v35, %v4653_v57  ;;  %v4641_v49 = vpop.f32.mrf.mxu0  ;;  %v4654_v47 = vpop.f32.mrf.mxu1 }
 0x589   :  { %v4679_v14 = vadd.f32 %v4678_v21, %v4666_v6 }
 0x58e   :  { %v4667_v24 = vpop.f32.mrf.mxu2  ;;  %v4680_v63 = vpop.f32.mrf.mxu3 }
 0x5f2   :  { %v4691_v42 = vpop.f32.mrf.mxu0 }
 0x5f3   :  { %v4692_v46 = vadd.f32 %v4691_v42, %v4679_v14 }
 0x5f5   :  { %v4695_v58 = vmax.f32 %v4692_v46, 0.0 }
 0x5f7   :  { %v4696_v61 = vpack.c.bf16 %v4695_v58, %v4695_v58 }
 0x5f9   :  { %4773 = vmatmul.bf16.vlgmr.msra.gmra.mxu1 %v4696_v61 }
 0x5fa   :  { %v4693_v7 = vpop.f32.mrf.mxu0 }
 0x676   :  { %v4774_v41 = vpop.f32.mrf.mxu1 }
 0x677   :  { %v4775_v34 = vadd.f32 %v6917_v48, %v4774_v41 }
 0x679   :  { %v4778_v60 = vmax.f32 %v4775_v34, 0.0 }
 0x67b   :  { %v4779_v2 = vpack.c.bf16 %v4778_v60, %v4778_v60 }
 0x67d   :  { %4856 = vmatmul.bf16.vlgmr.msra.gmra.mxu2 %v4779_v2 }
 0x67e   :  { %v4776_v26 = vpop.f32.mrf.mxu1 }
 0x700   :  { %v4857_v25 = vpop.f32.mrf.mxu2 }
 0x701   :  { %v4858_v27 = vadd.f32 %v6918_v62, %v4857_v25 }
 0x703   :  { %4861 = vst [vmem:[#allocation17] sm:$0x3] %v4858_v27 }
 0x704   :  { %4872 = dma.vmem_to_hbm [thread:$0]  %s4868_s20, 32, %s4870_s23, [#allocation5]  }
 0x708   :  { %v4859_v30 = vpop.f32.mrf.mxu2 }
 0x709   :  { %7145 = dma.done.wait [#allocation5], 32  }
 0x70a   :  { %7146 = vsyncadd [#allocation5], 4294967264 }
 0x70b   :  { %4877 = vsyncpa [#allocation4], 1 }
 0x70c   :  { %4878 = vsyncpa [#allocation7], 1 }
 0x70d   :  { %4879 = vsyncpa [#allocation10], 1 }
 0x70e   :  { %4880 = vsyncpa [#allocation13], 1 }
 0x70f   :  { %4881 = vsyncpa [#allocation16], 1 }
 0x710   :  { %4882 = vsyncpa [#allocation5], 1 }

</bundles_post_ra>
